<compile_context>
chip_gen: v7x
topology: tpu7x:2x2x1
jax: 0.10.0
libtpu: 0.0.40
codegen_flags: <defaults>
</compile_context>

<pallas_src>
import functools

import jax
import jax.numpy as jnp
from jax.experimental import pallas as pl
from jax.experimental.pallas import tpu as pltpu

_BN_EPS = 1e-5

# ResNet-34 basic-block stages: (channels, num_blocks, first_stride)
_RESNET34_STAGES = ((64, 3, 1), (128, 4, 2), (256, 6, 2), (512, 3, 2))


# ----------------------------- tiling helpers -----------------------------

def _round_up(x, m):
    return ((x + m - 1) // m) * m


def _pad_rows(m, cap):
    """Pad a row count and pick a row-tile: full rows (rounded to 8) when small,
    otherwise `cap`-sized tiles."""
    if m > cap:
        return _round_up(m, cap), cap
    mp = _round_up(m, 8)
    return mp, mp


def _pad_n(n):
    """Pad an output-channel count so stores are lane-dense (>=128, mult of 128)."""
    if n > 256:
        return _round_up(n, 256)
    return _round_up(n, 128)


def _pad_k(k):
    return _round_up(k, 128)


def _pick_k_tile(kp):
    for c in (512, 384, 256, 128):
        if kp % c == 0:
            return c
    return kp


# ----------------------------- Pallas kernels -----------------------------

def _mm_kernel(a_ref, b_ref, s_ref, c_ref, o_ref, acc_ref, *, relu):
    @pl.when(pl.program_id(2) == 0)
    def _init():
        acc_ref[...] = jnp.zeros_like(acc_ref)

    acc_ref[...] += jnp.dot(a_ref[...], b_ref[...],
                            preferred_element_type=jnp.float32)

    @pl.when(pl.program_id(2) == pl.num_programs(2) - 1)
    def _fin():
        y = acc_ref[...] * s_ref[...] + c_ref[...]
        if relu:
            y = jnp.maximum(y, 0.0)
        o_ref[...] = y.astype(o_ref.dtype)


def _mm_res_kernel(a_ref, b_ref, s_ref, c_ref, r_ref, o_ref, acc_ref, *, relu):
    @pl.when(pl.program_id(2) == 0)
    def _init():
        acc_ref[...] = jnp.zeros_like(acc_ref)

    acc_ref[...] += jnp.dot(a_ref[...], b_ref[...],
                            preferred_element_type=jnp.float32)

    @pl.when(pl.program_id(2) == pl.num_programs(2) - 1)
    def _fin():
        y = acc_ref[...] * s_ref[...] + c_ref[...] + r_ref[...].astype(jnp.float32)
        if relu:
            y = jnp.maximum(y, 0.0)
        o_ref[...] = y.astype(o_ref.dtype)


def _maxpool_kernel(p_ref, o_ref):
    # p_ref: (tm, 9, C) -> max over window axis (XLU reduction).
    o_ref[...] = jnp.max(p_ref[...].astype(jnp.float32), axis=1).astype(o_ref.dtype)


def _avgpool_kernel(x_ref, o_ref):
    # x_ref: (1, HW, C) -> mean over spatial axis.
    o_ref[...] = jnp.mean(x_ref[...].astype(jnp.float32), axis=1, keepdims=True)


# ----------------------------- Pallas wrappers -----------------------------

def matmul_fused(a, w_pad, s_pad, b_pad, n_out, residual=None, relu=False,
                 out_dtype=jnp.bfloat16):
    """Tiled fused matmul: (M,K)@(Kp,Np) * scale + bias [+ residual] [ReLU].

    `w_pad` is pre-padded (Kp, Np) bf16, `s_pad`/`b_pad` are (1, Np) f32.
    Returns (M, n_out) in `out_dtype`.
    """
    M, K = a.shape
    Kp, Np = w_pad.shape

    Mp, tm = _pad_rows(M, 256)
    tn = min(Np, 256)
    tk = _pick_k_tile(Kp)

    a_p = jnp.pad(a.astype(jnp.bfloat16), ((0, Mp - M), (0, Kp - K)))
    inputs = [a_p, w_pad, s_pad, b_pad]
    in_specs = [
        pl.BlockSpec((tm, tk), lambda i, j, k: (i, k)),
        pl.BlockSpec((tk, tn), lambda i, j, k: (k, j)),
        pl.BlockSpec((1, tn), lambda i, j, k: (0, j)),
        pl.BlockSpec((1, tn), lambda i, j, k: (0, j)),
    ]
    if residual is not None:
        r_p = jnp.pad(residual.astype(jnp.bfloat16),
                      ((0, Mp - M), (0, Np - residual.shape[1])))
        inputs.append(r_p)
        in_specs.append(pl.BlockSpec((tm, tn), lambda i, j, k: (i, j)))
        kernel = functools.partial(_mm_res_kernel, relu=relu)
    else:
        kernel = functools.partial(_mm_kernel, relu=relu)

    out = pl.pallas_call(
        kernel,
        out_shape=jax.ShapeDtypeStruct((Mp, Np), out_dtype),
        grid=(Mp // tm, Np // tn, Kp // tk),
        in_specs=in_specs,
        out_specs=pl.BlockSpec((tm, tn), lambda i, j, k: (i, j)),
        scratch_shapes=[pltpu.VMEM((tm, tn), jnp.float32)],
        compiler_params=pltpu.CompilerParams(
            dimension_semantics=("parallel", "parallel", "arbitrary")),
    )(*inputs)
    return out[:M, :n_out]


def _im2col(x, kh, kw, stride, pad):
    """NHWC bf16 -> (N*Ho*Wo, Cin*kh*kw) patches; feature index = c*(kh*kw) + i*kw + j,
    matching a PyTorch (Cout, Cin, kh, kw) weight reshaped to (Cout, Cin*kh*kw)."""
    N, H, W, C = x.shape
    Ho = (H + 2 * pad - kh) // stride + 1
    Wo = (W + 2 * pad - kw) // stride + 1
    xp = jnp.pad(x, ((0, 0), (pad, pad), (pad, pad), (0, 0)))
    cols = []
    for i in range(kh):
        for j in range(kw):
            cols.append(xp[:, i:i + stride * Ho:stride, j:j + stride * Wo:stride, :])
    patches = jnp.stack(cols, axis=-1)                 # (N, Ho, Wo, C, kh*kw)
    patches = patches.reshape(N, Ho, Wo, C * kh * kw)
    return patches.reshape(N * Ho * Wo, C * kh * kw), (N, Ho, Wo)


def conv_bn(x, layer, cout, kh, kw, stride, pad, relu, residual=None):
    """Conv2d (no bias) + folded BatchNorm [+ residual] [+ ReLU] via im2col + tiled matmul."""
    patches, (N, Ho, Wo) = _im2col(x, kh, kw, stride, pad)
    res = None if residual is None else residual.reshape(N * Ho * Wo, cout)
    y = matmul_fused(patches, layer['w'], layer['s'], layer['b'], cout,
                     residual=res, relu=relu)
    return y.reshape(N, Ho, Wo, cout)


def maxpool_3x3_s2_p1(x):
    N, H, W, C = x.shape
    k, stride, pad = 3, 2, 1
    Ho = (H + 2 * pad - k) // stride + 1
    Wo = (W + 2 * pad - k) // stride + 1
    xp = jnp.pad(x, ((0, 0), (pad, pad), (pad, pad), (0, 0)),
                 constant_values=-jnp.inf)  # PyTorch maxpool ignores padding
    cols = []
    for i in range(k):
        for j in range(k):
            cols.append(xp[:, i:i + stride * Ho:stride, j:j + stride * Wo:stride, :])
    patches = jnp.stack(cols, axis=3)                  # (N, Ho, Wo, 9, C)
    M = N * Ho * Wo
    patches = patches.reshape(M, k * k, C)
    Mp, tm = _pad_rows(M, 512)
    patches = jnp.pad(patches, ((0, Mp - M), (0, 0), (0, 0)),
                      constant_values=-jnp.inf)
    out = pl.pallas_call(
        _maxpool_kernel,
        out_shape=jax.ShapeDtypeStruct((Mp, C), x.dtype),
        grid=(Mp // tm,),
        in_specs=[pl.BlockSpec((tm, k * k, C), lambda i: (i, 0, 0))],
        out_specs=pl.BlockSpec((tm, C), lambda i: (i, 0)),
        compiler_params=pltpu.CompilerParams(dimension_semantics=("parallel",)),
    )(patches)
    return out[:M].reshape(N, Ho, Wo, C)


def global_avgpool(x):
    N, H, W, C = x.shape
    xr = x.reshape(N, H * W, C)
    out = pl.pallas_call(
        _avgpool_kernel,
        out_shape=jax.ShapeDtypeStruct((N, 1, C), jnp.float32),
        grid=(N,),
        in_specs=[pl.BlockSpec((1, H * W, C), lambda i: (i, 0, 0))],
        out_specs=pl.BlockSpec((1, 1, C), lambda i: (i, 0, 0)),
        compiler_params=pltpu.CompilerParams(dimension_semantics=("parallel",)),
    )(xr)
    return out.reshape(N, C)


# ----------------------------- parameters -----------------------------

class _KeyGen:
    def __init__(self, seed):
        self._key = jax.random.PRNGKey(seed)

    def __call__(self):
        self._key, sub = jax.random.split(self._key)
        return sub


def _init_conv_weight(kg, cout, cin, kh, kw):
    return 0.05 * jax.random.normal(kg(), (cout, cin, kh, kw), dtype=jnp.float32)


def _init_bn_folded(kg, c):
    gamma = 1.0 + 0.1 * jax.random.normal(kg(), (c,), dtype=jnp.float32)
    beta = 0.1 * jax.random.normal(kg(), (c,), dtype=jnp.float32)
    running_mean = 0.1 * jax.random.normal(kg(), (c,), dtype=jnp.float32)
    running_var = 0.5 + jax.random.uniform(kg(), (c,), dtype=jnp.float32)
    scale = gamma / jnp.sqrt(running_var + _BN_EPS)
    bias = beta - running_mean * scale
    return scale, bias


def _prep_conv(w_oihw, scale, bias):
    """Reshape/transpose conv weights ONCE into padded bf16 matmul form."""
    cout, cin, kh, kw = w_oihw.shape
    K = cin * kh * kw
    Kp, Np = _pad_k(K), _pad_n(cout)
    wmat = jnp.transpose(w_oihw.reshape(cout, K)).astype(jnp.bfloat16)   # (K, cout)
    w_pad = jnp.zeros((Kp, Np), jnp.bfloat16).at[:K, :cout].set(wmat)
    s_pad = jnp.zeros((1, Np), jnp.float32).at[0, :cout].set(scale)
    b_pad = jnp.zeros((1, Np), jnp.float32).at[0, :cout].set(bias)
    return {'w': w_pad, 's': s_pad, 'b': b_pad}


def init_params(seed, n_classes, in_ch=5):
    # TODO(synk): pretrained torchvision weights are not available here; random init.
    kg = _KeyGen(seed)
    p = {}
    w = _init_conv_weight(kg, 64, in_ch, 7, 7)           # modified 5-channel conv1
    s, b = _init_bn_folded(kg, 64)
    p['conv1'] = _prep_conv(w, s, b)

    layers = []
    cin = 64
    for cout, nblocks, stride in _RESNET34_STAGES:
        blocks = []
        for bi in range(nblocks):
            st = stride if bi == 0 else 1
            bp = {}
            w = _init_conv_weight(kg, cout, cin, 3, 3)
            s, b = _init_bn_folded(kg, cout)
            bp['c1'] = _prep_conv(w, s, b)
            w = _init_conv_weight(kg, cout, cout, 3, 3)
            s, b = _init_bn_folded(kg, cout)
            bp['c2'] = _prep_conv(w, s, b)
            if st != 1 or cin != cout:
                w = _init_conv_weight(kg, cout, cin, 1, 1)
                s, b = _init_bn_folded(kg, cout)
                bp['down'] = _prep_conv(w, s, b)
            blocks.append(bp)
            cin = cout
        layers.append(blocks)
    p['layers'] = layers

    fc_w = 0.05 * jax.random.normal(kg(), (n_classes, 512), dtype=jnp.float32)
    fc_b = 0.05 * jax.random.normal(kg(), (n_classes,), dtype=jnp.float32)
    Np = _pad_n(n_classes)
    w_pad = jnp.zeros((512, Np), jnp.bfloat16).at[:, :n_classes].set(
        jnp.transpose(fc_w).astype(jnp.bfloat16))
    s_pad = jnp.zeros((1, Np), jnp.float32).at[0, :n_classes].set(
        jnp.ones((n_classes,), jnp.float32))
    b_pad = jnp.zeros((1, Np), jnp.float32).at[0, :n_classes].set(fc_b)
    p['fc1'] = {'w': w_pad, 's': s_pad, 'b': b_pad}
    return p


# ----------------------------- forward pass -----------------------------

def basic_block(x, bp, cout, stride):
    out = conv_bn(x, bp['c1'], cout, 3, 3, stride, 1, relu=True)
    if 'down' in bp:
        identity = conv_bn(x, bp['down'], cout, 1, 1, stride, 0, relu=False)
    else:
        identity = x
    # residual add + final ReLU fused into the second conv's Pallas matmul kernel
    return conv_bn(out, bp['c2'], cout, 3, 3, 1, 1, relu=True, residual=identity)


@functools.partial(jax.jit, static_argnames=('n_classes',))
def resnet_model_mod_forward(x_nchw, params, *, n_classes):
    # TODO(synk): BatchNorm uses folded running statistics (eval mode); training-mode batch stats not implemented.
    x = jnp.transpose(x_nchw, (0, 2, 3, 1)).astype(jnp.bfloat16)   # NCHW -> NHWC, bf16
    x = conv_bn(x, params['conv1'], 64, 7, 7, 2, 3, relu=True)
    x = maxpool_3x3_s2_p1(x)
    for si, (cout, nblocks, stride0) in enumerate(_RESNET34_STAGES):
        for bi in range(nblocks):
            s = stride0 if bi == 0 else 1
            x = basic_block(x, params['layers'][si][bi], cout, s)
    features = global_avgpool(x)                        # (N, 512) f32; model_resnet.fc is Identity
    prediction = matmul_fused(features, params['fc1']['w'], params['fc1']['s'],
                              params['fc1']['b'], n_classes, relu=False,
                              out_dtype=jnp.float32)    # fc1: x @ W.T + b
    return prediction, features


# ----------------------------- main -----------------------------

if __name__ == "__main__":
    n_classes = 3
    params = init_params(seed=0, n_classes=n_classes, in_ch=5)
    x = jax.random.normal(jax.random.PRNGKey(0), (2, 5, 16, 16), dtype=jnp.float32)

    prediction, features = resnet_model_mod_forward(x, params, n_classes=n_classes)
    jax.block_until_ready((prediction, features))

    assert prediction.shape == (2, n_classes), prediction.shape
    assert features.shape == (2, 512), features.shape
    assert bool(jnp.all(jnp.isfinite(prediction))) and bool(jnp.all(jnp.isfinite(features)))
    print("KERNEL_OK")
</pallas_src>

<mosaic_0001>
module attributes {stable_mosaic.version = 11 : i64} {
  func.func @_mm_kernel(%arg0: i32, %arg1: i32, %arg2: i32, %arg3: memref<128x256xbf16, #tpu.memory_space<vmem>>, %arg4: memref<256x128xbf16, #tpu.memory_space<vmem>>, %arg5: memref<1x128xf32, #tpu.memory_space<vmem>>, %arg6: memref<1x128xf32, #tpu.memory_space<vmem>>, %arg7: memref<128x128xbf16, #tpu.memory_space<vmem>>, %arg8: memref<128x128xf32, #tpu.memory_space<vmem>>) attributes {dimension_semantics = [#tpu.dimension_semantics<parallel>, #tpu.dimension_semantics<parallel>, #tpu.dimension_semantics<arbitrary>], iteration_bounds = array<i64: 1, 1, 1>, scalar_prefetch = 0 : i64, scratch_operands = 1 : i64, tpu.core_type = #tpu.core_type<tc>, window_params = [{transform_indices = @transform_0, window_bounds = array<i64: 128, 256>}, {transform_indices = @transform_1, window_bounds = array<i64: 256, 128>}, {transform_indices = @transform_2, window_bounds = array<i64: 1, 128>}, {transform_indices = @transform_3, window_bounds = array<i64: 1, 128>}, {transform_indices = @transform_4, window_bounds = array<i64: 128, 128>}]} {
    %c0_i32 = arith.constant 0 : i32
    %0 = arith.cmpi eq, %arg2, %c0_i32 : i32
    %1 = arith.extui %0 : i1 to i32
    %c0_i32_0 = arith.constant 0 : i32
    %2 = arith.cmpi ne, %1, %c0_i32_0 : i32
    scf.if %2 {
      %cst_10 = arith.constant 0.000000e+00 : f32
      %12 = vector.broadcast %cst_10 : f32 to vector<128x128xf32>
      %c0_11 = arith.constant 0 : index
      %c0_12 = arith.constant 0 : index
      %13 = vector.load %arg8[%c0_11, %c0_12] : memref<128x128xf32, #tpu.memory_space<vmem>>, vector<128x128xf32>
      tpu.vector_store %arg8[%c0_11, %c0_12], %12 {strides = array<i32>} : memref<128x128xf32, #tpu.memory_space<vmem>>, vector<128x128xf32>,
    } else {
    }
    %c0 = arith.constant 0 : index
    %c0_1 = arith.constant 0 : index
    %3 = vector.load %arg8[%c0, %c0_1] : memref<128x128xf32, #tpu.memory_space<vmem>>, vector<128x128xf32>
    %c0_2 = arith.constant 0 : index
    %c0_3 = arith.constant 0 : index
    %4 = vector.load %arg3[%c0_2, %c0_3] : memref<128x256xbf16, #tpu.memory_space<vmem>>, vector<128x256xbf16>
    %c0_4 = arith.constant 0 : index
    %c0_5 = arith.constant 0 : index
    %5 = vector.load %arg4[%c0_4, %c0_5] : memref<256x128xbf16, #tpu.memory_space<vmem>>, vector<256x128xbf16>
    %cst = arith.constant dense<0.000000e+00> : vector<128x128xf32>
    %6 = tpu.matmul %4, %5, %cst {dimension_numbers = #tpu.dot_dimension_numbers<[1], [0], [0], [1], [0, 0, 1, 1], [], []>} : vector<128x256xbf16>, vector<256x128xbf16>, vector<128x128xf32> -> vector<128x128xf32>
    %7 = arith.addf %3, %6 : vector<128x128xf32>
    %c0_6 = arith.constant 0 : index
    %c0_7 = arith.constant 0 : index
    %8 = vector.load %arg8[%c0_6, %c0_7] : memref<128x128xf32, #tpu.memory_space<vmem>>, vector<128x128xf32>
    tpu.vector_store %arg8[%c0_6, %c0_7], %7 {strides = array<i32>} : memref<128x128xf32, #tpu.memory_space<vmem>>, vector<128x128xf32>,
    %c0_i32_8 = arith.constant 0 : i32
    %9 = arith.cmpi eq, %arg2, %c0_i32_8 : i32
    %10 = arith.extui %9 : i1 to i32
    %c0_i32_9 = arith.constant 0 : i32
    %11 = arith.cmpi ne, %10, %c0_i32_9 : i32
    scf.if %11 {
      %c0_10 = arith.constant 0 : index
      %c0_11 = arith.constant 0 : index
      %12 = vector.load %arg8[%c0_10, %c0_11] : memref<128x128xf32, #tpu.memory_space<vmem>>, vector<128x128xf32>
      %c0_12 = arith.constant 0 : index
      %c0_13 = arith.constant 0 : index
      %13 = vector.load %arg5[%c0_12, %c0_13] : memref<1x128xf32, #tpu.memory_space<vmem>>, vector<1x128xf32>
      %14 = vector.broadcast %13 : vector<1x128xf32> to vector<128x128xf32>
      %15 = arith.mulf %12, %14 : vector<128x128xf32>
      %c0_14 = arith.constant 0 : index
      %c0_15 = arith.constant 0 : index
      %16 = vector.load %arg6[%c0_14, %c0_15] : memref<1x128xf32, #tpu.memory_space<vmem>>, vector<1x128xf32>
      %17 = vector.broadcast %16 : vector<1x128xf32> to vector<128x128xf32>
      %18 = arith.addf %15, %17 : vector<128x128xf32>
      %cst_16 = arith.constant 0.000000e+00 : f32
      %19 = vector.broadcast %cst_16 : f32 to vector<128x128xf32>
      %20 = arith.maximumf %18, %19 : vector<128x128xf32>
      %21 = arith.truncf %20 : vector<128x128xf32> to vector<128x128xbf16>
      %c0_17 = arith.constant 0 : index
      %c0_18 = arith.constant 0 : index
      %22 = vector.load %arg7[%c0_17, %c0_18] : memref<128x128xbf16, #tpu.memory_space<vmem>>, vector<128x128xbf16>
      tpu.vector_store %arg7[%c0_17, %c0_18], %21 {strides = array<i32>} : memref<128x128xbf16, #tpu.memory_space<vmem>>, vector<128x128xbf16>,
    } else {
    }
    return
  }
  func.func @transform_0(%arg0: i32, %arg1: i32, %arg2: i32) -> (i32, i32) {
    %c0_i32 = arith.constant 0 : i32
    return %arg0, %arg2 : i32, i32
  }
  func.func @transform_1(%arg0: i32, %arg1: i32, %arg2: i32) -> (i32, i32) {
    %c0_i32 = arith.constant 0 : i32
    return %arg2, %arg1 : i32, i32
  }
  func.func @transform_2(%arg0: i32, %arg1: i32, %arg2: i32) -> (i32, i32) {
    %c0_i32 = arith.constant 0 : i32
    %c0_i32_0 = arith.constant 0 : i32
    return %c0_i32, %arg1 : i32, i32
  }
  func.func @transform_3(%arg0: i32, %arg1: i32, %arg2: i32) -> (i32, i32) {
    %c0_i32 = arith.constant 0 : i32
    %c0_i32_0 = arith.constant 0 : i32
    return %c0_i32, %arg1 : i32, i32
  }
  func.func @transform_4(%arg0: i32, %arg1: i32, %arg2: i32) -> (i32, i32) {
    %c0_i32 = arith.constant 0 : i32
    return %arg0, %arg1 : i32, i32
  }
}

module attributes {stable_mosaic.version = 11 : i64} {
  func.func @_maxpool_kernel(%arg0: i32, %arg1: memref<32x9x64xbf16, #tpu.memory_space<vmem>>, %arg2: memref<32x64xbf16, #tpu.memory_space<vmem>>) attributes {dimension_semantics = [#tpu.dimension_semantics<parallel>], iteration_bounds = array<i64: 1>, scalar_prefetch = 0 : i64, scratch_operands = 0 : i64, tpu.core_type = #tpu.core_type<tc>, window_params = [{transform_indices = @transform_0, window_bounds = array<i64: 32, 9, 64>}, {transform_indices = @transform_1, window_bounds = array<i64: 32, 64>}]} {
    %c0 = arith.constant 0 : index
    %c0_0 = arith.constant 0 : index
    %c0_1 = arith.constant 0 : index
    %0 = vector.load %arg1[%c0, %c0_0, %c0_1] : memref<32x9x64xbf16, #tpu.memory_space<vmem>>, vector<32x9x64xbf16>
    %1 = arith.extf %0 : vector<32x9x64xbf16> to vector<32x9x64xf32>
    %cst = arith.constant dense<0xFF800000> : vector<32x64xf32>
    %2 = vector.multi_reduction <maximumf>, %1, %cst [1] : vector<32x9x64xf32> to vector<32x64xf32>
    %3 = arith.truncf %2 : vector<32x64xf32> to vector<32x64xbf16>
    %c0_2 = arith.constant 0 : index
    %c0_3 = arith.constant 0 : index
    %4 = vector.load %arg2[%c0_2, %c0_3] : memref<32x64xbf16, #tpu.memory_space<vmem>>, vector<32x64xbf16>
    tpu.vector_store %arg2[%c0_2, %c0_3], %3 {strides = array<i32>} : memref<32x64xbf16, #tpu.memory_space<vmem>>, vector<32x64xbf16>,
    return
  }
  func.func @transform_0(%arg0: i32) -> (i32, i32, i32) {
    %c0_i32 = arith.constant 0 : i32
    %c0_i32_0 = arith.constant 0 : i32
    %c0_i32_1 = arith.constant 0 : i32
    return %arg0, %c0_i32, %c0_i32_0 : i32, i32, i32
  }
  func.func @transform_1(%arg0: i32) -> (i32, i32) {
    %c0_i32 = arith.constant 0 : i32
    %c0_i32_0 = arith.constant 0 : i32
    return %arg0, %c0_i32 : i32, i32
  }
}

module attributes {stable_mosaic.version = 11 : i64} {
  func.func @_mm_kernel(%arg0: i32, %arg1: i32, %arg2: i32, %arg3: memref<32x128xbf16, #tpu.memory_space<vmem>>, %arg4: memref<128x128xbf16, #tpu.memory_space<vmem>>, %arg5: memref<1x128xf32, #tpu.memory_space<vmem>>, %arg6: memref<1x128xf32, #tpu.memory_space<vmem>>, %arg7: memref<32x128xbf16, #tpu.memory_space<vmem>>, %arg8: memref<32x128xf32, #tpu.memory_space<vmem>>) attributes {dimension_semantics = [#tpu.dimension_semantics<parallel>, #tpu.dimension_semantics<parallel>, #tpu.dimension_semantics<arbitrary>], iteration_bounds = array<i64: 1, 1, 5>, scalar_prefetch = 0 : i64, scratch_operands = 1 : i64, tpu.core_type = #tpu.core_type<tc>, window_params = [{transform_indices = @transform_0, window_bounds = array<i64: 32, 128>}, {transform_indices = @transform_1, window_bounds = array<i64: 128, 128>}, {transform_indices = @transform_2, window_bounds = array<i64: 1, 128>}, {transform_indices = @transform_3, window_bounds = array<i64: 1, 128>}, {transform_indices = @transform_4, window_bounds = array<i64: 32, 128>}]} {
    %c0_i32 = arith.constant 0 : i32
    %0 = arith.cmpi eq, %arg2, %c0_i32 : i32
    %1 = arith.extui %0 : i1 to i32
    %c0_i32_0 = arith.constant 0 : i32
    %2 = arith.cmpi ne, %1, %c0_i32_0 : i32
    scf.if %2 {
      %cst_9 = arith.constant 0.000000e+00 : f32
      %12 = vector.broadcast %cst_9 : f32 to vector<32x128xf32>
      %c0_10 = arith.constant 0 : index
      %c0_11 = arith.constant 0 : index
      %13 = vector.load %arg8[%c0_10, %c0_11] : memref<32x128xf32, #tpu.memory_space<vmem>>, vector<32x128xf32>
      tpu.vector_store %arg8[%c0_10, %c0_11], %12 {strides = array<i32>} : memref<32x128xf32, #tpu.memory_space<vmem>>, vector<32x128xf32>,
    } else {
    }
    %c0 = arith.constant 0 : index
    %c0_1 = arith.constant 0 : index
    %3 = vector.load %arg8[%c0, %c0_1] : memref<32x128xf32, #tpu.memory_space<vmem>>, vector<32x128xf32>
    %c0_2 = arith.constant 0 : index
    %c0_3 = arith.constant 0 : index
    %4 = vector.load %arg3[%c0_2, %c0_3] : memref<32x128xbf16, #tpu.memory_space<vmem>>, vector<32x128xbf16>
    %c0_4 = arith.constant 0 : index
    %c0_5 = arith.constant 0 : index
    %5 = vector.load %arg4[%c0_4, %c0_5] : memref<128x128xbf16, #tpu.memory_space<vmem>>, vector<128x128xbf16>
    %cst = arith.constant dense<0.000000e+00> : vector<32x128xf32>
    %6 = tpu.matmul %4, %5, %cst {dimension_numbers = #tpu.dot_dimension_numbers<[1], [0], [0], [1], [0, 0, 1, 1], [], []>} : vector<32x128xbf16>, vector<128x128xbf16>, vector<32x128xf32> -> vector<32x128xf32>
    %7 = arith.addf %3, %6 : vector<32x128xf32>
    %c0_6 = arith.constant 0 : index
    %c0_7 = arith.constant 0 : index
    %8 = vector.load %arg8[%c0_6, %c0_7] : memref<32x128xf32, #tpu.memory_space<vmem>>, vector<32x128xf32>
    tpu.vector_store %arg8[%c0_6, %c0_7], %7 {strides = array<i32>} : memref<32x128xf32, #tpu.memory_space<vmem>>, vector<32x128xf32>,
    %c4_i32 = arith.constant 4 : i32
    %9 = arith.cmpi eq, %arg2, %c4_i32 : i32
    %10 = arith.extui %9 : i1 to i32
    %c0_i32_8 = arith.constant 0 : i32
    %11 = arith.cmpi ne, %10, %c0_i32_8 : i32
    scf.if %11 {
      %c0_9 = arith.constant 0 : index
      %c0_10 = arith.constant 0 : index
      %12 = vector.load %arg8[%c0_9, %c0_10] : memref<32x128xf32, #tpu.memory_space<vmem>>, vector<32x128xf32>
      %c0_11 = arith.constant 0 : index
      %c0_12 = arith.constant 0 : index
      %13 = vector.load %arg5[%c0_11, %c0_12] : memref<1x128xf32, #tpu.memory_space<vmem>>, vector<1x128xf32>
      %14 = vector.broadcast %13 : vector<1x128xf32> to vector<32x128xf32>
      %15 = arith.mulf %12, %14 : vector<32x128xf32>
      %c0_13 = arith.constant 0 : index
      %c0_14 = arith.constant 0 : index
      %16 = vector.load %arg6[%c0_13, %c0_14] : memref<1x128xf32, #tpu.memory_space<vmem>>, vector<1x128xf32>
      %17 = vector.broadcast %16 : vector<1x128xf32> to vector<32x128xf32>
      %18 = arith.addf %15, %17 : vector<32x128xf32>
      %cst_15 = arith.constant 0.000000e+00 : f32
      %19 = vector.broadcast %cst_15 : f32 to vector<32x128xf32>
      %20 = arith.maximumf %18, %19 : vector<32x128xf32>
      %21 = arith.truncf %20 : vector<32x128xf32> to vector<32x128xbf16>
      %c0_16 = arith.constant 0 : index
      %c0_17 = arith.constant 0 : index
      %22 = vector.load %arg7[%c0_16, %c0_17] : memref<32x128xbf16, #tpu.memory_space<vmem>>, vector<32x128xbf16>
      tpu.vector_store %arg7[%c0_16, %c0_17], %21 {strides = array<i32>} : memref<32x128xbf16, #tpu.memory_space<vmem>>, vector<32x128xbf16>,
    } else {
    }
    return
  }
  func.func @transform_0(%arg0: i32, %arg1: i32, %arg2: i32) -> (i32, i32) {
    %c0_i32 = arith.constant 0 : i32
    return %arg0, %arg2 : i32, i32
  }
  func.func @transform_1(%arg0: i32, %arg1: i32, %arg2: i32) -> (i32, i32) {
    %c0_i32 = arith.constant 0 : i32
    return %arg2, %arg1 : i32, i32
  }
  func.func @transform_2(%arg0: i32, %arg1: i32, %arg2: i32) -> (i32, i32) {
    %c0_i32 = arith.constant 0 : i32
    %c0_i32_0 = arith.constant 0 : i32
    return %c0_i32, %arg1 : i32, i32
  }
  func.func @transform_3(%arg0: i32, %arg1: i32, %arg2: i32) -> (i32, i32) {
    %c0_i32 = arith.constant 0 : i32
    %c0_i32_0 = arith.constant 0 : i32
    return %c0_i32, %arg1 : i32, i32
  }
  func.func @transform_4(%arg0: i32, %arg1: i32, %arg2: i32) -> (i32, i32) {
    %c0_i32 = arith.constant 0 : i32
    return %arg0, %arg1 : i32, i32
  }
}

module attributes {stable_mosaic.version = 11 : i64} {
  func.func @_mm_res_kernel(%arg0: i32, %arg1: i32, %arg2: i32, %arg3: memref<32x128xbf16, #tpu.memory_space<vmem>>, %arg4: memref<128x128xbf16, #tpu.memory_space<vmem>>, %arg5: memref<1x128xf32, #tpu.memory_space<vmem>>, %arg6: memref<1x128xf32, #tpu.memory_space<vmem>>, %arg7: memref<32x128xbf16, #tpu.memory_space<vmem>>, %arg8: memref<32x128xbf16, #tpu.memory_space<vmem>>, %arg9: memref<32x128xf32, #tpu.memory_space<vmem>>) attributes {dimension_semantics = [#tpu.dimension_semantics<parallel>, #tpu.dimension_semantics<parallel>, #tpu.dimension_semantics<arbitrary>], iteration_bounds = array<i64: 1, 1, 5>, scalar_prefetch = 0 : i64, scratch_operands = 1 : i64, tpu.core_type = #tpu.core_type<tc>, window_params = [{transform_indices = @transform_0, window_bounds = array<i64: 32, 128>}, {transform_indices = @transform_1, window_bounds = array<i64: 128, 128>}, {transform_indices = @transform_2, window_bounds = array<i64: 1, 128>}, {transform_indices = @transform_3, window_bounds = array<i64: 1, 128>}, {transform_indices = @transform_4, window_bounds = array<i64: 32, 128>}, {transform_indices = @transform_5, window_bounds = array<i64: 32, 128>}]} {
    %c0_i32 = arith.constant 0 : i32
    %0 = arith.cmpi eq, %arg2, %c0_i32 : i32
    %1 = arith.extui %0 : i1 to i32
    %c0_i32_0 = arith.constant 0 : i32
    %2 = arith.cmpi ne, %1, %c0_i32_0 : i32
    scf.if %2 {
      %cst_9 = arith.constant 0.000000e+00 : f32
      %12 = vector.broadcast %cst_9 : f32 to vector<32x128xf32>
      %c0_10 = arith.constant 0 : index
      %c0_11 = arith.constant 0 : index
      %13 = vector.load %arg9[%c0_10, %c0_11] : memref<32x128xf32, #tpu.memory_space<vmem>>, vector<32x128xf32>
      tpu.vector_store %arg9[%c0_10, %c0_11], %12 {strides = array<i32>} : memref<32x128xf32, #tpu.memory_space<vmem>>, vector<32x128xf32>,
    } else {
    }
    %c0 = arith.constant 0 : index
    %c0_1 = arith.constant 0 : index
    %3 = vector.load %arg9[%c0, %c0_1] : memref<32x128xf32, #tpu.memory_space<vmem>>, vector<32x128xf32>
    %c0_2 = arith.constant 0 : index
    %c0_3 = arith.constant 0 : index
    %4 = vector.load %arg3[%c0_2, %c0_3] : memref<32x128xbf16, #tpu.memory_space<vmem>>, vector<32x128xbf16>
    %c0_4 = arith.constant 0 : index
    %c0_5 = arith.constant 0 : index
    %5 = vector.load %arg4[%c0_4, %c0_5] : memref<128x128xbf16, #tpu.memory_space<vmem>>, vector<128x128xbf16>
    %cst = arith.constant dense<0.000000e+00> : vector<32x128xf32>
    %6 = tpu.matmul %4, %5, %cst {dimension_numbers = #tpu.dot_dimension_numbers<[1], [0], [0], [1], [0, 0, 1, 1], [], []>} : vector<32x128xbf16>, vector<128x128xbf16>, vector<32x128xf32> -> vector<32x128xf32>
    %7 = arith.addf %3, %6 : vector<32x128xf32>
    %c0_6 = arith.constant 0 : index
    %c0_7 = arith.constant 0 : index
    %8 = vector.load %arg9[%c0_6, %c0_7] : memref<32x128xf32, #tpu.memory_space<vmem>>, vector<32x128xf32>
    tpu.vector_store %arg9[%c0_6, %c0_7], %7 {strides = array<i32>} : memref<32x128xf32, #tpu.memory_space<vmem>>, vector<32x128xf32>,
    %c4_i32 = arith.constant 4 : i32
    %9 = arith.cmpi eq, %arg2, %c4_i32 : i32
    %10 = arith.extui %9 : i1 to i32
    %c0_i32_8 = arith.constant 0 : i32
    %11 = arith.cmpi ne, %10, %c0_i32_8 : i32
    scf.if %11 {
      %c0_9 = arith.constant 0 : index
      %c0_10 = arith.constant 0 : index
      %12 = vector.load %arg9[%c0_9, %c0_10] : memref<32x128xf32, #tpu.memory_space<vmem>>, vector<32x128xf32>
      %c0_11 = arith.constant 0 : index
      %c0_12 = arith.constant 0 : index
      %13 = vector.load %arg5[%c0_11, %c0_12] : memref<1x128xf32, #tpu.memory_space<vmem>>, vector<1x128xf32>
      %14 = vector.broadcast %13 : vector<1x128xf32> to vector<32x128xf32>
      %15 = arith.mulf %12, %14 : vector<32x128xf32>
      %c0_13 = arith.constant 0 : index
      %c0_14 = arith.constant 0 : index
      %16 = vector.load %arg6[%c0_13, %c0_14] : memref<1x128xf32, #tpu.memory_space<vmem>>, vector<1x128xf32>
      %17 = vector.broadcast %16 : vector<1x128xf32> to vector<32x128xf32>
      %18 = arith.addf %15, %17 : vector<32x128xf32>
      %c0_15 = arith.constant 0 : index
      %c0_16 = arith.constant 0 : index
      %19 = vector.load %arg7[%c0_15, %c0_16] : memref<32x128xbf16, #tpu.memory_space<vmem>>, vector<32x128xbf16>
      %20 = arith.extf %19 : vector<32x128xbf16> to vector<32x128xf32>
      %21 = arith.addf %18, %20 : vector<32x128xf32>
      %cst_17 = arith.constant 0.000000e+00 : f32
      %22 = vector.broadcast %cst_17 : f32 to vector<32x128xf32>
      %23 = arith.maximumf %21, %22 : vector<32x128xf32>
      %24 = arith.truncf %23 : vector<32x128xf32> to vector<32x128xbf16>
      %c0_18 = arith.constant 0 : index
      %c0_19 = arith.constant 0 : index
      %25 = vector.load %arg8[%c0_18, %c0_19] : memref<32x128xbf16, #tpu.memory_space<vmem>>, vector<32x128xbf16>
      tpu.vector_store %arg8[%c0_18, %c0_19], %24 {strides = array<i32>} : memref<32x128xbf16, #tpu.memory_space<vmem>>, vector<32x128xbf16>,
    } else {
    }
    return
  }
  func.func @transform_0(%arg0: i32, %arg1: i32, %arg2: i32) -> (i32, i32) {
    %c0_i32 = arith.constant 0 : i32
    return %arg0, %arg2 : i32, i32
  }
  func.func @transform_1(%arg0: i32, %arg1: i32, %arg2: i32) -> (i32, i32) {
    %c0_i32 = arith.constant 0 : i32
    return %arg2, %arg1 : i32, i32
  }
  func.func @transform_2(%arg0: i32, %arg1: i32, %arg2: i32) -> (i32, i32) {
    %c0_i32 = arith.constant 0 : i32
    %c0_i32_0 = arith.constant 0 : i32
    return %c0_i32, %arg1 : i32, i32
  }
  func.func @transform_3(%arg0: i32, %arg1: i32, %arg2: i32) -> (i32, i32) {
    %c0_i32 = arith.constant 0 : i32
    %c0_i32_0 = arith.constant 0 : i32
    return %c0_i32, %arg1 : i32, i32
  }
  func.func @transform_4(%arg0: i32, %arg1: i32, %arg2: i32) -> (i32, i32) {
    %c0_i32 = arith.constant 0 : i32
    return %arg0, %arg1 : i32, i32
  }
  func.func @transform_5(%arg0: i32, %arg1: i32, %arg2: i32) -> (i32, i32) {
    %c0_i32 = arith.constant 0 : i32
    return %arg0, %arg1 : i32, i32
  }
}

module attributes {stable_mosaic.version = 11 : i64} {
  func.func @_mm_kernel(%arg0: i32, %arg1: i32, %arg2: i32, %arg3: memref<8x128xbf16, #tpu.memory_space<vmem>>, %arg4: memref<128x128xbf16, #tpu.memory_space<vmem>>, %arg5: memref<1x128xf32, #tpu.memory_space<vmem>>, %arg6: memref<1x128xf32, #tpu.memory_space<vmem>>, %arg7: memref<8x128xbf16, #tpu.memory_space<vmem>>, %arg8: memref<8x128xf32, #tpu.memory_space<vmem>>) attributes {dimension_semantics = [#tpu.dimension_semantics<parallel>, #tpu.dimension_semantics<parallel>, #tpu.dimension_semantics<arbitrary>], iteration_bounds = array<i64: 1, 1, 5>, scalar_prefetch = 0 : i64, scratch_operands = 1 : i64, tpu.core_type = #tpu.core_type<tc>, window_params = [{transform_indices = @transform_0, window_bounds = array<i64: 8, 128>}, {transform_indices = @transform_1, window_bounds = array<i64: 128, 128>}, {transform_indices = @transform_2, window_bounds = array<i64: 1, 128>}, {transform_indices = @transform_3, window_bounds = array<i64: 1, 128>}, {transform_indices = @transform_4, window_bounds = array<i64: 8, 128>}]} {
    %c0_i32 = arith.constant 0 : i32
    %0 = arith.cmpi eq, %arg2, %c0_i32 : i32
    %1 = arith.extui %0 : i1 to i32
    %c0_i32_0 = arith.constant 0 : i32
    %2 = arith.cmpi ne, %1, %c0_i32_0 : i32
    scf.if %2 {
      %cst_9 = arith.constant 0.000000e+00 : f32
      %12 = vector.broadcast %cst_9 : f32 to vector<8x128xf32>
      %c0_10 = arith.constant 0 : index
      %c0_11 = arith.constant 0 : index
      %13 = vector.load %arg8[%c0_10, %c0_11] : memref<8x128xf32, #tpu.memory_space<vmem>>, vector<8x128xf32>
      tpu.vector_store %arg8[%c0_10, %c0_11], %12 {strides = array<i32>} : memref<8x128xf32, #tpu.memory_space<vmem>>, vector<8x128xf32>,
    } else {
    }
    %c0 = arith.constant 0 : index
    %c0_1 = arith.constant 0 : index
    %3 = vector.load %arg8[%c0, %c0_1] : memref<8x128xf32, #tpu.memory_space<vmem>>, vector<8x128xf32>
    %c0_2 = arith.constant 0 : index
    %c0_3 = arith.constant 0 : index
    %4 = vector.load %arg3[%c0_2, %c0_3] : memref<8x128xbf16, #tpu.memory_space<vmem>>, vector<8x128xbf16>
    %c0_4 = arith.constant 0 : index
    %c0_5 = arith.constant 0 : index
    %5 = vector.load %arg4[%c0_4, %c0_5] : memref<128x128xbf16, #tpu.memory_space<vmem>>, vector<128x128xbf16>
    %cst = arith.constant dense<0.000000e+00> : vector<8x128xf32>
    %6 = tpu.matmul %4, %5, %cst {dimension_numbers = #tpu.dot_dimension_numbers<[1], [0], [0], [1], [0, 0, 1, 1], [], []>} : vector<8x128xbf16>, vector<128x128xbf16>, vector<8x128xf32> -> vector<8x128xf32>
    %7 = arith.addf %3, %6 : vector<8x128xf32>
    %c0_6 = arith.constant 0 : index
    %c0_7 = arith.constant 0 : index
    %8 = vector.load %arg8[%c0_6, %c0_7] : memref<8x128xf32, #tpu.memory_space<vmem>>, vector<8x128xf32>
    tpu.vector_store %arg8[%c0_6, %c0_7], %7 {strides = array<i32>} : memref<8x128xf32, #tpu.memory_space<vmem>>, vector<8x128xf32>,
    %c4_i32 = arith.constant 4 : i32
    %9 = arith.cmpi eq, %arg2, %c4_i32 : i32
    %10 = arith.extui %9 : i1 to i32
    %c0_i32_8 = arith.constant 0 : i32
    %11 = arith.cmpi ne, %10, %c0_i32_8 : i32
    scf.if %11 {
      %c0_9 = arith.constant 0 : index
      %c0_10 = arith.constant 0 : index
      %12 = vector.load %arg8[%c0_9, %c0_10] : memref<8x128xf32, #tpu.memory_space<vmem>>, vector<8x128xf32>
      %c0_11 = arith.constant 0 : index
      %c0_12 = arith.constant 0 : index
      %13 = vector.load %arg5[%c0_11, %c0_12] : memref<1x128xf32, #tpu.memory_space<vmem>>, vector<1x128xf32>
      %14 = vector.broadcast %13 : vector<1x128xf32> to vector<8x128xf32>
      %15 = arith.mulf %12, %14 : vector<8x128xf32>
      %c0_13 = arith.constant 0 : index
      %c0_14 = arith.constant 0 : index
      %16 = vector.load %arg6[%c0_13, %c0_14] : memref<1x128xf32, #tpu.memory_space<vmem>>, vector<1x128xf32>
      %17 = vector.broadcast %16 : vector<1x128xf32> to vector<8x128xf32>
      %18 = arith.addf %15, %17 : vector<8x128xf32>
      %cst_15 = arith.constant 0.000000e+00 : f32
      %19 = vector.broadcast %cst_15 : f32 to vector<8x128xf32>
      %20 = arith.maximumf %18, %19 : vector<8x128xf32>
      %21 = arith.truncf %20 : vector<8x128xf32> to vector<8x128xbf16>
      %c0_16 = arith.constant 0 : index
      %c0_17 = arith.constant 0 : index
      %22 = vector.load %arg7[%c0_16, %c0_17] : memref<8x128xbf16, #tpu.memory_space<vmem>>, vector<8x128xbf16>
      tpu.vector_store %arg7[%c0_16, %c0_17], %21 {strides = array<i32>} : memref<8x128xbf16, #tpu.memory_space<vmem>>, vector<8x128xbf16>,
    } else {
    }
    return
  }
  func.func @transform_0(%arg0: i32, %arg1: i32, %arg2: i32) -> (i32, i32) {
    %c0_i32 = arith.constant 0 : i32
    return %arg0, %arg2 : i32, i32
  }
  func.func @transform_1(%arg0: i32, %arg1: i32, %arg2: i32) -> (i32, i32) {
    %c0_i32 = arith.constant 0 : i32
    return %arg2, %arg1 : i32, i32
  }
  func.func @transform_2(%arg0: i32, %arg1: i32, %arg2: i32) -> (i32, i32) {
    %c0_i32 = arith.constant 0 : i32
    %c0_i32_0 = arith.constant 0 : i32
    return %c0_i32, %arg1 : i32, i32
  }
  func.func @transform_3(%arg0: i32, %arg1: i32, %arg2: i32) -> (i32, i32) {
    %c0_i32 = arith.constant 0 : i32
    %c0_i32_0 = arith.constant 0 : i32
    return %c0_i32, %arg1 : i32, i32
  }
  func.func @transform_4(%arg0: i32, %arg1: i32, %arg2: i32) -> (i32, i32) {
    %c0_i32 = arith.constant 0 : i32
    return %arg0, %arg1 : i32, i32
  }
}

module attributes {stable_mosaic.version = 11 : i64} {
  func.func @_mm_kernel(%arg0: i32, %arg1: i32, %arg2: i32, %arg3: memref<8x128xbf16, #tpu.memory_space<vmem>>, %arg4: memref<128x128xbf16, #tpu.memory_space<vmem>>, %arg5: memref<1x128xf32, #tpu.memory_space<vmem>>, %arg6: memref<1x128xf32, #tpu.memory_space<vmem>>, %arg7: memref<8x128xbf16, #tpu.memory_space<vmem>>, %arg8: memref<8x128xf32, #tpu.memory_space<vmem>>) attributes {dimension_semantics = [#tpu.dimension_semantics<parallel>, #tpu.dimension_semantics<parallel>, #tpu.dimension_semantics<arbitrary>], iteration_bounds = array<i64: 1, 1, 1>, scalar_prefetch = 0 : i64, scratch_operands = 1 : i64, tpu.core_type = #tpu.core_type<tc>, window_params = [{transform_indices = @transform_0, window_bounds = array<i64: 8, 128>}, {transform_indices = @transform_1, window_bounds = array<i64: 128, 128>}, {transform_indices = @transform_2, window_bounds = array<i64: 1, 128>}, {transform_indices = @transform_3, window_bounds = array<i64: 1, 128>}, {transform_indices = @transform_4, window_bounds = array<i64: 8, 128>}]} {
    %c0_i32 = arith.constant 0 : i32
    %0 = arith.cmpi eq, %arg2, %c0_i32 : i32
    %1 = arith.extui %0 : i1 to i32
    %c0_i32_0 = arith.constant 0 : i32
    %2 = arith.cmpi ne, %1, %c0_i32_0 : i32
    scf.if %2 {
      %cst_10 = arith.constant 0.000000e+00 : f32
      %12 = vector.broadcast %cst_10 : f32 to vector<8x128xf32>
      %c0_11 = arith.constant 0 : index
      %c0_12 = arith.constant 0 : index
      %13 = vector.load %arg8[%c0_11, %c0_12] : memref<8x128xf32, #tpu.memory_space<vmem>>, vector<8x128xf32>
      tpu.vector_store %arg8[%c0_11, %c0_12], %12 {strides = array<i32>} : memref<8x128xf32, #tpu.memory_space<vmem>>, vector<8x128xf32>,
    } else {
    }
    %c0 = arith.constant 0 : index
    %c0_1 = arith.constant 0 : index
    %3 = vector.load %arg8[%c0, %c0_1] : memref<8x128xf32, #tpu.memory_space<vmem>>, vector<8x128xf32>
    %c0_2 = arith.constant 0 : index
    %c0_3 = arith.constant 0 : index
    %4 = vector.load %arg3[%c0_2, %c0_3] : memref<8x128xbf16, #tpu.memory_space<vmem>>, vector<8x128xbf16>
    %c0_4 = arith.constant 0 : index
    %c0_5 = arith.constant 0 : index
    %5 = vector.load %arg4[%c0_4, %c0_5] : memref<128x128xbf16, #tpu.memory_space<vmem>>, vector<128x128xbf16>
    %cst = arith.constant dense<0.000000e+00> : vector<8x128xf32>
    %6 = tpu.matmul %4, %5, %cst {dimension_numbers = #tpu.dot_dimension_numbers<[1], [0], [0], [1], [0, 0, 1, 1], [], []>} : vector<8x128xbf16>, vector<128x128xbf16>, vector<8x128xf32> -> vector<8x128xf32>
    %7 = arith.addf %3, %6 : vector<8x128xf32>
    %c0_6 = arith.constant 0 : index
    %c0_7 = arith.constant 0 : index
    %8 = vector.load %arg8[%c0_6, %c0_7] : memref<8x128xf32, #tpu.memory_space<vmem>>, vector<8x128xf32>
    tpu.vector_store %arg8[%c0_6, %c0_7], %7 {strides = array<i32>} : memref<8x128xf32, #tpu.memory_space<vmem>>, vector<8x128xf32>,
    %c0_i32_8 = arith.constant 0 : i32
    %9 = arith.cmpi eq, %arg2, %c0_i32_8 : i32
    %10 = arith.extui %9 : i1 to i32
    %c0_i32_9 = arith.constant 0 : i32
    %11 = arith.cmpi ne, %10, %c0_i32_9 : i32
    scf.if %11 {
      %c0_10 = arith.constant 0 : index
      %c0_11 = arith.constant 0 : index
      %12 = vector.load %arg8[%c0_10, %c0_11] : memref<8x128xf32, #tpu.memory_space<vmem>>, vector<8x128xf32>
      %c0_12 = arith.constant 0 : index
      %c0_13 = arith.constant 0 : index
      %13 = vector.load %arg5[%c0_12, %c0_13] : memref<1x128xf32, #tpu.memory_space<vmem>>, vector<1x128xf32>
      %14 = vector.broadcast %13 : vector<1x128xf32> to vector<8x128xf32>
      %15 = arith.mulf %12, %14 : vector<8x128xf32>
      %c0_14 = arith.constant 0 : index
      %c0_15 = arith.constant 0 : index
      %16 = vector.load %arg6[%c0_14, %c0_15] : memref<1x128xf32, #tpu.memory_space<vmem>>, vector<1x128xf32>
      %17 = vector.broadcast %16 : vector<1x128xf32> to vector<8x128xf32>
      %18 = arith.addf %15, %17 : vector<8x128xf32>
      %19 = arith.truncf %18 : vector<8x128xf32> to vector<8x128xbf16>
      %c0_16 = arith.constant 0 : index
      %c0_17 = arith.constant 0 : index
      %20 = vector.load %arg7[%c0_16, %c0_17] : memref<8x128xbf16, #tpu.memory_space<vmem>>, vector<8x128xbf16>
      tpu.vector_store %arg7[%c0_16, %c0_17], %19 {strides = array<i32>} : memref<8x128xbf16, #tpu.memory_space<vmem>>, vector<8x128xbf16>,
    } else {
    }
    return
  }
  func.func @transform_0(%arg0: i32, %arg1: i32, %arg2: i32) -> (i32, i32) {
    %c0_i32 = arith.constant 0 : i32
    return %arg0, %arg2 : i32, i32
  }
  func.func @transform_1(%arg0: i32, %arg1: i32, %arg2: i32) -> (i32, i32) {
    %c0_i32 = arith.constant 0 : i32
    return %arg2, %arg1 : i32, i32
  }
  func.func @transform_2(%arg0: i32, %arg1: i32, %arg2: i32) -> (i32, i32) {
    %c0_i32 = arith.constant 0 : i32
    %c0_i32_0 = arith.constant 0 : i32
    return %c0_i32, %arg1 : i32, i32
  }
  func.func @transform_3(%arg0: i32, %arg1: i32, %arg2: i32) -> (i32, i32) {
    %c0_i32 = arith.constant 0 : i32
    %c0_i32_0 = arith.constant 0 : i32
    return %c0_i32, %arg1 : i32, i32
  }
  func.func @transform_4(%arg0: i32, %arg1: i32, %arg2: i32) -> (i32, i32) {
    %c0_i32 = arith.constant 0 : i32
    return %arg0, %arg1 : i32, i32
  }
}

module attributes {stable_mosaic.version = 11 : i64} {
  func.func @_mm_res_kernel(%arg0: i32, %arg1: i32, %arg2: i32, %arg3: memref<8x384xbf16, #tpu.memory_space<vmem>>, %arg4: memref<384x128xbf16, #tpu.memory_space<vmem>>, %arg5: memref<1x128xf32, #tpu.memory_space<vmem>>, %arg6: memref<1x128xf32, #tpu.memory_space<vmem>>, %arg7: memref<8x128xbf16, #tpu.memory_space<vmem>>, %arg8: memref<8x128xbf16, #tpu.memory_space<vmem>>, %arg9: memref<8x128xf32, #tpu.memory_space<vmem>>) attributes {dimension_semantics = [#tpu.dimension_semantics<parallel>, #tpu.dimension_semantics<parallel>, #tpu.dimension_semantics<arbitrary>], iteration_bounds = array<i64: 1, 1, 3>, scalar_prefetch = 0 : i64, scratch_operands = 1 : i64, tpu.core_type = #tpu.core_type<tc>, window_params = [{transform_indices = @transform_0, window_bounds = array<i64: 8, 384>}, {transform_indices = @transform_1, window_bounds = array<i64: 384, 128>}, {transform_indices = @transform_2, window_bounds = array<i64: 1, 128>}, {transform_indices = @transform_3, window_bounds = array<i64: 1, 128>}, {transform_indices = @transform_4, window_bounds = array<i64: 8, 128>}, {transform_indices = @transform_5, window_bounds = array<i64: 8, 128>}]} {
    %c0_i32 = arith.constant 0 : i32
    %0 = arith.cmpi eq, %arg2, %c0_i32 : i32
    %1 = arith.extui %0 : i1 to i32
    %c0_i32_0 = arith.constant 0 : i32
    %2 = arith.cmpi ne, %1, %c0_i32_0 : i32
    scf.if %2 {
      %cst_9 = arith.constant 0.000000e+00 : f32
      %12 = vector.broadcast %cst_9 : f32 to vector<8x128xf32>
      %c0_10 = arith.constant 0 : index
      %c0_11 = arith.constant 0 : index
      %13 = vector.load %arg9[%c0_10, %c0_11] : memref<8x128xf32, #tpu.memory_space<vmem>>, vector<8x128xf32>
      tpu.vector_store %arg9[%c0_10, %c0_11], %12 {strides = array<i32>} : memref<8x128xf32, #tpu.memory_space<vmem>>, vector<8x128xf32>,
    } else {
    }
    %c0 = arith.constant 0 : index
    %c0_1 = arith.constant 0 : index
    %3 = vector.load %arg9[%c0, %c0_1] : memref<8x128xf32, #tpu.memory_space<vmem>>, vector<8x128xf32>
    %c0_2 = arith.constant 0 : index
    %c0_3 = arith.constant 0 : index
    %4 = vector.load %arg3[%c0_2, %c0_3] : memref<8x384xbf16, #tpu.memory_space<vmem>>, vector<8x384xbf16>
    %c0_4 = arith.constant 0 : index
    %c0_5 = arith.constant 0 : index
    %5 = vector.load %arg4[%c0_4, %c0_5] : memref<384x128xbf16, #tpu.memory_space<vmem>>, vector<384x128xbf16>
    %cst = arith.constant dense<0.000000e+00> : vector<8x128xf32>
    %6 = tpu.matmul %4, %5, %cst {dimension_numbers = #tpu.dot_dimension_numbers<[1], [0], [0], [1], [0, 0, 1, 1], [], []>} : vector<8x384xbf16>, vector<384x128xbf16>, vector<8x128xf32> -> vector<8x128xf32>
    %7 = arith.addf %3, %6 : vector<8x128xf32>
    %c0_6 = arith.constant 0 : index
    %c0_7 = arith.constant 0 : index
    %8 = vector.load %arg9[%c0_6, %c0_7] : memref<8x128xf32, #tpu.memory_space<vmem>>, vector<8x128xf32>
    tpu.vector_store %arg9[%c0_6, %c0_7], %7 {strides = array<i32>} : memref<8x128xf32, #tpu.memory_space<vmem>>, vector<8x128xf32>,
    %c2_i32 = arith.constant 2 : i32
    %9 = arith.cmpi eq, %arg2, %c2_i32 : i32
    %10 = arith.extui %9 : i1 to i32
    %c0_i32_8 = arith.constant 0 : i32
    %11 = arith.cmpi ne, %10, %c0_i32_8 : i32
    scf.if %11 {
      %c0_9 = arith.constant 0 : index
      %c0_10 = arith.constant 0 : index
      %12 = vector.load %arg9[%c0_9, %c0_10] : memref<8x128xf32, #tpu.memory_space<vmem>>, vector<8x128xf32>
      %c0_11 = arith.constant 0 : index
      %c0_12 = arith.constant 0 : index
      %13 = vector.load %arg5[%c0_11, %c0_12] : memref<1x128xf32, #tpu.memory_space<vmem>>, vector<1x128xf32>
      %14 = vector.broadcast %13 : vector<1x128xf32> to vector<8x128xf32>
      %15 = arith.mulf %12, %14 : vector<8x128xf32>
      %c0_13 = arith.constant 0 : index
      %c0_14 = arith.constant 0 : index
      %16 = vector.load %arg6[%c0_13, %c0_14] : memref<1x128xf32, #tpu.memory_space<vmem>>, vector<1x128xf32>
      %17 = vector.broadcast %16 : vector<1x128xf32> to vector<8x128xf32>
      %18 = arith.addf %15, %17 : vector<8x128xf32>
      %c0_15 = arith.constant 0 : index
      %c0_16 = arith.constant 0 : index
      %19 = vector.load %arg7[%c0_15, %c0_16] : memref<8x128xbf16, #tpu.memory_space<vmem>>, vector<8x128xbf16>
      %20 = arith.extf %19 : vector<8x128xbf16> to vector<8x128xf32>
      %21 = arith.addf %18, %20 : vector<8x128xf32>
      %cst_17 = arith.constant 0.000000e+00 : f32
      %22 = vector.broadcast %cst_17 : f32 to vector<8x128xf32>
      %23 = arith.maximumf %21, %22 : vector<8x128xf32>
      %24 = arith.truncf %23 : vector<8x128xf32> to vector<8x128xbf16>
      %c0_18 = arith.constant 0 : index
      %c0_19 = arith.constant 0 : index
      %25 = vector.load %arg8[%c0_18, %c0_19] : memref<8x128xbf16, #tpu.memory_space<vmem>>, vector<8x128xbf16>
      tpu.vector_store %arg8[%c0_18, %c0_19], %24 {strides = array<i32>} : memref<8x128xbf16, #tpu.memory_space<vmem>>, vector<8x128xbf16>,
    } else {
    }
    return
  }
  func.func @transform_0(%arg0: i32, %arg1: i32, %arg2: i32) -> (i32, i32) {
    %c0_i32 = arith.constant 0 : i32
    return %arg0, %arg2 : i32, i32
  }
  func.func @transform_1(%arg0: i32, %arg1: i32, %arg2: i32) -> (i32, i32) {
    %c0_i32 = arith.constant 0 : i32
    return %arg2, %arg1 : i32, i32
  }
  func.func @transform_2(%arg0: i32, %arg1: i32, %arg2: i32) -> (i32, i32) {
    %c0_i32 = arith.constant 0 : i32
    %c0_i32_0 = arith.constant 0 : i32
    return %c0_i32, %arg1 : i32, i32
  }
  func.func @transform_3(%arg0: i32, %arg1: i32, %arg2: i32) -> (i32, i32) {
    %c0_i32 = arith.constant 0 : i32
    %c0_i32_0 = arith.constant 0 : i32
    return %c0_i32, %arg1 : i32, i32
  }
  func.func @transform_4(%arg0: i32, %arg1: i32, %arg2: i32) -> (i32, i32) {
    %c0_i32 = arith.constant 0 : i32
    return %arg0, %arg1 : i32, i32
  }
  func.func @transform_5(%arg0: i32, %arg1: i32, %arg2: i32) -> (i32, i32) {
    %c0_i32 = arith.constant 0 : i32
    return %arg0, %arg1 : i32, i32
  }
}

module attributes {stable_mosaic.version = 11 : i64} {
  func.func @_mm_kernel(%arg0: i32, %arg1: i32, %arg2: i32, %arg3: memref<8x384xbf16, #tpu.memory_space<vmem>>, %arg4: memref<384x128xbf16, #tpu.memory_space<vmem>>, %arg5: memref<1x128xf32, #tpu.memory_space<vmem>>, %arg6: memref<1x128xf32, #tpu.memory_space<vmem>>, %arg7: memref<8x128xbf16, #tpu.memory_space<vmem>>, %arg8: memref<8x128xf32, #tpu.memory_space<vmem>>) attributes {dimension_semantics = [#tpu.dimension_semantics<parallel>, #tpu.dimension_semantics<parallel>, #tpu.dimension_semantics<arbitrary>], iteration_bounds = array<i64: 1, 1, 3>, scalar_prefetch = 0 : i64, scratch_operands = 1 : i64, tpu.core_type = #tpu.core_type<tc>, window_params = [{transform_indices = @transform_0, window_bounds = array<i64: 8, 384>}, {transform_indices = @transform_1, window_bounds = array<i64: 384, 128>}, {transform_indices = @transform_2, window_bounds = array<i64: 1, 128>}, {transform_indices = @transform_3, window_bounds = array<i64: 1, 128>}, {transform_indices = @transform_4, window_bounds = array<i64: 8, 128>}]} {
    %c0_i32 = arith.constant 0 : i32
    %0 = arith.cmpi eq, %arg2, %c0_i32 : i32
    %1 = arith.extui %0 : i1 to i32
    %c0_i32_0 = arith.constant 0 : i32
    %2 = arith.cmpi ne, %1, %c0_i32_0 : i32
    scf.if %2 {
      %cst_9 = arith.constant 0.000000e+00 : f32
      %12 = vector.broadcast %cst_9 : f32 to vector<8x128xf32>
      %c0_10 = arith.constant 0 : index
      %c0_11 = arith.constant 0 : index
      %13 = vector.load %arg8[%c0_10, %c0_11] : memref<8x128xf32, #tpu.memory_space<vmem>>, vector<8x128xf32>
      tpu.vector_store %arg8[%c0_10, %c0_11], %12 {strides = array<i32>} : memref<8x128xf32, #tpu.memory_space<vmem>>, vector<8x128xf32>,
    } else {
    }
    %c0 = arith.constant 0 : index
    %c0_1 = arith.constant 0 : index
    %3 = vector.load %arg8[%c0, %c0_1] : memref<8x128xf32, #tpu.memory_space<vmem>>, vector<8x128xf32>
    %c0_2 = arith.constant 0 : index
    %c0_3 = arith.constant 0 : index
    %4 = vector.load %arg3[%c0_2, %c0_3] : memref<8x384xbf16, #tpu.memory_space<vmem>>, vector<8x384xbf16>
    %c0_4 = arith.constant 0 : index
    %c0_5 = arith.constant 0 : index
    %5 = vector.load %arg4[%c0_4, %c0_5] : memref<384x128xbf16, #tpu.memory_space<vmem>>, vector<384x128xbf16>
    %cst = arith.constant dense<0.000000e+00> : vector<8x128xf32>
    %6 = tpu.matmul %4, %5, %cst {dimension_numbers = #tpu.dot_dimension_numbers<[1], [0], [0], [1], [0, 0, 1, 1], [], []>} : vector<8x384xbf16>, vector<384x128xbf16>, vector<8x128xf32> -> vector<8x128xf32>
    %7 = arith.addf %3, %6 : vector<8x128xf32>
    %c0_6 = arith.constant 0 : index
    %c0_7 = arith.constant 0 : index
    %8 = vector.load %arg8[%c0_6, %c0_7] : memref<8x128xf32, #tpu.memory_space<vmem>>, vector<8x128xf32>
    tpu.vector_store %arg8[%c0_6, %c0_7], %7 {strides = array<i32>} : memref<8x128xf32, #tpu.memory_space<vmem>>, vector<8x128xf32>,
    %c2_i32 = arith.constant 2 : i32
    %9 = arith.cmpi eq, %arg2, %c2_i32 : i32
    %10 = arith.extui %9 : i1 to i32
    %c0_i32_8 = arith.constant 0 : i32
    %11 = arith.cmpi ne, %10, %c0_i32_8 : i32
    scf.if %11 {
      %c0_9 = arith.constant 0 : index
      %c0_10 = arith.constant 0 : index
      %12 = vector.load %arg8[%c0_9, %c0_10] : memref<8x128xf32, #tpu.memory_space<vmem>>, vector<8x128xf32>
      %c0_11 = arith.constant 0 : index
      %c0_12 = arith.constant 0 : index
      %13 = vector.load %arg5[%c0_11, %c0_12] : memref<1x128xf32, #tpu.memory_space<vmem>>, vector<1x128xf32>
      %14 = vector.broadcast %13 : vector<1x128xf32> to vector<8x128xf32>
      %15 = arith.mulf %12, %14 : vector<8x128xf32>
      %c0_13 = arith.constant 0 : index
      %c0_14 = arith.constant 0 : index
      %16 = vector.load %arg6[%c0_13, %c0_14] : memref<1x128xf32, #tpu.memory_space<vmem>>, vector<1x128xf32>
      %17 = vector.broadcast %16 : vector<1x128xf32> to vector<8x128xf32>
      %18 = arith.addf %15, %17 : vector<8x128xf32>
      %cst_15 = arith.constant 0.000000e+00 : f32
      %19 = vector.broadcast %cst_15 : f32 to vector<8x128xf32>
      %20 = arith.maximumf %18, %19 : vector<8x128xf32>
      %21 = arith.truncf %20 : vector<8x128xf32> to vector<8x128xbf16>
      %c0_16 = arith.constant 0 : index
      %c0_17 = arith.constant 0 : index
      %22 = vector.load %arg7[%c0_16, %c0_17] : memref<8x128xbf16, #tpu.memory_space<vmem>>, vector<8x128xbf16>
      tpu.vector_store %arg7[%c0_16, %c0_17], %21 {strides = array<i32>} : memref<8x128xbf16, #tpu.memory_space<vmem>>, vector<8x128xbf16>,
    } else {
    }
    return
  }
  func.func @transform_0(%arg0: i32, %arg1: i32, %arg2: i32) -> (i32, i32) {
    %c0_i32 = arith.constant 0 : i32
    return %arg0, %arg2 : i32, i32
  }
  func.func @transform_1(%arg0: i32, %arg1: i32, %arg2: i32) -> (i32, i32) {
    %c0_i32 = arith.constant 0 : i32
    return %arg2, %arg1 : i32, i32
  }
  func.func @transform_2(%arg0: i32, %arg1: i32, %arg2: i32) -> (i32, i32) {
    %c0_i32 = arith.constant 0 : i32
    %c0_i32_0 = arith.constant 0 : i32
    return %c0_i32, %arg1 : i32, i32
  }
  func.func @transform_3(%arg0: i32, %arg1: i32, %arg2: i32) -> (i32, i32) {
    %c0_i32 = arith.constant 0 : i32
    %c0_i32_0 = arith.constant 0 : i32
    return %c0_i32, %arg1 : i32, i32
  }
  func.func @transform_4(%arg0: i32, %arg1: i32, %arg2: i32) -> (i32, i32) {
    %c0_i32 = arith.constant 0 : i32
    return %arg0, %arg1 : i32, i32
  }
}

module attributes {stable_mosaic.version = 11 : i64} {
  func.func @_mm_kernel(%arg0: i32, %arg1: i32, %arg2: i32, %arg3: memref<8x384xbf16, #tpu.memory_space<vmem>>, %arg4: memref<384x256xbf16, #tpu.memory_space<vmem>>, %arg5: memref<1x256xf32, #tpu.memory_space<vmem>>, %arg6: memref<1x256xf32, #tpu.memory_space<vmem>>, %arg7: memref<8x256xbf16, #tpu.memory_space<vmem>>, %arg8: memref<8x256xf32, #tpu.memory_space<vmem>>) attributes {dimension_semantics = [#tpu.dimension_semantics<parallel>, #tpu.dimension_semantics<parallel>, #tpu.dimension_semantics<arbitrary>], iteration_bounds = array<i64: 1, 1, 3>, scalar_prefetch = 0 : i64, scratch_operands = 1 : i64, tpu.core_type = #tpu.core_type<tc>, window_params = [{transform_indices = @transform_0, window_bounds = array<i64: 8, 384>}, {transform_indices = @transform_1, window_bounds = array<i64: 384, 256>}, {transform_indices = @transform_2, window_bounds = array<i64: 1, 256>}, {transform_indices = @transform_3, window_bounds = array<i64: 1, 256>}, {transform_indices = @transform_4, window_bounds = array<i64: 8, 256>}]} {
    %c0_i32 = arith.constant 0 : i32
    %0 = arith.cmpi eq, %arg2, %c0_i32 : i32
    %1 = arith.extui %0 : i1 to i32
    %c0_i32_0 = arith.constant 0 : i32
    %2 = arith.cmpi ne, %1, %c0_i32_0 : i32
    scf.if %2 {
      %cst_9 = arith.constant 0.000000e+00 : f32
      %12 = vector.broadcast %cst_9 : f32 to vector<8x256xf32>
      %c0_10 = arith.constant 0 : index
      %c0_11 = arith.constant 0 : index
      %13 = vector.load %arg8[%c0_10, %c0_11] : memref<8x256xf32, #tpu.memory_space<vmem>>, vector<8x256xf32>
      tpu.vector_store %arg8[%c0_10, %c0_11], %12 {strides = array<i32>} : memref<8x256xf32, #tpu.memory_space<vmem>>, vector<8x256xf32>,
    } else {
    }
    %c0 = arith.constant 0 : index
    %c0_1 = arith.constant 0 : index
    %3 = vector.load %arg8[%c0, %c0_1] : memref<8x256xf32, #tpu.memory_space<vmem>>, vector<8x256xf32>
    %c0_2 = arith.constant 0 : index
    %c0_3 = arith.constant 0 : index
    %4 = vector.load %arg3[%c0_2, %c0_3] : memref<8x384xbf16, #tpu.memory_space<vmem>>, vector<8x384xbf16>
    %c0_4 = arith.constant 0 : index
    %c0_5 = arith.constant 0 : index
    %5 = vector.load %arg4[%c0_4, %c0_5] : memref<384x256xbf16, #tpu.memory_space<vmem>>, vector<384x256xbf16>
    %cst = arith.constant dense<0.000000e+00> : vector<8x256xf32>
    %6 = tpu.matmul %4, %5, %cst {dimension_numbers = #tpu.dot_dimension_numbers<[1], [0], [0], [1], [0, 0, 1, 1], [], []>} : vector<8x384xbf16>, vector<384x256xbf16>, vector<8x256xf32> -> vector<8x256xf32>
    %7 = arith.addf %3, %6 : vector<8x256xf32>
    %c0_6 = arith.constant 0 : index
    %c0_7 = arith.constant 0 : index
    %8 = vector.load %arg8[%c0_6, %c0_7] : memref<8x256xf32, #tpu.memory_space<vmem>>, vector<8x256xf32>
    tpu.vector_store %arg8[%c0_6, %c0_7], %7 {strides = array<i32>} : memref<8x256xf32, #tpu.memory_space<vmem>>, vector<8x256xf32>,
    %c2_i32 = arith.constant 2 : i32
    %9 = arith.cmpi eq, %arg2, %c2_i32 : i32
    %10 = arith.extui %9 : i1 to i32
    %c0_i32_8 = arith.constant 0 : i32
    %11 = arith.cmpi ne, %10, %c0_i32_8 : i32
    scf.if %11 {
      %c0_9 = arith.constant 0 : index
      %c0_10 = arith.constant 0 : index
      %12 = vector.load %arg8[%c0_9, %c0_10] : memref<8x256xf32, #tpu.memory_space<vmem>>, vector<8x256xf32>
      %c0_11 = arith.constant 0 : index
      %c0_12 = arith.constant 0 : index
      %13 = vector.load %arg5[%c0_11, %c0_12] : memref<1x256xf32, #tpu.memory_space<vmem>>, vector<1x256xf32>
      %14 = vector.broadcast %13 : vector<1x256xf32> to vector<8x256xf32>
      %15 = arith.mulf %12, %14 : vector<8x256xf32>
      %c0_13 = arith.constant 0 : index
      %c0_14 = arith.constant 0 : index
      %16 = vector.load %arg6[%c0_13, %c0_14] : memref<1x256xf32, #tpu.memory_space<vmem>>, vector<1x256xf32>
      %17 = vector.broadcast %16 : vector<1x256xf32> to vector<8x256xf32>
      %18 = arith.addf %15, %17 : vector<8x256xf32>
      %cst_15 = arith.constant 0.000000e+00 : f32
      %19 = vector.broadcast %cst_15 : f32 to vector<8x256xf32>
      %20 = arith.maximumf %18, %19 : vector<8x256xf32>
      %21 = arith.truncf %20 : vector<8x256xf32> to vector<8x256xbf16>
      %c0_16 = arith.constant 0 : index
      %c0_17 = arith.constant 0 : index
      %22 = vector.load %arg7[%c0_16, %c0_17] : memref<8x256xbf16, #tpu.memory_space<vmem>>, vector<8x256xbf16>
      tpu.vector_store %arg7[%c0_16, %c0_17], %21 {strides = array<i32>} : memref<8x256xbf16, #tpu.memory_space<vmem>>, vector<8x256xbf16>,
    } else {
    }
    return
  }
  func.func @transform_0(%arg0: i32, %arg1: i32, %arg2: i32) -> (i32, i32) {
    %c0_i32 = arith.constant 0 : i32
    return %arg0, %arg2 : i32, i32
  }
  func.func @transform_1(%arg0: i32, %arg1: i32, %arg2: i32) -> (i32, i32) {
    %c0_i32 = arith.constant 0 : i32
    return %arg2, %arg1 : i32, i32
  }
  func.func @transform_2(%arg0: i32, %arg1: i32, %arg2: i32) -> (i32, i32) {
    %c0_i32 = arith.constant 0 : i32
    %c0_i32_0 = arith.constant 0 : i32
    return %c0_i32, %arg1 : i32, i32
  }
  func.func @transform_3(%arg0: i32, %arg1: i32, %arg2: i32) -> (i32, i32) {
    %c0_i32 = arith.constant 0 : i32
    %c0_i32_0 = arith.constant 0 : i32
    return %c0_i32, %arg1 : i32, i32
  }
  func.func @transform_4(%arg0: i32, %arg1: i32, %arg2: i32) -> (i32, i32) {
    %c0_i32 = arith.constant 0 : i32
    return %arg0, %arg1 : i32, i32
  }
}

module attributes {stable_mosaic.version = 11 : i64} {
  func.func @_mm_kernel(%arg0: i32, %arg1: i32, %arg2: i32, %arg3: memref<8x128xbf16, #tpu.memory_space<vmem>>, %arg4: memref<128x256xbf16, #tpu.memory_space<vmem>>, %arg5: memref<1x256xf32, #tpu.memory_space<vmem>>, %arg6: memref<1x256xf32, #tpu.memory_space<vmem>>, %arg7: memref<8x256xbf16, #tpu.memory_space<vmem>>, %arg8: memref<8x256xf32, #tpu.memory_space<vmem>>) attributes {dimension_semantics = [#tpu.dimension_semantics<parallel>, #tpu.dimension_semantics<parallel>, #tpu.dimension_semantics<arbitrary>], iteration_bounds = array<i64: 1, 1, 1>, scalar_prefetch = 0 : i64, scratch_operands = 1 : i64, tpu.core_type = #tpu.core_type<tc>, window_params = [{transform_indices = @transform_0, window_bounds = array<i64: 8, 128>}, {transform_indices = @transform_1, window_bounds = array<i64: 128, 256>}, {transform_indices = @transform_2, window_bounds = array<i64: 1, 256>}, {transform_indices = @transform_3, window_bounds = array<i64: 1, 256>}, {transform_indices = @transform_4, window_bounds = array<i64: 8, 256>}]} {
    %c0_i32 = arith.constant 0 : i32
    %0 = arith.cmpi eq, %arg2, %c0_i32 : i32
    %1 = arith.extui %0 : i1 to i32
    %c0_i32_0 = arith.constant 0 : i32
    %2 = arith.cmpi ne, %1, %c0_i32_0 : i32
    scf.if %2 {
      %cst_10 = arith.constant 0.000000e+00 : f32
      %12 = vector.broadcast %cst_10 : f32 to vector<8x256xf32>
      %c0_11 = arith.constant 0 : index
      %c0_12 = arith.constant 0 : index
      %13 = vector.load %arg8[%c0_11, %c0_12] : memref<8x256xf32, #tpu.memory_space<vmem>>, vector<8x256xf32>
      tpu.vector_store %arg8[%c0_11, %c0_12], %12 {strides = array<i32>} : memref<8x256xf32, #tpu.memory_space<vmem>>, vector<8x256xf32>,
    } else {
    }
    %c0 = arith.constant 0 : index
    %c0_1 = arith.constant 0 : index
    %3 = vector.load %arg8[%c0, %c0_1] : memref<8x256xf32, #tpu.memory_space<vmem>>, vector<8x256xf32>
    %c0_2 = arith.constant 0 : index
    %c0_3 = arith.constant 0 : index
    %4 = vector.load %arg3[%c0_2, %c0_3] : memref<8x128xbf16, #tpu.memory_space<vmem>>, vector<8x128xbf16>
    %c0_4 = arith.constant 0 : index
    %c0_5 = arith.constant 0 : index
    %5 = vector.load %arg4[%c0_4, %c0_5] : memref<128x256xbf16, #tpu.memory_space<vmem>>, vector<128x256xbf16>
    %cst = arith.constant dense<0.000000e+00> : vector<8x256xf32>
    %6 = tpu.matmul %4, %5, %cst {dimension_numbers = #tpu.dot_dimension_numbers<[1], [0], [0], [1], [0, 0, 1, 1], [], []>} : vector<8x128xbf16>, vector<128x256xbf16>, vector<8x256xf32> -> vector<8x256xf32>
    %7 = arith.addf %3, %6 : vector<8x256xf32>
    %c0_6 = arith.constant 0 : index
    %c0_7 = arith.constant 0 : index
    %8 = vector.load %arg8[%c0_6, %c0_7] : memref<8x256xf32, #tpu.memory_space<vmem>>, vector<8x256xf32>
    tpu.vector_store %arg8[%c0_6, %c0_7], %7 {strides = array<i32>} : memref<8x256xf32, #tpu.memory_space<vmem>>, vector<8x256xf32>,
    %c0_i32_8 = arith.constant 0 : i32
    %9 = arith.cmpi eq, %arg2, %c0_i32_8 : i32
    %10 = arith.extui %9 : i1 to i32
    %c0_i32_9 = arith.constant 0 : i32
    %11 = arith.cmpi ne, %10, %c0_i32_9 : i32
    scf.if %11 {
      %c0_10 = arith.constant 0 : index
      %c0_11 = arith.constant 0 : index
      %12 = vector.load %arg8[%c0_10, %c0_11] : memref<8x256xf32, #tpu.memory_space<vmem>>, vector<8x256xf32>
      %c0_12 = arith.constant 0 : index
      %c0_13 = arith.constant 0 : index
      %13 = vector.load %arg5[%c0_12, %c0_13] : memref<1x256xf32, #tpu.memory_space<vmem>>, vector<1x256xf32>
      %14 = vector.broadcast %13 : vector<1x256xf32> to vector<8x256xf32>
      %15 = arith.mulf %12, %14 : vector<8x256xf32>
      %c0_14 = arith.constant 0 : index
      %c0_15 = arith.constant 0 : index
      %16 = vector.load %arg6[%c0_14, %c0_15] : memref<1x256xf32, #tpu.memory_space<vmem>>, vector<1x256xf32>
      %17 = vector.broadcast %16 : vector<1x256xf32> to vector<8x256xf32>
      %18 = arith.addf %15, %17 : vector<8x256xf32>
      %19 = arith.truncf %18 : vector<8x256xf32> to vector<8x256xbf16>
      %c0_16 = arith.constant 0 : index
      %c0_17 = arith.constant 0 : index
      %20 = vector.load %arg7[%c0_16, %c0_17] : memref<8x256xbf16, #tpu.memory_space<vmem>>, vector<8x256xbf16>
      tpu.vector_store %arg7[%c0_16, %c0_17], %19 {strides = array<i32>} : memref<8x256xbf16, #tpu.memory_space<vmem>>, vector<8x256xbf16>,
    } else {
    }
    return
  }
  func.func @transform_0(%arg0: i32, %arg1: i32, %arg2: i32) -> (i32, i32) {
    %c0_i32 = arith.constant 0 : i32
    return %arg0, %arg2 : i32, i32
  }
  func.func @transform_1(%arg0: i32, %arg1: i32, %arg2: i32) -> (i32, i32) {
    %c0_i32 = arith.constant 0 : i32
    return %arg2, %arg1 : i32, i32
  }
  func.func @transform_2(%arg0: i32, %arg1: i32, %arg2: i32) -> (i32, i32) {
    %c0_i32 = arith.constant 0 : i32
    %c0_i32_0 = arith.constant 0 : i32
    return %c0_i32, %arg1 : i32, i32
  }
  func.func @transform_3(%arg0: i32, %arg1: i32, %arg2: i32) -> (i32, i32) {
    %c0_i32 = arith.constant 0 : i32
    %c0_i32_0 = arith.constant 0 : i32
    return %c0_i32, %arg1 : i32, i32
  }
  func.func @transform_4(%arg0: i32, %arg1: i32, %arg2: i32) -> (i32, i32) {
    %c0_i32 = arith.constant 0 : i32
    return %arg0, %arg1 : i32, i32
  }
}

module attributes {stable_mosaic.version = 11 : i64} {
  func.func @_mm_res_kernel(%arg0: i32, %arg1: i32, %arg2: i32, %arg3: memref<8x384xbf16, #tpu.memory_space<vmem>>, %arg4: memref<384x256xbf16, #tpu.memory_space<vmem>>, %arg5: memref<1x256xf32, #tpu.memory_space<vmem>>, %arg6: memref<1x256xf32, #tpu.memory_space<vmem>>, %arg7: memref<8x256xbf16, #tpu.memory_space<vmem>>, %arg8: memref<8x256xbf16, #tpu.memory_space<vmem>>, %arg9: memref<8x256xf32, #tpu.memory_space<vmem>>) attributes {dimension_semantics = [#tpu.dimension_semantics<parallel>, #tpu.dimension_semantics<parallel>, #tpu.dimension_semantics<arbitrary>], iteration_bounds = array<i64: 1, 1, 6>, scalar_prefetch = 0 : i64, scratch_operands = 1 : i64, tpu.core_type = #tpu.core_type<tc>, window_params = [{transform_indices = @transform_0, window_bounds = array<i64: 8, 384>}, {transform_indices = @transform_1, window_bounds = array<i64: 384, 256>}, {transform_indices = @transform_2, window_bounds = array<i64: 1, 256>}, {transform_indices = @transform_3, window_bounds = array<i64: 1, 256>}, {transform_indices = @transform_4, window_bounds = array<i64: 8, 256>}, {transform_indices = @transform_5, window_bounds = array<i64: 8, 256>}]} {
    %c0_i32 = arith.constant 0 : i32
    %0 = arith.cmpi eq, %arg2, %c0_i32 : i32
    %1 = arith.extui %0 : i1 to i32
    %c0_i32_0 = arith.constant 0 : i32
    %2 = arith.cmpi ne, %1, %c0_i32_0 : i32
    scf.if %2 {
      %cst_9 = arith.constant 0.000000e+00 : f32
      %12 = vector.broadcast %cst_9 : f32 to vector<8x256xf32>
      %c0_10 = arith.constant 0 : index
      %c0_11 = arith.constant 0 : index
      %13 = vector.load %arg9[%c0_10, %c0_11] : memref<8x256xf32, #tpu.memory_space<vmem>>, vector<8x256xf32>
      tpu.vector_store %arg9[%c0_10, %c0_11], %12 {strides = array<i32>} : memref<8x256xf32, #tpu.memory_space<vmem>>, vector<8x256xf32>,
    } else {
    }
    %c0 = arith.constant 0 : index
    %c0_1 = arith.constant 0 : index
    %3 = vector.load %arg9[%c0, %c0_1] : memref<8x256xf32, #tpu.memory_space<vmem>>, vector<8x256xf32>
    %c0_2 = arith.constant 0 : index
    %c0_3 = arith.constant 0 : index
    %4 = vector.load %arg3[%c0_2, %c0_3] : memref<8x384xbf16, #tpu.memory_space<vmem>>, vector<8x384xbf16>
    %c0_4 = arith.constant 0 : index
    %c0_5 = arith.constant 0 : index
    %5 = vector.load %arg4[%c0_4, %c0_5] : memref<384x256xbf16, #tpu.memory_space<vmem>>, vector<384x256xbf16>
    %cst = arith.constant dense<0.000000e+00> : vector<8x256xf32>
    %6 = tpu.matmul %4, %5, %cst {dimension_numbers = #tpu.dot_dimension_numbers<[1], [0], [0], [1], [0, 0, 1, 1], [], []>} : vector<8x384xbf16>, vector<384x256xbf16>, vector<8x256xf32> -> vector<8x256xf32>
    %7 = arith.addf %3, %6 : vector<8x256xf32>
    %c0_6 = arith.constant 0 : index
    %c0_7 = arith.constant 0 : index
    %8 = vector.load %arg9[%c0_6, %c0_7] : memref<8x256xf32, #tpu.memory_space<vmem>>, vector<8x256xf32>
    tpu.vector_store %arg9[%c0_6, %c0_7], %7 {strides = array<i32>} : memref<8x256xf32, #tpu.memory_space<vmem>>, vector<8x256xf32>,
    %c5_i32 = arith.constant 5 : i32
    %9 = arith.cmpi eq, %arg2, %c5_i32 : i32
    %10 = arith.extui %9 : i1 to i32
    %c0_i32_8 = arith.constant 0 : i32
    %11 = arith.cmpi ne, %10, %c0_i32_8 : i32
    scf.if %11 {
      %c0_9 = arith.constant 0 : index
      %c0_10 = arith.constant 0 : index
      %12 = vector.load %arg9[%c0_9, %c0_10] : memref<8x256xf32, #tpu.memory_space<vmem>>, vector<8x256xf32>
      %c0_11 = arith.constant 0 : index
      %c0_12 = arith.constant 0 : index
      %13 = vector.load %arg5[%c0_11, %c0_12] : memref<1x256xf32, #tpu.memory_space<vmem>>, vector<1x256xf32>
      %14 = vector.broadcast %13 : vector<1x256xf32> to vector<8x256xf32>
      %15 = arith.mulf %12, %14 : vector<8x256xf32>
      %c0_13 = arith.constant 0 : index
      %c0_14 = arith.constant 0 : index
      %16 = vector.load %arg6[%c0_13, %c0_14] : memref<1x256xf32, #tpu.memory_space<vmem>>, vector<1x256xf32>
      %17 = vector.broadcast %16 : vector<1x256xf32> to vector<8x256xf32>
      %18 = arith.addf %15, %17 : vector<8x256xf32>
      %c0_15 = arith.constant 0 : index
      %c0_16 = arith.constant 0 : index
      %19 = vector.load %arg7[%c0_15, %c0_16] : memref<8x256xbf16, #tpu.memory_space<vmem>>, vector<8x256xbf16>
      %20 = arith.extf %19 : vector<8x256xbf16> to vector<8x256xf32>
      %21 = arith.addf %18, %20 : vector<8x256xf32>
      %cst_17 = arith.constant 0.000000e+00 : f32
      %22 = vector.broadcast %cst_17 : f32 to vector<8x256xf32>
      %23 = arith.maximumf %21, %22 : vector<8x256xf32>
      %24 = arith.truncf %23 : vector<8x256xf32> to vector<8x256xbf16>
      %c0_18 = arith.constant 0 : index
      %c0_19 = arith.constant 0 : index
      %25 = vector.load %arg8[%c0_18, %c0_19] : memref<8x256xbf16, #tpu.memory_space<vmem>>, vector<8x256xbf16>
      tpu.vector_store %arg8[%c0_18, %c0_19], %24 {strides = array<i32>} : memref<8x256xbf16, #tpu.memory_space<vmem>>, vector<8x256xbf16>,
    } else {
    }
    return
  }
  func.func @transform_0(%arg0: i32, %arg1: i32, %arg2: i32) -> (i32, i32) {
    %c0_i32 = arith.constant 0 : i32
    return %arg0, %arg2 : i32, i32
  }
  func.func @transform_1(%arg0: i32, %arg1: i32, %arg2: i32) -> (i32, i32) {
    %c0_i32 = arith.constant 0 : i32
    return %arg2, %arg1 : i32, i32
  }
  func.func @transform_2(%arg0: i32, %arg1: i32, %arg2: i32) -> (i32, i32) {
    %c0_i32 = arith.constant 0 : i32
    %c0_i32_0 = arith.constant 0 : i32
    return %c0_i32, %arg1 : i32, i32
  }
  func.func @transform_3(%arg0: i32, %arg1: i32, %arg2: i32) -> (i32, i32) {
    %c0_i32 = arith.constant 0 : i32
    %c0_i32_0 = arith.constant 0 : i32
    return %c0_i32, %arg1 : i32, i32
  }
  func.func @transform_4(%arg0: i32, %arg1: i32, %arg2: i32) -> (i32, i32) {
    %c0_i32 = arith.constant 0 : i32
    return %arg0, %arg1 : i32, i32
  }
  func.func @transform_5(%arg0: i32, %arg1: i32, %arg2: i32) -> (i32, i32) {
    %c0_i32 = arith.constant 0 : i32
    return %arg0, %arg1 : i32, i32
  }
}

module attributes {stable_mosaic.version = 11 : i64} {
  func.func @_mm_kernel(%arg0: i32, %arg1: i32, %arg2: i32, %arg3: memref<8x384xbf16, #tpu.memory_space<vmem>>, %arg4: memref<384x256xbf16, #tpu.memory_space<vmem>>, %arg5: memref<1x256xf32, #tpu.memory_space<vmem>>, %arg6: memref<1x256xf32, #tpu.memory_space<vmem>>, %arg7: memref<8x256xbf16, #tpu.memory_space<vmem>>, %arg8: memref<8x256xf32, #tpu.memory_space<vmem>>) attributes {dimension_semantics = [#tpu.dimension_semantics<parallel>, #tpu.dimension_semantics<parallel>, #tpu.dimension_semantics<arbitrary>], iteration_bounds = array<i64: 1, 1, 6>, scalar_prefetch = 0 : i64, scratch_operands = 1 : i64, tpu.core_type = #tpu.core_type<tc>, window_params = [{transform_indices = @transform_0, window_bounds = array<i64: 8, 384>}, {transform_indices = @transform_1, window_bounds = array<i64: 384, 256>}, {transform_indices = @transform_2, window_bounds = array<i64: 1, 256>}, {transform_indices = @transform_3, window_bounds = array<i64: 1, 256>}, {transform_indices = @transform_4, window_bounds = array<i64: 8, 256>}]} {
    %c0_i32 = arith.constant 0 : i32
    %0 = arith.cmpi eq, %arg2, %c0_i32 : i32
    %1 = arith.extui %0 : i1 to i32
    %c0_i32_0 = arith.constant 0 : i32
    %2 = arith.cmpi ne, %1, %c0_i32_0 : i32
    scf.if %2 {
      %cst_9 = arith.constant 0.000000e+00 : f32
      %12 = vector.broadcast %cst_9 : f32 to vector<8x256xf32>
      %c0_10 = arith.constant 0 : index
      %c0_11 = arith.constant 0 : index
      %13 = vector.load %arg8[%c0_10, %c0_11] : memref<8x256xf32, #tpu.memory_space<vmem>>, vector<8x256xf32>
      tpu.vector_store %arg8[%c0_10, %c0_11], %12 {strides = array<i32>} : memref<8x256xf32, #tpu.memory_space<vmem>>, vector<8x256xf32>,
    } else {
    }
    %c0 = arith.constant 0 : index
    %c0_1 = arith.constant 0 : index
    %3 = vector.load %arg8[%c0, %c0_1] : memref<8x256xf32, #tpu.memory_space<vmem>>, vector<8x256xf32>
    %c0_2 = arith.constant 0 : index
    %c0_3 = arith.constant 0 : index
    %4 = vector.load %arg3[%c0_2, %c0_3] : memref<8x384xbf16, #tpu.memory_space<vmem>>, vector<8x384xbf16>
    %c0_4 = arith.constant 0 : index
    %c0_5 = arith.constant 0 : index
    %5 = vector.load %arg4[%c0_4, %c0_5] : memref<384x256xbf16, #tpu.memory_space<vmem>>, vector<384x256xbf16>
    %cst = arith.constant dense<0.000000e+00> : vector<8x256xf32>
    %6 = tpu.matmul %4, %5, %cst {dimension_numbers = #tpu.dot_dimension_numbers<[1], [0], [0], [1], [0, 0, 1, 1], [], []>} : vector<8x384xbf16>, vector<384x256xbf16>, vector<8x256xf32> -> vector<8x256xf32>
    %7 = arith.addf %3, %6 : vector<8x256xf32>
    %c0_6 = arith.constant 0 : index
    %c0_7 = arith.constant 0 : index
    %8 = vector.load %arg8[%c0_6, %c0_7] : memref<8x256xf32, #tpu.memory_space<vmem>>, vector<8x256xf32>
    tpu.vector_store %arg8[%c0_6, %c0_7], %7 {strides = array<i32>} : memref<8x256xf32, #tpu.memory_space<vmem>>, vector<8x256xf32>,
    %c5_i32 = arith.constant 5 : i32
    %9 = arith.cmpi eq, %arg2, %c5_i32 : i32
    %10 = arith.extui %9 : i1 to i32
    %c0_i32_8 = arith.constant 0 : i32
    %11 = arith.cmpi ne, %10, %c0_i32_8 : i32
    scf.if %11 {
      %c0_9 = arith.constant 0 : index
      %c0_10 = arith.constant 0 : index
      %12 = vector.load %arg8[%c0_9, %c0_10] : memref<8x256xf32, #tpu.memory_space<vmem>>, vector<8x256xf32>
      %c0_11 = arith.constant 0 : index
      %c0_12 = arith.constant 0 : index
      %13 = vector.load %arg5[%c0_11, %c0_12] : memref<1x256xf32, #tpu.memory_space<vmem>>, vector<1x256xf32>
      %14 = vector.broadcast %13 : vector<1x256xf32> to vector<8x256xf32>
      %15 = arith.mulf %12, %14 : vector<8x256xf32>
      %c0_13 = arith.constant 0 : index
      %c0_14 = arith.constant 0 : index
      %16 = vector.load %arg6[%c0_13, %c0_14] : memref<1x256xf32, #tpu.memory_space<vmem>>, vector<1x256xf32>
      %17 = vector.broadcast %16 : vector<1x256xf32> to vector<8x256xf32>
      %18 = arith.addf %15, %17 : vector<8x256xf32>
      %cst_15 = arith.constant 0.000000e+00 : f32
      %19 = vector.broadcast %cst_15 : f32 to vector<8x256xf32>
      %20 = arith.maximumf %18, %19 : vector<8x256xf32>
      %21 = arith.truncf %20 : vector<8x256xf32> to vector<8x256xbf16>
      %c0_16 = arith.constant 0 : index
      %c0_17 = arith.constant 0 : index
      %22 = vector.load %arg7[%c0_16, %c0_17] : memref<8x256xbf16, #tpu.memory_space<vmem>>, vector<8x256xbf16>
      tpu.vector_store %arg7[%c0_16, %c0_17], %21 {strides = array<i32>} : memref<8x256xbf16, #tpu.memory_space<vmem>>, vector<8x256xbf16>,
    } else {
    }
    return
  }
  func.func @transform_0(%arg0: i32, %arg1: i32, %arg2: i32) -> (i32, i32) {
    %c0_i32 = arith.constant 0 : i32
    return %arg0, %arg2 : i32, i32
  }
  func.func @transform_1(%arg0: i32, %arg1: i32, %arg2: i32) -> (i32, i32) {
    %c0_i32 = arith.constant 0 : i32
    return %arg2, %arg1 : i32, i32
  }
  func.func @transform_2(%arg0: i32, %arg1: i32, %arg2: i32) -> (i32, i32) {
    %c0_i32 = arith.constant 0 : i32
    %c0_i32_0 = arith.constant 0 : i32
    return %c0_i32, %arg1 : i32, i32
  }
  func.func @transform_3(%arg0: i32, %arg1: i32, %arg2: i32) -> (i32, i32) {
    %c0_i32 = arith.constant 0 : i32
    %c0_i32_0 = arith.constant 0 : i32
    return %c0_i32, %arg1 : i32, i32
  }
  func.func @transform_4(%arg0: i32, %arg1: i32, %arg2: i32) -> (i32, i32) {
    %c0_i32 = arith.constant 0 : i32
    return %arg0, %arg1 : i32, i32
  }
}

module attributes {stable_mosaic.version = 11 : i64} {
  func.func @_mm_kernel(%arg0: i32, %arg1: i32, %arg2: i32, %arg3: memref<8x384xbf16, #tpu.memory_space<vmem>>, %arg4: memref<384x256xbf16, #tpu.memory_space<vmem>>, %arg5: memref<1x256xf32, #tpu.memory_space<vmem>>, %arg6: memref<1x256xf32, #tpu.memory_space<vmem>>, %arg7: memref<8x256xbf16, #tpu.memory_space<vmem>>, %arg8: memref<8x256xf32, #tpu.memory_space<vmem>>) attributes {dimension_semantics = [#tpu.dimension_semantics<parallel>, #tpu.dimension_semantics<parallel>, #tpu.dimension_semantics<arbitrary>], iteration_bounds = array<i64: 1, 2, 6>, scalar_prefetch = 0 : i64, scratch_operands = 1 : i64, tpu.core_type = #tpu.core_type<tc>, window_params = [{transform_indices = @transform_0, window_bounds = array<i64: 8, 384>}, {transform_indices = @transform_1, window_bounds = array<i64: 384, 256>}, {transform_indices = @transform_2, window_bounds = array<i64: 1, 256>}, {transform_indices = @transform_3, window_bounds = array<i64: 1, 256>}, {transform_indices = @transform_4, window_bounds = array<i64: 8, 256>}]} {
    %c0_i32 = arith.constant 0 : i32
    %0 = arith.cmpi eq, %arg2, %c0_i32 : i32
    %1 = arith.extui %0 : i1 to i32
    %c0_i32_0 = arith.constant 0 : i32
    %2 = arith.cmpi ne, %1, %c0_i32_0 : i32
    scf.if %2 {
      %cst_9 = arith.constant 0.000000e+00 : f32
      %12 = vector.broadcast %cst_9 : f32 to vector<8x256xf32>
      %c0_10 = arith.constant 0 : index
      %c0_11 = arith.constant 0 : index
      %13 = vector.load %arg8[%c0_10, %c0_11] : memref<8x256xf32, #tpu.memory_space<vmem>>, vector<8x256xf32>
      tpu.vector_store %arg8[%c0_10, %c0_11], %12 {strides = array<i32>} : memref<8x256xf32, #tpu.memory_space<vmem>>, vector<8x256xf32>,
    } else {
    }
    %c0 = arith.constant 0 : index
    %c0_1 = arith.constant 0 : index
    %3 = vector.load %arg8[%c0, %c0_1] : memref<8x256xf32, #tpu.memory_space<vmem>>, vector<8x256xf32>
    %c0_2 = arith.constant 0 : index
    %c0_3 = arith.constant 0 : index
    %4 = vector.load %arg3[%c0_2, %c0_3] : memref<8x384xbf16, #tpu.memory_space<vmem>>, vector<8x384xbf16>
    %c0_4 = arith.constant 0 : index
    %c0_5 = arith.constant 0 : index
    %5 = vector.load %arg4[%c0_4, %c0_5] : memref<384x256xbf16, #tpu.memory_space<vmem>>, vector<384x256xbf16>
    %cst = arith.constant dense<0.000000e+00> : vector<8x256xf32>
    %6 = tpu.matmul %4, %5, %cst {dimension_numbers = #tpu.dot_dimension_numbers<[1], [0], [0], [1], [0, 0, 1, 1], [], []>} : vector<8x384xbf16>, vector<384x256xbf16>, vector<8x256xf32> -> vector<8x256xf32>
    %7 = arith.addf %3, %6 : vector<8x256xf32>
    %c0_6 = arith.constant 0 : index
    %c0_7 = arith.constant 0 : index
    %8 = vector.load %arg8[%c0_6, %c0_7] : memref<8x256xf32, #tpu.memory_space<vmem>>, vector<8x256xf32>
    tpu.vector_store %arg8[%c0_6, %c0_7], %7 {strides = array<i32>} : memref<8x256xf32, #tpu.memory_space<vmem>>, vector<8x256xf32>,
    %c5_i32 = arith.constant 5 : i32
    %9 = arith.cmpi eq, %arg2, %c5_i32 : i32
    %10 = arith.extui %9 : i1 to i32
    %c0_i32_8 = arith.constant 0 : i32
    %11 = arith.cmpi ne, %10, %c0_i32_8 : i32
    scf.if %11 {
      %c0_9 = arith.constant 0 : index
      %c0_10 = arith.constant 0 : index
      %12 = vector.load %arg8[%c0_9, %c0_10] : memref<8x256xf32, #tpu.memory_space<vmem>>, vector<8x256xf32>
      %c0_11 = arith.constant 0 : index
      %c0_12 = arith.constant 0 : index
      %13 = vector.load %arg5[%c0_11, %c0_12] : memref<1x256xf32, #tpu.memory_space<vmem>>, vector<1x256xf32>
      %14 = vector.broadcast %13 : vector<1x256xf32> to vector<8x256xf32>
      %15 = arith.mulf %12, %14 : vector<8x256xf32>
      %c0_13 = arith.constant 0 : index
      %c0_14 = arith.constant 0 : index
      %16 = vector.load %arg6[%c0_13, %c0_14] : memref<1x256xf32, #tpu.memory_space<vmem>>, vector<1x256xf32>
      %17 = vector.broadcast %16 : vector<1x256xf32> to vector<8x256xf32>
      %18 = arith.addf %15, %17 : vector<8x256xf32>
      %cst_15 = arith.constant 0.000000e+00 : f32
      %19 = vector.broadcast %cst_15 : f32 to vector<8x256xf32>
      %20 = arith.maximumf %18, %19 : vector<8x256xf32>
      %21 = arith.truncf %20 : vector<8x256xf32> to vector<8x256xbf16>
      %c0_16 = arith.constant 0 : index
      %c0_17 = arith.constant 0 : index
      %22 = vector.load %arg7[%c0_16, %c0_17] : memref<8x256xbf16, #tpu.memory_space<vmem>>, vector<8x256xbf16>
      tpu.vector_store %arg7[%c0_16, %c0_17], %21 {strides = array<i32>} : memref<8x256xbf16, #tpu.memory_space<vmem>>, vector<8x256xbf16>,
    } else {
    }
    return
  }
  func.func @transform_0(%arg0: i32, %arg1: i32, %arg2: i32) -> (i32, i32) {
    %c0_i32 = arith.constant 0 : i32
    return %arg0, %arg2 : i32, i32
  }
  func.func @transform_1(%arg0: i32, %arg1: i32, %arg2: i32) -> (i32, i32) {
    %c0_i32 = arith.constant 0 : i32
    return %arg2, %arg1 : i32, i32
  }
  func.func @transform_2(%arg0: i32, %arg1: i32, %arg2: i32) -> (i32, i32) {
    %c0_i32 = arith.constant 0 : i32
    %c0_i32_0 = arith.constant 0 : i32
    return %c0_i32, %arg1 : i32, i32
  }
  func.func @transform_3(%arg0: i32, %arg1: i32, %arg2: i32) -> (i32, i32) {
    %c0_i32 = arith.constant 0 : i32
    %c0_i32_0 = arith.constant 0 : i32
    return %c0_i32, %arg1 : i32, i32
  }
  func.func @transform_4(%arg0: i32, %arg1: i32, %arg2: i32) -> (i32, i32) {
    %c0_i32 = arith.constant 0 : i32
    return %arg0, %arg1 : i32, i32
  }
}

module attributes {stable_mosaic.version = 11 : i64} {
  func.func @_mm_kernel(%arg0: i32, %arg1: i32, %arg2: i32, %arg3: memref<8x256xbf16, #tpu.memory_space<vmem>>, %arg4: memref<256x256xbf16, #tpu.memory_space<vmem>>, %arg5: memref<1x256xf32, #tpu.memory_space<vmem>>, %arg6: memref<1x256xf32, #tpu.memory_space<vmem>>, %arg7: memref<8x256xbf16, #tpu.memory_space<vmem>>, %arg8: memref<8x256xf32, #tpu.memory_space<vmem>>) attributes {dimension_semantics = [#tpu.dimension_semantics<parallel>, #tpu.dimension_semantics<parallel>, #tpu.dimension_semantics<arbitrary>], iteration_bounds = array<i64: 1, 2, 1>, scalar_prefetch = 0 : i64, scratch_operands = 1 : i64, tpu.core_type = #tpu.core_type<tc>, window_params = [{transform_indices = @transform_0, window_bounds = array<i64: 8, 256>}, {transform_indices = @transform_1, window_bounds = array<i64: 256, 256>}, {transform_indices = @transform_2, window_bounds = array<i64: 1, 256>}, {transform_indices = @transform_3, window_bounds = array<i64: 1, 256>}, {transform_indices = @transform_4, window_bounds = array<i64: 8, 256>}]} {
    %c0_i32 = arith.constant 0 : i32
    %0 = arith.cmpi eq, %arg2, %c0_i32 : i32
    %1 = arith.extui %0 : i1 to i32
    %c0_i32_0 = arith.constant 0 : i32
    %2 = arith.cmpi ne, %1, %c0_i32_0 : i32
    scf.if %2 {
      %cst_10 = arith.constant 0.000000e+00 : f32
      %12 = vector.broadcast %cst_10 : f32 to vector<8x256xf32>
      %c0_11 = arith.constant 0 : index
      %c0_12 = arith.constant 0 : index
      %13 = vector.load %arg8[%c0_11, %c0_12] : memref<8x256xf32, #tpu.memory_space<vmem>>, vector<8x256xf32>
      tpu.vector_store %arg8[%c0_11, %c0_12], %12 {strides = array<i32>} : memref<8x256xf32, #tpu.memory_space<vmem>>, vector<8x256xf32>,
    } else {
    }
    %c0 = arith.constant 0 : index
    %c0_1 = arith.constant 0 : index
    %3 = vector.load %arg8[%c0, %c0_1] : memref<8x256xf32, #tpu.memory_space<vmem>>, vector<8x256xf32>
    %c0_2 = arith.constant 0 : index
    %c0_3 = arith.constant 0 : index
    %4 = vector.load %arg3[%c0_2, %c0_3] : memref<8x256xbf16, #tpu.memory_space<vmem>>, vector<8x256xbf16>
    %c0_4 = arith.constant 0 : index
    %c0_5 = arith.constant 0 : index
    %5 = vector.load %arg4[%c0_4, %c0_5] : memref<256x256xbf16, #tpu.memory_space<vmem>>, vector<256x256xbf16>
    %cst = arith.constant dense<0.000000e+00> : vector<8x256xf32>
    %6 = tpu.matmul %4, %5, %cst {dimension_numbers = #tpu.dot_dimension_numbers<[1], [0], [0], [1], [0, 0, 1, 1], [], []>} : vector<8x256xbf16>, vector<256x256xbf16>, vector<8x256xf32> -> vector<8x256xf32>
    %7 = arith.addf %3, %6 : vector<8x256xf32>
    %c0_6 = arith.constant 0 : index
    %c0_7 = arith.constant 0 : index
    %8 = vector.load %arg8[%c0_6, %c0_7] : memref<8x256xf32, #tpu.memory_space<vmem>>, vector<8x256xf32>
    tpu.vector_store %arg8[%c0_6, %c0_7], %7 {strides = array<i32>} : memref<8x256xf32, #tpu.memory_space<vmem>>, vector<8x256xf32>,
    %c0_i32_8 = arith.constant 0 : i32
    %9 = arith.cmpi eq, %arg2, %c0_i32_8 : i32
    %10 = arith.extui %9 : i1 to i32
    %c0_i32_9 = arith.constant 0 : i32
    %11 = arith.cmpi ne, %10, %c0_i32_9 : i32
    scf.if %11 {
      %c0_10 = arith.constant 0 : index
      %c0_11 = arith.constant 0 : index
      %12 = vector.load %arg8[%c0_10, %c0_11] : memref<8x256xf32, #tpu.memory_space<vmem>>, vector<8x256xf32>
      %c0_12 = arith.constant 0 : index
      %c0_13 = arith.constant 0 : index
      %13 = vector.load %arg5[%c0_12, %c0_13] : memref<1x256xf32, #tpu.memory_space<vmem>>, vector<1x256xf32>
      %14 = vector.broadcast %13 : vector<1x256xf32> to vector<8x256xf32>
      %15 = arith.mulf %12, %14 : vector<8x256xf32>
      %c0_14 = arith.constant 0 : index
      %c0_15 = arith.constant 0 : index
      %16 = vector.load %arg6[%c0_14, %c0_15] : memref<1x256xf32, #tpu.memory_space<vmem>>, vector<1x256xf32>
      %17 = vector.broadcast %16 : vector<1x256xf32> to vector<8x256xf32>
      %18 = arith.addf %15, %17 : vector<8x256xf32>
      %19 = arith.truncf %18 : vector<8x256xf32> to vector<8x256xbf16>
      %c0_16 = arith.constant 0 : index
      %c0_17 = arith.constant 0 : index
      %20 = vector.load %arg7[%c0_16, %c0_17] : memref<8x256xbf16, #tpu.memory_space<vmem>>, vector<8x256xbf16>
      tpu.vector_store %arg7[%c0_16, %c0_17], %19 {strides = array<i32>} : memref<8x256xbf16, #tpu.memory_space<vmem>>, vector<8x256xbf16>,
    } else {
    }
    return
  }
  func.func @transform_0(%arg0: i32, %arg1: i32, %arg2: i32) -> (i32, i32) {
    %c0_i32 = arith.constant 0 : i32
    return %arg0, %arg2 : i32, i32
  }
  func.func @transform_1(%arg0: i32, %arg1: i32, %arg2: i32) -> (i32, i32) {
    %c0_i32 = arith.constant 0 : i32
    return %arg2, %arg1 : i32, i32
  }
  func.func @transform_2(%arg0: i32, %arg1: i32, %arg2: i32) -> (i32, i32) {
    %c0_i32 = arith.constant 0 : i32
    %c0_i32_0 = arith.constant 0 : i32
    return %c0_i32, %arg1 : i32, i32
  }
  func.func @transform_3(%arg0: i32, %arg1: i32, %arg2: i32) -> (i32, i32) {
    %c0_i32 = arith.constant 0 : i32
    %c0_i32_0 = arith.constant 0 : i32
    return %c0_i32, %arg1 : i32, i32
  }
  func.func @transform_4(%arg0: i32, %arg1: i32, %arg2: i32) -> (i32, i32) {
    %c0_i32 = arith.constant 0 : i32
    return %arg0, %arg1 : i32, i32
  }
}

module attributes {stable_mosaic.version = 11 : i64} {
  func.func @_mm_res_kernel(%arg0: i32, %arg1: i32, %arg2: i32, %arg3: memref<8x512xbf16, #tpu.memory_space<vmem>>, %arg4: memref<512x256xbf16, #tpu.memory_space<vmem>>, %arg5: memref<1x256xf32, #tpu.memory_space<vmem>>, %arg6: memref<1x256xf32, #tpu.memory_space<vmem>>, %arg7: memref<8x256xbf16, #tpu.memory_space<vmem>>, %arg8: memref<8x256xbf16, #tpu.memory_space<vmem>>, %arg9: memref<8x256xf32, #tpu.memory_space<vmem>>) attributes {dimension_semantics = [#tpu.dimension_semantics<parallel>, #tpu.dimension_semantics<parallel>, #tpu.dimension_semantics<arbitrary>], iteration_bounds = array<i64: 1, 2, 9>, scalar_prefetch = 0 : i64, scratch_operands = 1 : i64, tpu.core_type = #tpu.core_type<tc>, window_params = [{transform_indices = @transform_0, window_bounds = array<i64: 8, 512>}, {transform_indices = @transform_1, window_bounds = array<i64: 512, 256>}, {transform_indices = @transform_2, window_bounds = array<i64: 1, 256>}, {transform_indices = @transform_3, window_bounds = array<i64: 1, 256>}, {transform_indices = @transform_4, window_bounds = array<i64: 8, 256>}, {transform_indices = @transform_5, window_bounds = array<i64: 8, 256>}]} {
    %c0_i32 = arith.constant 0 : i32
    %0 = arith.cmpi eq, %arg2, %c0_i32 : i32
    %1 = arith.extui %0 : i1 to i32
    %c0_i32_0 = arith.constant 0 : i32
    %2 = arith.cmpi ne, %1, %c0_i32_0 : i32
    scf.if %2 {
      %cst_9 = arith.constant 0.000000e+00 : f32
      %12 = vector.broadcast %cst_9 : f32 to vector<8x256xf32>
      %c0_10 = arith.constant 0 : index
      %c0_11 = arith.constant 0 : index
      %13 = vector.load %arg9[%c0_10, %c0_11] : memref<8x256xf32, #tpu.memory_space<vmem>>, vector<8x256xf32>
      tpu.vector_store %arg9[%c0_10, %c0_11], %12 {strides = array<i32>} : memref<8x256xf32, #tpu.memory_space<vmem>>, vector<8x256xf32>,
    } else {
    }
    %c0 = arith.constant 0 : index
    %c0_1 = arith.constant 0 : index
    %3 = vector.load %arg9[%c0, %c0_1] : memref<8x256xf32, #tpu.memory_space<vmem>>, vector<8x256xf32>
    %c0_2 = arith.constant 0 : index
    %c0_3 = arith.constant 0 : index
    %4 = vector.load %arg3[%c0_2, %c0_3] : memref<8x512xbf16, #tpu.memory_space<vmem>>, vector<8x512xbf16>
    %c0_4 = arith.constant 0 : index
    %c0_5 = arith.constant 0 : index
    %5 = vector.load %arg4[%c0_4, %c0_5] : memref<512x256xbf16, #tpu.memory_space<vmem>>, vector<512x256xbf16>
    %cst = arith.constant dense<0.000000e+00> : vector<8x256xf32>
    %6 = tpu.matmul %4, %5, %cst {dimension_numbers = #tpu.dot_dimension_numbers<[1], [0], [0], [1], [0, 0, 1, 1], [], []>} : vector<8x512xbf16>, vector<512x256xbf16>, vector<8x256xf32> -> vector<8x256xf32>
    %7 = arith.addf %3, %6 : vector<8x256xf32>
    %c0_6 = arith.constant 0 : index
    %c0_7 = arith.constant 0 : index
    %8 = vector.load %arg9[%c0_6, %c0_7] : memref<8x256xf32, #tpu.memory_space<vmem>>, vector<8x256xf32>
    tpu.vector_store %arg9[%c0_6, %c0_7], %7 {strides = array<i32>} : memref<8x256xf32, #tpu.memory_space<vmem>>, vector<8x256xf32>,
    %c8_i32 = arith.constant 8 : i32
    %9 = arith.cmpi eq, %arg2, %c8_i32 : i32
    %10 = arith.extui %9 : i1 to i32
    %c0_i32_8 = arith.constant 0 : i32
    %11 = arith.cmpi ne, %10, %c0_i32_8 : i32
    scf.if %11 {
      %c0_9 = arith.constant 0 : index
      %c0_10 = arith.constant 0 : index
      %12 = vector.load %arg9[%c0_9, %c0_10] : memref<8x256xf32, #tpu.memory_space<vmem>>, vector<8x256xf32>
      %c0_11 = arith.constant 0 : index
      %c0_12 = arith.constant 0 : index
      %13 = vector.load %arg5[%c0_11, %c0_12] : memref<1x256xf32, #tpu.memory_space<vmem>>, vector<1x256xf32>
      %14 = vector.broadcast %13 : vector<1x256xf32> to vector<8x256xf32>
      %15 = arith.mulf %12, %14 : vector<8x256xf32>
      %c0_13 = arith.constant 0 : index
      %c0_14 = arith.constant 0 : index
      %16 = vector.load %arg6[%c0_13, %c0_14] : memref<1x256xf32, #tpu.memory_space<vmem>>, vector<1x256xf32>
      %17 = vector.broadcast %16 : vector<1x256xf32> to vector<8x256xf32>
      %18 = arith.addf %15, %17 : vector<8x256xf32>
      %c0_15 = arith.constant 0 : index
      %c0_16 = arith.constant 0 : index
      %19 = vector.load %arg7[%c0_15, %c0_16] : memref<8x256xbf16, #tpu.memory_space<vmem>>, vector<8x256xbf16>
      %20 = arith.extf %19 : vector<8x256xbf16> to vector<8x256xf32>
      %21 = arith.addf %18, %20 : vector<8x256xf32>
      %cst_17 = arith.constant 0.000000e+00 : f32
      %22 = vector.broadcast %cst_17 : f32 to vector<8x256xf32>
      %23 = arith.maximumf %21, %22 : vector<8x256xf32>
      %24 = arith.truncf %23 : vector<8x256xf32> to vector<8x256xbf16>
      %c0_18 = arith.constant 0 : index
      %c0_19 = arith.constant 0 : index
      %25 = vector.load %arg8[%c0_18, %c0_19] : memref<8x256xbf16, #tpu.memory_space<vmem>>, vector<8x256xbf16>
      tpu.vector_store %arg8[%c0_18, %c0_19], %24 {strides = array<i32>} : memref<8x256xbf16, #tpu.memory_space<vmem>>, vector<8x256xbf16>,
    } else {
    }
    return
  }
  func.func @transform_0(%arg0: i32, %arg1: i32, %arg2: i32) -> (i32, i32) {
    %c0_i32 = arith.constant 0 : i32
    return %arg0, %arg2 : i32, i32
  }
  func.func @transform_1(%arg0: i32, %arg1: i32, %arg2: i32) -> (i32, i32) {
    %c0_i32 = arith.constant 0 : i32
    return %arg2, %arg1 : i32, i32
  }
  func.func @transform_2(%arg0: i32, %arg1: i32, %arg2: i32) -> (i32, i32) {
    %c0_i32 = arith.constant 0 : i32
    %c0_i32_0 = arith.constant 0 : i32
    return %c0_i32, %arg1 : i32, i32
  }
  func.func @transform_3(%arg0: i32, %arg1: i32, %arg2: i32) -> (i32, i32) {
    %c0_i32 = arith.constant 0 : i32
    %c0_i32_0 = arith.constant 0 : i32
    return %c0_i32, %arg1 : i32, i32
  }
  func.func @transform_4(%arg0: i32, %arg1: i32, %arg2: i32) -> (i32, i32) {
    %c0_i32 = arith.constant 0 : i32
    return %arg0, %arg1 : i32, i32
  }
  func.func @transform_5(%arg0: i32, %arg1: i32, %arg2: i32) -> (i32, i32) {
    %c0_i32 = arith.constant 0 : i32
    return %arg0, %arg1 : i32, i32
  }
}

module attributes {stable_mosaic.version = 11 : i64} {
  func.func @_mm_kernel(%arg0: i32, %arg1: i32, %arg2: i32, %arg3: memref<8x512xbf16, #tpu.memory_space<vmem>>, %arg4: memref<512x256xbf16, #tpu.memory_space<vmem>>, %arg5: memref<1x256xf32, #tpu.memory_space<vmem>>, %arg6: memref<1x256xf32, #tpu.memory_space<vmem>>, %arg7: memref<8x256xbf16, #tpu.memory_space<vmem>>, %arg8: memref<8x256xf32, #tpu.memory_space<vmem>>) attributes {dimension_semantics = [#tpu.dimension_semantics<parallel>, #tpu.dimension_semantics<parallel>, #tpu.dimension_semantics<arbitrary>], iteration_bounds = array<i64: 1, 2, 9>, scalar_prefetch = 0 : i64, scratch_operands = 1 : i64, tpu.core_type = #tpu.core_type<tc>, window_params = [{transform_indices = @transform_0, window_bounds = array<i64: 8, 512>}, {transform_indices = @transform_1, window_bounds = array<i64: 512, 256>}, {transform_indices = @transform_2, window_bounds = array<i64: 1, 256>}, {transform_indices = @transform_3, window_bounds = array<i64: 1, 256>}, {transform_indices = @transform_4, window_bounds = array<i64: 8, 256>}]} {
    %c0_i32 = arith.constant 0 : i32
    %0 = arith.cmpi eq, %arg2, %c0_i32 : i32
    %1 = arith.extui %0 : i1 to i32
    %c0_i32_0 = arith.constant 0 : i32
    %2 = arith.cmpi ne, %1, %c0_i32_0 : i32
    scf.if %2 {
      %cst_9 = arith.constant 0.000000e+00 : f32
      %12 = vector.broadcast %cst_9 : f32 to vector<8x256xf32>
      %c0_10 = arith.constant 0 : index
      %c0_11 = arith.constant 0 : index
      %13 = vector.load %arg8[%c0_10, %c0_11] : memref<8x256xf32, #tpu.memory_space<vmem>>, vector<8x256xf32>
      tpu.vector_store %arg8[%c0_10, %c0_11], %12 {strides = array<i32>} : memref<8x256xf32, #tpu.memory_space<vmem>>, vector<8x256xf32>,
    } else {
    }
    %c0 = arith.constant 0 : index
    %c0_1 = arith.constant 0 : index
    %3 = vector.load %arg8[%c0, %c0_1] : memref<8x256xf32, #tpu.memory_space<vmem>>, vector<8x256xf32>
    %c0_2 = arith.constant 0 : index
    %c0_3 = arith.constant 0 : index
    %4 = vector.load %arg3[%c0_2, %c0_3] : memref<8x512xbf16, #tpu.memory_space<vmem>>, vector<8x512xbf16>
    %c0_4 = arith.constant 0 : index
    %c0_5 = arith.constant 0 : index
    %5 = vector.load %arg4[%c0_4, %c0_5] : memref<512x256xbf16, #tpu.memory_space<vmem>>, vector<512x256xbf16>
    %cst = arith.constant dense<0.000000e+00> : vector<8x256xf32>
    %6 = tpu.matmul %4, %5, %cst {dimension_numbers = #tpu.dot_dimension_numbers<[1], [0], [0], [1], [0, 0, 1, 1], [], []>} : vector<8x512xbf16>, vector<512x256xbf16>, vector<8x256xf32> -> vector<8x256xf32>
    %7 = arith.addf %3, %6 : vector<8x256xf32>
    %c0_6 = arith.constant 0 : index
    %c0_7 = arith.constant 0 : index
    %8 = vector.load %arg8[%c0_6, %c0_7] : memref<8x256xf32, #tpu.memory_space<vmem>>, vector<8x256xf32>
    tpu.vector_store %arg8[%c0_6, %c0_7], %7 {strides = array<i32>} : memref<8x256xf32, #tpu.memory_space<vmem>>, vector<8x256xf32>,
    %c8_i32 = arith.constant 8 : i32
    %9 = arith.cmpi eq, %arg2, %c8_i32 : i32
    %10 = arith.extui %9 : i1 to i32
    %c0_i32_8 = arith.constant 0 : i32
    %11 = arith.cmpi ne, %10, %c0_i32_8 : i32
    scf.if %11 {
      %c0_9 = arith.constant 0 : index
      %c0_10 = arith.constant 0 : index
      %12 = vector.load %arg8[%c0_9, %c0_10] : memref<8x256xf32, #tpu.memory_space<vmem>>, vector<8x256xf32>
      %c0_11 = arith.constant 0 : index
      %c0_12 = arith.constant 0 : index
      %13 = vector.load %arg5[%c0_11, %c0_12] : memref<1x256xf32, #tpu.memory_space<vmem>>, vector<1x256xf32>
      %14 = vector.broadcast %13 : vector<1x256xf32> to vector<8x256xf32>
      %15 = arith.mulf %12, %14 : vector<8x256xf32>
      %c0_13 = arith.constant 0 : index
      %c0_14 = arith.constant 0 : index
      %16 = vector.load %arg6[%c0_13, %c0_14] : memref<1x256xf32, #tpu.memory_space<vmem>>, vector<1x256xf32>
      %17 = vector.broadcast %16 : vector<1x256xf32> to vector<8x256xf32>
      %18 = arith.addf %15, %17 : vector<8x256xf32>
      %cst_15 = arith.constant 0.000000e+00 : f32
      %19 = vector.broadcast %cst_15 : f32 to vector<8x256xf32>
      %20 = arith.maximumf %18, %19 : vector<8x256xf32>
      %21 = arith.truncf %20 : vector<8x256xf32> to vector<8x256xbf16>
      %c0_16 = arith.constant 0 : index
      %c0_17 = arith.constant 0 : index
      %22 = vector.load %arg7[%c0_16, %c0_17] : memref<8x256xbf16, #tpu.memory_space<vmem>>, vector<8x256xbf16>
      tpu.vector_store %arg7[%c0_16, %c0_17], %21 {strides = array<i32>} : memref<8x256xbf16, #tpu.memory_space<vmem>>, vector<8x256xbf16>,
    } else {
    }
    return
  }
  func.func @transform_0(%arg0: i32, %arg1: i32, %arg2: i32) -> (i32, i32) {
    %c0_i32 = arith.constant 0 : i32
    return %arg0, %arg2 : i32, i32
  }
  func.func @transform_1(%arg0: i32, %arg1: i32, %arg2: i32) -> (i32, i32) {
    %c0_i32 = arith.constant 0 : i32
    return %arg2, %arg1 : i32, i32
  }
  func.func @transform_2(%arg0: i32, %arg1: i32, %arg2: i32) -> (i32, i32) {
    %c0_i32 = arith.constant 0 : i32
    %c0_i32_0 = arith.constant 0 : i32
    return %c0_i32, %arg1 : i32, i32
  }
  func.func @transform_3(%arg0: i32, %arg1: i32, %arg2: i32) -> (i32, i32) {
    %c0_i32 = arith.constant 0 : i32
    %c0_i32_0 = arith.constant 0 : i32
    return %c0_i32, %arg1 : i32, i32
  }
  func.func @transform_4(%arg0: i32, %arg1: i32, %arg2: i32) -> (i32, i32) {
    %c0_i32 = arith.constant 0 : i32
    return %arg0, %arg1 : i32, i32
  }
}

module attributes {stable_mosaic.version = 11 : i64} {
  func.func @_avgpool_kernel(%arg0: i32, %arg1: memref<1x1x512xbf16, #tpu.memory_space<vmem>>, %arg2: memref<1x1x512xf32, #tpu.memory_space<vmem>>) attributes {dimension_semantics = [#tpu.dimension_semantics<parallel>], iteration_bounds = array<i64: 2>, scalar_prefetch = 0 : i64, scratch_operands = 0 : i64, tpu.core_type = #tpu.core_type<tc>, window_params = [{transform_indices = @transform_0, window_bounds = array<i64: 1, 1, 512>}, {transform_indices = @transform_1, window_bounds = array<i64: 1, 1, 512>}]} {
    %c0 = arith.constant 0 : index
    %c0_0 = arith.constant 0 : index
    %c0_1 = arith.constant 0 : index
    %0 = vector.load %arg1[%c0, %c0_0, %c0_1] : memref<1x1x512xbf16, #tpu.memory_space<vmem>>, vector<1x1x512xbf16>
    %1 = arith.extf %0 : vector<1x1x512xbf16> to vector<1x1x512xf32>
    %cst = arith.constant dense<0.000000e+00> : vector<1x512xf32>
    %2 = vector.multi_reduction <add>, %1, %cst [1] : vector<1x1x512xf32> to vector<1x512xf32>
    %3 = vector.shape_cast %2 : vector<1x512xf32> to vector<1x1x512xf32>
    %cst_2 = arith.constant 1.000000e+00 : f32
    %4 = vector.broadcast %cst_2 : f32 to vector<1x1x512xf32>
    %5 = arith.divf %3, %4 : vector<1x1x512xf32>
    %c0_3 = arith.constant 0 : index
    %c0_4 = arith.constant 0 : index
    %c0_5 = arith.constant 0 : index
    %6 = vector.load %arg2[%c0_3, %c0_4, %c0_5] : memref<1x1x512xf32, #tpu.memory_space<vmem>>, vector<1x1x512xf32>
    tpu.vector_store %arg2[%c0_3, %c0_4, %c0_5], %5 {strides = array<i32>} : memref<1x1x512xf32, #tpu.memory_space<vmem>>, vector<1x1x512xf32>,
    return
  }
  func.func @transform_0(%arg0: i32) -> (i32, i32, i32) {
    %c0_i32 = arith.constant 0 : i32
    %c0_i32_0 = arith.constant 0 : i32
    %c0_i32_1 = arith.constant 0 : i32
    return %arg0, %c0_i32, %c0_i32_0 : i32, i32, i32
  }
  func.func @transform_1(%arg0: i32) -> (i32, i32, i32) {
    %c0_i32 = arith.constant 0 : i32
    %c0_i32_0 = arith.constant 0 : i32
    %c0_i32_1 = arith.constant 0 : i32
    return %arg0, %c0_i32, %c0_i32_0 : i32, i32, i32
  }
}

module attributes {stable_mosaic.version = 11 : i64} {
  func.func @_mm_kernel(%arg0: i32, %arg1: i32, %arg2: i32, %arg3: memref<8x512xbf16, #tpu.memory_space<vmem>>, %arg4: memref<512x128xbf16, #tpu.memory_space<vmem>>, %arg5: memref<1x128xf32, #tpu.memory_space<vmem>>, %arg6: memref<1x128xf32, #tpu.memory_space<vmem>>, %arg7: memref<8x128xf32, #tpu.memory_space<vmem>>, %arg8: memref<8x128xf32, #tpu.memory_space<vmem>>) attributes {dimension_semantics = [#tpu.dimension_semantics<parallel>, #tpu.dimension_semantics<parallel>, #tpu.dimension_semantics<arbitrary>], iteration_bounds = array<i64: 1, 1, 1>, scalar_prefetch = 0 : i64, scratch_operands = 1 : i64, tpu.core_type = #tpu.core_type<tc>, window_params = [{transform_indices = @transform_0, window_bounds = array<i64: 8, 512>}, {transform_indices = @transform_1, window_bounds = array<i64: 512, 128>}, {transform_indices = @transform_2, window_bounds = array<i64: 1, 128>}, {transform_indices = @transform_3, window_bounds = array<i64: 1, 128>}, {transform_indices = @transform_4, window_bounds = array<i64: 8, 128>}]} {
    %c0_i32 = arith.constant 0 : i32
    %0 = arith.cmpi eq, %arg2, %c0_i32 : i32
    %1 = arith.extui %0 : i1 to i32
    %c0_i32_0 = arith.constant 0 : i32
    %2 = arith.cmpi ne, %1, %c0_i32_0 : i32
    scf.if %2 {
      %cst_10 = arith.constant 0.000000e+00 : f32
      %12 = vector.broadcast %cst_10 : f32 to vector<8x128xf32>
      %c0_11 = arith.constant 0 : index
      %c0_12 = arith.constant 0 : index
      %13 = vector.load %arg8[%c0_11, %c0_12] : memref<8x128xf32, #tpu.memory_space<vmem>>, vector<8x128xf32>
      tpu.vector_store %arg8[%c0_11, %c0_12], %12 {strides = array<i32>} : memref<8x128xf32, #tpu.memory_space<vmem>>, vector<8x128xf32>,
    } else {
    }
    %c0 = arith.constant 0 : index
    %c0_1 = arith.constant 0 : index
    %3 = vector.load %arg8[%c0, %c0_1] : memref<8x128xf32, #tpu.memory_space<vmem>>, vector<8x128xf32>
    %c0_2 = arith.constant 0 : index
    %c0_3 = arith.constant 0 : index
    %4 = vector.load %arg3[%c0_2, %c0_3] : memref<8x512xbf16, #tpu.memory_space<vmem>>, vector<8x512xbf16>
    %c0_4 = arith.constant 0 : index
    %c0_5 = arith.constant 0 : index
    %5 = vector.load %arg4[%c0_4, %c0_5] : memref<512x128xbf16, #tpu.memory_space<vmem>>, vector<512x128xbf16>
    %cst = arith.constant dense<0.000000e+00> : vector<8x128xf32>
    %6 = tpu.matmul %4, %5, %cst {dimension_numbers = #tpu.dot_dimension_numbers<[1], [0], [0], [1], [0, 0, 1, 1], [], []>} : vector<8x512xbf16>, vector<512x128xbf16>, vector<8x128xf32> -> vector<8x128xf32>
    %7 = arith.addf %3, %6 : vector<8x128xf32>
    %c0_6 = arith.constant 0 : index
    %c0_7 = arith.constant 0 : index
    %8 = vector.load %arg8[%c0_6, %c0_7] : memref<8x128xf32, #tpu.memory_space<vmem>>, vector<8x128xf32>
    tpu.vector_store %arg8[%c0_6, %c0_7], %7 {strides = array<i32>} : memref<8x128xf32, #tpu.memory_space<vmem>>, vector<8x128xf32>,
    %c0_i32_8 = arith.constant 0 : i32
    %9 = arith.cmpi eq, %arg2, %c0_i32_8 : i32
    %10 = arith.extui %9 : i1 to i32
    %c0_i32_9 = arith.constant 0 : i32
    %11 = arith.cmpi ne, %10, %c0_i32_9 : i32
    scf.if %11 {
      %c0_10 = arith.constant 0 : index
      %c0_11 = arith.constant 0 : index
      %12 = vector.load %arg8[%c0_10, %c0_11] : memref<8x128xf32, #tpu.memory_space<vmem>>, vector<8x128xf32>
      %c0_12 = arith.constant 0 : index
      %c0_13 = arith.constant 0 : index
      %13 = vector.load %arg5[%c0_12, %c0_13] : memref<1x128xf32, #tpu.memory_space<vmem>>, vector<1x128xf32>
      %14 = vector.broadcast %13 : vector<1x128xf32> to vector<8x128xf32>
      %15 = arith.mulf %12, %14 : vector<8x128xf32>
      %c0_14 = arith.constant 0 : index
      %c0_15 = arith.constant 0 : index
      %16 = vector.load %arg6[%c0_14, %c0_15] : memref<1x128xf32, #tpu.memory_space<vmem>>, vector<1x128xf32>
      %17 = vector.broadcast %16 : vector<1x128xf32> to vector<8x128xf32>
      %18 = arith.addf %15, %17 : vector<8x128xf32>
      %c0_16 = arith.constant 0 : index
      %c0_17 = arith.constant 0 : index
      %19 = vector.load %arg7[%c0_16, %c0_17] : memref<8x128xf32, #tpu.memory_space<vmem>>, vector<8x128xf32>
      tpu.vector_store %arg7[%c0_16, %c0_17], %18 {strides = array<i32>} : memref<8x128xf32, #tpu.memory_space<vmem>>, vector<8x128xf32>,
    } else {
    }
    return
  }
  func.func @transform_0(%arg0: i32, %arg1: i32, %arg2: i32) -> (i32, i32) {
    %c0_i32 = arith.constant 0 : i32
    return %arg0, %arg2 : i32, i32
  }
  func.func @transform_1(%arg0: i32, %arg1: i32, %arg2: i32) -> (i32, i32) {
    %c0_i32 = arith.constant 0 : i32
    return %arg2, %arg1 : i32, i32
  }
  func.func @transform_2(%arg0: i32, %arg1: i32, %arg2: i32) -> (i32, i32) {
    %c0_i32 = arith.constant 0 : i32
    %c0_i32_0 = arith.constant 0 : i32
    return %c0_i32, %arg1 : i32, i32
  }
  func.func @transform_3(%arg0: i32, %arg1: i32, %arg2: i32) -> (i32, i32) {
    %c0_i32 = arith.constant 0 : i32
    %c0_i32_0 = arith.constant 0 : i32
    return %c0_i32, %arg1 : i32, i32
  }
  func.func @transform_4(%arg0: i32, %arg1: i32, %arg2: i32) -> (i32, i32) {
    %c0_i32 = arith.constant 0 : i32
    return %arg0, %arg1 : i32, i32
  }
}

</mosaic_0001>

<bundles_post_ra>
// kernel: resnet_model_mod_forward.39
= control target key start
LH: loop header
LB: loop body
LE: loop exit
PB: predicated region body
PF: predicated region fallthrough
CT: control target
= control target key end

     0   :  { %s992_s1 = inlined_call_operand.vmem [shape: bf16[256,128], index: 1, kind: input, shape index: {}]   ;;  %s993_s0 = inlined_call_operand.vmem [shape: bf16[128,256], index: 0, kind: input, shape index: {}]   ;;  %s994_s2 = inlined_call_operand.vmem [shape: f32[1,128], index: 2, kind: input, shape index: {}]   ;;  %s995_s3 = inlined_call_operand.vmem [shape: f32[1,128], index: 3, kind: input, shape index: {}]   ;;  %s996_s4 = inlined_call_operand.vmem [shape: bf16[128,128], index: 4, kind: output, shape index: {}]  }
   0x1   :  { %v765_v0 = vld [vmem:[%s992_s1 + $0x40] sm:$0xff]   ;;  %v767_v2 = vld [vmem:[%s992_s1 + $0x48] sm:$0xff]   ;;  %v769_v4 = vld [vmem:[%s992_s1 + $0x50] sm:$0xff]  }
   0x2   :  { %v766_v1 = vld [vmem:[%s992_s1] sm:$0xff]   ;;  %685 = vmatprep.subr.bf16.mxu0 %v765_v0  ;;  %749 = vmatprep.subr.bf16.mxu1 %v765_v0  ;;  %v768_v3 = vld [vmem:[%s992_s1 + $0x8] sm:$0xff]   ;;  %v770_v5 = vld [vmem:[%s992_s1 + $0x10] sm:$0xff]  }
   0x3   :  { %686 = vmatpush3.bf16.msra.mxu0 %v766_v1  ;;  %757 = vmatpush3.bf16.msra.mxu1 %v766_v1  ;;  %v771_v6 = vld [vmem:[%s992_s1 + $0x58] sm:$0xff]   ;;  %v773_v8 = vld [vmem:[%s992_s1 + $0x60] sm:$0xff]   ;;  %v775_v10 = vld [vmem:[%s992_s1 + $0x68] sm:$0xff]  }
   0x4   :  { %687 = vmatprep.subr.bf16.mxu0 %v767_v2  ;;  %750 = vmatprep.subr.bf16.mxu1 %v767_v2  ;;  %v772_v7 = vld [vmem:[%s992_s1 + $0x18] sm:$0xff]   ;;  %v774_v9 = vld [vmem:[%s992_s1 + $0x20] sm:$0xff]   ;;  %v776_v13 = vld [vmem:[%s992_s1 + $0x28] sm:$0xff]  }
   0x5   :  { %v783_v11 = vld [vmem:[%s993_s0 + $0x4] ss:$8 sps:$4 sm:$0xff]   ;;  %v777_v14 = vld [vmem:[%s992_s1 + $0x70] sm:$0xff]   ;;  %v779_v16 = vld [vmem:[%s992_s1 + $0x78] sm:$0xff]  }
   0x6   :  { %v786_v12 = vld [vmem:[%s993_s0 + $0x44] ss:$8 sps:$4 sm:$0xff]   ;;  %310 = vmatprep.mubr.bf16.mxu0 %v783_v11  ;;  %v778_v15 = vld [vmem:[%s992_s1 + $0x30] sm:$0xff]   ;;  %v780_v17 = vld [vmem:[%s992_s1 + $0x38] sm:$0xff]  }
   0x7   :  { %688 = vmatpush3.bf16.msra.mxu0 %v768_v3  ;;  %758 = vmatpush3.bf16.msra.mxu1 %v768_v3  ;;  %v781_v18 = vld [vmem:[%s993_s0] ss:$8 sps:$4 sm:$0xff]   ;;  %v787_v20 = vld [vmem:[%s993_s0 + $0x14] ss:$8 sps:$4 sm:$0xff]   ;;  %v791_v22 = vld [vmem:[%s993_s0 + $0x10] ss:$8 sps:$4 sm:$0xff]  }
   0x8   :  { %689 = vmatprep.subr.bf16.mxu0 %v769_v4  ;;  %751 = vmatprep.subr.bf16.mxu1 %v769_v4  ;;  %v784_v19 = vld [vmem:[%s993_s0 + $0x40] ss:$8 sps:$4 sm:$0xff]   ;;  %v789_v21 = vld [vmem:[%s993_s0 + $0x54] ss:$8 sps:$4 sm:$0xff]   ;;  %v792_v23 = vld [vmem:[%s993_s0 + $0x50] ss:$8 sps:$4 sm:$0xff]  }
   0x9   :  { %342 = vmatprep.mubr.bf16.mxu1 %v786_v12  ;;  %v793_v24 = vld [vmem:[%s993_s0 + $0x24] ss:$8 sps:$4 sm:$0xff]   ;;  %v797_v26 = vld [vmem:[%s993_s0 + $0x20] ss:$8 sps:$4 sm:$0xff]   ;;  %v799_v28 = vld [vmem:[%s993_s0 + $0x34] ss:$8 sps:$4 sm:$0xff]  }
   0xa   :  { %v795_v25 = vld [vmem:[%s993_s0 + $0x64] ss:$8 sps:$4 sm:$0xff]   ;;  %v798_v27 = vld [vmem:[%s993_s0 + $0x60] ss:$8 sps:$4 sm:$0xff]   ;;  %v801_v29 = vld [vmem:[%s993_s0 + $0x74] ss:$8 sps:$4 sm:$0xff]  }
   0xb   :  { %690 = vmatpush3.bf16.msra.mxu0 %v770_v5  ;;  %759 = vmatpush3.bf16.msra.mxu1 %v770_v5  ;;  %v803_v30 = vld [vmem:[%s993_s0 + $0x30] ss:$8 sps:$4 sm:$0xff]   ;;  %v929_v35 = vld [vmem:[%s994_s2] ss:$0 sm:$0xff] }
   0xc   :  { %691 = vmatprep.subr.bf16.mxu0 %v771_v6  ;;  %752 = vmatprep.subr.bf16.mxu1 %v771_v6  ;;  %v804_v31 = vld [vmem:[%s993_s0 + $0x70] ss:$8 sps:$4 sm:$0xff]   ;;  %v934_v41 = vld [vmem:[%s995_s3] ss:$0 sm:$0xff] }
   0xf   :  { %692 = vmatpush3.bf16.msra.mxu0 %v772_v7  ;;  %760 = vmatpush3.bf16.msra.mxu1 %v772_v7 }
  0x10   :  { %693 = vmatprep.subr.bf16.mxu0 %v773_v8  ;;  %753 = vmatprep.subr.bf16.mxu1 %v773_v8 }
  0x13   :  { %694 = vmatpush3.bf16.msra.mxu0 %v774_v9  ;;  %761 = vmatpush3.bf16.msra.mxu1 %v774_v9 }
  0x14   :  { %695 = vmatprep.subr.bf16.mxu0 %v775_v10  ;;  %754 = vmatprep.subr.bf16.mxu1 %v775_v10 }
  0x17   :  { %696 = vmatpush3.bf16.msra.mxu0 %v776_v13  ;;  %762 = vmatpush3.bf16.msra.mxu1 %v776_v13 }
  0x18   :  { %697 = vmatprep.subr.bf16.mxu0 %v777_v14  ;;  %755 = vmatprep.subr.bf16.mxu1 %v777_v14 }
  0x1b   :  { %698 = vmatpush3.bf16.msra.mxu0 %v778_v15  ;;  %763 = vmatpush3.bf16.msra.mxu1 %v778_v15 }
  0x1c   :  { %699 = vmatprep.subr.bf16.mxu0 %v779_v16  ;;  %756 = vmatprep.subr.bf16.mxu1 %v779_v16 }
  0x1f   :  { %700 = vmatpush3.bf16.msra.mxu0 %v780_v17  ;;  %764 = vmatpush3.bf16.msra.mxu1 %v780_v17 }
  0x22   :  { %311 = vmatmul.mubr.bf16.vlgmr.msra.gmra.mrb[0].mxu0 %v781_v18  ;;  %343 = vmatmul.mubr.bf16.vlgmr.msra.gmra.mrb[0].mxu1 %v784_v19 }
  0x23   :  { %318 = vmatprep.mubr.bf16.mxu0 %v787_v20  ;;  %350 = vmatprep.mubr.bf16.mxu1 %v789_v21 }
  0x2a   :  { %319 = vmatmul.mubr.bf16.gmra.mrb[4].mxu0 %v791_v22  ;;  %351 = vmatmul.mubr.bf16.gmra.mrb[4].mxu1 %v792_v23 }
  0x2b   :  { %326 = vmatprep.mubr.bf16.mxu0 %v793_v24  ;;  %358 = vmatprep.mubr.bf16.mxu1 %v795_v25 }
  0x32   :  { %327 = vmatmul.mubr.bf16.gmra.mrb[8].mxu0 %v797_v26  ;;  %359 = vmatmul.mubr.bf16.gmra.mrb[8].mxu1 %v798_v27 }
  0x33   :  { %334 = vmatprep.mubr.bf16.mxu0 %v799_v28  ;;  %366 = vmatprep.mubr.bf16.mxu1 %v801_v29 }
  0x3a   :  { %335 = vmatmul.mubr.bf16.gmra.mrb[12].mxu0 %v803_v30  ;;  %367 = vmatmul.mubr.bf16.gmra.mrb[12].mxu1 %v804_v31 }
  0xf5   :  { %v701_v32 = vpop.f32.mrb[0].mxu0  ;;  %v725_v33 = vpop.f32.mrb[0].mxu1 }
  0xf6   :  { %v702_v34 = vpop.f32.mrb[1].mxu0  ;;  %v726_v36 = vpop.f32.mrb[1].mxu1 }
  0xf7   :  { %v703_v37 = vadd.f32 %v702_v34, %v701_v32  ;;  %v727_v38 = vadd.f32 %v726_v36, %v725_v33  ;;  %v704_v39 = vpop.f32.mrb[2].mxu0  ;;  %v728_v40 = vpop.f32.mrb[2].mxu1 }
  0xf8   :  { %v705_v42 = vpop.f32.mrb[3].mxu0  ;;  %v729_v43 = vpop.f32.mrb[3].mxu1 }
  0xf9   :  { %v433_v44 = vmul.f32 %v703_v37, %v929_v35  ;;  %v441_v45 = vmul.f32 %v727_v38, %v929_v35  ;;  %v706_v46 = vadd.f32 %v705_v42, %v704_v39  ;;  %v730_v47 = vadd.f32 %v729_v43, %v728_v40 }
  0xfb   :  { %v456_v48 = vadd.f32 %v934_v41, %v433_v44  ;;  %v464_v49 = vadd.f32 %v934_v41, %v441_v45  ;;  %v434_v50 = vmul.f32 %v706_v46, %v929_v35  ;;  %v442_v51 = vmul.f32 %v730_v47, %v929_v35 }
  0xfd   :  { %v457_v52 = vadd.f32 %v934_v41, %v434_v50  ;;  %v465_v53 = vadd.f32 %v934_v41, %v442_v51  ;;  %v707_v54 = vpop.f32.mrb[4].mxu0  ;;  %v731_v55 = vpop.f32.mrb[4].mxu1  ;;  %v472_v56 = vmax.f32 %v456_v48, 0.0  ;;  %v480_v57 = vmax.f32 %v464_v49, 0.0 }
  0xfe   :  { %v708_v58 = vpop.f32.mrb[5].mxu0  ;;  %v732_v59 = vpop.f32.mrb[5].mxu1 }
  0xff   :  { %v473_v60 = vmax.f32 %v457_v52, 0.0  ;;  %v481_v61 = vmax.f32 %v465_v53, 0.0  ;;  %v709_v62 = vadd.f32 %v708_v58, %v707_v54  ;;  %v733_v63 = vadd.f32 %v732_v59, %v731_v55  ;;  %v710_v0 = vpop.f32.mrb[6].mxu0  ;;  %v734_v1 = vpop.f32.mrb[6].mxu1 }
 0x100   :  { %v711_v2 = vpop.f32.mrb[7].mxu0  ;;  %v735_v3 = vpop.f32.mrb[7].mxu1 }
 0x101   :  { %v641_v4 = vpack.c.bf16 %v473_v60, %v472_v56  ;;  %v661_v5 = vpack.c.bf16 %v481_v61, %v480_v57  ;;  %v435_v6 = vmul.f32 %v709_v62, %v929_v35  ;;  %v443_v7 = vmul.f32 %v733_v63, %v929_v35 }
 0x102   :  { %v712_v8 = vadd.f32 %v711_v2, %v710_v0  ;;  %v736_v9 = vadd.f32 %v735_v3, %v734_v1 }
 0x103   :  { %642 = vst [vmem:[%s996_s4] sm:$0xff] %v641_v4   ;;  %681 = vst [vmem:[%s996_s4 + $0x20] sm:$0xff] %v661_v5   ;;  %v458_v10 = vadd.f32 %v934_v41, %v435_v6  ;;  %v466_v11 = vadd.f32 %v934_v41, %v443_v7 }
 0x104   :  { %v436_v12 = vmul.f32 %v712_v8, %v929_v35  ;;  %v444_v13 = vmul.f32 %v736_v9, %v929_v35 }
 0x105   :  { %v713_v14 = vpop.f32.mrb[8].mxu0  ;;  %v737_v15 = vpop.f32.mrb[8].mxu1  ;;  %v474_v24 = vmax.f32 %v458_v10, 0.0  ;;  %v482_v25 = vmax.f32 %v466_v11, 0.0 }
 0x106   :  { %v459_v16 = vadd.f32 %v934_v41, %v436_v12  ;;  %v467_v17 = vadd.f32 %v934_v41, %v444_v13  ;;  %v714_v18 = vpop.f32.mrb[9].mxu0  ;;  %v738_v19 = vpop.f32.mrb[9].mxu1 }
 0x107   :  { %v715_v20 = vadd.f32 %v714_v18, %v713_v14  ;;  %v739_v21 = vadd.f32 %v738_v19, %v737_v15  ;;  %v716_v22 = vpop.f32.mrb[10].mxu0  ;;  %v740_v23 = vpop.f32.mrb[10].mxu1 }
 0x108   :  { %v475_v26 = vmax.f32 %v459_v16, 0.0  ;;  %v483_v27 = vmax.f32 %v467_v17, 0.0  ;;  %v717_v28 = vpop.f32.mrb[11].mxu0  ;;  %v741_v29 = vpop.f32.mrb[11].mxu1 }
 0x109   :  { %v437_v30 = vmul.f32 %v715_v20, %v929_v35  ;;  %v445_v31 = vmul.f32 %v739_v21, %v929_v35  ;;  %v718_v32 = vadd.f32 %v717_v28, %v716_v22  ;;  %v742_v33 = vadd.f32 %v741_v29, %v740_v23 }
 0x10a   :  { %v646_v34 = vpack.c.bf16 %v475_v26, %v474_v24  ;;  %v666_v36 = vpack.c.bf16 %v483_v27, %v482_v25 }
 0x10b   :  { %v460_v37 = vadd.f32 %v934_v41, %v437_v30  ;;  %v468_v38 = vadd.f32 %v934_v41, %v445_v31  ;;  %v438_v39 = vmul.f32 %v718_v32, %v929_v35  ;;  %v446_v40 = vmul.f32 %v742_v33, %v929_v35 }
 0x10c   :  { %678 = vst [vmem:[%s996_s4 + $0x8] sm:$0xff] %v646_v34   ;;  %682 = vst [vmem:[%s996_s4 + $0x28] sm:$0xff] %v666_v36  }
 0x10d   :  { %v461_v42 = vadd.f32 %v934_v41, %v438_v39  ;;  %v469_v43 = vadd.f32 %v934_v41, %v446_v40  ;;  %v719_v44 = vpop.f32.mrb[12].mxu0  ;;  %v743_v45 = vpop.f32.mrb[12].mxu1  ;;  %v476_v46 = vmax.f32 %v460_v37, 0.0  ;;  %v484_v47 = vmax.f32 %v468_v38, 0.0 }
 0x10e   :  { %v720_v48 = vpop.f32.mrb[13].mxu0  ;;  %v744_v49 = vpop.f32.mrb[13].mxu1 }
 0x10f   :  { %v477_v50 = vmax.f32 %v461_v42, 0.0  ;;  %v485_v51 = vmax.f32 %v469_v43, 0.0  ;;  %v721_v52 = vadd.f32 %v720_v48, %v719_v44  ;;  %v745_v53 = vadd.f32 %v744_v49, %v743_v45  ;;  %v722_v54 = vpop.f32.mrb[14].mxu0  ;;  %v746_v55 = vpop.f32.mrb[14].mxu1 }
 0x110   :  { %v723_v56 = vpop.f32.mrb[15].mxu0  ;;  %v747_v57 = vpop.f32.mrb[15].mxu1 }
 0x111   :  { %v651_v58 = vpack.c.bf16 %v477_v50, %v476_v46  ;;  %v671_v59 = vpack.c.bf16 %v485_v51, %v484_v47  ;;  %v439_v60 = vmul.f32 %v721_v52, %v929_v35  ;;  %v447_v61 = vmul.f32 %v745_v53, %v929_v35 }
 0x112   :  { %v724_v62 = vadd.f32 %v723_v56, %v722_v54  ;;  %v748_v63 = vadd.f32 %v747_v57, %v746_v55 }
 0x113   :  { %679 = vst [vmem:[%s996_s4 + $0x10] sm:$0xff] %v651_v58   ;;  %683 = vst [vmem:[%s996_s4 + $0x30] sm:$0xff] %v671_v59   ;;  %v462_v0 = vadd.f32 %v934_v41, %v439_v60  ;;  %v470_v1 = vadd.f32 %v934_v41, %v447_v61 }
 0x114   :  { %v440_v2 = vmul.f32 %v724_v62, %v929_v35  ;;  %v448_v3 = vmul.f32 %v748_v63, %v929_v35 }
 0x115   :  { %v478_v6 = vmax.f32 %v462_v0, 0.0  ;;  %v486_v7 = vmax.f32 %v470_v1, 0.0 }
 0x116   :  { %v463_v4 = vadd.f32 %v934_v41, %v440_v2  ;;  %v471_v5 = vadd.f32 %v934_v41, %v448_v3 }
 0x118   :  { %v479_v8 = vmax.f32 %v463_v4, 0.0  ;;  %v487_v9 = vmax.f32 %v471_v5, 0.0 }
 0x11a   :  { %v656_v10 = vpack.c.bf16 %v479_v8, %v478_v6  ;;  %v676_v11 = vpack.c.bf16 %v487_v9, %v486_v7 }
 0x11c   :  { %680 = vst [vmem:[%s996_s4 + $0x18] sm:$0xff] %v656_v10   ;;  %684 = vst [vmem:[%s996_s4 + $0x38] sm:$0xff] %v676_v11  }

// kernel: resnet_model_mod_forward.40
= control target key start
LH: loop header
LB: loop body
LE: loop exit
PB: predicated region body
PF: predicated region fallthrough
CT: control target
= control target key end

     0   :  { %vm136_vm0 = vcmask 523264   ;;  %vm138_vm1 = vcmask 516096   ;;  %vm586_vm2 = vcmask 1041409   ;;  %vm588_vm3 = vcmask 1042434   ;;  %s1360_s0 = inlined_call_operand.vmem [shape: bf16[32,9,64], index: 0, kind: input, shape index: {}]   ;;  %s1361_s1 = inlined_call_operand.vmem [shape: bf16[32,64], index: 1, kind: output, shape index: {}]  }
   0x1   :  { %v715_v0 = vld [vmem:[%s1360_s0] ss:$8 sps:$4 sm:$0xff]   ;;  %v720_v1 = vld [vmem:[%s1360_s0 + $0x4] sm:$0x1]  ;;  %v725_v2 = vld [vmem:[%s1360_s0 + $0xc] sm:$0x1] }
   0x2   :  { %v730_v3 = vld [vmem:[%s1360_s0 + $0x10] ss:$8 sps:$4 sm:$0xff]   ;;  %v735_v4 = vld [vmem:[%s1360_s0 + $0x14] sm:$0x1]  ;;  %v740_v5 = vld [vmem:[%s1360_s0 + $0x1c] sm:$0x1]  ;;  %v72_v6 = vunpack.c.l.bf16 %v715_v0  ;;  %v73_v7 = vunpack.c.l.bf16 %v720_v1  ;;  %v74_v8 = vunpack.c.h.bf16 %v715_v0  ;;  %v75_v9 = vunpack.c.l.bf16 %v725_v2 }
   0x3   :  { %v749_v10 = vld [vmem:[%s1360_s0 + $0x20] ss:$8 sps:$4 sm:$0xff]   ;;  %v754_v11 = vld [vmem:[%s1360_s0 + $0x24] sm:$0x1]  ;;  %v759_v12 = vld [vmem:[%s1360_s0 + $0x2c] sm:$0x1]  ;;  %v76_v13 = vunpack.c.l.bf16 %v730_v3  ;;  %v77_v14 = vunpack.c.l.bf16 %v735_v4  ;;  %v78_v15 = vunpack.c.h.bf16 %v730_v3 }
   0x4   :  { %v768_v17 = vld [vmem:[%s1360_s0 + $0x30] ss:$8 sps:$4 sm:$0xff]   ;;  %v773_v18 = vld [vmem:[%s1360_s0 + $0x34] sm:$0x1]  ;;  %v778_v19 = vld [vmem:[%s1360_s0 + $0x3c] sm:$0x1]  ;;  %v1371_v4 = vunpack.c.l.bf16 %v754_v11  ;;  %v1372_v3 = vunpack.c.h.bf16 %v749_v10 }
   0x5   :  { %v787_v24 = vld [vmem:[%s1360_s0 + $0x40] ss:$8 sps:$4 sm:$0xff]   ;;  %v792_v25 = vld [vmem:[%s1360_s0 + $0x44] sm:$0x1]  ;;  %v797_v26 = vld [vmem:[%s1360_s0 + $0x4c] sm:$0x1]  ;;  %v1374_v11 = vunpack.c.l.bf16 %v768_v17 }
   0x6   :  { %v806_v31 = vld [vmem:[%s1360_s0 + $0x50] ss:$8 sps:$4 sm:$0xff]   ;;  %v811_v32 = vld [vmem:[%s1360_s0 + $0x54] sm:$0x1]  ;;  %v816_v33 = vld [vmem:[%s1360_s0 + $0x5c] sm:$0x1] }
   0x7   :  { %v825_v38 = vld [vmem:[%s1360_s0 + $0x60] ss:$8 sps:$4 sm:$0xff]   ;;  %v830_v39 = vld [vmem:[%s1360_s0 + $0x64] sm:$0x1]  ;;  %v835_v40 = vld [vmem:[%s1360_s0 + $0x6c] sm:$0x1] }
   0x8   :  { %v844_v45 = vld [vmem:[%s1360_s0 + $0x70] ss:$8 sps:$4 sm:$0xff]   ;;  %v849_v46 = vld [vmem:[%s1360_s0 + $0x74] sm:$0x1]  ;;  %v854_v47 = vld [vmem:[%s1360_s0 + $0x7c] sm:$0x1] }
   0x9   :  { %v863_v52 = vld [vmem:[%s1360_s0 + $0x80] ss:$8 sps:$4 sm:$0xff]   ;;  %v868_v53 = vld [vmem:[%s1360_s0 + $0x84] sm:$0x1]  ;;  %v873_v54 = vld [vmem:[%s1360_s0 + $0x8c] sm:$0x1] }
   0xa   :  { %v882_v59 = vld [vmem:[%s1360_s0 + $0x90] ss:$8 sps:$4 sm:$0xff]   ;;  %v887_v60 = vld [vmem:[%s1360_s0 + $0x94] sm:$0x1]  ;;  %v892_v61 = vld [vmem:[%s1360_s0 + $0x9c] sm:$0x1] }
   0xb   :  { %v901_v56 = vld [vmem:[%s1360_s0 + $0xa0] ss:$8 sps:$4 sm:$0xff]   ;;  %v906_v55 = vld [vmem:[%s1360_s0 + $0xa4] sm:$0x1]  ;;  %v911_v62 = vld [vmem:[%s1360_s0 + $0xac] sm:$0x1] }
   0xc   :  { %v920_v50 = vld [vmem:[%s1360_s0 + $0xb0] ss:$8 sps:$4 sm:$0xff]   ;;  %v925_v49 = vld [vmem:[%s1360_s0 + $0xb4] sm:$0x1]  ;;  %v930_v63 = vld [vmem:[%s1360_s0 + $0xbc] sm:$0x1] }
   0xd   :  { %v939_v44 = vld [vmem:[%s1360_s0 + $0xc0] ss:$8 sps:$4 sm:$0xff]   ;;  %v944_v43 = vld [vmem:[%s1360_s0 + $0xc4] sm:$0x1]  ;;  %v949_v58 = vld [vmem:[%s1360_s0 + $0xcc] sm:$0x1] }
   0xe   :  { %v958_v41 = vld [vmem:[%s1360_s0 + $0xd0] ss:$8 sps:$4 sm:$0xff]   ;;  %v963_v37 = vld [vmem:[%s1360_s0 + $0xd4] sm:$0x1]  ;;  %v968_v57 = vld [vmem:[%s1360_s0 + $0xdc] sm:$0x1] }
   0xf   :  { %v977_v35 = vld [vmem:[%s1360_s0 + $0xe0] ss:$8 sps:$4 sm:$0xff]   ;;  %v982_v34 = vld [vmem:[%s1360_s0 + $0xe4] sm:$0x1]  ;;  %v987_v51 = vld [vmem:[%s1360_s0 + $0xec] sm:$0x1] }
  0x10   :  { %v996_v29 = vld [vmem:[%s1360_s0 + $0xf0] ss:$8 sps:$4 sm:$0xff]   ;;  %v1001_v28 = vld [vmem:[%s1360_s0 + $0xf4] sm:$0x1]  ;;  %v1006_v48 = vld [vmem:[%s1360_s0 + $0xfc] sm:$0x1] }
  0x11   :  { %1366 = vst [vmem:[#allocation2_spill] sm:$0xff] %v996_v29  ;;  %1367 = vst [vmem:[#allocation3_spill] sm:$0xff] %v1001_v28  ;;  %v137_v16 = vsel %vm136_vm0, %v72_v6, -inf  ;;  %v139_v36 = vsel %vm138_vm1, %v73_v7, -inf  ;;  %v147_v27 = vsel %vm136_vm0, %v74_v8, -inf  ;;  %v148_v22 = vsel %vm138_vm1, %v75_v9, -inf }
  0x12   :  { %1368 = vst [vmem:[#allocation4_spill] sm:$0xff] %v1006_v48  ;;  %v140_v23 = vmax.f32 %v137_v16, %v139_v36  ;;  %v149_v21 = vmax.f32 %v147_v27, %v148_v22  ;;  %v156_v20 = vsel %vm136_vm0, %v76_v13, -inf  ;;  %v157_v1 = vsel %vm138_vm1, %v77_v14, -inf }
  0x13   :  { %v158_v6 = vmax.f32 %v156_v20, %v157_v1  ;;  %v165_v0 = vsel %vm136_vm0, %v78_v15, -inf  ;;  %v1369_v7 = vunpack.c.l.bf16 %v740_v5  ;;  %v1370_v8 = vunpack.c.l.bf16 %v749_v10 }
  0x14   :  { %v141_v16 = vrot.slane %v140_v23, 4  ;;  %v150_v22 = vrot.slane %v149_v21, 4  ;;  %v175_v14 = vsel %vm138_vm1, %v1371_v4, -inf  ;;  %v183_v15 = vsel %vm136_vm0, %v1372_v3, -inf }
  0x15   :  { %v166_v2 = vsel %vm138_vm1, %v1369_v7, -inf  ;;  %v174_v9 = vsel %vm136_vm0, %v1370_v8, -inf  ;;  %v159_v20 = vrot.slane %v158_v6, 4  ;;  %v1373_v5 = vunpack.c.l.bf16 %v759_v12 }
  0x16   :  { %v167_v13 = vmax.f32 %v165_v0, %v166_v2  ;;  %v176_v27 = vmax.f32 %v174_v9, %v175_v14  ;;  %v142_v1 = vmax.f32 %v140_v23, %v141_v16  ;;  %v151_v7 = vmax.f32 %v149_v21, %v150_v22 }
  0x17   :  { %v184_v36 = vsel %vm138_vm1, %v1373_v5, -inf  ;;  %v160_v42 = vmax.f32 %v158_v6, %v159_v20  ;;  %v192_v2 = vsel %vm136_vm0, %v1374_v11, -inf  ;;  %v1375_v9 = vunpack.c.l.bf16 %v773_v18 }
  0x18   :  { %v168_v8 = vrot.slane %v167_v13, 4  ;;  %v185_v30 = vmax.f32 %v183_v15, %v184_v36  ;;  %v177_v0 = vrot.slane %v176_v27, 4  ;;  %v143_v4 = vrot.slane %v142_v1, 2 }
  0x19   :  { %v193_v10 = vsel %vm138_vm1, %v1375_v9, -inf  ;;  %v152_v14 = vrot.slane %v151_v7, 2  ;;  %v161_v48 = vrot.slane %v160_v42, 2  ;;  %v1376_v21 = vunpack.c.h.bf16 %v768_v17 }
  0x1a   :  { %v169_v3 = vmax.f32 %v167_v13, %v168_v8  ;;  %v186_v12 = vrot.slane %v185_v30, 4  ;;  %v178_v5 = vmax.f32 %v176_v27, %v177_v0  ;;  %v194_v23 = vmax.f32 %v192_v2, %v193_v10 }
  0x1b   :  { %v201_v6 = vsel %vm136_vm0, %v1376_v21, -inf  ;;  %v144_v16 = vmax.f32 %v142_v1, %v143_v4  ;;  %v153_v22 = vmax.f32 %v151_v7, %v152_v14  ;;  %v162_v36 = vmax.f32 %v160_v42, %v161_v48 }
  0x1c   :  { %v170_v20 = vrot.slane %v169_v3, 2  ;;  %v187_v15 = vmax.f32 %v185_v30, %v186_v12  ;;  %v179_v11 = vrot.slane %v178_v5, 2  ;;  %v195_v18 = vrot.slane %v194_v23, 4 }
  0x1d   :  { %v1377_v9 = vunpack.c.l.bf16 %v778_v19  ;;  %v145_v13 = vrot.slane %v144_v16, 1  ;;  %v154_v8 = vrot.slane %v153_v22, 1  ;;  %v163_v0 = vrot.slane %v162_v36, 1 }
  0x1e   :  { %v171_v29 = vmax.f32 %v169_v3, %v170_v20  ;;  %v188_v27 = vrot.slane %v187_v15, 2  ;;  %v180_v2 = vmax.f32 %v178_v5, %v179_v11  ;;  %v196_v17 = vmax.f32 %v194_v23, %v195_v18 }
  0x1f   :  { %v202_v28 = vsel %vm138_vm1, %v1377_v9, -inf  ;;  %v1064_v21 = vmax.f32 %v144_v16, %v145_v13  ;;  %v1066_v1 = vmax.f32 %v153_v22, %v154_v8  ;;  %v1068_v48 = vmax.f32 %v162_v36, %v163_v0 }
  0x20   :  { %v203_v10 = vmax.f32 %v201_v6, %v202_v28  ;;  %v172_v30 = vrot.slane %v171_v29, 1  ;;  %v189_v42 = vmax.f32 %v187_v15, %v188_v27  ;;  %v181_v7 = vrot.slane %v180_v2, 1 }
  0x21   :  { %v197_v19 = vrot.slane %v196_v17, 2  ;;  %v1378_v3 = vunpack.c.l.bf16 %v787_v24  ;;  %v1379_v28 = vunpack.c.l.bf16 %v792_v25  ;;  %v1380_v36 = vunpack.c.h.bf16 %v787_v24 }
  0x22   :  { %v204_v4 = vrot.slane %v203_v10, 4  ;;  %v1070_v14 = vmax.f32 %v171_v29, %v172_v30  ;;  %v190_v12 = vrot.slane %v189_v42, 1  ;;  %v1078_v6 = vmax.f32 %v180_v2, %v181_v7 }
  0x23   :  { %v210_v5 = vsel %vm136_vm0, %v1378_v3, -inf  ;;  %v211_v23 = vsel %vm138_vm1, %v1379_v28, -inf  ;;  %v198_v16 = vmax.f32 %v196_v17, %v197_v19  ;;  %v219_v29 = vsel %vm136_vm0, %v1380_v36, -inf }
  0x24   :  { %v205_v22 = vmax.f32 %v203_v10, %v204_v4  ;;  %v212_v20 = vmax.f32 %v210_v5, %v211_v23  ;;  %v1080_v15 = vmax.f32 %v189_v42, %v190_v12  ;;  %v1381_v11 = vunpack.c.l.bf16 %v797_v26 }
  0x25   :  { %v1382_v9 = vunpack.c.l.bf16 %v806_v31  ;;  %v199_v13 = vrot.slane %v198_v16, 1  ;;  %v1383_v2 = vunpack.c.l.bf16 %v811_v32  ;;  %v1384_v24 = vunpack.c.h.bf16 %v806_v31 }
  0x26   :  { %v220_v18 = vsel %vm138_vm1, %v1381_v11, -inf  ;;  %v206_v8 = vrot.slane %v205_v22, 2  ;;  %v213_v27 = vrot.slane %v212_v20, 4  ;;  %v1385_v26 = vunpack.c.l.bf16 %v816_v33 }
  0x27   :  { %v228_v25 = vsel %vm136_vm0, %v1382_v9, -inf  ;;  %v221_v0 = vmax.f32 %v219_v29, %v220_v18  ;;  %v229_v17 = vsel %vm138_vm1, %v1383_v2, -inf  ;;  %v237_v10 = vsel %vm136_vm0, %v1384_v24, -inf }
  0x28   :  { %v238_v30 = vsel %vm138_vm1, %v1385_v26, -inf  ;;  %v1386_v42 = vunpack.c.l.bf16 %v825_v38  ;;  %v1103_v19 = vmax.f32 %v198_v16, %v199_v13  ;;  %v207_v4 = vmax.f32 %v205_v22, %v206_v8 }
  0x29   :  { %v214_v12 = vmax.f32 %v212_v20, %v213_v27  ;;  %v222_v3 = vrot.slane %v221_v0, 4  ;;  %v230_v32 = vmax.f32 %v228_v25, %v229_v17  ;;  %v239_v5 = vmax.f32 %v237_v10, %v238_v30 }
  0x2a   :  { %v246_v7 = vsel %vm136_vm0, %v1386_v42, -inf  ;;  %v1387_v28 = vunpack.c.l.bf16 %v830_v39  ;;  %v1388_v23 = vunpack.c.h.bf16 %v825_v38  ;;  %v208_v36 = vrot.slane %v207_v4, 1 }
  0x2b   :  { %v215_v29 = vrot.slane %v214_v12, 2  ;;  %v223_v11 = vmax.f32 %v221_v0, %v222_v3  ;;  %v231_v9 = vrot.slane %v230_v32, 4  ;;  %v240_v16 = vrot.slane %v239_v5, 4 }
  0x2c   :  { %v247_v31 = vsel %vm138_vm1, %v1387_v28, -inf  ;;  %v255_v33 = vsel %vm136_vm0, %v1388_v23, -inf  ;;  %v1389_v22 = vunpack.c.l.bf16 %v835_v40  ;;  %v1390_v25 = vunpack.c.l.bf16 %v844_v45 }
  0x2d   :  { %v248_v18 = vmax.f32 %v246_v7, %v247_v31  ;;  %v1117_v13 = vmax.f32 %v207_v4, %v208_v36  ;;  %v216_v8 = vmax.f32 %v214_v12, %v215_v29  ;;  %v224_v38 = vrot.slane %v223_v11, 2 }
  0x2e   :  { %v256_v20 = vsel %vm138_vm1, %v1389_v22, -inf  ;;  %v264_v39 = vsel %vm136_vm0, %v1390_v25, -inf  ;;  %v232_v2 = vmax.f32 %v230_v32, %v231_v9  ;;  %v241_v17 = vmax.f32 %v239_v5, %v240_v16 }
  0x2f   :  { %v249_v27 = vrot.slane %v248_v18, 4  ;;  %v257_v24 = vmax.f32 %v255_v33, %v256_v20  ;;  %v1391_v0 = vunpack.c.l.bf16 %v849_v46  ;;  %v217_v26 = vrot.slane %v216_v8, 1 }
  0x30   :  { %v225_v40 = vmax.f32 %v223_v11, %v224_v38  ;;  %v233_v7 = vrot.slane %v232_v2, 2  ;;  %v242_v3 = vrot.slane %v241_v17, 2  ;;  %v1392_v4 = vunpack.c.h.bf16 %v844_v45 }
  0x31   :  { %v265_v10 = vsel %vm138_vm1, %v1391_v0, -inf  ;;  %v250_v30 = vmax.f32 %v248_v18, %v249_v27  ;;  %v258_v28 = vrot.slane %v257_v24, 4  ;;  %v1125_v31 = vmax.f32 %v216_v8, %v217_v26 }
  0x32   :  { %v266_v42 = vmax.f32 %v264_v39, %v265_v10  ;;  %v273_v12 = vsel %vm136_vm0, %v1392_v4, -inf  ;;  %v226_v32 = vrot.slane %v225_v40, 1  ;;  %v234_v33 = vmax.f32 %v232_v2, %v233_v7 }
  0x33   :  { %v251_v5 = vrot.slane %v250_v30, 2  ;;  %v243_v46 = vmax.f32 %v241_v17, %v242_v3  ;;  %v259_v36 = vmax.f32 %v257_v24, %v258_v28  ;;  %v1393_v29 = vunpack.c.l.bf16 %v854_v47 }
  0x34   :  { %v267_v23 = vrot.slane %v266_v42, 4  ;;  %v1130_v18 = vmax.f32 %v225_v40, %v226_v32  ;;  %v235_v45 = vrot.slane %v234_v33, 1  ;;  %v1394_v39 = vunpack.c.l.bf16 %v863_v52 }
  0x35   :  { %v274_v11 = vsel %vm138_vm1, %v1393_v29, -inf  ;;  %v252_v9 = vmax.f32 %v250_v30, %v251_v5  ;;  %v244_v20 = vrot.slane %v243_v46, 1  ;;  %v260_v25 = vrot.slane %v259_v36, 2 }
  0x36   :  { %v268_v16 = vmax.f32 %v266_v42, %v267_v23  ;;  %v275_v22 = vmax.f32 %v273_v12, %v274_v11  ;;  %v282_v8 = vsel %vm136_vm0, %v1394_v39, -inf  ;;  %v1395_v17 = vunpack.c.l.bf16 %v868_v53 }
  0x37   :  { %v253_v38 = vrot.slane %v252_v9, 1  ;;  %v1138_v24 = vmax.f32 %v234_v33, %v235_v45  ;;  %v1140_v0 = vmax.f32 %v243_v46, %v244_v20  ;;  %v261_v10 = vmax.f32 %v259_v36, %v260_v25 }
  0x38   :  { %v269_v27 = vrot.slane %v268_v16, 2  ;;  %v276_v2 = vrot.slane %v275_v22, 4  ;;  %v283_v47 = vsel %vm138_vm1, %v1395_v17, -inf  ;;  %v1396_v7 = vunpack.c.h.bf16 %v863_v52 }
  0x39   :  { %v284_v26 = vmax.f32 %v282_v8, %v283_v47  ;;  %v1142_v40 = vmax.f32 %v252_v9, %v253_v38  ;;  %v262_v28 = vrot.slane %v261_v10, 1  ;;  %v1397_v53 = vunpack.c.l.bf16 %v873_v54 }
  0x3a   :  { %v270_v30 = vmax.f32 %v268_v16, %v269_v27  ;;  %v277_v42 = vmax.f32 %v275_v22, %v276_v2  ;;  %v291_v3 = vsel %vm136_vm0, %v1396_v7, -inf  ;;  %v1398_v32 = vunpack.c.l.bf16 %v882_v59 }
  0x3b   :  { %v285_v4 = vrot.slane %v284_v26, 4  ;;  %v292_v12 = vsel %vm138_vm1, %v1397_v53, -inf  ;;  %v1399_v36 = vunpack.c.l.bf16 %v887_v60  ;;  %v1156_v52 = vmax.f32 %v261_v10, %v262_v28 }
  0x3c   :  { %v300_v5 = vsel %vm136_vm0, %v1398_v32, -inf  ;;  %v271_v23 = vrot.slane %v270_v30, 1  ;;  %v278_v33 = vrot.slane %v277_v42, 2  ;;  %v293_v46 = vmax.f32 %v291_v3, %v292_v12 }
  0x3d   :  { %v301_v29 = vsel %vm138_vm1, %v1399_v36, -inf  ;;  %v286_v11 = vmax.f32 %v284_v26, %v285_v4  ;;  %v1400_v16 = vunpack.c.h.bf16 %v882_v59  ;;  %v1401_v25 = vunpack.c.l.bf16 %v892_v61 }
  0x3e   :  { %v302_v9 = vmax.f32 %v300_v5, %v301_v29  ;;  %v1161_v22 = vmax.f32 %v270_v30, %v271_v23  ;;  %v279_v45 = vmax.f32 %v277_v42, %v278_v33  ;;  %v294_v20 = vrot.slane %v293_v46, 4 }
  0x3f   :  { %v309_v54 = vsel %vm136_vm0, %v1400_v16, -inf  ;;  %v310_v39 = vsel %vm138_vm1, %v1401_v25, -inf  ;;  %v287_v8 = vrot.slane %v286_v11, 2  ;;  %v1402_v27 = vunpack.c.l.bf16 %v901_v56 }
  0x40   :  { %v303_v60 = vrot.slane %v302_v9, 4  ;;  %v311_v38 = vmax.f32 %v309_v54, %v310_v39  ;;  %v280_v17 = vrot.slane %v279_v45, 1  ;;  %v295_v47 = vmax.f32 %v293_v46, %v294_v20 }
  0x41   :  { %v318_v2 = vsel %vm136_vm0, %v1402_v27, -inf  ;;  %v1403_v59 = vunpack.c.l.bf16 %v906_v55  ;;  %v1404_v26 = vunpack.c.h.bf16 %v901_v56  ;;  %v288_v61 = vmax.f32 %v286_v11, %v287_v8 }
  0x42   :  { %v304_v42 = vmax.f32 %v302_v9, %v303_v60  ;;  %v312_v7 = vrot.slane %v311_v38, 4  ;;  %v1175_v28 = vmax.f32 %v279_v45, %v280_v17  ;;  %v296_v4 = vrot.slane %v295_v47, 2 }
  0x43   :  { %v319_v10 = vsel %vm138_vm1, %v1403_v59, -inf  ;;  %v327_v30 = vsel %vm136_vm0, %v1404_v26, -inf  ;;  %v1405_v53 = vunpack.c.l.bf16 %v911_v62  ;;  %v1406_v32 = vunpack.c.l.bf16 %v920_v50 }
  0x44   :  { %v320_v3 = vmax.f32 %v318_v2, %v319_v10  ;;  %v289_v5 = vrot.slane %v288_v61, 1  ;;  %v305_v23 = vrot.slane %v304_v42, 2  ;;  %v313_v56 = vmax.f32 %v311_v38, %v312_v7 }
  0x45   :  { %v328_v12 = vsel %vm138_vm1, %v1405_v53, -inf  ;;  %v336_v55 = vsel %vm136_vm0, %v1406_v32, -inf  ;;  %v297_v46 = vmax.f32 %v295_v47, %v296_v4  ;;  %v1407_v29 = vunpack.c.l.bf16 %v925_v49 }
  0x46   :  { %v321_v33 = vrot.slane %v320_v3, 4  ;;  %v329_v36 = vmax.f32 %v327_v30, %v328_v12  ;;  %v1408_v9 = vunpack.c.h.bf16 %v920_v50  ;;  %v1189_v16 = vmax.f32 %v288_v61, %v289_v5 }
  0x47   :  { %v337_v11 = vsel %vm138_vm1, %v1407_v29, -inf  ;;  %v306_v54 = vmax.f32 %v304_v42, %v305_v23  ;;  %v314_v45 = vrot.slane %v313_v56, 2  ;;  %v298_v25 = vrot.slane %v297_v46, 1 }
  0x48   :  { %v345_v62 = vsel %vm136_vm0, %v1408_v9, -inf  ;;  %v322_v20 = vmax.f32 %v320_v3, %v321_v33  ;;  %v330_v39 = vrot.slane %v329_v36, 4  ;;  %v338_v8 = vmax.f32 %v336_v55, %v337_v11 }
  0x49   :  { %v1409_v60 = vunpack.c.l.bf16 %v930_v63  ;;  %v307_v27 = vrot.slane %v306_v54, 1  ;;  %v315_v49 = vmax.f32 %v313_v56, %v314_v45  ;;  %v1194_v47 = vmax.f32 %v297_v46, %v298_v25 }
  0x4a   :  { %v323_v2 = vrot.slane %v322_v20, 2  ;;  %v331_v50 = vmax.f32 %v329_v36, %v330_v39  ;;  %v339_v59 = vrot.slane %v338_v8, 4  ;;  %v1410_v10 = vunpack.c.l.bf16 %v939_v44 }
  0x4b   :  { %v346_v38 = vsel %vm138_vm1, %v1409_v60, -inf  ;;  %v1199_v30 = vmax.f32 %v306_v54, %v307_v27  ;;  %v316_v61 = vrot.slane %v315_v49, 1  ;;  %v1411_v4 = vunpack.c.l.bf16 %v944_v43 }
  0x4c   :  { %v347_v17 = vmax.f32 %v345_v62, %v346_v38  ;;  %v354_v26 = vsel %vm136_vm0, %v1410_v10, -inf  ;;  %v324_v42 = vmax.f32 %v322_v20, %v323_v2  ;;  %v332_v63 = vrot.slane %v331_v50, 2 }
  0x4d   :  { %v340_v3 = vmax.f32 %v338_v8, %v339_v59  ;;  %v355_v53 = vsel %vm138_vm1, %v1411_v4, -inf  ;;  %v1412_v12 = vunpack.c.h.bf16 %v939_v44  ;;  %v1207_v55 = vmax.f32 %v315_v49, %v316_v61 }
  0x4e   :  { %v348_v7 = vrot.slane %v347_v17, 4  ;;  %v325_v5 = vrot.slane %v324_v42, 1  ;;  %v356_v56 = vmax.f32 %v354_v26, %v355_v53  ;;  %v333_v33 = vmax.f32 %v331_v50, %v332_v63 }
  0x4f   :  { %v363_v32 = vsel %vm136_vm0, %v1412_v12, -inf  ;;  %v341_v46 = vrot.slane %v340_v3, 2  ;;  %v1413_v36 = vunpack.c.l.bf16 %v949_v58  ;;  %v1414_v11 = vunpack.c.l.bf16 %v958_v41 }
  0x50   :  { %v349_v23 = vmax.f32 %v347_v17, %v348_v7  ;;  %v1215_v9 = vmax.f32 %v324_v42, %v325_v5  ;;  %v357_v62 = vrot.slane %v356_v56, 4  ;;  %v334_v45 = vrot.slane %v333_v33, 1 }
  0x51   :  { %v364_v29 = vsel %vm138_vm1, %v1413_v36, -inf  ;;  %v372_v43 = vsel %vm136_vm0, %v1414_v11, -inf  ;;  %v342_v20 = vmax.f32 %v340_v3, %v341_v46  ;;  %v1415_v25 = vunpack.c.l.bf16 %v963_v37 }
  0x52   :  { %v350_v44 = vrot.slane %v349_v23, 2  ;;  %v365_v54 = vmax.f32 %v363_v32, %v364_v29  ;;  %v1416_v8 = vunpack.c.h.bf16 %v958_v41  ;;  %v358_v38 = vmax.f32 %v356_v56, %v357_v62  ;;  %v1422_v29 = vld [vmem:[#allocation2_spill] sm:$0xff] }
  0x53   :  { %v373_v39 = vsel %vm138_vm1, %v1415_v25, -inf  ;;  %v1223_v2 = vmax.f32 %v333_v33, %v334_v45  ;;  %v343_v17 = vrot.slane %v342_v20, 1  ;;  %v1417_v50 = vunpack.c.l.bf16 %v968_v57 }
  0x54   :  { %v381_v58 = vsel %vm136_vm0, %v1416_v8, -inf  ;;  %v351_v60 = vmax.f32 %v349_v23, %v350_v44  ;;  %v366_v27 = vrot.slane %v365_v54, 4  ;;  %v374_v49 = vmax.f32 %v372_v43, %v373_v39 }
  0x55   :  { %v382_v59 = vsel %vm138_vm1, %v1417_v50, -inf  ;;  %v1418_v10 = vunpack.c.l.bf16 %v977_v35  ;;  %v359_v61 = vrot.slane %v358_v38, 2  ;;  %v1231_v7 = vmax.f32 %v342_v20, %v343_v17  ;;  %v1424_v20 = vld [vmem:[#allocation3_spill] sm:$0xff] }
  0x56   :  { %v352_v26 = vrot.slane %v351_v60, 1  ;;  %v367_v41 = vmax.f32 %v365_v54, %v366_v27  ;;  %v375_v42 = vrot.slane %v374_v49, 4  ;;  %v383_v63 = vmax.f32 %v381_v58, %v382_v59  ;;  %v1427_v59 = vld [vmem:[#allocation4_spill] sm:$0xff] }
  0x57   :  { %v390_v37 = vsel %vm136_vm0, %v1418_v10, -inf  ;;  %v1419_v3 = vunpack.c.l.bf16 %v982_v34  ;;  %v1420_v53 = vunpack.c.h.bf16 %v977_v35  ;;  %v360_v32 = vmax.f32 %v358_v38, %v359_v61 }
  0x58   :  { %v1239_v12 = vmax.f32 %v351_v60, %v352_v26  ;;  %v368_v5 = vrot.slane %v367_v41, 2  ;;  %v376_v23 = vmax.f32 %v374_v49, %v375_v42  ;;  %v384_v56 = vrot.slane %v383_v63, 4 }
  0x59   :  { %v391_v4 = vsel %vm138_vm1, %v1419_v3, -inf  ;;  %v399_v57 = vsel %vm136_vm0, %v1420_v53, -inf  ;;  %v1421_v46 = vunpack.c.l.bf16 %v987_v51  ;;  %v1423_v11 = vunpack.c.l.bf16 %v1422_v29 }
  0x5a   :  { %v392_v33 = vmax.f32 %v390_v37, %v391_v4  ;;  %v361_v43 = vrot.slane %v360_v32, 1  ;;  %v369_v44 = vmax.f32 %v367_v41, %v368_v5  ;;  %v377_v35 = vrot.slane %v376_v23, 2 }
  0x5b   :  { %v400_v36 = vsel %vm138_vm1, %v1421_v46, -inf  ;;  %v408_v34 = vsel %vm136_vm0, %v1423_v11, -inf  ;;  %v385_v54 = vmax.f32 %v383_v63, %v384_v56  ;;  %v1425_v25 = vunpack.c.l.bf16 %v1424_v20 }
  0x5c   :  { %v401_v62 = vmax.f32 %v399_v57, %v400_v36  ;;  %v393_v45 = vrot.slane %v392_v33, 4  ;;  %v1426_v8 = vunpack.c.h.bf16 %v1422_v29  ;;  %v1253_v58 = vmax.f32 %v360_v32, %v361_v43 }
  0x5d   :  { %v409_v39 = vsel %vm138_vm1, %v1425_v25, -inf  ;;  %v370_v60 = vrot.slane %v369_v44, 1  ;;  %v378_v38 = vmax.f32 %v376_v23, %v377_v35  ;;  %v386_v49 = vrot.slane %v385_v54, 2 }
  0x5e   :  { %v417_v51 = vsel %vm136_vm0, %v1426_v8, -inf  ;;  %v402_v27 = vrot.slane %v401_v62, 4  ;;  %v394_v17 = vmax.f32 %v392_v33, %v393_v45  ;;  %v410_v50 = vmax.f32 %v408_v34, %v409_v39 }
  0x5f   :  { %v1428_v10 = vunpack.c.l.bf16 %v1427_v59  ;;  %v1258_v26 = vmax.f32 %v369_v44, %v370_v60  ;;  %v379_v61 = vrot.slane %v378_v38, 1  ;;  %v387_v63 = vmax.f32 %v385_v54, %v386_v49 }
  0x60   :  { %v403_v41 = vmax.f32 %v401_v62, %v402_v27  ;;  %v395_v3 = vrot.slane %v394_v17, 2  ;;  %v411_v4 = vrot.slane %v410_v50, 4  ;;  %v670_v53 = vpack.c.bf16 %v1064_v21, %v1064_v21 }
  0x61   :  { %v418_v37 = vsel %vm138_vm1, %v1428_v10, -inf  ;;  %v1262_v57 = vmax.f32 %v378_v38, %v379_v61  ;;  %v671_v23 = vpack.c.bf16 %v1066_v1, %v1066_v1  ;;  %v388_v56 = vrot.slane %v387_v63, 1 }
  0x62   :  { %v419_v42 = vmax.f32 %v417_v51, %v418_v37  ;;  %v404_v32 = vrot.slane %v403_v41, 2  ;;  %v396_v33 = vmax.f32 %v394_v17, %v395_v3  ;;  %v412_v46 = vmax.f32 %v410_v50, %v411_v4 }
  0x63   :  { %v672_v36 = vpack.c.bf16 %v1068_v48, %v1068_v48  ;;  %v673_v34 = vpack.c.bf16 %v1070_v14, %v1070_v14  ;;  %v674_v21 = vpack.c.bf16 %v1078_v6, %v1078_v6  ;;  %v1272_v43 = vmax.f32 %v387_v63, %v388_v56 }
  0x64   :  { %v420_v5 = vrot.slane %v419_v42, 4  ;;  %v405_v29 = vmax.f32 %v403_v41, %v404_v32  ;;  %v397_v44 = vrot.slane %v396_v33, 1  ;;  %v413_v35 = vrot.slane %v412_v46, 2 }
  0x65   :  { %v675_v1 = vpack.c.bf16 %v1080_v15, %v1080_v15  ;;  %v676_v48 = vpack.c.bf16 %v1103_v19, %v1103_v19  ;;  %v677_v45 = vpack.c.bf16 %v1117_v13, %v1117_v13  ;;  %v678_v6 = vpack.c.bf16 %v1125_v31, %v1125_v31 }
  0x66   :  { %v421_v11 = vmax.f32 %v419_v42, %v420_v5  ;;  %v406_v62 = vrot.slane %v405_v29, 1  ;;  %v398_v20 = vmax.f32 %v396_v33, %v397_v44  ;;  %v414_v14 = vmax.f32 %v412_v46, %v413_v35 }
  0x67   :  { %v679_v25 = vpack.c.bf16 %v1130_v18, %v1130_v18  ;;  %v680_v15 = vpack.c.bf16 %v1138_v24, %v1138_v24  ;;  %v681_v51 = vpack.c.bf16 %v1140_v0, %v1140_v0  ;;  %v682_v13 = vpack.c.bf16 %v1142_v40, %v1142_v40 }
  0x68   :  { %v422_v54 = vrot.slane %v421_v11, 2  ;;  %v407_v39 = vmax.f32 %v405_v29, %v406_v62  ;;  %v415_v19 = vrot.slane %v414_v14, 1  ;;  %v683_v60 = vpack.c.bf16 %v1156_v52, %v1156_v52 }
  0x69   :  { %v684_v31 = vpack.c.bf16 %v1161_v22, %v1161_v22  ;;  %v685_v18 = vpack.c.bf16 %v1175_v28, %v1175_v28  ;;  %v686_v24 = vpack.c.bf16 %v1189_v16, %v1189_v16  ;;  %v687_v0 = vpack.c.bf16 %v1194_v47, %v1194_v47 }
  0x6a   :  { %v423_v8 = vmax.f32 %v421_v11, %v422_v54  ;;  %v416_v27 = vmax.f32 %v414_v14, %v415_v19  ;;  %v688_v40 = vpack.c.bf16 %v1199_v30, %v1199_v30  ;;  %v689_v52 = vpack.c.bf16 %v1207_v55, %v1207_v55 }
  0x6b   :  { %v690_v22 = vpack.c.bf16 %v1215_v9, %v1215_v9  ;;  %v691_v28 = vpack.c.bf16 %v1223_v2, %v1223_v2  ;;  %v692_v16 = vpack.c.bf16 %v1231_v7, %v1231_v7  ;;  %v693_v47 = vpack.c.bf16 %v1239_v12, %v1239_v12 }
  0x6c   :  { %v424_v38 = vrot.slane %v423_v8, 1  ;;  %v694_v30 = vpack.c.bf16 %v1253_v58, %v1253_v58  ;;  %v695_v55 = vpack.c.bf16 %v1258_v26, %v1258_v26  ;;  %v696_v9 = vpack.c.bf16 %v1262_v57, %v1262_v57 }
  0x6d   :  { %v697_v17 = vpack.c.bf16 %v1272_v43, %v1272_v43  ;;  %v698_v2 = vpack.c.bf16 %v398_v20, %v398_v20  ;;  %v699_v50 = vpack.c.bf16 %v407_v39, %v407_v39  ;;  %v700_v7 = vpack.c.bf16 %v416_v27, %v416_v27 }
  0x6e   :  { %v425_v49 = vmax.f32 %v423_v8, %v424_v38  ;;  %v554_v10 = vunpack.c.l.b16 %v670_v53  ;;  %v555_v12 = vunpack.c.l.b16 %v671_v23  ;;  %v556_v37 = vunpack.c.l.b16 %v672_v36 }
  0x6f   :  { %v557_v61 = vunpack.c.l.b16 %v673_v34  ;;  %v558_v41 = vunpack.c.l.b16 %v674_v21  ;;  %v559_v58 = vunpack.c.l.b16 %v675_v1  ;;  %v560_v42 = vunpack.c.l.b16 %v676_v48 }
  0x70   :  { %v701_v59 = vpack.c.bf16 %v425_v49, %v425_v49  ;;  %v561_v63 = vunpack.c.l.b16 %v677_v45  ;;  %v562_v26 = vunpack.c.l.b16 %v678_v6  ;;  %v563_v3 = vunpack.c.l.b16 %v679_v25 }
  0x71   :  { %v564_v4 = vunpack.c.l.b16 %v680_v15  ;;  %v565_v57 = vunpack.c.l.b16 %v681_v51  ;;  %v566_v32 = vunpack.c.l.b16 %v682_v13  ;;  %v567_v5 = vunpack.c.l.b16 %v683_v60 }
  0x72   :  { %v568_v56 = vunpack.c.l.b16 %v684_v31  ;;  %v569_v33 = vunpack.c.l.b16 %v685_v18  ;;  %v570_v46 = vunpack.c.l.b16 %v686_v24  ;;  %v571_v29 = vunpack.c.l.b16 %v687_v0 }
  0x73   :  { %v572_v11 = vunpack.c.l.b16 %v688_v40  ;;  %v573_v43 = vunpack.c.l.b16 %v689_v52  ;;  %v574_v53 = vunpack.c.l.b16 %v690_v22  ;;  %v575_v23 = vunpack.c.l.b16 %v691_v28 }
  0x74   :  { %v576_v36 = vunpack.c.l.b16 %v692_v16  ;;  %v577_v34 = vunpack.c.l.b16 %v693_v47  ;;  %v578_v21 = vunpack.c.l.b16 %v694_v30  ;;  %v579_v44 = vunpack.c.l.b16 %v695_v55 }
  0x75   :  { %v580_v35 = vunpack.c.l.b16 %v696_v9  ;;  %v581_v1 = vunpack.c.l.b16 %v697_v17  ;;  %v582_v62 = vunpack.c.l.b16 %v698_v2  ;;  %v583_v54 = vunpack.c.l.b16 %v699_v50 }
  0x76   :  { %v584_v48 = vunpack.c.l.b16 %v700_v7  ;;  %v585_v45 = vunpack.c.l.b16 %v701_v59  ;;  %v587_v20 = vsel %vm586_vm2, %v555_v12, %v554_v10  ;;  %vm590_vm4 = vcmask 1043459  }
  0x77   :  { %vm592_vm5 = vcmask 1044484   ;;  %vm594_vm6 = vcmask 1045509   ;;  %v589_v14 = vsel %vm588_vm3, %v556_v37, %v587_v20  ;;  %vm596_vm7 = vcmask 1046534  }
  0x78   :  { %vm598_vm8 = vcmask 1047559   ;;  %v600_v6 = vsel %vm586_vm2, %v563_v3, %v562_v26  ;;  %v591_v25 = vsel %vm590_vm4, %v557_v61, %v589_v14  ;;  %v607_v8 = vsel %vm586_vm2, %v571_v29, %v570_v46 }
  0x79   :  { %v601_v39 = vsel %vm588_vm3, %v564_v4, %v600_v6  ;;  %v614_v15 = vsel %vm586_vm2, %v579_v44, %v578_v21  ;;  %v593_v51 = vsel %vm592_vm5, %v558_v41, %v591_v25  ;;  %v608_v13 = vsel %vm588_vm3, %v572_v11, %v607_v8 }
  0x7a   :  { %v602_v19 = vsel %vm590_vm4, %v565_v57, %v601_v39  ;;  %v615_v60 = vsel %vm588_vm3, %v580_v35, %v614_v15  ;;  %v595_v31 = vsel %vm594_vm6, %v559_v58, %v593_v51  ;;  %v609_v18 = vsel %vm590_vm4, %v573_v43, %v608_v13 }
  0x7b   :  { %v603_v38 = vsel %vm592_vm5, %v566_v32, %v602_v19  ;;  %v616_v24 = vsel %vm590_vm4, %v581_v1, %v615_v60  ;;  %v597_v0 = vsel %vm596_vm7, %v560_v42, %v595_v31  ;;  %v610_v40 = vsel %vm592_vm5, %v574_v53, %v609_v18 }
  0x7c   :  { %v604_v27 = vsel %vm594_vm6, %v567_v5, %v603_v38  ;;  %v617_v52 = vsel %vm592_vm5, %v582_v62, %v616_v24  ;;  %v599_v22 = vsel %vm598_vm8, %v561_v63, %v597_v0  ;;  %v611_v28 = vsel %vm594_vm6, %v575_v23, %v610_v40 }
  0x7d   :  { %v605_v49 = vsel %vm596_vm7, %v568_v56, %v604_v27  ;;  %v618_v16 = vsel %vm594_vm6, %v583_v54, %v617_v52  ;;  %v612_v30 = vsel %vm596_vm7, %v576_v36, %v611_v28  ;;  %v621_v9 = vpack.c.b16 %v599_v22, %v599_v22 }
  0x7e   :  { %v606_v47 = vsel %vm598_vm8, %v569_v33, %v605_v49  ;;  %v619_v55 = vsel %vm596_vm7, %v584_v48, %v618_v16  ;;  %v613_v17 = vsel %vm598_vm8, %v577_v34, %v612_v30  ;;  %vm629_vm9 = vcmask 519168  }
  0x7f   :  { %v620_v2 = vsel %vm598_vm8, %v585_v45, %v619_v55  ;;  %v622_v50 = vpack.c.b16 %v606_v47, %v606_v47  ;;  %v623_v7 = vpack.c.b16 %v613_v17, %v613_v17  ;;  %630 = vst.msk [vmem:[%s1361_s1] sm:$0xf] %vm629_vm9, %v621_v9 }
  0x80   :  { %v624_v59 = vpack.c.b16 %v620_v2, %v620_v2 }
  0x81   :  { %631 = vst.msk [vmem:[%s1361_s1 + $0x4] sm:$0xf] %vm629_vm9, %v622_v50  ;;  %632 = vst.msk [vmem:[%s1361_s1 + $0x8] sm:$0xf] %vm629_vm9, %v623_v7 }
  0x82   :  { %633 = vst.msk [vmem:[%s1361_s1 + $0xc] sm:$0xf] %vm629_vm9, %v624_v59 }

// kernel: resnet_model_mod_forward.41
= control target key start
LH: loop header
LB: loop body
LE: loop exit
PB: predicated region body
PF: predicated region fallthrough
CT: control target
= control target key end

     0   :  { %s867_s15 = smov 0   ;;  %s869_s16 = smov 0   ;;  %s963_s0 = inlined_call_operand.vmem [shape: bf16[32,640], index: 0, kind: input, shape index: {}]   ;;  %s964_s1 = inlined_call_operand.vmem [shape: bf16[640,128], index: 1, kind: input, shape index: {}]   ;;  %s965_s2 = inlined_call_operand.vmem [shape: f32[1,128], index: 2, kind: input, shape index: {}]   ;;  %s966_s3 = inlined_call_operand.vmem [shape: f32[1,128], index: 3, kind: input, shape index: {}]   ;;  %s967_s4 = inlined_call_operand.vmem [shape: bf16[32,128], index: 4, kind: output, shape index: {}]  }
   0x1   :  { %s871_s17 = smov 0   ;;  %s873_s18 = smov 0  }
   0x2   :  { %s875_s19 = smov 0  }
   0x3 LB: > { %s26_s20 = sadd.s32 1, %s835_s18  ;;  %p49_p1 = scmp.ne.s32.totalorder %s827_s16, %s823_s15  ;;  %s839_s19 = sphi %s875_s19, %s14_s19   ;;  %s835_s18 = sphi %s873_s18, %s971_s18   ;;  %s831_s17 = sphi %s871_s17, %s970_s17   ;;  %s827_s16 = sphi %s869_s16, %s969_s16   ;;  %s823_s15 = sphi %s867_s15, %s968_s15  }
   0x4   : > { %p27_p0 = scmp.ge.s32.totalorder %s26_s20, 5  ;;  %p50_p2 = scmp.eq.s32.totalorder %s839_s19, 0 }
   0x5   : > { %s42_s22 = sadd.s32 1, %s827_s16  ;;  %p676_p5 = scmp.ge.s32.totalorder %s839_s19, 5 }
   0x6   : > { %s973_s20 = smov (%p27_p0, %s26_s20), 0  ;;  %p51_p3 = por %p50_p2, %p49_p1 }
   0x7   : > { %s38_s21 = ssub.s32 %s835_s18, %s973_s20  ;;  %195 = sbr.rel (%p676_p5) target bundleno = 21 (0x15), region = 24 }
   0x8   : > { %p40_p4 = scmp.eq.s32.totalorder %s38_s21, 0 }
   0xa   : > { %s902_s23 = scalar_select %p40_p4, %s827_s16, %s42_s22  }
   0xe   : > { %198 = sbr.rel (!%p51_p3) target bundleno = 21 (0x15), region = 28  ;;  %s200_s24 = sand.u32 (%p51_p3), 1, %s827_s16  }
   0xf   : > { %s678_s25 = sshll.u32 (%p51_p3), %s835_s18, 2  ;;  %s677_s26 = sshll.u32 (%p51_p3), %s200_s24, 4 }
  0x10   : > { %s207_s29 = scalar_lea.vmem (%p51_p3), %s963_s0, %s678_s25  ;;  %s202_s30 = scalar_lea.vmem (%p51_p3), [#allocation3], %s677_s26 }
  0x11   : > { %v223_v0 = vld [vmem:[%s207_s29] sm:$0xf] (%p51_p3)  ;;  %v225_v1 = vld [vmem:[%s207_s29 + $0x14] sm:$0xf] (%p51_p3)  ;;  %v227_v2 = vld [vmem:[%s207_s29 + $0x28] sm:$0xf] (%p51_p3) }
  0x12   : > { %224 = vst [vmem:[%s202_s30] sm:$0xf] (%p51_p3), %v223_v0  ;;  %226 = vst [vmem:[%s202_s30 + $0x4] sm:$0xf] (%p51_p3), %v225_v1  ;;  %v229_v3 = vld [vmem:[%s207_s29 + $0x3c] sm:$0xf] (%p51_p3) }
  0x13   : > { %228 = vst [vmem:[%s202_s30 + $0x8] sm:$0xf] (%p51_p3), %v227_v2  ;;  %230 = vst [vmem:[%s202_s30 + $0xc] sm:$0xf] (%p51_p3), %v229_v3 }
  0x15 PF: > { %p679_p6 = scmp.ge.s32.totalorder %s839_s19, 1  ;;  %p272_p7 = scmp.lt.s32.totalorder %s839_s19, 6 }
  0x17   : > { %p273_p8 = pnand %p679_p6, %p272_p7 }
  0x18   : > { %s279_s5 = sand.u32 (!%p273_p8), 1, %s823_s15   ;;  %s681_s6 = sshll.u32 (!%p273_p8), %s831_s17, 4 }
  0x19   : > { %276 = sbr.rel (%p273_p8) target bundleno = 306 (0x132), region = 73  ;;  %s914_s7 = sshll.u32 (!%p273_p8), %s279_s5, 4 }
  0x1a   : > { %p323_p9 = scmp.lt.s32.totalorder (!%p273_p8), %s681_s6, 79  ;;  %s281_s12 = scalar_lea.vmem (!%p273_p8), [#allocation3], %s914_s7 }
  0x1b   : > { %p683_p10 = scmp.ne.s32.totalorder (!%p273_p8), %s831_s17, 0 }
  0x20   : > { %s975_s6 = smov (!%p323_p9, %s681_s6), 79  ;;  %350 = sbr.rel (%p683_p10) target bundleno = 39 (0x27), region = 81 }
  0x21   : > { %s682_s8 = sshll.u32 %s975_s6, 2  ;;  %v841_v4 = vmov (!%p683_p10), 0.0  }
  0x22   : > { %s919_s11 = scalar_lea.vmem %s964_s1, %s682_s8  ;;  %351 = vst [vmem:[#allocation2] sm:$0xff] (!%p683_p10), %v841_v4  ;;  %352 = vst [vmem:[#allocation2 + $0x8] sm:$0xff] (!%p683_p10), %v841_v4 }
  0x23   : > { %353 = vst [vmem:[#allocation2 + $0x10] sm:$0xff] (!%p683_p10), %v841_v4  ;;  %354 = vst [vmem:[#allocation2 + $0x18] sm:$0xff] (!%p683_p10), %v841_v4 }
  0x27 PF: > { %v791_v5 = vld [vmem:[%s919_s11] sm:$0xff]   ;;  %v792_v6 = vld [vmem:[%s919_s11 + $0x8] sm:$0xff]   ;;  %v793_v7 = vld [vmem:[%s919_s11 + $0x10] sm:$0xff]   ;;  %p694_p11 = scmp.ne.s32.totalorder %s831_s17, 4 }
  0x28   : > { %730 = vmatprep.subr.bf16.mxu0 %v791_v5  ;;  %v794_v8 = vld [vmem:[%s919_s11 + $0x18] sm:$0xff]   ;;  %v799_v9 = vld [vmem:[%s281_s12] sm:$0xff]   ;;  %v796_v11 = vld [vmem:[%s919_s11 + $0x28] sm:$0xff]  }
  0x29   : > { %731 = vmatpush3.bf16.msra.mxu0 %v791_v5  ;;  %746 = vmatprep.mubr.bf16.mxu0 %v799_v9  ;;  %v795_v10 = vld [vmem:[%s919_s11 + $0x20] sm:$0xff]   ;;  %v797_v12 = vld [vmem:[%s919_s11 + $0x30] sm:$0xff]   ;;  %v798_v13 = vld [vmem:[%s919_s11 + $0x38] sm:$0xff]  }
  0x2a   : > { %732 = vmatprep.subr.bf16.mxu0 %v792_v6  ;;  %v800_v14 = vld [vmem:[%s281_s12 + $0x8] sm:$0xff]   ;;  %v357_v15 = vld [vmem:[#allocation2 + $0x10] sm:$0xff]  ;;  %v355_v16 = vld [vmem:[#allocation2] sm:$0xff] }
  0x2b   : > { %v358_v18 = vld [vmem:[#allocation2 + $0x18] sm:$0xff]  ;;  %v356_v21 = vld [vmem:[#allocation2 + $0x8] sm:$0xff]  ;;  %v695_v29 = vld [vmem:[%s965_s2] ss:$0 sm:$0xff] (!%p694_p11) }
  0x2c   : > { %v696_v32 = vld [vmem:[%s966_s3] ss:$0 sm:$0xff] (!%p694_p11) }
  0x2d   : > { %733 = vmatpush3.bf16.msra.mxu0 %v792_v6 }
  0x2e   : > { %734 = vmatprep.subr.bf16.mxu0 %v793_v7 }
  0x31   : > { %735 = vmatpush3.bf16.msra.mxu0 %v793_v7 }
  0x32   : > { %736 = vmatprep.subr.bf16.mxu0 %v794_v8 }
  0x35   : > { %737 = vmatpush3.bf16.msra.mxu0 %v794_v8 }
  0x36   : > { %738 = vmatprep.subr.bf16.mxu0 %v795_v10 }
  0x39   : > { %739 = vmatpush3.bf16.msra.mxu0 %v795_v10 }
  0x3a   : > { %740 = vmatprep.subr.bf16.mxu0 %v796_v11 }
  0x3d   : > { %741 = vmatpush3.bf16.msra.mxu0 %v796_v11 }
  0x3e   : > { %742 = vmatprep.subr.bf16.mxu0 %v797_v12 }
  0x41   : > { %743 = vmatpush3.bf16.msra.mxu0 %v797_v12 }
  0x42   : > { %744 = vmatprep.subr.bf16.mxu0 %v798_v13 }
  0x45   : > { %745 = vmatpush3.bf16.msra.mxu0 %v798_v13 }
  0x48   : > { %747 = vmatmul.mubr.bf16.vlgmr.msra.gmra.mrb[0].mxu0 %v800_v14 }
 0x11b   : > { %v748_v17 = vpop.f32.mrb[0].mxu0  ;;  %499 = sbr.rel (%p694_p11) target bundleno = 306 (0x132), region = 85 }
 0x11c   : > { %v490_v19 = vadd.f32 %v748_v17, %v357_v15  ;;  %v473_v20 = vpop.f32.mrb[1].mxu0 }
 0x11d   : > { %v488_v22 = vadd.f32 %v473_v20, %v355_v16  ;;  %v749_v23 = vpop.f32.mrb[2].mxu0 }
 0x11e   : > { %494 = vst [vmem:[#allocation2 + $0x10] sm:$0xff] %v490_v19  ;;  %v491_v24 = vadd.f32 %v749_v23, %v358_v18  ;;  %v476_v25 = vpop.f32.mrb[3].mxu0 }
 0x11f   : > { %492 = vst [vmem:[#allocation2] sm:$0xff] %v488_v22  ;;  %v489_v26 = vadd.f32 %v476_v25, %v356_v21 }
 0x120   : > { %495 = vst [vmem:[#allocation2 + $0x18] sm:$0xff] %v491_v24 }
 0x121   : > { %493 = vst [vmem:[#allocation2 + $0x8] sm:$0xff] %v489_v26 }
 0x125   : > { %v502_v33 = vld [vmem:[#allocation2 + $0x10] sm:$0xff] }
 0x126   : > { %v500_v27 = vld [vmem:[#allocation2] sm:$0xff]  ;;  %v513_v35 = vmul.f32 %v695_v29, %v502_v33 }
 0x127   : > { %v511_v30 = vmul.f32 %v695_v29, %v500_v27  ;;  %v503_v34 = vld [vmem:[#allocation2 + $0x18] sm:$0xff] }
 0x128   : > { %v501_v28 = vld [vmem:[#allocation2 + $0x8] sm:$0xff]  ;;  %v514_v36 = vmul.f32 %v695_v29, %v503_v34  ;;  %v524_v39 = vadd.f32 %v696_v32, %v513_v35 }
 0x129   : > { %v512_v31 = vmul.f32 %v695_v29, %v501_v28  ;;  %v522_v37 = vadd.f32 %v696_v32, %v511_v30 }
 0x12a   : > { %v525_v40 = vadd.f32 %v696_v32, %v514_v36  ;;  %v528_v43 = vmax.f32 %v524_v39, 0.0 }
 0x12b   : > { %v523_v38 = vadd.f32 %v696_v32, %v512_v31  ;;  %v526_v41 = vmax.f32 %v522_v37, 0.0 }
 0x12c   : > { %v529_v44 = vmax.f32 %v525_v40, 0.0 }
 0x12d   : > { %v527_v42 = vmax.f32 %v523_v38, 0.0 }
 0x12e   : > { %v717_v46 = vpack.c.bf16 %v529_v44, %v528_v43 }
 0x12f   : > { %v712_v45 = vpack.c.bf16 %v527_v42, %v526_v41 }
 0x130   : > { %719 = vst [vmem:[%s967_s4 + $0x8] sm:$0xff] %v717_v46  }
 0x131   : > { %713 = vst [vmem:[%s967_s4] sm:$0xff] %v712_v45  }
 0x132 PF: > { %s14_s19 = sadd.s32 1, %s839_s19   ;;  %s968_s15 = smov %s827_s16 }
 0x133   : > { %p11_p12 = scmp.ge.s32.totalorder %s14_s19, 7   ;;  %s969_s16 = smov %s902_s23 }
 0x134   : > { %s970_s17 = smov %s835_s18  ;;  %s971_s18 = smov %s973_s20 }
 0x135   :  { %13 = sbr.rel (!%p11_p12) target bundleno = 3 (0x3), region = 129 }

// kernel: resnet_model_mod_forward.42
= control target key start
LH: loop header
LB: loop body
LE: loop exit
PB: predicated region body
PF: predicated region fallthrough
CT: control target
= control target key end

     0   :  { %s972_s18 = smov 0   ;;  %s974_s19 = smov 0   ;;  %s1074_s0 = inlined_call_operand.vmem [shape: bf16[32,640], index: 0, kind: input, shape index: {}]   ;;  %s1075_s1 = inlined_call_operand.vmem [shape: bf16[640,128], index: 1, kind: input, shape index: {}]   ;;  %s1076_s2 = inlined_call_operand.vmem [shape: f32[1,128], index: 2, kind: input, shape index: {}]   ;;  %s1077_s3 = inlined_call_operand.vmem [shape: f32[1,128], index: 3, kind: input, shape index: {}]   ;;  %s1078_s4 = inlined_call_operand.vmem [shape: bf16[32,128], index: 4, kind: input, shape index: {}]   ;;  %s1079_s5 = inlined_call_operand.vmem [shape: bf16[32,128], index: 5, kind: output, shape index: {}]  }
   0x1   :  { %s976_s20 = smov 0   ;;  %s978_s21 = smov 0  }
   0x2   :  { %s980_s22 = smov 0  }
   0x3 LB: > { %s27_s23 = sadd.s32 1, %s935_s21  ;;  %p50_p1 = scmp.ne.s32.totalorder %s927_s19, %s923_s18  ;;  %s939_s22 = sphi %s980_s22, %s15_s22   ;;  %s935_s21 = sphi %s978_s21, %s1083_s21   ;;  %s931_s20 = sphi %s976_s20, %s1082_s20   ;;  %s927_s19 = sphi %s974_s19, %s1081_s19   ;;  %s923_s18 = sphi %s972_s18, %s1080_s18  }
   0x4   : > { %p28_p0 = scmp.ge.s32.totalorder %s27_s23, 5  ;;  %p51_p2 = scmp.eq.s32.totalorder %s939_s22, 0 }
   0x5   : > { %s43_s25 = sadd.s32 1, %s927_s19  ;;  %p767_p5 = scmp.ge.s32.totalorder %s939_s22, 5 }
   0x6   : > { %s1085_s23 = smov (%p28_p0, %s27_s23), 0  ;;  %p52_p3 = por %p51_p2, %p50_p1 }
   0x7   : > { %s39_s24 = ssub.s32 %s935_s21, %s1085_s23  ;;  %236 = sbr.rel (%p767_p5) target bundleno = 21 (0x15), region = 28 }
   0x8   : > { %p41_p4 = scmp.eq.s32.totalorder %s39_s24, 0 }
   0xa   : > { %s1007_s26 = scalar_select %p41_p4, %s927_s19, %s43_s25  }
   0xe   : > { %239 = sbr.rel (!%p52_p3) target bundleno = 21 (0x15), region = 32  ;;  %s241_s27 = sand.u32 (%p52_p3), 1, %s927_s19  }
   0xf   : > { %s769_s28 = sshll.u32 (%p52_p3), %s935_s21, 2  ;;  %s768_s29 = sshll.u32 (%p52_p3), %s241_s27, 4 }
  0x10   : > { %s248_s7 = scalar_lea.vmem (%p52_p3), %s1074_s0, %s769_s28  ;;  %s243_s8 = scalar_lea.vmem (%p52_p3), [#allocation3], %s768_s29 }
  0x11   : > { %v264_v0 = vld [vmem:[%s248_s7] sm:$0xf] (%p52_p3)  ;;  %v266_v1 = vld [vmem:[%s248_s7 + $0x14] sm:$0xf] (%p52_p3)  ;;  %v268_v2 = vld [vmem:[%s248_s7 + $0x28] sm:$0xf] (%p52_p3) }
  0x12   : > { %265 = vst [vmem:[%s243_s8] sm:$0xf] (%p52_p3), %v264_v0  ;;  %267 = vst [vmem:[%s243_s8 + $0x4] sm:$0xf] (%p52_p3), %v266_v1  ;;  %v270_v3 = vld [vmem:[%s248_s7 + $0x3c] sm:$0xf] (%p52_p3) }
  0x13   : > { %269 = vst [vmem:[%s243_s8 + $0x8] sm:$0xf] (%p52_p3), %v268_v2  ;;  %271 = vst [vmem:[%s243_s8 + $0xc] sm:$0xf] (%p52_p3), %v270_v3 }
  0x15 PF: > { %p770_p6 = scmp.ge.s32.totalorder %s939_s22, 1  ;;  %p313_p7 = scmp.lt.s32.totalorder %s939_s22, 6 }
  0x17   : > { %p314_p8 = pnand %p770_p6, %p313_p7 }
  0x18   : > { %s320_s9 = sand.u32 (!%p314_p8), 1, %s923_s18   ;;  %s772_s10 = sshll.u32 (!%p314_p8), %s931_s20, 4 }
  0x19   : > { %317 = sbr.rel (%p314_p8) target bundleno = 308 (0x134), region = 77  ;;  %s1019_s11 = sshll.u32 (!%p314_p8), %s320_s9, 4 }
  0x1a   : > { %p374_p9 = scmp.lt.s32.totalorder (!%p314_p8), %s772_s10, 79  ;;  %s322_s16 = scalar_lea.vmem (!%p314_p8), [#allocation3], %s1019_s11 }
  0x1b   : > { %p774_p10 = scmp.ne.s32.totalorder (!%p314_p8), %s931_s20, 0 }
  0x20   : > { %s1087_s10 = smov (!%p374_p9, %s772_s10), 79  ;;  %410 = sbr.rel (%p774_p10) target bundleno = 39 (0x27), region = 85 }
  0x21   : > { %s773_s12 = sshll.u32 %s1087_s10, 2  ;;  %v941_v4 = vmov (!%p774_p10), 0.0  }
  0x22   : > { %s1024_s15 = scalar_lea.vmem %s1075_s1, %s773_s12  ;;  %411 = vst [vmem:[#allocation2] sm:$0xff] (!%p774_p10), %v941_v4  ;;  %412 = vst [vmem:[#allocation2 + $0x8] sm:$0xff] (!%p774_p10), %v941_v4 }
  0x23   : > { %413 = vst [vmem:[#allocation2 + $0x10] sm:$0xff] (!%p774_p10), %v941_v4  ;;  %414 = vst [vmem:[#allocation2 + $0x18] sm:$0xff] (!%p774_p10), %v941_v4 }
  0x27 PF: > { %v891_v5 = vld [vmem:[%s1024_s15] sm:$0xff]   ;;  %v892_v6 = vld [vmem:[%s1024_s15 + $0x8] sm:$0xff]   ;;  %v893_v7 = vld [vmem:[%s1024_s15 + $0x10] sm:$0xff]   ;;  %p785_p11 = scmp.ne.s32.totalorder %s931_s20, 4 }
  0x28   : > { %830 = vmatprep.subr.bf16.mxu0 %v891_v5  ;;  %v894_v8 = vld [vmem:[%s1024_s15 + $0x18] sm:$0xff]   ;;  %v899_v9 = vld [vmem:[%s322_s16] sm:$0xff]   ;;  %v896_v11 = vld [vmem:[%s1024_s15 + $0x28] sm:$0xff]  }
  0x29   : > { %831 = vmatpush3.bf16.msra.mxu0 %v891_v5  ;;  %846 = vmatprep.mubr.bf16.mxu0 %v899_v9  ;;  %v895_v10 = vld [vmem:[%s1024_s15 + $0x20] sm:$0xff]   ;;  %v897_v12 = vld [vmem:[%s1024_s15 + $0x30] sm:$0xff]   ;;  %v898_v13 = vld [vmem:[%s1024_s15 + $0x38] sm:$0xff]  }
  0x2a   : > { %832 = vmatprep.subr.bf16.mxu0 %v892_v6  ;;  %v900_v14 = vld [vmem:[%s322_s16 + $0x8] sm:$0xff]   ;;  %v417_v15 = vld [vmem:[#allocation2 + $0x10] sm:$0xff]  ;;  %v415_v16 = vld [vmem:[#allocation2] sm:$0xff] }
  0x2b   : > { %v418_v18 = vld [vmem:[#allocation2 + $0x18] sm:$0xff]  ;;  %v416_v21 = vld [vmem:[#allocation2 + $0x8] sm:$0xff]  ;;  %v786_v29 = vld [vmem:[%s1076_s2] ss:$0 sm:$0xff] (!%p785_p11) }
  0x2c   : > { %v787_v32 = vld [vmem:[%s1077_s3] ss:$0 sm:$0xff] (!%p785_p11)  ;;  %v818_v39 = vld [vmem:[%s1078_s4 + $0x8] sm:$0xff] (!%p785_p11)  }
  0x2d   : > { %833 = vmatpush3.bf16.msra.mxu0 %v892_v6  ;;  %v801_v33 = vld [vmem:[%s1078_s4] sm:$0xff] (!%p785_p11)   ;;  %v806_v43 = vunpack.c.l.bf16 (!%p785_p11), %v818_v39  ;;  %v807_v45 = vunpack.c.h.bf16 (!%p785_p11), %v818_v39 }
  0x2e   : > { %834 = vmatprep.subr.bf16.mxu0 %v893_v7  ;;  %v802_v35 = vunpack.c.l.bf16 (!%p785_p11), %v801_v33  ;;  %v803_v36 = vunpack.c.h.bf16 (!%p785_p11), %v801_v33 }
  0x31   : > { %835 = vmatpush3.bf16.msra.mxu0 %v893_v7 }
  0x32   : > { %836 = vmatprep.subr.bf16.mxu0 %v894_v8 }
  0x35   : > { %837 = vmatpush3.bf16.msra.mxu0 %v894_v8 }
  0x36   : > { %838 = vmatprep.subr.bf16.mxu0 %v895_v10 }
  0x39   : > { %839 = vmatpush3.bf16.msra.mxu0 %v895_v10 }
  0x3a   : > { %840 = vmatprep.subr.bf16.mxu0 %v896_v11 }
  0x3d   : > { %841 = vmatpush3.bf16.msra.mxu0 %v896_v11 }
  0x3e   : > { %842 = vmatprep.subr.bf16.mxu0 %v897_v12 }
  0x41   : > { %843 = vmatpush3.bf16.msra.mxu0 %v897_v12 }
  0x42   : > { %844 = vmatprep.subr.bf16.mxu0 %v898_v13 }
  0x45   : > { %845 = vmatpush3.bf16.msra.mxu0 %v898_v13 }
  0x48   : > { %847 = vmatmul.mubr.bf16.vlgmr.msra.gmra.mrb[0].mxu0 %v900_v14 }
 0x11b   : > { %v848_v17 = vpop.f32.mrb[0].mxu0  ;;  %559 = sbr.rel (%p785_p11) target bundleno = 308 (0x134), region = 89 }
 0x11c   : > { %v550_v19 = vadd.f32 %v848_v17, %v417_v15  ;;  %v533_v20 = vpop.f32.mrb[1].mxu0 }
 0x11d   : > { %v548_v22 = vadd.f32 %v533_v20, %v415_v16  ;;  %v849_v23 = vpop.f32.mrb[2].mxu0 }
 0x11e   : > { %554 = vst [vmem:[#allocation2 + $0x10] sm:$0xff] %v550_v19  ;;  %v551_v24 = vadd.f32 %v849_v23, %v418_v18  ;;  %v536_v25 = vpop.f32.mrb[3].mxu0 }
 0x11f   : > { %552 = vst [vmem:[#allocation2] sm:$0xff] %v548_v22  ;;  %v549_v26 = vadd.f32 %v536_v25, %v416_v21 }
 0x120   : > { %555 = vst [vmem:[#allocation2 + $0x18] sm:$0xff] %v551_v24 }
 0x121   : > { %553 = vst [vmem:[#allocation2 + $0x8] sm:$0xff] %v549_v26 }
 0x125   : > { %v562_v34 = vld [vmem:[#allocation2 + $0x10] sm:$0xff] }
 0x126   : > { %v560_v27 = vld [vmem:[#allocation2] sm:$0xff]  ;;  %v573_v38 = vmul.f32 %v786_v29, %v562_v34 }
 0x127   : > { %v571_v30 = vmul.f32 %v786_v29, %v560_v27  ;;  %v563_v37 = vld [vmem:[#allocation2 + $0x18] sm:$0xff] }
 0x128   : > { %v561_v28 = vld [vmem:[#allocation2 + $0x8] sm:$0xff]  ;;  %v574_v42 = vmul.f32 %v786_v29, %v563_v37  ;;  %v584_v44 = vadd.f32 %v787_v32, %v573_v38 }
 0x129   : > { %v572_v31 = vmul.f32 %v786_v29, %v561_v28  ;;  %v582_v40 = vadd.f32 %v787_v32, %v571_v30 }
 0x12a   : > { %v585_v48 = vadd.f32 %v787_v32, %v574_v42  ;;  %v596_v49 = vadd.f32 %v806_v43, %v584_v44 }
 0x12b   : > { %v583_v41 = vadd.f32 %v787_v32, %v572_v31  ;;  %v594_v46 = vadd.f32 %v802_v35, %v582_v40 }
 0x12c   : > { %v597_v52 = vadd.f32 %v807_v45, %v585_v48  ;;  %v600_v53 = vmax.f32 %v596_v49, 0.0 }
 0x12d   : > { %v595_v47 = vadd.f32 %v803_v36, %v583_v41  ;;  %v598_v50 = vmax.f32 %v594_v46, 0.0 }
 0x12e   : > { %v601_v55 = vmax.f32 %v597_v52, 0.0 }
 0x12f   : > { %v599_v51 = vmax.f32 %v595_v47, 0.0 }
 0x130   : > { %v816_v56 = vpack.c.bf16 %v601_v55, %v600_v53 }
 0x131   : > { %v811_v54 = vpack.c.bf16 %v599_v51, %v598_v50 }
 0x132   : > { %819 = vst [vmem:[%s1079_s5 + $0x8] sm:$0xff] %v816_v56  }
 0x133   : > { %812 = vst [vmem:[%s1079_s5] sm:$0xff] %v811_v54  }
 0x134 PF: > { %s15_s22 = sadd.s32 1, %s939_s22   ;;  %s1080_s18 = smov %s927_s19 }
 0x135   : > { %p12_p12 = scmp.ge.s32.totalorder %s15_s22, 7   ;;  %s1081_s19 = smov %s1007_s26 }
 0x136   : > { %s1082_s20 = smov %s935_s21  ;;  %s1083_s21 = smov %s1085_s23 }
 0x137   :  { %14 = sbr.rel (!%p12_p12) target bundleno = 3 (0x3), region = 136 }

// kernel: resnet_model_mod_forward.47
= control target key start
LH: loop header
LB: loop body
LE: loop exit
PB: predicated region body
PF: predicated region fallthrough
CT: control target
= control target key end

     0   :  { %s690_s15 = smov 0   ;;  %s692_s16 = smov 0   ;;  %s742_s0 = inlined_call_operand.vmem [shape: bf16[8,640], index: 0, kind: input, shape index: {}]   ;;  %s743_s1 = inlined_call_operand.vmem [shape: bf16[640,128], index: 1, kind: input, shape index: {}]   ;;  %s744_s2 = inlined_call_operand.vmem [shape: f32[1,128], index: 2, kind: input, shape index: {}]   ;;  %s745_s3 = inlined_call_operand.vmem [shape: f32[1,128], index: 3, kind: input, shape index: {}]   ;;  %s746_s4 = inlined_call_operand.vmem [shape: bf16[8,128], index: 4, kind: output, shape index: {}]  }
   0x1   :  { %s694_s17 = smov 0  }
   0x2 LB: > { %s26_s18 = sadd.s32 1, %s656_s16  ;;  %p555_p0 = scmp.ge.s32.totalorder %s660_s17, 1  ;;  %s660_s17 = sphi %s694_s17, %s14_s17   ;;  %s656_s16 = sphi %s692_s16, %s748_s16   ;;  %s652_s15 = sphi %s690_s15, %s747_s15  }
   0x3   : > { %p27_p1 = scmp.ge.s32.totalorder %s26_s18, 5  ;;  %p220_p2 = scmp.lt.s32.totalorder %s660_s17, 6 }
   0x5   : > { %s750_s18 = smov (%p27_p1, %s26_s18), 0  ;;  %p221_p3 = pnand %p555_p0, %p220_p2 }
   0x6   : > { %p267_p4 = scmp.lt.s32.totalorder (!%p221_p3), %s652_s15, 4  ;;  %s557_s19 = sshll.u32 (!%p221_p3), %s652_s15, 4 }
   0x7   : > { %224 = sbr.rel (%p221_p3) target bundleno = 286 (0x11e), region = 36  ;;  %p274_p5 = scmp.lt.s32.totalorder (!%p221_p3), %s557_s19, 79 }
   0x8   : > { %p559_p6 = scmp.ne.s32.totalorder (!%p221_p3), %s652_s15, 0 }
   0xe   : > { %s268_s20 = scalar_select %p267_p4, %s652_s15, 4 }
   0xf   : > { %s752_s19 = smov (!%p274_p5, %s557_s19), 79  ;;  %299 = sbr.rel (%p559_p6) target bundleno = 22 (0x16), region = 40 }
  0x10   : > { %s556_s21 = sshll.u32 %s268_s20, 2  ;;  %s558_s25 = sshll.u32 %s752_s19, 2  ;;  %v662_v0 = vmov (!%p559_p6), 0.0  }
  0x11   : > { %s716_s24 = scalar_lea.vmem %s742_s0, %s556_s21  ;;  %s280_s28 = scalar_lea.vmem %s743_s1, %s558_s25  ;;  %300 = vst [vmem:[#allocation2] sm:$0xff] (!%p559_p6), %v662_v0 }
  0x16 PF: > { %v630_v1 = vld [vmem:[%s280_s28] sm:$0xff]   ;;  %v663_v2 = vmov 0.0   ;;  %v631_v3 = vld [vmem:[%s280_s28 + $0x8] sm:$0xff]   ;;  %vm664_vm0 = vmmov 0   ;;  %v632_v4 = vld [vmem:[%s280_s28 + $0x10] sm:$0xff]   ;;  %p568_p7 = scmp.ne.s32.totalorder %s652_s15, 4 }
  0x17   : > { %583 = vmatprep.subr.bf16.mxu0 %v663_v2  ;;  %599 = vmatprep.mubr.msk.bf16.mxu0 %vm664_vm0, %v663_v2  ;;  %v633_v5 = vld [vmem:[%s280_s28 + $0x18] sm:$0xff]   ;;  %v634_v6 = vld [vmem:[%s280_s28 + $0x20] sm:$0xff]   ;;  %v635_v7 = vld [vmem:[%s280_s28 + $0x28] sm:$0xff]  }
  0x18   : > { %584 = vmatpush3.bf16.msra.mxu0 %v630_v1  ;;  %v636_v8 = vld [vmem:[%s280_s28 + $0x30] sm:$0xff]   ;;  %v637_v9 = vld [vmem:[%s280_s28 + $0x38] sm:$0xff]   ;;  %v302_v10 = vld [vmem:[%s716_s24] sm:$0xf] }
  0x19   : > { %585 = vmatprep.subr.bf16.mxu0 %v663_v2  ;;  %v301_v11 = vld [vmem:[#allocation2] sm:$0xff] }
  0x1a   : > { %v569_v18 = vld [vmem:[%s744_s2] ss:$0 sm:$0xff] (!%p568_p7) }
  0x1b   : > { %v570_v19 = vld [vmem:[%s745_s3] ss:$0 sm:$0xff] (!%p568_p7) }
  0x1c   : > { %586 = vmatpush3.bf16.msra.mxu0 %v631_v3 }
  0x1d   : > { %587 = vmatprep.subr.bf16.mxu0 %v663_v2 }
  0x20   : > { %588 = vmatpush3.bf16.msra.mxu0 %v632_v4 }
  0x21   : > { %589 = vmatprep.subr.bf16.mxu0 %v663_v2 }
  0x24   : > { %590 = vmatpush3.bf16.msra.mxu0 %v633_v5 }
  0x25   : > { %591 = vmatprep.subr.bf16.mxu0 %v663_v2 }
  0x28   : > { %592 = vmatpush3.bf16.msra.mxu0 %v634_v6 }
  0x29   : > { %593 = vmatprep.subr.bf16.mxu0 %v663_v2 }
  0x2c   : > { %594 = vmatpush3.bf16.msra.mxu0 %v635_v7 }
  0x2d   : > { %595 = vmatprep.subr.bf16.mxu0 %v663_v2 }
  0x30   : > { %596 = vmatpush3.bf16.msra.mxu0 %v636_v8 }
  0x31   : > { %597 = vmatprep.subr.bf16.mxu0 %v663_v2 }
  0x34   : > { %598 = vmatpush3.bf16.msra.mxu0 %v637_v9 }
  0x37   : > { %600 = vmatmul.mubr.bf16.vlgmr.msra.gmra.mrb[0].mxu0 %v302_v10 }
 0x107   : > { %412 = sbr.rel (%p568_p7) target bundleno = 286 (0x11e), region = 44 }
 0x10a   : > { %v401_v12 = vpop.f32.mrb[0].mxu0 }
 0x10b   : > { %v407_v13 = vadd.f32 %v401_v12, %v301_v11  ;;  %v601_v14 = vpop.f32.mrb[1].mxu0 }
 0x10c   : > { %v404_v15 = vpop.f32.mrb[2].mxu0 }
 0x10d   : > { %408 = vst [vmem:[#allocation2] sm:$0xff] %v407_v13  ;;  %v602_v16 = vpop.f32.mrb[3].mxu0 }
 0x114   : > { %v413_v17 = vld [vmem:[#allocation2] sm:$0xff] }
 0x115   : > { %v421_v20 = vmul.f32 %v569_v18, %v413_v17 }
 0x117   : > { %v429_v21 = vadd.f32 %v570_v19, %v421_v20 }
 0x119   : > { %v430_v22 = vmax.f32 %v429_v21, 0.0 }
 0x11b   : > { %v431_v23 = vpack.c.bf16 %v430_v22, %v430_v22 }
 0x11d   : > { %432 = vst [vmem:[%s746_s4] sm:$0xf] %v431_v23 }
 0x11e PF: > { %s14_s17 = sadd.s32 1, %s660_s17   ;;  %s747_s15 = smov %s656_s16 }
 0x11f   : > { %p11_p8 = scmp.ge.s32.totalorder %s14_s17, 7   ;;  %s748_s16 = smov %s750_s18 }
 0x121   :  { %13 = sbr.rel (!%p11_p8) target bundleno = 2 (0x2), region = 83 }

// kernel: resnet_model_mod_forward.48
= control target key start
LH: loop header
LB: loop body
LE: loop exit
PB: predicated region body
PF: predicated region fallthrough
CT: control target
= control target key end

     0   :  { %v206_v0 = vmov 0.0   ;;  %vm207_vm0 = vmmov 0   ;;  %s269_s1 = inlined_call_operand.vmem [shape: bf16[128,128], index: 1, kind: input, shape index: {}]   ;;  %s270_s0 = inlined_call_operand.vmem [shape: bf16[8,128], index: 0, kind: input, shape index: {}]   ;;  %s271_s2 = inlined_call_operand.vmem [shape: f32[1,128], index: 2, kind: input, shape index: {}]   ;;  %s272_s3 = inlined_call_operand.vmem [shape: f32[1,128], index: 3, kind: input, shape index: {}]   ;;  %s273_s4 = inlined_call_operand.vmem [shape: bf16[8,128], index: 4, kind: output, shape index: {}]  }
   0x1   :  { %176 = vmatprep.subr.bf16.mxu0 %v206_v0  ;;  %v198_v1 = vld [vmem:[%s269_s1] sm:$0xff]   ;;  %192 = vmatprep.mubr.msk.bf16.mxu0 %vm207_vm0, %v206_v0  ;;  %v199_v2 = vld [vmem:[%s269_s1 + $0x8] sm:$0xff]   ;;  %v200_v3 = vld [vmem:[%s269_s1 + $0x10] sm:$0xff]  }
   0x2   :  { %177 = vmatpush3.bf16.msra.mxu0 %v198_v1  ;;  %v201_v4 = vld [vmem:[%s269_s1 + $0x18] sm:$0xff]   ;;  %v202_v5 = vld [vmem:[%s269_s1 + $0x20] sm:$0xff]   ;;  %v203_v6 = vld [vmem:[%s269_s1 + $0x28] sm:$0xff]  }
   0x3   :  { %178 = vmatprep.subr.bf16.mxu0 %v206_v0  ;;  %v204_v7 = vld [vmem:[%s269_s1 + $0x30] sm:$0xff]   ;;  %v205_v8 = vld [vmem:[%s269_s1 + $0x38] sm:$0xff]   ;;  %v24_v9 = vld [vmem:[%s270_s0] sm:$0xf] }
   0x4   :  { %v165_v10 = vld [vmem:[%s271_s2] ss:$0 sm:$0xff] }
   0x5   :  { %v166_v12 = vld [vmem:[%s272_s3] ss:$0 sm:$0xff] }
   0x6   :  { %179 = vmatpush3.bf16.msra.mxu0 %v199_v2 }
   0x7   :  { %180 = vmatprep.subr.bf16.mxu0 %v206_v0 }
   0xa   :  { %181 = vmatpush3.bf16.msra.mxu0 %v200_v3 }
   0xb   :  { %182 = vmatprep.subr.bf16.mxu0 %v206_v0 }
   0xe   :  { %183 = vmatpush3.bf16.msra.mxu0 %v201_v4 }
   0xf   :  { %184 = vmatprep.subr.bf16.mxu0 %v206_v0 }
  0x12   :  { %185 = vmatpush3.bf16.msra.mxu0 %v202_v5 }
  0x13   :  { %186 = vmatprep.subr.bf16.mxu0 %v206_v0 }
  0x16   :  { %187 = vmatpush3.bf16.msra.mxu0 %v203_v6 }
  0x17   :  { %188 = vmatprep.subr.bf16.mxu0 %v206_v0 }
  0x1a   :  { %189 = vmatpush3.bf16.msra.mxu0 %v204_v7 }
  0x1b   :  { %190 = vmatprep.subr.bf16.mxu0 %v206_v0 }
  0x1e   :  { %191 = vmatpush3.bf16.msra.mxu0 %v205_v8 }
  0x21   :  { %193 = vmatmul.mubr.bf16.vlgmr.msra.gmra.mrb[0].mxu0 %v24_v9 }
  0xf4   :  { %v123_v11 = vpop.f32.mrb[0].mxu0 }
  0xf5   :  { %v142_v13 = vmul.f32 %v165_v10, %v123_v11  ;;  %v194_v14 = vpop.f32.mrb[1].mxu0 }
  0xf6   :  { %v126_v15 = vpop.f32.mrb[2].mxu0 }
  0xf7   :  { %v150_v16 = vadd.f32 %v166_v12, %v142_v13  ;;  %v195_v17 = vpop.f32.mrb[3].mxu0 }
  0xf9   :  { %v151_v18 = vpack.c.bf16 %v150_v16, %v150_v16 }
  0xfb   :  { %152 = vst [vmem:[%s273_s4] sm:$0xf] %v151_v18 }

// kernel: resnet_model_mod_forward.49
= control target key start
LH: loop header
LB: loop body
LE: loop exit
PB: predicated region body
PF: predicated region fallthrough
CT: control target
= control target key end

     0   :  { %s1016_s18 = smov 0   ;;  %s1018_s19 = smov 0   ;;  %s1097_s0 = inlined_call_operand.vmem [shape: bf16[8,1152], index: 0, kind: input, shape index: {}]   ;;  %s1098_s1 = inlined_call_operand.vmem [shape: bf16[1152,128], index: 1, kind: input, shape index: {}]   ;;  %s1099_s2 = inlined_call_operand.vmem [shape: f32[1,128], index: 2, kind: input, shape index: {}]   ;;  %s1100_s3 = inlined_call_operand.vmem [shape: f32[1,128], index: 3, kind: input, shape index: {}]   ;;  %s1101_s4 = inlined_call_operand.vmem [shape: bf16[8,128], index: 4, kind: input, shape index: {}]   ;;  %s1102_s5 = inlined_call_operand.vmem [shape: bf16[8,128], index: 5, kind: output, shape index: {}]  }
   0x1   :  { %s1020_s20 = smov 0  }
   0x2 LB: > { %s27_s21 = sadd.s32 1, %s977_s19  ;;  %p817_p0 = scmp.ge.s32.totalorder %s981_s20, 1  ;;  %s981_s20 = sphi %s1020_s20, %s15_s20   ;;  %s977_s19 = sphi %s1018_s19, %s1104_s19   ;;  %s973_s18 = sphi %s1016_s18, %s1103_s18  }
   0x3   : > { %p28_p1 = scmp.ge.s32.totalorder %s27_s21, 3  ;;  %p261_p2 = scmp.lt.s32.totalorder %s981_s20, 4 }
   0x5   : > { %s1106_s21 = smov (%p28_p1, %s27_s21), 0  ;;  %p262_p3 = pnand %p817_p0, %p261_p2 }
   0x6   : > { %s316_s22 = smul.u32 (!%p262_p3), 3, %s973_s18  ;;  %p820_p6 = scmp.ne.s32.totalorder (!%p262_p3), %s973_s18, 0 }
   0x7   : > { %265 = sbr.rel (%p262_p3) target bundleno = 295 (0x127), region = 40 }
   0x8   : > { %s326_s23 = smul.u32 (!%p262_p3), 48, %s973_s18  ;;  %p319_p4 = scmp.lt.s32.totalorder (!%p262_p3), %s316_s22, 8 }
   0xa   : > { %p327_p5 = scmp.lt.s32.totalorder (!%p262_p3), %s326_s23, 143 }
   0xe   : > { %s1108_s22 = smov (!%p319_p4, %s316_s22), 8  ;;  %s1110_s23 = smov (!%p327_p5, %s326_s23), 143 }
   0xf   : > { %s818_s24 = sshll.u32 %s1108_s22, 2  ;;  %s819_s28 = sshll.u32 %s1110_s23, 2  ;;  %v983_v0 = vmov (!%p820_p6), 0.0  }
  0x10   : > { %s1041_s27 = scalar_lea.vmem %s1097_s0, %s818_s24  ;;  %s1046_s6 = scalar_lea.vmem %s1098_s1, %s819_s28  ;;  %360 = vst [vmem:[#allocation2] sm:$0xff] (!%p820_p6), %v983_v0 }
  0x11   : > { %359 = sbr.rel (%p820_p6) target bundleno = 24 (0x18), region = 44 }
  0x18 PF: > { %v932_v1 = vld [vmem:[%s1046_s6 + $0x40] sm:$0xff]   ;;  %v984_v2 = vmov 0.0   ;;  %vm985_vm0 = vmmov 0   ;;  %v935_v5 = vld [vmem:[%s1046_s6 + $0x48] sm:$0xff]   ;;  %v938_v8 = vld [vmem:[%s1046_s6 + $0x50] sm:$0xff]   ;;  %p848_p7 = scmp.ne.s32.totalorder %s973_s18, 2 }
  0x19   : > { %885 = vmatprep.subr.bf16.mxu1 %v984_v2  ;;  %v933_v3 = vld [vmem:[%s1046_s6] sm:$0xff]   ;;  %854 = vmatprep.subr.bf16.mxu0 %v932_v1  ;;  %v936_v6 = vld [vmem:[%s1046_s6 + $0x8] sm:$0xff]   ;;  %v939_v9 = vld [vmem:[%s1046_s6 + $0x10] sm:$0xff]  }
  0x1a   : > { %v934_v4 = vld [vmem:[%s1046_s6 + $0x80] sm:$0xff]   ;;  %901 = vmatprep.mubr.msk.bf16.mxu1 %vm985_vm0, %v984_v2  ;;  %855 = vmatpush3.bf16.msra.mxu0 %v933_v3  ;;  %v937_v7 = vld [vmem:[%s1046_s6 + $0x88] sm:$0xff]   ;;  %v940_v10 = vld [vmem:[%s1046_s6 + $0x90] sm:$0xff]  }
  0x1b   : > { %886 = vmatpush3.bf16.msra.mxu1 %v934_v4  ;;  %856 = vmatprep.subr.bf16.mxu0 %v935_v5  ;;  %v941_v11 = vld [vmem:[%s1046_s6 + $0x58] sm:$0xff]   ;;  %v944_v14 = vld [vmem:[%s1046_s6 + $0x60] sm:$0xff]   ;;  %v947_v17 = vld [vmem:[%s1046_s6 + $0x68] sm:$0xff]  }
  0x1c   : > { %887 = vmatprep.subr.bf16.mxu1 %v984_v2  ;;  %v942_v12 = vld [vmem:[%s1046_s6 + $0x18] sm:$0xff]   ;;  %v945_v15 = vld [vmem:[%s1046_s6 + $0x20] sm:$0xff]   ;;  %v948_v18 = vld [vmem:[%s1046_s6 + $0x28] sm:$0xff]  }
  0x1d   : > { %v943_v13 = vld [vmem:[%s1046_s6 + $0x98] sm:$0xff]   ;;  %v946_v16 = vld [vmem:[%s1046_s6 + $0xa0] sm:$0xff]   ;;  %v949_v19 = vld [vmem:[%s1046_s6 + $0xa8] sm:$0xff]  }
  0x1e   : > { %857 = vmatpush3.bf16.msra.mxu0 %v936_v6  ;;  %v950_v20 = vld [vmem:[%s1046_s6 + $0x70] sm:$0xff]   ;;  %v953_v23 = vld [vmem:[%s1046_s6 + $0x78] sm:$0xff]   ;;  %v362_v24 = vld [vmem:[%s1041_s27] sm:$0xff] }
  0x1f   : > { %888 = vmatpush3.bf16.msra.mxu1 %v937_v7  ;;  %858 = vmatprep.subr.bf16.mxu0 %v938_v8  ;;  %v951_v21 = vld [vmem:[%s1046_s6 + $0x30] sm:$0xff]   ;;  %v822_v25 = vcombine.high %v362_v24, %v362_v24  ;;  %v954_v26 = vld [vmem:[%s1046_s6 + $0x38] sm:$0xff]   ;;  %v821_v28 = vcombine.low %v362_v24, %v362_v24  ;;  %v958_v29 = vld [vmem:[%s1041_s27 + $0x8] ss:$0 sps:$4 sm:$0xff]  }
  0x20   : > { %889 = vmatprep.subr.bf16.mxu1 %v984_v2  ;;  %v952_v22 = vld [vmem:[%s1046_s6 + $0xb0] sm:$0xff]   ;;  %v955_v27 = vld [vmem:[%s1046_s6 + $0xb8] sm:$0xff]   ;;  %v361_v36 = vld [vmem:[#allocation2] sm:$0xff] }
  0x21   : > { %599 = vmatprep.mubr.bf16.mxu0 %v822_v25  ;;  %v849_v43 = vld [vmem:[%s1099_s2] ss:$0 sm:$0xff] (!%p848_p7) }
  0x22   : > { %859 = vmatpush3.bf16.msra.mxu0 %v939_v9  ;;  %v850_v44 = vld [vmem:[%s1100_s3] ss:$0 sm:$0xff] (!%p848_p7) }
  0x23   : > { %890 = vmatpush3.bf16.msra.mxu1 %v940_v10  ;;  %860 = vmatprep.subr.bf16.mxu0 %v941_v11  ;;  %v670_v46 = vld [vmem:[%s1101_s4] sm:$0xf] (!%p848_p7) }
  0x24   : > { %891 = vmatprep.subr.bf16.mxu1 %v984_v2  ;;  %v671_v47 = vunpack.c.l.bf16 (!%p848_p7), %v670_v46 }
  0x26   : > { %861 = vmatpush3.bf16.msra.mxu0 %v942_v12 }
  0x27   : > { %892 = vmatpush3.bf16.msra.mxu1 %v943_v13  ;;  %862 = vmatprep.subr.bf16.mxu0 %v944_v14 }
  0x28   : > { %893 = vmatprep.subr.bf16.mxu1 %v984_v2 }
  0x2a   : > { %863 = vmatpush3.bf16.msra.mxu0 %v945_v15 }
  0x2b   : > { %894 = vmatpush3.bf16.msra.mxu1 %v946_v16  ;;  %864 = vmatprep.subr.bf16.mxu0 %v947_v17 }
  0x2c   : > { %895 = vmatprep.subr.bf16.mxu1 %v984_v2 }
  0x2e   : > { %865 = vmatpush3.bf16.msra.mxu0 %v948_v18 }
  0x2f   : > { %896 = vmatpush3.bf16.msra.mxu1 %v949_v19  ;;  %866 = vmatprep.subr.bf16.mxu0 %v950_v20 }
  0x30   : > { %897 = vmatprep.subr.bf16.mxu1 %v984_v2 }
  0x32   : > { %867 = vmatpush3.bf16.msra.mxu0 %v951_v21 }
  0x33   : > { %898 = vmatpush3.bf16.msra.mxu1 %v952_v22  ;;  %868 = vmatprep.subr.bf16.mxu0 %v953_v23 }
  0x34   : > { %899 = vmatprep.subr.bf16.mxu1 %v984_v2 }
  0x36   : > { %869 = vmatpush3.bf16.msra.mxu0 %v954_v26 }
  0x37   : > { %900 = vmatpush3.bf16.msra.mxu1 %v955_v27 }
  0x39   : > { %600 = vmatmul.mubr.bf16.vlgmr.msra.gmra.mrb[0].mxu0 %v821_v28 }
  0x3a   : > { %902 = vmatmul.mubr.bf16.vlgmr.msra.gmra.mrb[0].mxu1 %v958_v29 }
 0x10c   : > { %v870_v30 = vpop.f32.mrb[0].mxu0 }
 0x10d   : > { %v641_v31 = vpop.f32.mrb[0].mxu1  ;;  %v871_v32 = vpop.f32.mrb[1].mxu0 }
 0x10e   : > { %v872_v33 = vadd.f32 %v871_v32, %v870_v30  ;;  %v903_v34 = vpop.f32.mrb[1].mxu1  ;;  %v873_v35 = vpop.f32.mrb[2].mxu0  ;;  %652 = sbr.rel (%p848_p7) target bundleno = 295 (0x127), region = 48 }
 0x10f   : > { %v644_v37 = vpop.f32.mrb[2].mxu1  ;;  %v874_v38 = vpop.f32.mrb[3].mxu0 }
 0x110   : > { %v642_v39 = vadd.f32 %v872_v33, %v641_v31  ;;  %v904_v40 = vpop.f32.mrb[3].mxu1 }
 0x112   : > { %v647_v41 = vadd.f32 %v642_v39, %v361_v36 }
 0x114   : > { %648 = vst [vmem:[#allocation2] sm:$0xff] %v647_v41 }
 0x11b   : > { %v653_v42 = vld [vmem:[#allocation2] sm:$0xff] }
 0x11c   : > { %v661_v45 = vmul.f32 %v849_v43, %v653_v42 }
 0x11e   : > { %v669_v48 = vadd.f32 %v850_v44, %v661_v45 }
 0x120   : > { %v672_v49 = vadd.f32 %v671_v47, %v669_v48 }
 0x122   : > { %v673_v50 = vmax.f32 %v672_v49, 0.0 }
 0x124   : > { %v674_v51 = vpack.c.bf16 %v673_v50, %v673_v50 }
 0x126   : > { %675 = vst [vmem:[%s1102_s5] sm:$0xf] %v674_v51 }
 0x127 PF: > { %s15_s20 = sadd.s32 1, %s981_s20   ;;  %s1103_s18 = smov %s977_s19 }
 0x128   : > { %p12_p8 = scmp.ge.s32.totalorder %s15_s20, 5   ;;  %s1104_s19 = smov %s1106_s21 }
 0x12a   :  { %14 = sbr.rel (!%p12_p8) target bundleno = 2 (0x2), region = 90 }

// kernel: resnet_model_mod_forward.50
= control target key start
LH: loop header
LB: loop body
LE: loop exit
PB: predicated region body
PF: predicated region fallthrough
CT: control target
= control target key end

     0   :  { %s934_s15 = smov 0   ;;  %s936_s16 = smov 0   ;;  %s1012_s0 = inlined_call_operand.vmem [shape: bf16[8,1152], index: 0, kind: input, shape index: {}]   ;;  %s1013_s1 = inlined_call_operand.vmem [shape: bf16[1152,128], index: 1, kind: input, shape index: {}]   ;;  %s1014_s2 = inlined_call_operand.vmem [shape: f32[1,128], index: 2, kind: input, shape index: {}]   ;;  %s1015_s3 = inlined_call_operand.vmem [shape: f32[1,128], index: 3, kind: input, shape index: {}]   ;;  %s1016_s4 = inlined_call_operand.vmem [shape: bf16[8,128], index: 4, kind: output, shape index: {}]  }
   0x1   :  { %s938_s17 = smov 0  }
   0x2 LB: > { %s26_s18 = sadd.s32 1, %s900_s16  ;;  %p740_p0 = scmp.ge.s32.totalorder %s904_s17, 1  ;;  %s904_s17 = sphi %s938_s17, %s14_s17   ;;  %s900_s16 = sphi %s936_s16, %s1018_s16   ;;  %s896_s15 = sphi %s934_s15, %s1017_s15  }
   0x3   : > { %p27_p1 = scmp.ge.s32.totalorder %s26_s18, 3  ;;  %p222_p2 = scmp.lt.s32.totalorder %s904_s17, 4 }
   0x5   : > { %s1020_s18 = smov (%p27_p1, %s26_s18), 0  ;;  %p223_p3 = pnand %p740_p0, %p222_p2 }
   0x6   : > { %s268_s19 = smul.u32 (!%p223_p3), 3, %s896_s15  ;;  %p743_p6 = scmp.ne.s32.totalorder (!%p223_p3), %s896_s15, 0 }
   0x7   : > { %226 = sbr.rel (%p223_p3) target bundleno = 293 (0x125), region = 36 }
   0x8   : > { %s278_s20 = smul.u32 (!%p223_p3), 48, %s896_s15  ;;  %p271_p4 = scmp.lt.s32.totalorder (!%p223_p3), %s268_s19, 8 }
   0xa   : > { %p279_p5 = scmp.lt.s32.totalorder (!%p223_p3), %s278_s20, 143 }
   0xe   : > { %s1022_s19 = smov (!%p271_p4, %s268_s19), 8  ;;  %s1024_s20 = smov (!%p279_p5, %s278_s20), 143 }
   0xf   : > { %s741_s21 = sshll.u32 %s1022_s19, 2  ;;  %s742_s25 = sshll.u32 %s1024_s20, 2  ;;  %v906_v0 = vmov (!%p743_p6), 0.0  }
  0x10   : > { %s959_s24 = scalar_lea.vmem %s1012_s0, %s741_s21  ;;  %s964_s28 = scalar_lea.vmem %s1013_s1, %s742_s25  ;;  %305 = vst [vmem:[#allocation2] sm:$0xff] (!%p743_p6), %v906_v0 }
  0x11   : > { %304 = sbr.rel (%p743_p6) target bundleno = 24 (0x18), region = 40 }
  0x18 PF: > { %v855_v1 = vld [vmem:[%s964_s28 + $0x40] sm:$0xff]   ;;  %v907_v2 = vmov 0.0   ;;  %vm908_vm0 = vmmov 0   ;;  %v858_v5 = vld [vmem:[%s964_s28 + $0x48] sm:$0xff]   ;;  %v861_v8 = vld [vmem:[%s964_s28 + $0x50] sm:$0xff]   ;;  %p771_p7 = scmp.ne.s32.totalorder %s896_s15, 2 }
  0x19   : > { %808 = vmatprep.subr.bf16.mxu1 %v907_v2  ;;  %v856_v3 = vld [vmem:[%s964_s28] sm:$0xff]   ;;  %777 = vmatprep.subr.bf16.mxu0 %v855_v1  ;;  %v859_v6 = vld [vmem:[%s964_s28 + $0x8] sm:$0xff]   ;;  %v862_v9 = vld [vmem:[%s964_s28 + $0x10] sm:$0xff]  }
  0x1a   : > { %v857_v4 = vld [vmem:[%s964_s28 + $0x80] sm:$0xff]   ;;  %824 = vmatprep.mubr.msk.bf16.mxu1 %vm908_vm0, %v907_v2  ;;  %778 = vmatpush3.bf16.msra.mxu0 %v856_v3  ;;  %v860_v7 = vld [vmem:[%s964_s28 + $0x88] sm:$0xff]   ;;  %v863_v10 = vld [vmem:[%s964_s28 + $0x90] sm:$0xff]  }
  0x1b   : > { %809 = vmatpush3.bf16.msra.mxu1 %v857_v4  ;;  %779 = vmatprep.subr.bf16.mxu0 %v858_v5  ;;  %v864_v11 = vld [vmem:[%s964_s28 + $0x58] sm:$0xff]   ;;  %v867_v14 = vld [vmem:[%s964_s28 + $0x60] sm:$0xff]   ;;  %v870_v17 = vld [vmem:[%s964_s28 + $0x68] sm:$0xff]  }
  0x1c   : > { %810 = vmatprep.subr.bf16.mxu1 %v907_v2  ;;  %v865_v12 = vld [vmem:[%s964_s28 + $0x18] sm:$0xff]   ;;  %v868_v15 = vld [vmem:[%s964_s28 + $0x20] sm:$0xff]   ;;  %v871_v18 = vld [vmem:[%s964_s28 + $0x28] sm:$0xff]  }
  0x1d   : > { %v866_v13 = vld [vmem:[%s964_s28 + $0x98] sm:$0xff]   ;;  %v869_v16 = vld [vmem:[%s964_s28 + $0xa0] sm:$0xff]   ;;  %v872_v19 = vld [vmem:[%s964_s28 + $0xa8] sm:$0xff]  }
  0x1e   : > { %780 = vmatpush3.bf16.msra.mxu0 %v859_v6  ;;  %v873_v20 = vld [vmem:[%s964_s28 + $0x70] sm:$0xff]   ;;  %v876_v23 = vld [vmem:[%s964_s28 + $0x78] sm:$0xff]   ;;  %v307_v24 = vld [vmem:[%s959_s24] sm:$0xff] }
  0x1f   : > { %811 = vmatpush3.bf16.msra.mxu1 %v860_v7  ;;  %781 = vmatprep.subr.bf16.mxu0 %v861_v8  ;;  %v874_v21 = vld [vmem:[%s964_s28 + $0x30] sm:$0xff]   ;;  %v745_v25 = vcombine.high %v307_v24, %v307_v24  ;;  %v877_v26 = vld [vmem:[%s964_s28 + $0x38] sm:$0xff]   ;;  %v744_v28 = vcombine.low %v307_v24, %v307_v24  ;;  %v881_v29 = vld [vmem:[%s959_s24 + $0x8] ss:$0 sps:$4 sm:$0xff]  }
  0x20   : > { %812 = vmatprep.subr.bf16.mxu1 %v907_v2  ;;  %v875_v22 = vld [vmem:[%s964_s28 + $0xb0] sm:$0xff]   ;;  %v878_v27 = vld [vmem:[%s964_s28 + $0xb8] sm:$0xff]   ;;  %v306_v36 = vld [vmem:[#allocation2] sm:$0xff] }
  0x21   : > { %544 = vmatprep.mubr.bf16.mxu0 %v745_v25  ;;  %v772_v43 = vld [vmem:[%s1014_s2] ss:$0 sm:$0xff] (!%p771_p7) }
  0x22   : > { %782 = vmatpush3.bf16.msra.mxu0 %v862_v9  ;;  %v773_v44 = vld [vmem:[%s1015_s3] ss:$0 sm:$0xff] (!%p771_p7) }
  0x23   : > { %813 = vmatpush3.bf16.msra.mxu1 %v863_v10  ;;  %783 = vmatprep.subr.bf16.mxu0 %v864_v11 }
  0x24   : > { %814 = vmatprep.subr.bf16.mxu1 %v907_v2 }
  0x26   : > { %784 = vmatpush3.bf16.msra.mxu0 %v865_v12 }
  0x27   : > { %815 = vmatpush3.bf16.msra.mxu1 %v866_v13  ;;  %785 = vmatprep.subr.bf16.mxu0 %v867_v14 }
  0x28   : > { %816 = vmatprep.subr.bf16.mxu1 %v907_v2 }
  0x2a   : > { %786 = vmatpush3.bf16.msra.mxu0 %v868_v15 }
  0x2b   : > { %817 = vmatpush3.bf16.msra.mxu1 %v869_v16  ;;  %787 = vmatprep.subr.bf16.mxu0 %v870_v17 }
  0x2c   : > { %818 = vmatprep.subr.bf16.mxu1 %v907_v2 }
  0x2e   : > { %788 = vmatpush3.bf16.msra.mxu0 %v871_v18 }
  0x2f   : > { %819 = vmatpush3.bf16.msra.mxu1 %v872_v19  ;;  %789 = vmatprep.subr.bf16.mxu0 %v873_v20 }
  0x30   : > { %820 = vmatprep.subr.bf16.mxu1 %v907_v2 }
  0x32   : > { %790 = vmatpush3.bf16.msra.mxu0 %v874_v21 }
  0x33   : > { %821 = vmatpush3.bf16.msra.mxu1 %v875_v22  ;;  %791 = vmatprep.subr.bf16.mxu0 %v876_v23 }
  0x34   : > { %822 = vmatprep.subr.bf16.mxu1 %v907_v2 }
  0x36   : > { %792 = vmatpush3.bf16.msra.mxu0 %v877_v26 }
  0x37   : > { %823 = vmatpush3.bf16.msra.mxu1 %v878_v27 }
  0x39   : > { %545 = vmatmul.mubr.bf16.vlgmr.msra.gmra.mrb[0].mxu0 %v744_v28 }
  0x3a   : > { %825 = vmatmul.mubr.bf16.vlgmr.msra.gmra.mrb[0].mxu1 %v881_v29 }
 0x10c   : > { %v793_v30 = vpop.f32.mrb[0].mxu0 }
 0x10d   : > { %v586_v31 = vpop.f32.mrb[0].mxu1  ;;  %v794_v32 = vpop.f32.mrb[1].mxu0 }
 0x10e   : > { %v795_v33 = vadd.f32 %v794_v32, %v793_v30  ;;  %v826_v34 = vpop.f32.mrb[1].mxu1  ;;  %v796_v35 = vpop.f32.mrb[2].mxu0  ;;  %597 = sbr.rel (%p771_p7) target bundleno = 293 (0x125), region = 44 }
 0x10f   : > { %v589_v37 = vpop.f32.mrb[2].mxu1  ;;  %v797_v38 = vpop.f32.mrb[3].mxu0 }
 0x110   : > { %v587_v39 = vadd.f32 %v795_v33, %v586_v31  ;;  %v827_v40 = vpop.f32.mrb[3].mxu1 }
 0x112   : > { %v592_v41 = vadd.f32 %v587_v39, %v306_v36 }
 0x114   : > { %593 = vst [vmem:[#allocation2] sm:$0xff] %v592_v41 }
 0x11b   : > { %v598_v42 = vld [vmem:[#allocation2] sm:$0xff] }
 0x11c   : > { %v606_v45 = vmul.f32 %v772_v43, %v598_v42 }
 0x11e   : > { %v614_v46 = vadd.f32 %v773_v44, %v606_v45 }
 0x120   : > { %v615_v47 = vmax.f32 %v614_v46, 0.0 }
 0x122   : > { %v616_v48 = vpack.c.bf16 %v615_v47, %v615_v47 }
 0x124   : > { %617 = vst [vmem:[%s1016_s4] sm:$0xf] %v616_v48 }
 0x125 PF: > { %s14_s17 = sadd.s32 1, %s904_s17   ;;  %s1017_s15 = smov %s900_s16 }
 0x126   : > { %p11_p8 = scmp.ge.s32.totalorder %s14_s17, 5   ;;  %s1018_s16 = smov %s1020_s18 }
 0x128   :  { %13 = sbr.rel (!%p11_p8) target bundleno = 2 (0x2), region = 83 }

// kernel: resnet_model_mod_forward.56
= control target key start
LH: loop header
LB: loop body
LE: loop exit
PB: predicated region body
PF: predicated region fallthrough
CT: control target
= control target key end

     0   :  { %s1114_s15 = smov 0   ;;  %s1116_s16 = smov 0   ;;  %s1216_s0 = inlined_call_operand.vmem [shape: bf16[8,1152], index: 0, kind: input, shape index: {}]   ;;  %s1217_s1 = inlined_call_operand.vmem [shape: bf16[1152,256], index: 1, kind: input, shape index: {}]   ;;  %s1218_s2 = inlined_call_operand.vmem [shape: f32[1,256], index: 2, kind: input, shape index: {}]   ;;  %s1219_s3 = inlined_call_operand.vmem [shape: f32[1,256], index: 3, kind: input, shape index: {}]   ;;  %s1220_s4 = inlined_call_operand.vmem [shape: bf16[8,256], index: 4, kind: output, shape index: {}]  }
   0x1   :  { %s1118_s17 = smov 0  }
   0x2 LB: > { %s26_s18 = sadd.s32 1, %s1081_s16  ;;  %p898_p0 = scmp.ge.s32.totalorder %s1085_s17, 1  ;;  %s1085_s17 = sphi %s1118_s17, %s14_s17   ;;  %s1081_s16 = sphi %s1116_s16, %s1222_s16   ;;  %s1077_s15 = sphi %s1114_s15, %s1221_s15  }
   0x3   : > { %p27_p1 = scmp.ge.s32.totalorder %s26_s18, 3  ;;  %p229_p2 = scmp.lt.s32.totalorder %s1085_s17, 4 }
   0x5   : > { %s1224_s18 = smov (%p27_p1, %s26_s18), 0  ;;  %p230_p3 = pnand %p898_p0, %p229_p2 }
   0x6   : > { %s281_s19 = smul.u32 (!%p230_p3), 3, %s1077_s15  ;;  %p902_p6 = scmp.ne.s32.totalorder (!%p230_p3), %s1077_s15, 0 }
   0x7   : > { %233 = sbr.rel (%p230_p3) target bundleno = 323 (0x143), region = 36 }
   0x8   : > { %s291_s20 = smul.u32 (!%p230_p3), 48, %s1077_s15  ;;  %p284_p4 = scmp.lt.s32.totalorder (!%p230_p3), %s281_s19, 8 }
   0xa   : > { %p293_p5 = scmp.lt.s32.totalorder (!%p230_p3), %s291_s20, 143 }
   0xe   : > { %s1226_s19 = smov (!%p284_p4, %s281_s19), 8  ;;  %s1228_s20 = smov (!%p293_p5, %s291_s20), 143 }
   0xf   : > { %s899_s21 = sshll.u32 %s1226_s19, 2  ;;  %s960_s25 = sshll.u32 %s1228_s20, 3  ;;  %v1087_v0 = vmov (!%p902_p6), 0.0  }
  0x10   : > { %s1139_s24 = scalar_lea.vmem %s1216_s0, %s899_s21  ;;  %s1144_s28 = scalar_lea.vmem %s1217_s1, %s960_s25  ;;  %328 = vst [vmem:[#allocation2] sm:$0xff] (!%p902_p6), %v1087_v0  ;;  %329 = vst [vmem:[#allocation2 + $0x8] sm:$0xff] (!%p902_p6), %v1087_v0 }
  0x11   : > { %327 = sbr.rel (%p902_p6) target bundleno = 24 (0x18), region = 40 }
  0x18 PF: > { %v988_v1 = vld [vmem:[%s1144_s28 + $0x4] ss:$8 sps:$4 sm:$0xff]   ;;  %v990_v2 = vld [vmem:[%s1144_s28] ss:$8 sps:$4 sm:$0xff]   ;;  %v1088_v3 = vmov 0   ;;  %p954_p7 = scmp.ne.s32.totalorder %s1077_s15, 2 }
  0x19   : > { %706 = vmatprep.mubr.bf16.mxu1 %v1088_v3  ;;  %633 = vmatprep.subr.bf16.mxu0 %v988_v1  ;;  %v991_v4 = vld [vmem:[%s1144_s28 + $0x14] ss:$8 sps:$4 sm:$0xff]   ;;  %v993_v5 = vld [vmem:[%s1144_s28 + $0x10] ss:$8 sps:$4 sm:$0xff]   ;;  %v994_v6 = vld [vmem:[%s1144_s28 + $0x24] ss:$8 sps:$4 sm:$0xff]  }
  0x1a   : > { %634 = vmatpush1.bf16.msra.mxu0 %v990_v2  ;;  %v996_v7 = vld [vmem:[%s1144_s28 + $0x20] ss:$8 sps:$4 sm:$0xff]   ;;  %v997_v8 = vld [vmem:[%s1144_s28 + $0x34] ss:$8 sps:$4 sm:$0xff]   ;;  %v999_v9 = vld [vmem:[%s1144_s28 + $0x30] ss:$8 sps:$4 sm:$0xff]  }
  0x1b   : > { %635 = vmatprep.subr.bf16.mxu0 %v991_v4  ;;  %v1012_v10 = vld [vmem:[%s1144_s28 + $0x104] ss:$8 sps:$4 sm:$0xff]   ;;  %v1014_v11 = vld [vmem:[%s1144_s28 + $0x100] ss:$8 sps:$4 sm:$0xff]   ;;  %v1018_v13 = vld [vmem:[%s1144_s28 + $0x114] ss:$8 sps:$4 sm:$0xff]   ;;  %v727_v4 = vlaneseq (!%p954_p7) }
  0x1c   : > { %v1000_v12 = vld [vmem:[%s1144_s28 + $0x44] ss:$8 sps:$4 sm:$0xff]   ;;  %674 = vmatprep.subr.bf16.mxu1 %v1012_v10  ;;  %v1020_v14 = vld [vmem:[%s1144_s28 + $0x110] ss:$8 sps:$4 sm:$0xff]   ;;  %v1002_v15 = vld [vmem:[%s1144_s28 + $0x40] ss:$8 sps:$4 sm:$0xff]  }
  0x1d   : > { %675 = vmatpush1.bf16.msra.mxu1 %v1014_v11  ;;  %v1003_v16 = vld [vmem:[%s1144_s28 + $0x54] ss:$8 sps:$4 sm:$0xff]   ;;  %v1024_v17 = vld [vmem:[%s1144_s28 + $0x124] ss:$8 sps:$4 sm:$0xff]   ;;  %v1026_v18 = vld [vmem:[%s1144_s28 + $0x120] ss:$8 sps:$4 sm:$0xff]  }
  0x1e   : > { %636 = vmatpush1.bf16.msra.mxu0 %v993_v5  ;;  %676 = vmatprep.subr.bf16.mxu1 %v1018_v13  ;;  %v1005_v19 = vld [vmem:[%s1144_s28 + $0x50] ss:$8 sps:$4 sm:$0xff]   ;;  %v1030_v20 = vld [vmem:[%s1144_s28 + $0x134] ss:$8 sps:$4 sm:$0xff]   ;;  %v1006_v21 = vld [vmem:[%s1144_s28 + $0x64] ss:$8 sps:$4 sm:$0xff]  }
  0x1f   : > { %637 = vmatprep.subr.bf16.mxu0 %v994_v6  ;;  %v1032_v22 = vld [vmem:[%s1144_s28 + $0x130] ss:$8 sps:$4 sm:$0xff]   ;;  %v1008_v23 = vld [vmem:[%s1144_s28 + $0x60] ss:$8 sps:$4 sm:$0xff]   ;;  %v1036_v24 = vld [vmem:[%s1144_s28 + $0x144] ss:$8 sps:$4 sm:$0xff]  }
  0x20   : > { %v1009_v25 = vld [vmem:[%s1144_s28 + $0x74] ss:$8 sps:$4 sm:$0xff]   ;;  %v1038_v26 = vld [vmem:[%s1144_s28 + $0x140] ss:$8 sps:$4 sm:$0xff]   ;;  %v1011_v27 = vld [vmem:[%s1144_s28 + $0x70] ss:$8 sps:$4 sm:$0xff]  }
  0x21   : > { %677 = vmatpush1.bf16.msra.mxu1 %v1020_v14  ;;  %v1042_v28 = vld [vmem:[%s1144_s28 + $0x154] ss:$8 sps:$4 sm:$0xff]   ;;  %v1015_v29 = vld [vmem:[%s1144_s28 + $0x84] ss:$8 sps:$4 sm:$0xff]   ;;  %v1044_v30 = vld [vmem:[%s1144_s28 + $0x150] ss:$8 sps:$4 sm:$0xff]  }
  0x22   : > { %638 = vmatpush1.bf16.msra.mxu0 %v996_v7  ;;  %678 = vmatprep.subr.bf16.mxu1 %v1024_v17  ;;  %v1017_v31 = vld [vmem:[%s1144_s28 + $0x80] ss:$8 sps:$4 sm:$0xff]   ;;  %v1048_v32 = vld [vmem:[%s1144_s28 + $0x164] ss:$8 sps:$4 sm:$0xff]   ;;  %v1021_v33 = vld [vmem:[%s1144_s28 + $0x94] ss:$8 sps:$4 sm:$0xff]  }
  0x23   : > { %639 = vmatprep.subr.bf16.mxu0 %v997_v8  ;;  %v332_v34 = vld [vmem:[%s1139_s24] sm:$0xff]  ;;  %v1023_v37 = vld [vmem:[%s1144_s28 + $0x90] ss:$8 sps:$4 sm:$0xff]   ;;  %v1054_v38 = vld [vmem:[%s1144_s28 + $0x174] ss:$8 sps:$4 sm:$0xff]   ;;  %v728_v5 = vshrl.u32 (!%p954_p7), %v727_v4, 7 }
  0x24   : > { %v904_v35 = vcombine.high %v332_v34, %v332_v34  ;;  %v1050_v36 = vld [vmem:[%s1144_s28 + $0x160] ss:$8 sps:$4 sm:$0xff]   ;;  %v1027_v39 = vld [vmem:[%s1144_s28 + $0xa4] ss:$8 sps:$4 sm:$0xff]   ;;  %v1056_v40 = vld [vmem:[%s1144_s28 + $0x170] ss:$8 sps:$4 sm:$0xff]   ;;  %v903_v53 = vcombine.low %v332_v34, %v332_v34 }
  0x25   : > { %679 = vmatpush1.bf16.msra.mxu1 %v1026_v18  ;;  %v1029_v41 = vld [vmem:[%s1144_s28 + $0xa0] ss:$8 sps:$4 sm:$0xff]   ;;  %v1033_v42 = vld [vmem:[%s1144_s28 + $0xb4] ss:$8 sps:$4 sm:$0xff]   ;;  %v1035_v44 = vld [vmem:[%s1144_s28 + $0xb0] ss:$8 sps:$4 sm:$0xff]  }
  0x26   : > { %640 = vmatpush1.bf16.msra.mxu0 %v999_v9  ;;  %680 = vmatprep.subr.bf16.mxu1 %v1030_v20  ;;  %v1060_v43 = vld [vmem:[%s1139_s24 + $0x8] ss:$0 sps:$4 sm:$0xff]   ;;  %v1039_v45 = vld [vmem:[%s1144_s28 + $0xc4] ss:$8 sps:$4 sm:$0xff]   ;;  %v1045_v47 = vld [vmem:[%s1144_s28 + $0xd4] ss:$8 sps:$4 sm:$0xff]  }
  0x27   : > { %641 = vmatprep.subr.bf16.mxu0 %v1000_v12  ;;  %665 = vmatprep.mubr.bf16.mxu0 %v904_v35  ;;  %v1041_v46 = vld [vmem:[%s1144_s28 + $0xc0] ss:$8 sps:$4 sm:$0xff]   ;;  %v1047_v48 = vld [vmem:[%s1144_s28 + $0xd0] ss:$8 sps:$4 sm:$0xff]   ;;  %v1051_v49 = vld [vmem:[%s1144_s28 + $0xe4] ss:$8 sps:$4 sm:$0xff]  }
  0x28   : > { %v1053_v50 = vld [vmem:[%s1144_s28 + $0xe0] ss:$8 sps:$4 sm:$0xff]   ;;  %v1057_v51 = vld [vmem:[%s1144_s28 + $0xf4] ss:$8 sps:$4 sm:$0xff]   ;;  %v1059_v52 = vld [vmem:[%s1144_s28 + $0xf0] ss:$8 sps:$4 sm:$0xff]  }
  0x29   : > { %681 = vmatpush1.bf16.msra.mxu1 %v1032_v22  ;;  %v330_v58 = vld [vmem:[#allocation2] sm:$0xff]  ;;  %v331_v61 = vld [vmem:[#allocation2 + $0x8] sm:$0xff]  ;;  %v729_v8 = vsub.s32 (!%p954_p7), 0, %v728_v5  ;;  %v733_v9 = vsub.s32 (!%p954_p7), 1, %v728_v5 }
  0x2a   : > { %642 = vmatpush1.bf16.msra.mxu0 %v1002_v15  ;;  %682 = vmatprep.subr.bf16.mxu1 %v1036_v24  ;;  %v725_v6 = vld [vmem:[%s1218_s2] sm:$0x3] (!%p954_p7) }
  0x2b   : > { %643 = vmatprep.subr.bf16.mxu0 %v1003_v16  ;;  %v739_v7 = vld [vmem:[%s1219_s3] sm:$0x3] (!%p954_p7)  ;;  %v730_v12 = vrot.slane (!%p954_p7), %v725_v6, %v729_v8  ;;  %v734_v13 = vrot.slane (!%p954_p7), %v725_v6, %v733_v9 }
  0x2c   : > { %v744_v14 = vrot.slane (!%p954_p7), %v739_v7, %v729_v8  ;;  %v748_v15 = vrot.slane (!%p954_p7), %v739_v7, %v733_v9 }
  0x2d   : > { %683 = vmatpush1.bf16.msra.mxu1 %v1038_v26 }
  0x2e   : > { %644 = vmatpush1.bf16.msra.mxu0 %v1005_v19  ;;  %684 = vmatprep.subr.bf16.mxu1 %v1042_v28 }
  0x2f   : > { %645 = vmatprep.subr.bf16.mxu0 %v1006_v21 }
  0x31   : > { %685 = vmatpush1.bf16.msra.mxu1 %v1044_v30 }
  0x32   : > { %646 = vmatpush1.bf16.msra.mxu0 %v1008_v23  ;;  %686 = vmatprep.subr.bf16.mxu1 %v1048_v32 }
  0x33   : > { %647 = vmatprep.subr.bf16.mxu0 %v1009_v25 }
  0x35   : > { %687 = vmatpush1.bf16.msra.mxu1 %v1050_v36 }
  0x36   : > { %648 = vmatpush1.bf16.msra.mxu0 %v1011_v27  ;;  %688 = vmatprep.subr.bf16.mxu1 %v1054_v38 }
  0x37   : > { %649 = vmatprep.subr.bf16.mxu0 %v1015_v29 }
  0x39   : > { %689 = vmatpush1.bf16.msra.mxu1 %v1056_v40 }
  0x3a   : > { %650 = vmatpush1.bf16.msra.mxu0 %v1017_v31 }
  0x3b   : > { %651 = vmatprep.subr.bf16.mxu0 %v1021_v33 }
  0x3c   : > { %707 = vmatmul.mubr.bf16.vlgmr.msra.gmra.mrb[0].mxu1 %v1060_v43 }
  0x3e   : > { %652 = vmatpush1.bf16.msra.mxu0 %v1023_v37 }
  0x3f   : > { %653 = vmatprep.subr.bf16.mxu0 %v1027_v39 }
  0x42   : > { %654 = vmatpush1.bf16.msra.mxu0 %v1029_v41 }
  0x43   : > { %655 = vmatprep.subr.bf16.mxu0 %v1033_v42 }
  0x46   : > { %656 = vmatpush1.bf16.msra.mxu0 %v1035_v44 }
  0x47   : > { %657 = vmatprep.subr.bf16.mxu0 %v1039_v45 }
  0x4a   : > { %658 = vmatpush1.bf16.msra.mxu0 %v1041_v46 }
  0x4b   : > { %659 = vmatprep.subr.bf16.mxu0 %v1045_v47 }
  0x4e   : > { %660 = vmatpush1.bf16.msra.mxu0 %v1047_v48 }
  0x4f   : > { %661 = vmatprep.subr.bf16.mxu0 %v1051_v49 }
  0x52   : > { %662 = vmatpush1.bf16.msra.mxu0 %v1053_v50 }
  0x53   : > { %663 = vmatprep.subr.bf16.mxu0 %v1057_v51 }
  0x56   : > { %664 = vmatpush1.bf16.msra.mxu0 %v1059_v52 }
  0x59   : > { %666 = vmatmul.mubr.bf16.vlgmr.msra.gmra.mrb[0].mxu0 %v903_v53 }
 0x10f   : > { %v708_v54 = vpop.f32.mrb[0].mxu1 }
 0x110   : > { %v710_v55 = vpop.f32.mrb[1].mxu1 }
 0x111   : > { %v712_v56 = vpop.f32.mrb[2].mxu1 }
 0x112   : > { %v713_v57 = vpop.f32.mrb[3].mxu1 }
 0x12c   : > { %v667_v59 = vpop.f32.mrb[0].mxu0  ;;  %722 = sbr.rel (%p954_p7) target bundleno = 323 (0x143), region = 44 }
 0x12d   : > { %v709_v60 = vadd.f32 %v708_v54, %v667_v59  ;;  %v669_v62 = vpop.f32.mrb[1].mxu0 }
 0x12e   : > { %v711_v63 = vadd.f32 %v710_v55, %v669_v62  ;;  %v671_v0 = vpop.f32.mrb[2].mxu0 }
 0x12f   : > { %v715_v1 = vadd.f32 %v709_v60, %v330_v58  ;;  %v672_v2 = vpop.f32.mrb[3].mxu0 }
 0x130   : > { %v716_v3 = vadd.f32 %v711_v63, %v331_v61 }
 0x131   : > { %717 = vst [vmem:[#allocation2] sm:$0xff] %v715_v1 }
 0x132   : > { %718 = vst [vmem:[#allocation2 + $0x8] sm:$0xff] %v716_v3 }
 0x138   : > { %v723_v10 = vld [vmem:[#allocation2] sm:$0xff] }
 0x139   : > { %v724_v11 = vld [vmem:[#allocation2 + $0x8] sm:$0xff]  ;;  %v737_v16 = vmul.f32 %v730_v12, %v723_v10 }
 0x13a   : > { %v738_v17 = vmul.f32 %v734_v13, %v724_v11 }
 0x13b   : > { %v751_v18 = vadd.f32 %v744_v14, %v737_v16 }
 0x13c   : > { %v752_v19 = vadd.f32 %v748_v15, %v738_v17 }
 0x13d   : > { %v753_v20 = vmax.f32 %v751_v18, 0.0 }
 0x13e   : > { %v754_v21 = vmax.f32 %v752_v19, 0.0 }
 0x140   : > { %v961_v22 = vpack.c.bf16 %v754_v21, %v753_v20 }
 0x142   : > { %763 = vst [vmem:[%s1220_s4] sm:$0xff] %v961_v22 }
 0x143 PF: > { %s14_s17 = sadd.s32 1, %s1085_s17   ;;  %s1221_s15 = smov %s1081_s16 }
 0x144   : > { %p11_p8 = scmp.ge.s32.totalorder %s14_s17, 5   ;;  %s1222_s16 = smov %s1224_s18 }
 0x146   :  { %13 = sbr.rel (!%p11_p8) target bundleno = 2 (0x2), region = 83 }

// kernel: resnet_model_mod_forward.57
= control target key start
LH: loop header
LB: loop body
LE: loop exit
PB: predicated region body
PF: predicated region fallthrough
CT: control target
= control target key end

     0   :  { %v257_v1 = vmov 0   ;;  %v175_v18 = vlaneseq  ;;  %s343_s1 = inlined_call_operand.vmem [shape: bf16[128,256], index: 1, kind: input, shape index: {}]   ;;  %s344_s0 = inlined_call_operand.vmem [shape: bf16[8,128], index: 0, kind: input, shape index: {}]   ;;  %s345_s2 = inlined_call_operand.vmem [shape: f32[1,256], index: 2, kind: input, shape index: {}]   ;;  %s346_s3 = inlined_call_operand.vmem [shape: f32[1,256], index: 3, kind: input, shape index: {}]   ;;  %s347_s4 = inlined_call_operand.vmem [shape: bf16[8,256], index: 4, kind: output, shape index: {}]  }
   0x1   :  { %v233_v0 = vld [vmem:[%s343_s1 + $0x4] ss:$8 sps:$4 sm:$0xff]   ;;  %155 = vmatprep.mubr.bf16.mxu0 %v257_v1  ;;  %v235_v2 = vld [vmem:[%s343_s1] ss:$8 sps:$4 sm:$0xff]   ;;  %v236_v3 = vld [vmem:[%s343_s1 + $0x14] ss:$8 sps:$4 sm:$0xff]  }
   0x2   :  { %123 = vmatprep.subr.bf16.mxu0 %v233_v0  ;;  %v238_v4 = vld [vmem:[%s343_s1 + $0x10] ss:$8 sps:$4 sm:$0xff]   ;;  %v239_v5 = vld [vmem:[%s343_s1 + $0x24] ss:$8 sps:$4 sm:$0xff]   ;;  %v241_v6 = vld [vmem:[%s343_s1 + $0x20] ss:$8 sps:$4 sm:$0xff]  }
   0x3   :  { %124 = vmatpush1.bf16.msra.mxu0 %v235_v2  ;;  %v242_v7 = vld [vmem:[%s343_s1 + $0x34] ss:$8 sps:$4 sm:$0xff]   ;;  %v244_v8 = vld [vmem:[%s343_s1 + $0x30] ss:$8 sps:$4 sm:$0xff]   ;;  %v245_v9 = vld [vmem:[%s343_s1 + $0x44] ss:$8 sps:$4 sm:$0xff]  }
   0x4   :  { %125 = vmatprep.subr.bf16.mxu0 %v236_v3  ;;  %v247_v10 = vld [vmem:[%s343_s1 + $0x40] ss:$8 sps:$4 sm:$0xff]   ;;  %v248_v11 = vld [vmem:[%s343_s1 + $0x54] ss:$8 sps:$4 sm:$0xff]   ;;  %v250_v12 = vld [vmem:[%s343_s1 + $0x50] ss:$8 sps:$4 sm:$0xff]  }
   0x5   :  { %v251_v13 = vld [vmem:[%s343_s1 + $0x64] ss:$8 sps:$4 sm:$0xff]   ;;  %v253_v14 = vld [vmem:[%s343_s1 + $0x60] ss:$8 sps:$4 sm:$0xff]   ;;  %v254_v15 = vld [vmem:[%s343_s1 + $0x74] ss:$8 sps:$4 sm:$0xff]  }
   0x6   :  { %v256_v16 = vld [vmem:[%s343_s1 + $0x70] ss:$8 sps:$4 sm:$0xff]   ;;  %v26_v17 = vld [vmem:[%s344_s0] sm:$0xf]  ;;  %v176_v19 = vshrl.u32 %v175_v18, 7 }
   0x7   :  { %126 = vmatpush1.bf16.msra.mxu0 %v238_v4  ;;  %v173_v21 = vld [vmem:[%s345_s2] sm:$0x3] }
   0x8   :  { %127 = vmatprep.subr.bf16.mxu0 %v239_v5  ;;  %v177_v20 = vsub.s32 0, %v176_v19  ;;  %v181_v22 = vsub.s32 1, %v176_v19  ;;  %v187_v23 = vld [vmem:[%s346_s3] sm:$0x3] }
   0xa   :  { %v178_v24 = vrot.slane %v173_v21, %v177_v20  ;;  %v182_v25 = vrot.slane %v173_v21, %v181_v22  ;;  %v192_v26 = vrot.slane %v187_v23, %v177_v20  ;;  %v196_v28 = vrot.slane %v187_v23, %v181_v22 }
   0xb   :  { %128 = vmatpush1.bf16.msra.mxu0 %v241_v6 }
   0xc   :  { %129 = vmatprep.subr.bf16.mxu0 %v242_v7 }
   0xf   :  { %130 = vmatpush1.bf16.msra.mxu0 %v244_v8 }
  0x10   :  { %131 = vmatprep.subr.bf16.mxu0 %v245_v9 }
  0x13   :  { %132 = vmatpush1.bf16.msra.mxu0 %v247_v10 }
  0x14   :  { %133 = vmatprep.subr.bf16.mxu0 %v248_v11 }
  0x17   :  { %134 = vmatpush1.bf16.msra.mxu0 %v250_v12 }
  0x18   :  { %135 = vmatprep.subr.bf16.mxu0 %v251_v13 }
  0x1b   :  { %136 = vmatpush1.bf16.msra.mxu0 %v253_v14 }
  0x1c   :  { %137 = vmatprep.subr.bf16.mxu0 %v254_v15 }
  0x1f   :  { %138 = vmatpush1.bf16.msra.mxu0 %v256_v16 }
  0x22   :  { %156 = vmatmul.mubr.bf16.vlgmr.msra.gmra.mrb[0].mxu0 %v26_v17 }
  0xf5   :  { %v157_v27 = vpop.f32.mrb[0].mxu0 }
  0xf6   :  { %v185_v29 = vmul.f32 %v178_v24, %v157_v27  ;;  %v159_v30 = vpop.f32.mrb[1].mxu0 }
  0xf7   :  { %v186_v31 = vmul.f32 %v182_v25, %v159_v30  ;;  %v161_v32 = vpop.f32.mrb[2].mxu0 }
  0xf8   :  { %v199_v33 = vadd.f32 %v192_v26, %v185_v29  ;;  %v162_v34 = vpop.f32.mrb[3].mxu0 }
  0xf9   :  { %v200_v35 = vadd.f32 %v196_v28, %v186_v31 }
  0xfb   :  { %v231_v36 = vpack.c.bf16 %v200_v35, %v199_v33 }
  0xfd   :  { %209 = vst [vmem:[%s347_s4] sm:$0xff] %v231_v36 }

// kernel: resnet_model_mod_forward.58
= control target key start
LH: loop header
LB: loop body
LE: loop exit
PB: predicated region body
PF: predicated region fallthrough
CT: control target
= control target key end

     0   :  { %s1209_s18 = smov 0   ;;  %s1211_s19 = smov 0   ;;  %s1314_s0 = inlined_call_operand.vmem [shape: bf16[8,2304], index: 0, kind: input, shape index: {}]   ;;  %s1315_s1 = inlined_call_operand.vmem [shape: bf16[2304,256], index: 1, kind: input, shape index: {}]   ;;  %s1316_s2 = inlined_call_operand.vmem [shape: f32[1,256], index: 2, kind: input, shape index: {}]   ;;  %s1317_s3 = inlined_call_operand.vmem [shape: f32[1,256], index: 3, kind: input, shape index: {}]   ;;  %s1318_s4 = inlined_call_operand.vmem [shape: bf16[8,256], index: 4, kind: input, shape index: {}]   ;;  %s1319_s5 = inlined_call_operand.vmem [shape: bf16[8,256], index: 5, kind: output, shape index: {}]  }
   0x1   :  { %s1213_s20 = smov 0  }
   0x2 LB: > { %s27_s21 = sadd.s32 1, %s1171_s19  ;;  %p988_p0 = scmp.ge.s32.totalorder %s1175_s20, 1  ;;  %s1175_s20 = sphi %s1213_s20, %s15_s20   ;;  %s1171_s19 = sphi %s1211_s19, %s1321_s19   ;;  %s1167_s18 = sphi %s1209_s18, %s1320_s18  }
   0x3   : > { %p28_p1 = scmp.ge.s32.totalorder %s27_s21, 6  ;;  %p271_p2 = scmp.lt.s32.totalorder %s1175_s20, 7 }
   0x5   : > { %s1323_s21 = smov (%p28_p1, %s27_s21), 0  ;;  %p272_p3 = pnand %p988_p0, %p271_p2 }
   0x6   : > { %s334_s22 = smul.u32 (!%p272_p3), 3, %s1167_s18  ;;  %p992_p6 = scmp.ne.s32.totalorder (!%p272_p3), %s1167_s18, 0 }
   0x7   : > { %275 = sbr.rel (%p272_p3) target bundleno = 325 (0x145), region = 40 }
   0x8   : > { %s344_s23 = smul.u32 (!%p272_p3), 48, %s1167_s18  ;;  %p337_p4 = scmp.lt.s32.totalorder (!%p272_p3), %s334_s22, 17 }
   0xa   : > { %p346_p5 = scmp.lt.s32.totalorder (!%p272_p3), %s344_s23, 287 }
   0xe   : > { %s1325_s22 = smov (!%p337_p4, %s334_s22), 17  ;;  %s1327_s23 = smov (!%p346_p5, %s344_s23), 287 }
   0xf   : > { %s989_s24 = sshll.u32 %s1325_s22, 2  ;;  %s1050_s28 = sshll.u32 %s1327_s23, 3  ;;  %v1177_v0 = vmov (!%p992_p6), 0.0  }
  0x10   : > { %s1234_s27 = scalar_lea.vmem %s1314_s0, %s989_s24  ;;  %s1239_s6 = scalar_lea.vmem %s1315_s1, %s1050_s28  ;;  %391 = vst [vmem:[#allocation2] sm:$0xff] (!%p992_p6), %v1177_v0  ;;  %392 = vst [vmem:[#allocation2 + $0x8] sm:$0xff] (!%p992_p6), %v1177_v0 }
  0x11   : > { %390 = sbr.rel (%p992_p6) target bundleno = 24 (0x18), region = 44 }
  0x18 PF: > { %v1078_v1 = vld [vmem:[%s1239_s6 + $0x4] ss:$8 sps:$4 sm:$0xff]   ;;  %v1080_v2 = vld [vmem:[%s1239_s6] ss:$8 sps:$4 sm:$0xff]   ;;  %v1178_v3 = vmov 0   ;;  %p1044_p7 = scmp.ne.s32.totalorder %s1167_s18, 5 }
  0x19   : > { %769 = vmatprep.mubr.bf16.mxu1 %v1178_v3  ;;  %696 = vmatprep.subr.bf16.mxu0 %v1078_v1  ;;  %v1081_v4 = vld [vmem:[%s1239_s6 + $0x14] ss:$8 sps:$4 sm:$0xff]   ;;  %v1083_v5 = vld [vmem:[%s1239_s6 + $0x10] ss:$8 sps:$4 sm:$0xff]   ;;  %v1084_v6 = vld [vmem:[%s1239_s6 + $0x24] ss:$8 sps:$4 sm:$0xff]  }
  0x1a   : > { %697 = vmatpush1.bf16.msra.mxu0 %v1080_v2  ;;  %v1086_v7 = vld [vmem:[%s1239_s6 + $0x20] ss:$8 sps:$4 sm:$0xff]   ;;  %v1087_v8 = vld [vmem:[%s1239_s6 + $0x34] ss:$8 sps:$4 sm:$0xff]   ;;  %v1089_v9 = vld [vmem:[%s1239_s6 + $0x30] ss:$8 sps:$4 sm:$0xff]  }
  0x1b   : > { %698 = vmatprep.subr.bf16.mxu0 %v1081_v4  ;;  %v1102_v10 = vld [vmem:[%s1239_s6 + $0x104] ss:$8 sps:$4 sm:$0xff]   ;;  %v1104_v11 = vld [vmem:[%s1239_s6 + $0x100] ss:$8 sps:$4 sm:$0xff]   ;;  %v1108_v13 = vld [vmem:[%s1239_s6 + $0x114] ss:$8 sps:$4 sm:$0xff]   ;;  %v790_v4 = vlaneseq (!%p1044_p7) }
  0x1c   : > { %v1090_v12 = vld [vmem:[%s1239_s6 + $0x44] ss:$8 sps:$4 sm:$0xff]   ;;  %737 = vmatprep.subr.bf16.mxu1 %v1102_v10  ;;  %v1110_v14 = vld [vmem:[%s1239_s6 + $0x110] ss:$8 sps:$4 sm:$0xff]   ;;  %v1092_v15 = vld [vmem:[%s1239_s6 + $0x40] ss:$8 sps:$4 sm:$0xff]  }
  0x1d   : > { %738 = vmatpush1.bf16.msra.mxu1 %v1104_v11  ;;  %v1093_v16 = vld [vmem:[%s1239_s6 + $0x54] ss:$8 sps:$4 sm:$0xff]   ;;  %v1114_v17 = vld [vmem:[%s1239_s6 + $0x124] ss:$8 sps:$4 sm:$0xff]   ;;  %v1116_v18 = vld [vmem:[%s1239_s6 + $0x120] ss:$8 sps:$4 sm:$0xff]  }
  0x1e   : > { %699 = vmatpush1.bf16.msra.mxu0 %v1083_v5  ;;  %739 = vmatprep.subr.bf16.mxu1 %v1108_v13  ;;  %v1095_v19 = vld [vmem:[%s1239_s6 + $0x50] ss:$8 sps:$4 sm:$0xff]   ;;  %v1120_v20 = vld [vmem:[%s1239_s6 + $0x134] ss:$8 sps:$4 sm:$0xff]   ;;  %v1096_v21 = vld [vmem:[%s1239_s6 + $0x64] ss:$8 sps:$4 sm:$0xff]  }
  0x1f   : > { %700 = vmatprep.subr.bf16.mxu0 %v1084_v6  ;;  %v1122_v22 = vld [vmem:[%s1239_s6 + $0x130] ss:$8 sps:$4 sm:$0xff]   ;;  %v1098_v23 = vld [vmem:[%s1239_s6 + $0x60] ss:$8 sps:$4 sm:$0xff]   ;;  %v1126_v24 = vld [vmem:[%s1239_s6 + $0x144] ss:$8 sps:$4 sm:$0xff]  }
  0x20   : > { %v1099_v25 = vld [vmem:[%s1239_s6 + $0x74] ss:$8 sps:$4 sm:$0xff]   ;;  %v1128_v26 = vld [vmem:[%s1239_s6 + $0x140] ss:$8 sps:$4 sm:$0xff]   ;;  %v1101_v27 = vld [vmem:[%s1239_s6 + $0x70] ss:$8 sps:$4 sm:$0xff]  }
  0x21   : > { %740 = vmatpush1.bf16.msra.mxu1 %v1110_v14  ;;  %v1132_v28 = vld [vmem:[%s1239_s6 + $0x154] ss:$8 sps:$4 sm:$0xff]   ;;  %v1105_v29 = vld [vmem:[%s1239_s6 + $0x84] ss:$8 sps:$4 sm:$0xff]   ;;  %v1134_v30 = vld [vmem:[%s1239_s6 + $0x150] ss:$8 sps:$4 sm:$0xff]  }
  0x22   : > { %701 = vmatpush1.bf16.msra.mxu0 %v1086_v7  ;;  %741 = vmatprep.subr.bf16.mxu1 %v1114_v17  ;;  %v1107_v31 = vld [vmem:[%s1239_s6 + $0x80] ss:$8 sps:$4 sm:$0xff]   ;;  %v1138_v32 = vld [vmem:[%s1239_s6 + $0x164] ss:$8 sps:$4 sm:$0xff]   ;;  %v1111_v33 = vld [vmem:[%s1239_s6 + $0x94] ss:$8 sps:$4 sm:$0xff]  }
  0x23   : > { %702 = vmatprep.subr.bf16.mxu0 %v1087_v8  ;;  %v395_v34 = vld [vmem:[%s1234_s27] sm:$0xff]  ;;  %v1113_v37 = vld [vmem:[%s1239_s6 + $0x90] ss:$8 sps:$4 sm:$0xff]   ;;  %v1144_v38 = vld [vmem:[%s1239_s6 + $0x174] ss:$8 sps:$4 sm:$0xff]   ;;  %v791_v5 = vshrl.u32 (!%p1044_p7), %v790_v4, 7 }
  0x24   : > { %v994_v35 = vcombine.high %v395_v34, %v395_v34  ;;  %v1140_v36 = vld [vmem:[%s1239_s6 + $0x160] ss:$8 sps:$4 sm:$0xff]   ;;  %v1117_v39 = vld [vmem:[%s1239_s6 + $0xa4] ss:$8 sps:$4 sm:$0xff]   ;;  %v1146_v40 = vld [vmem:[%s1239_s6 + $0x170] ss:$8 sps:$4 sm:$0xff]   ;;  %v993_v53 = vcombine.low %v395_v34, %v395_v34 }
  0x25   : > { %742 = vmatpush1.bf16.msra.mxu1 %v1116_v18  ;;  %v1119_v41 = vld [vmem:[%s1239_s6 + $0xa0] ss:$8 sps:$4 sm:$0xff]   ;;  %v1123_v42 = vld [vmem:[%s1239_s6 + $0xb4] ss:$8 sps:$4 sm:$0xff]   ;;  %v1125_v44 = vld [vmem:[%s1239_s6 + $0xb0] ss:$8 sps:$4 sm:$0xff]  }
  0x26   : > { %703 = vmatpush1.bf16.msra.mxu0 %v1089_v9  ;;  %743 = vmatprep.subr.bf16.mxu1 %v1120_v20  ;;  %v1150_v43 = vld [vmem:[%s1234_s27 + $0x8] ss:$0 sps:$4 sm:$0xff]   ;;  %v1129_v45 = vld [vmem:[%s1239_s6 + $0xc4] ss:$8 sps:$4 sm:$0xff]   ;;  %v1135_v47 = vld [vmem:[%s1239_s6 + $0xd4] ss:$8 sps:$4 sm:$0xff]  }
  0x27   : > { %704 = vmatprep.subr.bf16.mxu0 %v1090_v12  ;;  %728 = vmatprep.mubr.bf16.mxu0 %v994_v35  ;;  %v1131_v46 = vld [vmem:[%s1239_s6 + $0xc0] ss:$8 sps:$4 sm:$0xff]   ;;  %v1137_v48 = vld [vmem:[%s1239_s6 + $0xd0] ss:$8 sps:$4 sm:$0xff]   ;;  %v1141_v49 = vld [vmem:[%s1239_s6 + $0xe4] ss:$8 sps:$4 sm:$0xff]  }
  0x28   : > { %v1143_v50 = vld [vmem:[%s1239_s6 + $0xe0] ss:$8 sps:$4 sm:$0xff]   ;;  %v1147_v51 = vld [vmem:[%s1239_s6 + $0xf4] ss:$8 sps:$4 sm:$0xff]   ;;  %v1149_v52 = vld [vmem:[%s1239_s6 + $0xf0] ss:$8 sps:$4 sm:$0xff]  }
  0x29   : > { %744 = vmatpush1.bf16.msra.mxu1 %v1122_v22  ;;  %v393_v58 = vld [vmem:[#allocation2] sm:$0xff]  ;;  %v394_v61 = vld [vmem:[#allocation2 + $0x8] sm:$0xff]  ;;  %v792_v8 = vsub.s32 (!%p1044_p7), 0, %v791_v5  ;;  %v796_v9 = vsub.s32 (!%p1044_p7), 1, %v791_v5 }
  0x2a   : > { %705 = vmatpush1.bf16.msra.mxu0 %v1092_v15  ;;  %745 = vmatprep.subr.bf16.mxu1 %v1126_v24  ;;  %v788_v6 = vld [vmem:[%s1316_s2] sm:$0x3] (!%p1044_p7) }
  0x2b   : > { %706 = vmatprep.subr.bf16.mxu0 %v1093_v16  ;;  %v802_v7 = vld [vmem:[%s1317_s3] sm:$0x3] (!%p1044_p7)  ;;  %v793_v13 = vrot.slane (!%p1044_p7), %v788_v6, %v792_v8  ;;  %v797_v14 = vrot.slane (!%p1044_p7), %v788_v6, %v796_v9 }
  0x2c   : > { %v816_v12 = vld [vmem:[%s1318_s4] sm:$0xff] (!%p1044_p7)  ;;  %v807_v15 = vrot.slane (!%p1044_p7), %v802_v7, %v792_v8  ;;  %v811_v16 = vrot.slane (!%p1044_p7), %v802_v7, %v796_v9 }
  0x2d   : > { %746 = vmatpush1.bf16.msra.mxu1 %v1128_v26  ;;  %v818_v20 = vunpack.c.h.bf16 (!%p1044_p7), %v816_v12 }
  0x2e   : > { %707 = vmatpush1.bf16.msra.mxu0 %v1095_v19  ;;  %747 = vmatprep.subr.bf16.mxu1 %v1132_v28  ;;  %v817_v19 = vunpack.c.l.bf16 (!%p1044_p7), %v816_v12 }
  0x2f   : > { %708 = vmatprep.subr.bf16.mxu0 %v1096_v21 }
  0x31   : > { %748 = vmatpush1.bf16.msra.mxu1 %v1134_v30 }
  0x32   : > { %709 = vmatpush1.bf16.msra.mxu0 %v1098_v23  ;;  %749 = vmatprep.subr.bf16.mxu1 %v1138_v32 }
  0x33   : > { %710 = vmatprep.subr.bf16.mxu0 %v1099_v25 }
  0x35   : > { %750 = vmatpush1.bf16.msra.mxu1 %v1140_v36 }
  0x36   : > { %711 = vmatpush1.bf16.msra.mxu0 %v1101_v27  ;;  %751 = vmatprep.subr.bf16.mxu1 %v1144_v38 }
  0x37   : > { %712 = vmatprep.subr.bf16.mxu0 %v1105_v29 }
  0x39   : > { %752 = vmatpush1.bf16.msra.mxu1 %v1146_v40 }
  0x3a   : > { %713 = vmatpush1.bf16.msra.mxu0 %v1107_v31 }
  0x3b   : > { %714 = vmatprep.subr.bf16.mxu0 %v1111_v33 }
  0x3c   : > { %770 = vmatmul.mubr.bf16.vlgmr.msra.gmra.mrb[0].mxu1 %v1150_v43 }
  0x3e   : > { %715 = vmatpush1.bf16.msra.mxu0 %v1113_v37 }
  0x3f   : > { %716 = vmatprep.subr.bf16.mxu0 %v1117_v39 }
  0x42   : > { %717 = vmatpush1.bf16.msra.mxu0 %v1119_v41 }
  0x43   : > { %718 = vmatprep.subr.bf16.mxu0 %v1123_v42 }
  0x46   : > { %719 = vmatpush1.bf16.msra.mxu0 %v1125_v44 }
  0x47   : > { %720 = vmatprep.subr.bf16.mxu0 %v1129_v45 }
  0x4a   : > { %721 = vmatpush1.bf16.msra.mxu0 %v1131_v46 }
  0x4b   : > { %722 = vmatprep.subr.bf16.mxu0 %v1135_v47 }
  0x4e   : > { %723 = vmatpush1.bf16.msra.mxu0 %v1137_v48 }
  0x4f   : > { %724 = vmatprep.subr.bf16.mxu0 %v1141_v49 }
  0x52   : > { %725 = vmatpush1.bf16.msra.mxu0 %v1143_v50 }
  0x53   : > { %726 = vmatprep.subr.bf16.mxu0 %v1147_v51 }
  0x56   : > { %727 = vmatpush1.bf16.msra.mxu0 %v1149_v52 }
  0x59   : > { %729 = vmatmul.mubr.bf16.vlgmr.msra.gmra.mrb[0].mxu0 %v993_v53 }
 0x10f   : > { %v771_v54 = vpop.f32.mrb[0].mxu1 }
 0x110   : > { %v773_v55 = vpop.f32.mrb[1].mxu1 }
 0x111   : > { %v775_v56 = vpop.f32.mrb[2].mxu1 }
 0x112   : > { %v776_v57 = vpop.f32.mrb[3].mxu1 }
 0x12c   : > { %v730_v59 = vpop.f32.mrb[0].mxu0  ;;  %785 = sbr.rel (%p1044_p7) target bundleno = 325 (0x145), region = 48 }
 0x12d   : > { %v772_v60 = vadd.f32 %v771_v54, %v730_v59  ;;  %v732_v62 = vpop.f32.mrb[1].mxu0 }
 0x12e   : > { %v774_v63 = vadd.f32 %v773_v55, %v732_v62  ;;  %v734_v0 = vpop.f32.mrb[2].mxu0 }
 0x12f   : > { %v778_v1 = vadd.f32 %v772_v60, %v393_v58  ;;  %v735_v2 = vpop.f32.mrb[3].mxu0 }
 0x130   : > { %v779_v3 = vadd.f32 %v774_v63, %v394_v61 }
 0x131   : > { %780 = vst [vmem:[#allocation2] sm:$0xff] %v778_v1 }
 0x132   : > { %781 = vst [vmem:[#allocation2 + $0x8] sm:$0xff] %v779_v3 }
 0x138   : > { %v786_v10 = vld [vmem:[#allocation2] sm:$0xff] }
 0x139   : > { %v787_v11 = vld [vmem:[#allocation2 + $0x8] sm:$0xff]  ;;  %v800_v17 = vmul.f32 %v793_v13, %v786_v10 }
 0x13a   : > { %v801_v18 = vmul.f32 %v797_v14, %v787_v11 }
 0x13b   : > { %v814_v21 = vadd.f32 %v807_v15, %v800_v17 }
 0x13c   : > { %v815_v22 = vadd.f32 %v811_v16, %v801_v18 }
 0x13d   : > { %v819_v23 = vadd.f32 %v817_v19, %v814_v21 }
 0x13e   : > { %v820_v24 = vadd.f32 %v818_v20, %v815_v22 }
 0x13f   : > { %v821_v25 = vmax.f32 %v819_v23, 0.0 }
 0x140   : > { %v822_v26 = vmax.f32 %v820_v24, 0.0 }
 0x142   : > { %v1051_v27 = vpack.c.bf16 %v822_v26, %v821_v25 }
 0x144   : > { %831 = vst [vmem:[%s1319_s5] sm:$0xff] %v1051_v27 }
 0x145 PF: > { %s15_s20 = sadd.s32 1, %s1175_s20   ;;  %s1320_s18 = smov %s1171_s19 }
 0x146   : > { %p12_p8 = scmp.ge.s32.totalorder %s15_s20, 8   ;;  %s1321_s19 = smov %s1323_s21 }
 0x148   :  { %14 = sbr.rel (!%p12_p8) target bundleno = 2 (0x2), region = 90 }

// kernel: resnet_model_mod_forward.59
= control target key start
LH: loop header
LB: loop body
LE: loop exit
PB: predicated region body
PF: predicated region fallthrough
CT: control target
= control target key end

     0   :  { %s1114_s15 = smov 0   ;;  %s1116_s16 = smov 0   ;;  %s1216_s0 = inlined_call_operand.vmem [shape: bf16[8,2304], index: 0, kind: input, shape index: {}]   ;;  %s1217_s1 = inlined_call_operand.vmem [shape: bf16[2304,256], index: 1, kind: input, shape index: {}]   ;;  %s1218_s2 = inlined_call_operand.vmem [shape: f32[1,256], index: 2, kind: input, shape index: {}]   ;;  %s1219_s3 = inlined_call_operand.vmem [shape: f32[1,256], index: 3, kind: input, shape index: {}]   ;;  %s1220_s4 = inlined_call_operand.vmem [shape: bf16[8,256], index: 4, kind: output, shape index: {}]  }
   0x1   :  { %s1118_s17 = smov 0  }
   0x2 LB: > { %s26_s18 = sadd.s32 1, %s1081_s16  ;;  %p898_p0 = scmp.ge.s32.totalorder %s1085_s17, 1  ;;  %s1085_s17 = sphi %s1118_s17, %s14_s17   ;;  %s1081_s16 = sphi %s1116_s16, %s1222_s16   ;;  %s1077_s15 = sphi %s1114_s15, %s1221_s15  }
   0x3   : > { %p27_p1 = scmp.ge.s32.totalorder %s26_s18, 6  ;;  %p229_p2 = scmp.lt.s32.totalorder %s1085_s17, 7 }
   0x5   : > { %s1224_s18 = smov (%p27_p1, %s26_s18), 0  ;;  %p230_p3 = pnand %p898_p0, %p229_p2 }
   0x6   : > { %s281_s19 = smul.u32 (!%p230_p3), 3, %s1077_s15  ;;  %p902_p6 = scmp.ne.s32.totalorder (!%p230_p3), %s1077_s15, 0 }
   0x7   : > { %233 = sbr.rel (%p230_p3) target bundleno = 323 (0x143), region = 36 }
   0x8   : > { %s291_s20 = smul.u32 (!%p230_p3), 48, %s1077_s15  ;;  %p284_p4 = scmp.lt.s32.totalorder (!%p230_p3), %s281_s19, 17 }
   0xa   : > { %p293_p5 = scmp.lt.s32.totalorder (!%p230_p3), %s291_s20, 287 }
   0xe   : > { %s1226_s19 = smov (!%p284_p4, %s281_s19), 17  ;;  %s1228_s20 = smov (!%p293_p5, %s291_s20), 287 }
   0xf   : > { %s899_s21 = sshll.u32 %s1226_s19, 2  ;;  %s960_s25 = sshll.u32 %s1228_s20, 3  ;;  %v1087_v0 = vmov (!%p902_p6), 0.0  }
  0x10   : > { %s1139_s24 = scalar_lea.vmem %s1216_s0, %s899_s21  ;;  %s1144_s28 = scalar_lea.vmem %s1217_s1, %s960_s25  ;;  %328 = vst [vmem:[#allocation2] sm:$0xff] (!%p902_p6), %v1087_v0  ;;  %329 = vst [vmem:[#allocation2 + $0x8] sm:$0xff] (!%p902_p6), %v1087_v0 }
  0x11   : > { %327 = sbr.rel (%p902_p6) target bundleno = 24 (0x18), region = 40 }
  0x18 PF: > { %v988_v1 = vld [vmem:[%s1144_s28 + $0x4] ss:$8 sps:$4 sm:$0xff]   ;;  %v990_v2 = vld [vmem:[%s1144_s28] ss:$8 sps:$4 sm:$0xff]   ;;  %v1088_v3 = vmov 0   ;;  %p954_p7 = scmp.ne.s32.totalorder %s1077_s15, 5 }
  0x19   : > { %706 = vmatprep.mubr.bf16.mxu1 %v1088_v3  ;;  %633 = vmatprep.subr.bf16.mxu0 %v988_v1  ;;  %v991_v4 = vld [vmem:[%s1144_s28 + $0x14] ss:$8 sps:$4 sm:$0xff]   ;;  %v993_v5 = vld [vmem:[%s1144_s28 + $0x10] ss:$8 sps:$4 sm:$0xff]   ;;  %v994_v6 = vld [vmem:[%s1144_s28 + $0x24] ss:$8 sps:$4 sm:$0xff]  }
  0x1a   : > { %634 = vmatpush1.bf16.msra.mxu0 %v990_v2  ;;  %v996_v7 = vld [vmem:[%s1144_s28 + $0x20] ss:$8 sps:$4 sm:$0xff]   ;;  %v997_v8 = vld [vmem:[%s1144_s28 + $0x34] ss:$8 sps:$4 sm:$0xff]   ;;  %v999_v9 = vld [vmem:[%s1144_s28 + $0x30] ss:$8 sps:$4 sm:$0xff]  }
  0x1b   : > { %635 = vmatprep.subr.bf16.mxu0 %v991_v4  ;;  %v1012_v10 = vld [vmem:[%s1144_s28 + $0x104] ss:$8 sps:$4 sm:$0xff]   ;;  %v1014_v11 = vld [vmem:[%s1144_s28 + $0x100] ss:$8 sps:$4 sm:$0xff]   ;;  %v1018_v13 = vld [vmem:[%s1144_s28 + $0x114] ss:$8 sps:$4 sm:$0xff]   ;;  %v727_v4 = vlaneseq (!%p954_p7) }
  0x1c   : > { %v1000_v12 = vld [vmem:[%s1144_s28 + $0x44] ss:$8 sps:$4 sm:$0xff]   ;;  %674 = vmatprep.subr.bf16.mxu1 %v1012_v10  ;;  %v1020_v14 = vld [vmem:[%s1144_s28 + $0x110] ss:$8 sps:$4 sm:$0xff]   ;;  %v1002_v15 = vld [vmem:[%s1144_s28 + $0x40] ss:$8 sps:$4 sm:$0xff]  }
  0x1d   : > { %675 = vmatpush1.bf16.msra.mxu1 %v1014_v11  ;;  %v1003_v16 = vld [vmem:[%s1144_s28 + $0x54] ss:$8 sps:$4 sm:$0xff]   ;;  %v1024_v17 = vld [vmem:[%s1144_s28 + $0x124] ss:$8 sps:$4 sm:$0xff]   ;;  %v1026_v18 = vld [vmem:[%s1144_s28 + $0x120] ss:$8 sps:$4 sm:$0xff]  }
  0x1e   : > { %636 = vmatpush1.bf16.msra.mxu0 %v993_v5  ;;  %676 = vmatprep.subr.bf16.mxu1 %v1018_v13  ;;  %v1005_v19 = vld [vmem:[%s1144_s28 + $0x50] ss:$8 sps:$4 sm:$0xff]   ;;  %v1030_v20 = vld [vmem:[%s1144_s28 + $0x134] ss:$8 sps:$4 sm:$0xff]   ;;  %v1006_v21 = vld [vmem:[%s1144_s28 + $0x64] ss:$8 sps:$4 sm:$0xff]  }
  0x1f   : > { %637 = vmatprep.subr.bf16.mxu0 %v994_v6  ;;  %v1032_v22 = vld [vmem:[%s1144_s28 + $0x130] ss:$8 sps:$4 sm:$0xff]   ;;  %v1008_v23 = vld [vmem:[%s1144_s28 + $0x60] ss:$8 sps:$4 sm:$0xff]   ;;  %v1036_v24 = vld [vmem:[%s1144_s28 + $0x144] ss:$8 sps:$4 sm:$0xff]  }
  0x20   : > { %v1009_v25 = vld [vmem:[%s1144_s28 + $0x74] ss:$8 sps:$4 sm:$0xff]   ;;  %v1038_v26 = vld [vmem:[%s1144_s28 + $0x140] ss:$8 sps:$4 sm:$0xff]   ;;  %v1011_v27 = vld [vmem:[%s1144_s28 + $0x70] ss:$8 sps:$4 sm:$0xff]  }
  0x21   : > { %677 = vmatpush1.bf16.msra.mxu1 %v1020_v14  ;;  %v1042_v28 = vld [vmem:[%s1144_s28 + $0x154] ss:$8 sps:$4 sm:$0xff]   ;;  %v1015_v29 = vld [vmem:[%s1144_s28 + $0x84] ss:$8 sps:$4 sm:$0xff]   ;;  %v1044_v30 = vld [vmem:[%s1144_s28 + $0x150] ss:$8 sps:$4 sm:$0xff]  }
  0x22   : > { %638 = vmatpush1.bf16.msra.mxu0 %v996_v7  ;;  %678 = vmatprep.subr.bf16.mxu1 %v1024_v17  ;;  %v1017_v31 = vld [vmem:[%s1144_s28 + $0x80] ss:$8 sps:$4 sm:$0xff]   ;;  %v1048_v32 = vld [vmem:[%s1144_s28 + $0x164] ss:$8 sps:$4 sm:$0xff]   ;;  %v1021_v33 = vld [vmem:[%s1144_s28 + $0x94] ss:$8 sps:$4 sm:$0xff]  }
  0x23   : > { %639 = vmatprep.subr.bf16.mxu0 %v997_v8  ;;  %v332_v34 = vld [vmem:[%s1139_s24] sm:$0xff]  ;;  %v1023_v37 = vld [vmem:[%s1144_s28 + $0x90] ss:$8 sps:$4 sm:$0xff]   ;;  %v1054_v38 = vld [vmem:[%s1144_s28 + $0x174] ss:$8 sps:$4 sm:$0xff]   ;;  %v728_v5 = vshrl.u32 (!%p954_p7), %v727_v4, 7 }
  0x24   : > { %v904_v35 = vcombine.high %v332_v34, %v332_v34  ;;  %v1050_v36 = vld [vmem:[%s1144_s28 + $0x160] ss:$8 sps:$4 sm:$0xff]   ;;  %v1027_v39 = vld [vmem:[%s1144_s28 + $0xa4] ss:$8 sps:$4 sm:$0xff]   ;;  %v1056_v40 = vld [vmem:[%s1144_s28 + $0x170] ss:$8 sps:$4 sm:$0xff]   ;;  %v903_v53 = vcombine.low %v332_v34, %v332_v34 }
  0x25   : > { %679 = vmatpush1.bf16.msra.mxu1 %v1026_v18  ;;  %v1029_v41 = vld [vmem:[%s1144_s28 + $0xa0] ss:$8 sps:$4 sm:$0xff]   ;;  %v1033_v42 = vld [vmem:[%s1144_s28 + $0xb4] ss:$8 sps:$4 sm:$0xff]   ;;  %v1035_v44 = vld [vmem:[%s1144_s28 + $0xb0] ss:$8 sps:$4 sm:$0xff]  }
  0x26   : > { %640 = vmatpush1.bf16.msra.mxu0 %v999_v9  ;;  %680 = vmatprep.subr.bf16.mxu1 %v1030_v20  ;;  %v1060_v43 = vld [vmem:[%s1139_s24 + $0x8] ss:$0 sps:$4 sm:$0xff]   ;;  %v1039_v45 = vld [vmem:[%s1144_s28 + $0xc4] ss:$8 sps:$4 sm:$0xff]   ;;  %v1045_v47 = vld [vmem:[%s1144_s28 + $0xd4] ss:$8 sps:$4 sm:$0xff]  }
  0x27   : > { %641 = vmatprep.subr.bf16.mxu0 %v1000_v12  ;;  %665 = vmatprep.mubr.bf16.mxu0 %v904_v35  ;;  %v1041_v46 = vld [vmem:[%s1144_s28 + $0xc0] ss:$8 sps:$4 sm:$0xff]   ;;  %v1047_v48 = vld [vmem:[%s1144_s28 + $0xd0] ss:$8 sps:$4 sm:$0xff]   ;;  %v1051_v49 = vld [vmem:[%s1144_s28 + $0xe4] ss:$8 sps:$4 sm:$0xff]  }
  0x28   : > { %v1053_v50 = vld [vmem:[%s1144_s28 + $0xe0] ss:$8 sps:$4 sm:$0xff]   ;;  %v1057_v51 = vld [vmem:[%s1144_s28 + $0xf4] ss:$8 sps:$4 sm:$0xff]   ;;  %v1059_v52 = vld [vmem:[%s1144_s28 + $0xf0] ss:$8 sps:$4 sm:$0xff]  }
  0x29   : > { %681 = vmatpush1.bf16.msra.mxu1 %v1032_v22  ;;  %v330_v58 = vld [vmem:[#allocation2] sm:$0xff]  ;;  %v331_v61 = vld [vmem:[#allocation2 + $0x8] sm:$0xff]  ;;  %v729_v8 = vsub.s32 (!%p954_p7), 0, %v728_v5  ;;  %v733_v9 = vsub.s32 (!%p954_p7), 1, %v728_v5 }
  0x2a   : > { %642 = vmatpush1.bf16.msra.mxu0 %v1002_v15  ;;  %682 = vmatprep.subr.bf16.mxu1 %v1036_v24  ;;  %v725_v6 = vld [vmem:[%s1218_s2] sm:$0x3] (!%p954_p7) }
  0x2b   : > { %643 = vmatprep.subr.bf16.mxu0 %v1003_v16  ;;  %v739_v7 = vld [vmem:[%s1219_s3] sm:$0x3] (!%p954_p7)  ;;  %v730_v12 = vrot.slane (!%p954_p7), %v725_v6, %v729_v8  ;;  %v734_v13 = vrot.slane (!%p954_p7), %v725_v6, %v733_v9 }
  0x2c   : > { %v744_v14 = vrot.slane (!%p954_p7), %v739_v7, %v729_v8  ;;  %v748_v15 = vrot.slane (!%p954_p7), %v739_v7, %v733_v9 }
  0x2d   : > { %683 = vmatpush1.bf16.msra.mxu1 %v1038_v26 }
  0x2e   : > { %644 = vmatpush1.bf16.msra.mxu0 %v1005_v19  ;;  %684 = vmatprep.subr.bf16.mxu1 %v1042_v28 }
  0x2f   : > { %645 = vmatprep.subr.bf16.mxu0 %v1006_v21 }
  0x31   : > { %685 = vmatpush1.bf16.msra.mxu1 %v1044_v30 }
  0x32   : > { %646 = vmatpush1.bf16.msra.mxu0 %v1008_v23  ;;  %686 = vmatprep.subr.bf16.mxu1 %v1048_v32 }
  0x33   : > { %647 = vmatprep.subr.bf16.mxu0 %v1009_v25 }
  0x35   : > { %687 = vmatpush1.bf16.msra.mxu1 %v1050_v36 }
  0x36   : > { %648 = vmatpush1.bf16.msra.mxu0 %v1011_v27  ;;  %688 = vmatprep.subr.bf16.mxu1 %v1054_v38 }
  0x37   : > { %649 = vmatprep.subr.bf16.mxu0 %v1015_v29 }
  0x39   : > { %689 = vmatpush1.bf16.msra.mxu1 %v1056_v40 }
  0x3a   : > { %650 = vmatpush1.bf16.msra.mxu0 %v1017_v31 }
  0x3b   : > { %651 = vmatprep.subr.bf16.mxu0 %v1021_v33 }
  0x3c   : > { %707 = vmatmul.mubr.bf16.vlgmr.msra.gmra.mrb[0].mxu1 %v1060_v43 }
  0x3e   : > { %652 = vmatpush1.bf16.msra.mxu0 %v1023_v37 }
  0x3f   : > { %653 = vmatprep.subr.bf16.mxu0 %v1027_v39 }
  0x42   : > { %654 = vmatpush1.bf16.msra.mxu0 %v1029_v41 }
  0x43   : > { %655 = vmatprep.subr.bf16.mxu0 %v1033_v42 }
  0x46   : > { %656 = vmatpush1.bf16.msra.mxu0 %v1035_v44 }
  0x47   : > { %657 = vmatprep.subr.bf16.mxu0 %v1039_v45 }
  0x4a   : > { %658 = vmatpush1.bf16.msra.mxu0 %v1041_v46 }
  0x4b   : > { %659 = vmatprep.subr.bf16.mxu0 %v1045_v47 }
  0x4e   : > { %660 = vmatpush1.bf16.msra.mxu0 %v1047_v48 }
  0x4f   : > { %661 = vmatprep.subr.bf16.mxu0 %v1051_v49 }
  0x52   : > { %662 = vmatpush1.bf16.msra.mxu0 %v1053_v50 }
  0x53   : > { %663 = vmatprep.subr.bf16.mxu0 %v1057_v51 }
  0x56   : > { %664 = vmatpush1.bf16.msra.mxu0 %v1059_v52 }
  0x59   : > { %666 = vmatmul.mubr.bf16.vlgmr.msra.gmra.mrb[0].mxu0 %v903_v53 }
 0x10f   : > { %v708_v54 = vpop.f32.mrb[0].mxu1 }
 0x110   : > { %v710_v55 = vpop.f32.mrb[1].mxu1 }
 0x111   : > { %v712_v56 = vpop.f32.mrb[2].mxu1 }
 0x112   : > { %v713_v57 = vpop.f32.mrb[3].mxu1 }
 0x12c   : > { %v667_v59 = vpop.f32.mrb[0].mxu0  ;;  %722 = sbr.rel (%p954_p7) target bundleno = 323 (0x143), region = 44 }
 0x12d   : > { %v709_v60 = vadd.f32 %v708_v54, %v667_v59  ;;  %v669_v62 = vpop.f32.mrb[1].mxu0 }
 0x12e   : > { %v711_v63 = vadd.f32 %v710_v55, %v669_v62  ;;  %v671_v0 = vpop.f32.mrb[2].mxu0 }
 0x12f   : > { %v715_v1 = vadd.f32 %v709_v60, %v330_v58  ;;  %v672_v2 = vpop.f32.mrb[3].mxu0 }
 0x130   : > { %v716_v3 = vadd.f32 %v711_v63, %v331_v61 }
 0x131   : > { %717 = vst [vmem:[#allocation2] sm:$0xff] %v715_v1 }
 0x132   : > { %718 = vst [vmem:[#allocation2 + $0x8] sm:$0xff] %v716_v3 }
 0x138   : > { %v723_v10 = vld [vmem:[#allocation2] sm:$0xff] }
 0x139   : > { %v724_v11 = vld [vmem:[#allocation2 + $0x8] sm:$0xff]  ;;  %v737_v16 = vmul.f32 %v730_v12, %v723_v10 }
 0x13a   : > { %v738_v17 = vmul.f32 %v734_v13, %v724_v11 }
 0x13b   : > { %v751_v18 = vadd.f32 %v744_v14, %v737_v16 }
 0x13c   : > { %v752_v19 = vadd.f32 %v748_v15, %v738_v17 }
 0x13d   : > { %v753_v20 = vmax.f32 %v751_v18, 0.0 }
 0x13e   : > { %v754_v21 = vmax.f32 %v752_v19, 0.0 }
 0x140   : > { %v961_v22 = vpack.c.bf16 %v754_v21, %v753_v20 }
 0x142   : > { %763 = vst [vmem:[%s1220_s4] sm:$0xff] %v961_v22 }
 0x143 PF: > { %s14_s17 = sadd.s32 1, %s1085_s17   ;;  %s1221_s15 = smov %s1081_s16 }
 0x144   : > { %p11_p8 = scmp.ge.s32.totalorder %s14_s17, 8   ;;  %s1222_s16 = smov %s1224_s18 }
 0x146   :  { %13 = sbr.rel (!%p11_p8) target bundleno = 2 (0x2), region = 83 }

// kernel: resnet_model_mod_forward.69
= control target key start
LH: loop header
LB: loop body
LE: loop exit
PB: predicated region body
PF: predicated region fallthrough
CT: control target
= control target key end

     0   :  { %s1394_s15 = smov 0   ;;  %s1396_s16 = smov 0   ;;  %s1666_s0 = inlined_call_operand.vmem [shape: bf16[8,2304], index: 0, kind: input, shape index: {}]   ;;  %s1667_s1 = inlined_call_operand.vmem [shape: bf16[2304,512], index: 1, kind: input, shape index: {}]   ;;  %s1668_s2 = inlined_call_operand.vmem [shape: f32[1,512], index: 2, kind: input, shape index: {}]   ;;  %s1669_s3 = inlined_call_operand.vmem [shape: f32[1,512], index: 3, kind: input, shape index: {}]   ;;  %s1670_s4 = inlined_call_operand.vmem [shape: bf16[8,512], index: 4, kind: output, shape index: {}]  }
   0x1   :  { %s1398_s17 = smov 0   ;;  %s1400_s18 = smov 0  }
   0x2   :  { %s1402_s19 = smov 0   ;;  %s1404_s20 = smov 0  }
   0x3   :  { %s1406_s21 = smov 0  }
   0x4 LB: > { %s26_s22 = sadd.s32 1, %s1357_s19  ;;  %s29_s23 = sadd.s32 1, %s1361_s20  ;;  %s1365_s21 = sphi %s1406_s21, %s14_s21   ;;  %s1361_s20 = sphi %s1404_s20, %s1676_s20   ;;  %s1357_s19 = sphi %s1402_s19, %s1675_s19   ;;  %s1353_s18 = sphi %s1400_s18, %s1674_s18   ;;  %s1349_s17 = sphi %s1398_s17, %s1673_s17   ;;  %s1345_s16 = sphi %s1396_s16, %s1672_s16   ;;  %s1341_s15 = sphi %s1394_s15, %s1671_s15  }
   0x5   : > { %p27_p0 = scmp.ge.s32.totalorder %s26_s22, 6  ;;  %p77_p1 = scmp.ne.s32.totalorder %s1345_s16, %s1341_s15 }
   0x6   : > { %p78_p2 = scmp.eq.s32.totalorder %s1365_s21, 0  ;;  %s70_s27 = sadd.s32 1, %s1345_s16 }
   0x7   : > { %s1678_s22 = smov (%p27_p0, %s26_s22), 0  ;;  %s1680_s23 = smov (!%p27_p0, %s29_s23), %s1361_s20 }
   0x8   : > { %p79_p3 = por %p78_p2, %p77_p1  ;;  %p31_p4 = scmp.ge.s32.totalorder %s1680_s23, 2 }
   0x9   : > { %s65_s24 = ssub.s32 %s1357_s19, %s1678_s22  ;;  %p1108_p6 = scmp.ge.s32.totalorder %s1365_s21, 12 }
   0xa   : > { %s1682_s23 = smov (%p31_p4, %s1680_s23), 0 }
   0xb   : > { %s66_s25 = ssub.s32 %s1361_s20, %s1682_s23  ;;  %183 = sbr.rel (%p1108_p6) target bundleno = 50 (0x32), region = 16 }
   0xc   : > { %s67_s26 = sor.u32 %s66_s25, %s65_s24 }
   0xd   : > { %p68_p5 = scmp.eq.s32.totalorder %s67_s26, 0 }
   0xf   : > { %s1445_s28 = scalar_select %p68_p5, %s1345_s16, %s70_s27  }
  0x12   : > { %199 = sbr.rel (!%p79_p3) target bundleno = 50 (0x32), region = 24  ;;  %s201_s29 = sand.u32 (%p79_p3), 1, %s1345_s16  }
  0x13   : > { %s1176_s30 = smul.u32 (%p79_p3), 384, %s201_s29  ;;  %s1109_s5 = sshll.u32 (%p79_p3), %s1361_s20, 1 }
  0x14   : > { %s1174_s6 = smul.u32 (%p79_p3), 192, %s1357_s19 }
  0x15   : > { %s1459_s12 = scalar_lea.vmem (%p79_p3), [#allocation3], %s1176_s30 }
  0x16   : > { %s207_s7 = sadd.s32 (%p79_p3), %s1174_s6, %s1109_s5 }
  0x17   : > { %s1111_s8 = sshll.u32 (%p79_p3), %s207_s7, 2 }
  0x18   : > { %s1454_s11 = scalar_lea.vmem (%p79_p3), %s1667_s1, %s1111_s8 }
  0x19   : > { %v331_v0 = vld [vmem:[%s1454_s11] sm:$0xff]  ;;  %v333_v1 = vld [vmem:[%s1454_s11 + $0x10] sm:$0xff] }
  0x1a   : > { %v335_v2 = vld [vmem:[%s1454_s11 + $0x20] sm:$0xff]  ;;  %332 = vst [vmem:[%s1459_s12] sm:$0xff] %v331_v0  ;;  %334 = vst [vmem:[%s1459_s12 + $0x8] sm:$0xff] %v333_v1  ;;  %v337_v3 = vld [vmem:[%s1454_s11 + $0x30] sm:$0xff] }
  0x1b   : > { %336 = vst [vmem:[%s1459_s12 + $0x10] sm:$0xff] %v335_v2  ;;  %v339_v4 = vld [vmem:[%s1454_s11 + $0x40] sm:$0xff]  ;;  %v341_v5 = vld [vmem:[%s1454_s11 + $0x50] sm:$0xff]  ;;  %338 = vst [vmem:[%s1459_s12 + $0x18] sm:$0xff] %v337_v3 }
  0x1c   : > { %340 = vst [vmem:[%s1459_s12 + $0x20] sm:$0xff] %v339_v4  ;;  %342 = vst [vmem:[%s1459_s12 + $0x28] sm:$0xff] %v341_v5  ;;  %v343_v6 = vld [vmem:[%s1454_s11 + $0x60] sm:$0xff]  ;;  %v345_v7 = vld [vmem:[%s1454_s11 + $0x70] sm:$0xff] }
  0x1d   : > { %v347_v8 = vld [vmem:[%s1454_s11 + $0x80] sm:$0xff]  ;;  %344 = vst [vmem:[%s1459_s12 + $0x30] sm:$0xff] %v343_v6  ;;  %346 = vst [vmem:[%s1459_s12 + $0x38] sm:$0xff] %v345_v7  ;;  %v349_v9 = vld [vmem:[%s1454_s11 + $0x90] sm:$0xff] }
  0x1e   : > { %348 = vst [vmem:[%s1459_s12 + $0x40] sm:$0xff] %v347_v8  ;;  %v351_v10 = vld [vmem:[%s1454_s11 + $0xa0] sm:$0xff]  ;;  %v353_v11 = vld [vmem:[%s1454_s11 + $0xb0] sm:$0xff]  ;;  %350 = vst [vmem:[%s1459_s12 + $0x48] sm:$0xff] %v349_v9 }
  0x1f   : > { %352 = vst [vmem:[%s1459_s12 + $0x50] sm:$0xff] %v351_v10  ;;  %354 = vst [vmem:[%s1459_s12 + $0x58] sm:$0xff] %v353_v11  ;;  %v355_v12 = vld [vmem:[%s1454_s11 + $0xc0] sm:$0xff]  ;;  %v357_v13 = vld [vmem:[%s1454_s11 + $0xd0] sm:$0xff] }
  0x20   : > { %v359_v14 = vld [vmem:[%s1454_s11 + $0xe0] sm:$0xff]  ;;  %356 = vst [vmem:[%s1459_s12 + $0x60] sm:$0xff] %v355_v12  ;;  %358 = vst [vmem:[%s1459_s12 + $0x68] sm:$0xff] %v357_v13  ;;  %v361_v15 = vld [vmem:[%s1454_s11 + $0xf0] sm:$0xff] }
  0x21   : > { %360 = vst [vmem:[%s1459_s12 + $0x70] sm:$0xff] %v359_v14  ;;  %v363_v16 = vld [vmem:[%s1454_s11 + $0x100] sm:$0xff]  ;;  %v365_v17 = vld [vmem:[%s1454_s11 + $0x110] sm:$0xff]  ;;  %362 = vst [vmem:[%s1459_s12 + $0x78] sm:$0xff] %v361_v15 }
  0x22   : > { %364 = vst [vmem:[%s1459_s12 + $0x80] sm:$0xff] %v363_v16  ;;  %366 = vst [vmem:[%s1459_s12 + $0x88] sm:$0xff] %v365_v17  ;;  %v367_v18 = vld [vmem:[%s1454_s11 + $0x120] sm:$0xff]  ;;  %v369_v19 = vld [vmem:[%s1454_s11 + $0x130] sm:$0xff] }
  0x23   : > { %v371_v20 = vld [vmem:[%s1454_s11 + $0x140] sm:$0xff]  ;;  %368 = vst [vmem:[%s1459_s12 + $0x90] sm:$0xff] %v367_v18  ;;  %370 = vst [vmem:[%s1459_s12 + $0x98] sm:$0xff] %v369_v19  ;;  %v373_v21 = vld [vmem:[%s1454_s11 + $0x150] sm:$0xff] }
  0x24   : > { %372 = vst [vmem:[%s1459_s12 + $0xa0] sm:$0xff] %v371_v20  ;;  %v375_v22 = vld [vmem:[%s1454_s11 + $0x160] sm:$0xff]  ;;  %v377_v23 = vld [vmem:[%s1454_s11 + $0x170] sm:$0xff]  ;;  %374 = vst [vmem:[%s1459_s12 + $0xa8] sm:$0xff] %v373_v21 }
  0x25   : > { %376 = vst [vmem:[%s1459_s12 + $0xb0] sm:$0xff] %v375_v22  ;;  %378 = vst [vmem:[%s1459_s12 + $0xb8] sm:$0xff] %v377_v23  ;;  %v379_v24 = vld [vmem:[%s1454_s11 + $0x180] sm:$0xff]  ;;  %v381_v25 = vld [vmem:[%s1454_s11 + $0x190] sm:$0xff] }
  0x26   : > { %v383_v26 = vld [vmem:[%s1454_s11 + $0x1a0] sm:$0xff]  ;;  %380 = vst [vmem:[%s1459_s12 + $0xc0] sm:$0xff] %v379_v24  ;;  %382 = vst [vmem:[%s1459_s12 + $0xc8] sm:$0xff] %v381_v25  ;;  %v385_v27 = vld [vmem:[%s1454_s11 + $0x1b0] sm:$0xff] }
  0x27   : > { %384 = vst [vmem:[%s1459_s12 + $0xd0] sm:$0xff] %v383_v26  ;;  %v387_v28 = vld [vmem:[%s1454_s11 + $0x1c0] sm:$0xff]  ;;  %v389_v29 = vld [vmem:[%s1454_s11 + $0x1d0] sm:$0xff]  ;;  %386 = vst [vmem:[%s1459_s12 + $0xd8] sm:$0xff] %v385_v27 }
  0x28   : > { %388 = vst [vmem:[%s1459_s12 + $0xe0] sm:$0xff] %v387_v28  ;;  %390 = vst [vmem:[%s1459_s12 + $0xe8] sm:$0xff] %v389_v29  ;;  %v391_v30 = vld [vmem:[%s1454_s11 + $0x1e0] sm:$0xff]  ;;  %v393_v31 = vld [vmem:[%s1454_s11 + $0x1f0] sm:$0xff] }
  0x29   : > { %v395_v32 = vld [vmem:[%s1454_s11 + $0x200] sm:$0xff]  ;;  %392 = vst [vmem:[%s1459_s12 + $0xf0] sm:$0xff] %v391_v30  ;;  %394 = vst [vmem:[%s1459_s12 + $0xf8] sm:$0xff] %v393_v31  ;;  %v397_v33 = vld [vmem:[%s1454_s11 + $0x210] sm:$0xff] }
  0x2a   : > { %396 = vst [vmem:[%s1459_s12 + $0x100] sm:$0xff] %v395_v32  ;;  %v399_v34 = vld [vmem:[%s1454_s11 + $0x220] sm:$0xff]  ;;  %v401_v35 = vld [vmem:[%s1454_s11 + $0x230] sm:$0xff]  ;;  %398 = vst [vmem:[%s1459_s12 + $0x108] sm:$0xff] %v397_v33 }
  0x2b   : > { %400 = vst [vmem:[%s1459_s12 + $0x110] sm:$0xff] %v399_v34  ;;  %402 = vst [vmem:[%s1459_s12 + $0x118] sm:$0xff] %v401_v35  ;;  %v403_v36 = vld [vmem:[%s1454_s11 + $0x240] sm:$0xff]  ;;  %v405_v37 = vld [vmem:[%s1454_s11 + $0x250] sm:$0xff] }
  0x2c   : > { %v407_v38 = vld [vmem:[%s1454_s11 + $0x260] sm:$0xff]  ;;  %404 = vst [vmem:[%s1459_s12 + $0x120] sm:$0xff] %v403_v36  ;;  %406 = vst [vmem:[%s1459_s12 + $0x128] sm:$0xff] %v405_v37  ;;  %v409_v39 = vld [vmem:[%s1454_s11 + $0x270] sm:$0xff] }
  0x2d   : > { %408 = vst [vmem:[%s1459_s12 + $0x130] sm:$0xff] %v407_v38  ;;  %v411_v40 = vld [vmem:[%s1454_s11 + $0x280] sm:$0xff]  ;;  %v413_v41 = vld [vmem:[%s1454_s11 + $0x290] sm:$0xff]  ;;  %410 = vst [vmem:[%s1459_s12 + $0x138] sm:$0xff] %v409_v39 }
  0x2e   : > { %412 = vst [vmem:[%s1459_s12 + $0x140] sm:$0xff] %v411_v40  ;;  %414 = vst [vmem:[%s1459_s12 + $0x148] sm:$0xff] %v413_v41  ;;  %v415_v42 = vld [vmem:[%s1454_s11 + $0x2a0] sm:$0xff]  ;;  %v417_v43 = vld [vmem:[%s1454_s11 + $0x2b0] sm:$0xff] }
  0x2f   : > { %v419_v44 = vld [vmem:[%s1454_s11 + $0x2c0] sm:$0xff]  ;;  %416 = vst [vmem:[%s1459_s12 + $0x150] sm:$0xff] %v415_v42  ;;  %418 = vst [vmem:[%s1459_s12 + $0x158] sm:$0xff] %v417_v43  ;;  %v421_v45 = vld [vmem:[%s1454_s11 + $0x2d0] sm:$0xff] }
  0x30   : > { %420 = vst [vmem:[%s1459_s12 + $0x160] sm:$0xff] %v419_v44  ;;  %v423_v46 = vld [vmem:[%s1454_s11 + $0x2e0] sm:$0xff]  ;;  %v425_v47 = vld [vmem:[%s1454_s11 + $0x2f0] sm:$0xff]  ;;  %422 = vst [vmem:[%s1459_s12 + $0x168] sm:$0xff] %v421_v45 }
  0x31   : > { %424 = vst [vmem:[%s1459_s12 + $0x170] sm:$0xff] %v423_v46  ;;  %426 = vst [vmem:[%s1459_s12 + $0x178] sm:$0xff] %v425_v47 }
  0x32 PF: > { %p1112_p7 = scmp.ge.s32.totalorder %s1365_s21, 1  ;;  %p447_p8 = scmp.lt.s32.totalorder %s1365_s21, 13 }
  0x34   : > { %p448_p9 = pnand %p1112_p7, %p447_p8 }
  0x35   : > { %s454_s13 = sand.u32 (!%p448_p9), 1, %s1341_s15   ;;  %s500_s14 = smul.u32 (!%p448_p9), 3, %s1349_s17 }
  0x36   : > { %451 = sbr.rel (%p448_p9) target bundleno = 370 (0x172), region = 70  ;;  %s1114_s25 = sshll.u32 (!%p448_p9), %s1353_s18, 1 }
  0x37   : > { %s1177_s24 = smul.u32 (!%p448_p9), 384, %s454_s13  ;;  %p503_p10 = scmp.lt.s32.totalorder (!%p448_p9), %s500_s14, 17 }
  0x38   : > { %p513_p11 = scmp.lt.s32.totalorder (!%p448_p9), %s1114_s25, 3  ;;  %p1118_p12 = scmp.ne.s32.totalorder (!%p448_p9), %s1349_s17, 0 }
  0x39   : > { %s1580_s13 = scalar_lea.vmem (!%p448_p9), [#allocation3], %s1177_s24 }
  0x3d   : > { %s1684_s14 = smov (!%p503_p10, %s500_s14), 17  ;;  %s1686_s25 = smov (!%p513_p11, %s1114_s25), 3 }
  0x3e   : > { %s1113_s26 = sshll.u32 %s1684_s14, 2  ;;  %s515_s15 = scalar_lea.vmem %s1668_s2, %s1686_s25  ;;  %v1367_v48 = vmov (!%p1118_p12), 0.0  }
  0x3f   : > { %s1564_s30 = scalar_lea.vmem %s1666_s0, %s1113_s26  ;;  %s520_s8 = scalar_lea.vmem %s1669_s3, %s1686_s25  ;;  %537 = vst [vmem:[#allocation2] sm:$0xff] (!%p1118_p12), %v1367_v48  ;;  %538 = vst [vmem:[#allocation2 + $0x8] sm:$0xff] (!%p1118_p12), %v1367_v48 }
  0x40   : > { %s1117_s9 = sshll.u32 %s1686_s25, 2  ;;  %536 = sbr.rel (%p1118_p12) target bundleno = 71 (0x47), region = 78 }
  0x41   : > { %s1578_s12 = scalar_lea.vmem %s1670_s4, %s1117_s9 }
  0x47 PF: > { %v1236_v49 = vld [vmem:[%s1580_s13 + $0x4] ss:$8 sps:$4 sm:$0xff]   ;;  %v1238_v50 = vld [vmem:[%s1580_s13] ss:$8 sps:$4 sm:$0xff]   ;;  %v1368_v51 = vmov 0   ;;  %v541_v18 = vld [vmem:[%s1564_s30] sm:$0xff] }
  0x48   : > { %915 = vmatprep.mubr.bf16.mxu1 %v1368_v51  ;;  %842 = vmatprep.subr.bf16.mxu0 %v1236_v49  ;;  %v1239_v52 = vld [vmem:[%s1580_s13 + $0x14] ss:$8 sps:$4 sm:$0xff]   ;;  %v1241_v53 = vld [vmem:[%s1580_s13 + $0x10] ss:$8 sps:$4 sm:$0xff]   ;;  %v1242_v54 = vld [vmem:[%s1580_s13 + $0x24] ss:$8 sps:$4 sm:$0xff]   ;;  %v1120_v19 = vcombine.high %v541_v18, %v541_v18  ;;  %v1119_v37 = vcombine.low %v541_v18, %v541_v18 }
  0x49   : > { %843 = vmatpush1.bf16.msra.mxu0 %v1238_v50  ;;  %v1244_v55 = vld [vmem:[%s1580_s13 + $0x20] ss:$8 sps:$4 sm:$0xff]   ;;  %v1245_v56 = vld [vmem:[%s1580_s13 + $0x34] ss:$8 sps:$4 sm:$0xff]   ;;  %v1247_v57 = vld [vmem:[%s1580_s13 + $0x30] ss:$8 sps:$4 sm:$0xff]  }
  0x4a   : > { %844 = vmatprep.subr.bf16.mxu0 %v1239_v52  ;;  %v1260_v58 = vld [vmem:[%s1580_s13 + $0x104] ss:$8 sps:$4 sm:$0xff]   ;;  %v1262_v59 = vld [vmem:[%s1580_s13 + $0x100] ss:$8 sps:$4 sm:$0xff]   ;;  %v1266_v61 = vld [vmem:[%s1580_s13 + $0x114] ss:$8 sps:$4 sm:$0xff]   ;;  %874 = vmatprep.mubr.bf16.mxu0 %v1120_v19 }
  0x4b   : > { %v1248_v60 = vld [vmem:[%s1580_s13 + $0x44] ss:$8 sps:$4 sm:$0xff]   ;;  %883 = vmatprep.subr.bf16.mxu1 %v1260_v58  ;;  %v1268_v62 = vld [vmem:[%s1580_s13 + $0x110] ss:$8 sps:$4 sm:$0xff]   ;;  %v1250_v63 = vld [vmem:[%s1580_s13 + $0x40] ss:$8 sps:$4 sm:$0xff]  }
  0x4c   : > { %884 = vmatpush1.bf16.msra.mxu1 %v1262_v59  ;;  %v1251_v0 = vld [vmem:[%s1580_s13 + $0x54] ss:$8 sps:$4 sm:$0xff]   ;;  %v1272_v1 = vld [vmem:[%s1580_s13 + $0x124] ss:$8 sps:$4 sm:$0xff]   ;;  %v1274_v2 = vld [vmem:[%s1580_s13 + $0x120] ss:$8 sps:$4 sm:$0xff]  }
  0x4d   : > { %845 = vmatpush1.bf16.msra.mxu0 %v1241_v53  ;;  %885 = vmatprep.subr.bf16.mxu1 %v1266_v61  ;;  %v1253_v3 = vld [vmem:[%s1580_s13 + $0x50] ss:$8 sps:$4 sm:$0xff]   ;;  %v1278_v4 = vld [vmem:[%s1580_s13 + $0x134] ss:$8 sps:$4 sm:$0xff]   ;;  %v1254_v5 = vld [vmem:[%s1580_s13 + $0x64] ss:$8 sps:$4 sm:$0xff]  }
  0x4e   : > { %846 = vmatprep.subr.bf16.mxu0 %v1242_v54  ;;  %v1280_v6 = vld [vmem:[%s1580_s13 + $0x130] ss:$8 sps:$4 sm:$0xff]   ;;  %v1256_v7 = vld [vmem:[%s1580_s13 + $0x60] ss:$8 sps:$4 sm:$0xff]   ;;  %v1284_v8 = vld [vmem:[%s1580_s13 + $0x144] ss:$8 sps:$4 sm:$0xff]  }
  0x4f   : > { %v1257_v9 = vld [vmem:[%s1580_s13 + $0x74] ss:$8 sps:$4 sm:$0xff]   ;;  %v1286_v10 = vld [vmem:[%s1580_s13 + $0x140] ss:$8 sps:$4 sm:$0xff]   ;;  %v1259_v11 = vld [vmem:[%s1580_s13 + $0x70] ss:$8 sps:$4 sm:$0xff]  }
  0x50   : > { %886 = vmatpush1.bf16.msra.mxu1 %v1268_v62  ;;  %v1290_v12 = vld [vmem:[%s1580_s13 + $0x154] ss:$8 sps:$4 sm:$0xff]   ;;  %v1263_v13 = vld [vmem:[%s1580_s13 + $0x84] ss:$8 sps:$4 sm:$0xff]   ;;  %v1292_v14 = vld [vmem:[%s1580_s13 + $0x150] ss:$8 sps:$4 sm:$0xff]  }
  0x51   : > { %847 = vmatpush1.bf16.msra.mxu0 %v1244_v55  ;;  %887 = vmatprep.subr.bf16.mxu1 %v1272_v1  ;;  %v1265_v15 = vld [vmem:[%s1580_s13 + $0x80] ss:$8 sps:$4 sm:$0xff]   ;;  %v1296_v16 = vld [vmem:[%s1580_s13 + $0x164] ss:$8 sps:$4 sm:$0xff]   ;;  %v1269_v17 = vld [vmem:[%s1580_s13 + $0x94] ss:$8 sps:$4 sm:$0xff]  }
  0x52   : > { %848 = vmatprep.subr.bf16.mxu0 %v1245_v56  ;;  %v1298_v20 = vld [vmem:[%s1580_s13 + $0x160] ss:$8 sps:$4 sm:$0xff]   ;;  %v1271_v21 = vld [vmem:[%s1580_s13 + $0x90] ss:$8 sps:$4 sm:$0xff]   ;;  %v1302_v22 = vld [vmem:[%s1580_s13 + $0x174] ss:$8 sps:$4 sm:$0xff]  }
  0x53   : > { %v1275_v23 = vld [vmem:[%s1580_s13 + $0xa4] ss:$8 sps:$4 sm:$0xff]   ;;  %v1304_v24 = vld [vmem:[%s1580_s13 + $0x170] ss:$8 sps:$4 sm:$0xff]   ;;  %v1277_v25 = vld [vmem:[%s1580_s13 + $0xa0] ss:$8 sps:$4 sm:$0xff]  }
  0x54   : > { %888 = vmatpush1.bf16.msra.mxu1 %v1274_v2  ;;  %v1281_v26 = vld [vmem:[%s1580_s13 + $0xb4] ss:$8 sps:$4 sm:$0xff]   ;;  %v1308_v27 = vld [vmem:[%s1564_s30 + $0x8] ss:$0 sps:$4 sm:$0xff]   ;;  %v1287_v29 = vld [vmem:[%s1580_s13 + $0xc4] ss:$8 sps:$4 sm:$0xff]  }
  0x55   : > { %849 = vmatpush1.bf16.msra.mxu0 %v1247_v57  ;;  %889 = vmatprep.subr.bf16.mxu1 %v1278_v4  ;;  %v1283_v28 = vld [vmem:[%s1580_s13 + $0xb0] ss:$8 sps:$4 sm:$0xff]   ;;  %v1289_v30 = vld [vmem:[%s1580_s13 + $0xc0] ss:$8 sps:$4 sm:$0xff]   ;;  %v1293_v31 = vld [vmem:[%s1580_s13 + $0xd4] ss:$8 sps:$4 sm:$0xff]  }
  0x56   : > { %850 = vmatprep.subr.bf16.mxu0 %v1248_v60  ;;  %v1295_v32 = vld [vmem:[%s1580_s13 + $0xd0] ss:$8 sps:$4 sm:$0xff]   ;;  %v1299_v33 = vld [vmem:[%s1580_s13 + $0xe4] ss:$8 sps:$4 sm:$0xff]   ;;  %v1301_v34 = vld [vmem:[%s1580_s13 + $0xe0] ss:$8 sps:$4 sm:$0xff]  }
  0x57   : > { %v1305_v35 = vld [vmem:[%s1580_s13 + $0xf4] ss:$8 sps:$4 sm:$0xff]   ;;  %v1307_v36 = vld [vmem:[%s1580_s13 + $0xf0] ss:$8 sps:$4 sm:$0xff]   ;;  %p1170_p13 = scmp.ne.s32.totalorder %s1349_s17, 5 }
  0x58   : > { %890 = vmatpush1.bf16.msra.mxu1 %v1280_v6  ;;  %v539_v42 = vld [vmem:[#allocation2] sm:$0xff]  ;;  %v540_v45 = vld [vmem:[#allocation2 + $0x8] sm:$0xff]  ;;  %v936_v52 = vlaneseq (!%p1170_p13) }
  0x59   : > { %851 = vmatpush1.bf16.msra.mxu0 %v1250_v63  ;;  %891 = vmatprep.subr.bf16.mxu1 %v1284_v8  ;;  %v934_v54 = vld [vmem:[%s515_s15] sm:$0x3] (!%p1170_p13) }
  0x5a   : > { %852 = vmatprep.subr.bf16.mxu0 %v1251_v0  ;;  %v937_v53 = vshrl.u32 (!%p1170_p13), %v936_v52, 7  ;;  %v948_v55 = vld [vmem:[%s520_s8] sm:$0x3] (!%p1170_p13) }
  0x5c   : > { %892 = vmatpush1.bf16.msra.mxu1 %v1286_v10  ;;  %v938_v56 = vsub.s32 (!%p1170_p13), 0, %v937_v53  ;;  %v942_v57 = vsub.s32 (!%p1170_p13), 1, %v937_v53 }
  0x5d   : > { %853 = vmatpush1.bf16.msra.mxu0 %v1253_v3  ;;  %893 = vmatprep.subr.bf16.mxu1 %v1290_v12 }
  0x5e   : > { %854 = vmatprep.subr.bf16.mxu0 %v1254_v5  ;;  %v939_v60 = vrot.slane (!%p1170_p13), %v934_v54, %v938_v56  ;;  %v943_v61 = vrot.slane (!%p1170_p13), %v934_v54, %v942_v57  ;;  %v953_v62 = vrot.slane (!%p1170_p13), %v948_v55, %v938_v56  ;;  %v957_v63 = vrot.slane (!%p1170_p13), %v948_v55, %v942_v57 }
  0x60   : > { %894 = vmatpush1.bf16.msra.mxu1 %v1292_v14 }
  0x61   : > { %855 = vmatpush1.bf16.msra.mxu0 %v1256_v7  ;;  %895 = vmatprep.subr.bf16.mxu1 %v1296_v16 }
  0x62   : > { %856 = vmatprep.subr.bf16.mxu0 %v1257_v9 }
  0x64   : > { %896 = vmatpush1.bf16.msra.mxu1 %v1298_v20 }
  0x65   : > { %857 = vmatpush1.bf16.msra.mxu0 %v1259_v11  ;;  %897 = vmatprep.subr.bf16.mxu1 %v1302_v22 }
  0x66   : > { %858 = vmatprep.subr.bf16.mxu0 %v1263_v13 }
  0x68   : > { %898 = vmatpush1.bf16.msra.mxu1 %v1304_v24 }
  0x69   : > { %859 = vmatpush1.bf16.msra.mxu0 %v1265_v15 }
  0x6a   : > { %860 = vmatprep.subr.bf16.mxu0 %v1269_v17 }
  0x6b   : > { %916 = vmatmul.mubr.bf16.vlgmr.msra.gmra.mrb[0].mxu1 %v1308_v27 }
  0x6d   : > { %861 = vmatpush1.bf16.msra.mxu0 %v1271_v21 }
  0x6e   : > { %862 = vmatprep.subr.bf16.mxu0 %v1275_v23 }
  0x71   : > { %863 = vmatpush1.bf16.msra.mxu0 %v1277_v25 }
  0x72   : > { %864 = vmatprep.subr.bf16.mxu0 %v1281_v26 }
  0x75   : > { %865 = vmatpush1.bf16.msra.mxu0 %v1283_v28 }
  0x76   : > { %866 = vmatprep.subr.bf16.mxu0 %v1287_v29 }
  0x79   : > { %867 = vmatpush1.bf16.msra.mxu0 %v1289_v30 }
  0x7a   : > { %868 = vmatprep.subr.bf16.mxu0 %v1293_v31 }
  0x7d   : > { %869 = vmatpush1.bf16.msra.mxu0 %v1295_v32 }
  0x7e   : > { %870 = vmatprep.subr.bf16.mxu0 %v1299_v33 }
  0x81   : > { %871 = vmatpush1.bf16.msra.mxu0 %v1301_v34 }
  0x82   : > { %872 = vmatprep.subr.bf16.mxu0 %v1305_v35 }
  0x85   : > { %873 = vmatpush1.bf16.msra.mxu0 %v1307_v36 }
  0x88   : > { %875 = vmatmul.mubr.bf16.vlgmr.msra.gmra.mrb[0].mxu0 %v1119_v37 }
 0x13e   : > { %v917_v38 = vpop.f32.mrb[0].mxu1 }
 0x13f   : > { %v919_v39 = vpop.f32.mrb[1].mxu1 }
 0x140   : > { %v921_v40 = vpop.f32.mrb[2].mxu1 }
 0x141   : > { %v922_v41 = vpop.f32.mrb[3].mxu1 }
 0x15b   : > { %v876_v43 = vpop.f32.mrb[0].mxu0  ;;  %931 = sbr.rel (%p1170_p13) target bundleno = 370 (0x172), region = 82 }
 0x15c   : > { %v918_v44 = vadd.f32 %v917_v38, %v876_v43  ;;  %v878_v46 = vpop.f32.mrb[1].mxu0 }
 0x15d   : > { %v920_v47 = vadd.f32 %v919_v39, %v878_v46  ;;  %v880_v48 = vpop.f32.mrb[2].mxu0 }
 0x15e   : > { %v924_v49 = vadd.f32 %v918_v44, %v539_v42  ;;  %v881_v50 = vpop.f32.mrb[3].mxu0 }
 0x15f   : > { %v925_v51 = vadd.f32 %v920_v47, %v540_v45 }
 0x160   : > { %926 = vst [vmem:[#allocation2] sm:$0xff] %v924_v49 }
 0x161   : > { %927 = vst [vmem:[#allocation2 + $0x8] sm:$0xff] %v925_v51 }
 0x167   : > { %v932_v58 = vld [vmem:[#allocation2] sm:$0xff] }
 0x168   : > { %v933_v59 = vld [vmem:[#allocation2 + $0x8] sm:$0xff]  ;;  %v946_v0 = vmul.f32 %v939_v60, %v932_v58 }
 0x169   : > { %v947_v1 = vmul.f32 %v943_v61, %v933_v59 }
 0x16a   : > { %v960_v2 = vadd.f32 %v953_v62, %v946_v0 }
 0x16b   : > { %v961_v3 = vadd.f32 %v957_v63, %v947_v1 }
 0x16c   : > { %v962_v4 = vmax.f32 %v960_v2, 0.0 }
 0x16d   : > { %v963_v5 = vmax.f32 %v961_v3, 0.0 }
 0x16f   : > { %v1175_v6 = vpack.c.bf16 %v963_v5, %v962_v4 }
 0x171   : > { %972 = vst [vmem:[%s1578_s12] sm:$0xff] %v1175_v6 }
 0x172 PF: > { %s14_s21 = sadd.s32 1, %s1365_s21   ;;  %s1671_s15 = smov %s1345_s16 }
 0x173   : > { %p11_p0 = scmp.ge.s32.totalorder %s14_s21, 14   ;;  %s1672_s16 = smov %s1445_s28 }
 0x174   : > { %s1673_s17 = smov %s1357_s19  ;;  %s1674_s18 = smov %s1361_s20 }
 0x175   : > { %s1675_s19 = smov %s1678_s22  ;;  %s1676_s20 = smov %s1682_s23 }
 0x176   :  { %13 = sbr.rel (!%p11_p0) target bundleno = 4 (0x4), region = 126 }

// kernel: resnet_model_mod_forward.70
= control target key start
LH: loop header
LB: loop body
LE: loop exit
PB: predicated region body
PF: predicated region fallthrough
CT: control target
= control target key end

     0   :  { %s1103_s15 = smov 0   ;;  %s1105_s16 = smov 0   ;;  %s1285_s0 = inlined_call_operand.vmem [shape: bf16[8,256], index: 0, kind: input, shape index: {}]   ;;  %s1286_s1 = inlined_call_operand.vmem [shape: bf16[256,512], index: 1, kind: input, shape index: {}]   ;;  %s1287_s2 = inlined_call_operand.vmem [shape: f32[1,512], index: 2, kind: input, shape index: {}]   ;;  %s1288_s3 = inlined_call_operand.vmem [shape: f32[1,512], index: 3, kind: input, shape index: {}]   ;;  %s1289_s4 = inlined_call_operand.vmem [shape: bf16[8,512], index: 4, kind: output, shape index: {}]  }
   0x1   :  { %s1107_s17 = smov 0   ;;  %s1109_s18 = smov 0  }
   0x2   :  { %s1111_s19 = smov 0  }
   0x3 LB: > { %s29_s20 = sadd.s32 1, %s1072_s18  ;;  %p77_p1 = scmp.ne.s32.totalorder %s1064_s16, %s1060_s15  ;;  %s1076_s19 = sphi %s1111_s19, %s14_s19   ;;  %s1072_s18 = sphi %s1109_s18, %s1293_s18   ;;  %s1068_s17 = sphi %s1107_s17, %s1292_s17   ;;  %s1064_s16 = sphi %s1105_s16, %s1291_s16   ;;  %s1060_s15 = sphi %s1103_s15, %s1290_s15  }
   0x4   : > { %p31_p0 = scmp.ge.s32.totalorder %s29_s20, 2  ;;  %p78_p2 = scmp.eq.s32.totalorder %s1076_s19, 0 }
   0x5   : > { %s70_s22 = sadd.s32 1, %s1064_s16  ;;  %p899_p5 = scmp.ge.s32.totalorder %s1076_s19, 2 }
   0x6   : > { %s1295_s20 = smov (%p31_p0, %s29_s20), 0  ;;  %p79_p3 = por %p78_p2, %p77_p1 }
   0x7   : > { %s66_s21 = ssub.s32 %s1072_s18, %s1295_s20  ;;  %196 = sbr.rel (%p899_p5) target bundleno = 34 (0x22), region = 20 }
   0x8   : > { %p68_p4 = scmp.eq.s32.totalorder %s66_s21, 0 }
   0xa   : > { %s1138_s23 = scalar_select %p68_p4, %s1064_s16, %s70_s22  }
   0xe   : > { %199 = sbr.rel (!%p79_p3) target bundleno = 34 (0x22), region = 24  ;;  %s201_s24 = sand.u32 (%p79_p3), 1, %s1064_s16  }
   0xf   : > { %s946_s25 = sshll.u32 (%p79_p3), %s1072_s18, 3  ;;  %s900_s26 = sshll.u32 (%p79_p3), %s201_s24, 8 }
  0x10   : > { %s1146_s29 = scalar_lea.vmem (%p79_p3), %s1286_s1, %s946_s25  ;;  %s1151_s30 = scalar_lea.vmem (%p79_p3), [#allocation3], %s900_s26 }
  0x11   : > { %v299_v0 = vld [vmem:[%s1146_s29] sm:$0xff] (%p79_p3)  ;;  %v301_v1 = vld [vmem:[%s1146_s29 + $0x10] sm:$0xff] (%p79_p3) }
  0x12   : > { %v303_v2 = vld [vmem:[%s1146_s29 + $0x20] sm:$0xff] (%p79_p3)  ;;  %300 = vst [vmem:[%s1151_s30] sm:$0xff] (%p79_p3), %v299_v0  ;;  %302 = vst [vmem:[%s1151_s30 + $0x8] sm:$0xff] (%p79_p3), %v301_v1  ;;  %v305_v3 = vld [vmem:[%s1146_s29 + $0x30] sm:$0xff] (%p79_p3) }
  0x13   : > { %304 = vst [vmem:[%s1151_s30 + $0x10] sm:$0xff] (%p79_p3), %v303_v2  ;;  %v307_v4 = vld [vmem:[%s1146_s29 + $0x40] sm:$0xff] (%p79_p3)  ;;  %v309_v5 = vld [vmem:[%s1146_s29 + $0x50] sm:$0xff] (%p79_p3)  ;;  %306 = vst [vmem:[%s1151_s30 + $0x18] sm:$0xff] (%p79_p3), %v305_v3 }
  0x14   : > { %308 = vst [vmem:[%s1151_s30 + $0x20] sm:$0xff] (%p79_p3), %v307_v4  ;;  %310 = vst [vmem:[%s1151_s30 + $0x28] sm:$0xff] (%p79_p3), %v309_v5  ;;  %v311_v6 = vld [vmem:[%s1146_s29 + $0x60] sm:$0xff] (%p79_p3)  ;;  %v313_v7 = vld [vmem:[%s1146_s29 + $0x70] sm:$0xff] (%p79_p3) }
  0x15   : > { %v315_v8 = vld [vmem:[%s1146_s29 + $0x80] sm:$0xff]  ;;  %312 = vst [vmem:[%s1151_s30 + $0x30] sm:$0xff] %v311_v6  ;;  %314 = vst [vmem:[%s1151_s30 + $0x38] sm:$0xff] %v313_v7  ;;  %v317_v9 = vld [vmem:[%s1146_s29 + $0x90] sm:$0xff] }
  0x16   : > { %316 = vst [vmem:[%s1151_s30 + $0x40] sm:$0xff] %v315_v8  ;;  %v319_v10 = vld [vmem:[%s1146_s29 + $0xa0] sm:$0xff]  ;;  %v321_v11 = vld [vmem:[%s1146_s29 + $0xb0] sm:$0xff]  ;;  %318 = vst [vmem:[%s1151_s30 + $0x48] sm:$0xff] %v317_v9 }
  0x17   : > { %320 = vst [vmem:[%s1151_s30 + $0x50] sm:$0xff] %v319_v10  ;;  %322 = vst [vmem:[%s1151_s30 + $0x58] sm:$0xff] %v321_v11  ;;  %v323_v12 = vld [vmem:[%s1146_s29 + $0xc0] sm:$0xff]  ;;  %v325_v13 = vld [vmem:[%s1146_s29 + $0xd0] sm:$0xff] }
  0x18   : > { %v327_v14 = vld [vmem:[%s1146_s29 + $0xe0] sm:$0xff]  ;;  %324 = vst [vmem:[%s1151_s30 + $0x60] sm:$0xff] %v323_v12  ;;  %326 = vst [vmem:[%s1151_s30 + $0x68] sm:$0xff] %v325_v13  ;;  %v329_v15 = vld [vmem:[%s1146_s29 + $0xf0] sm:$0xff] }
  0x19   : > { %328 = vst [vmem:[%s1151_s30 + $0x70] sm:$0xff] %v327_v14  ;;  %v331_v16 = vld [vmem:[%s1146_s29 + $0x100] sm:$0xff]  ;;  %v333_v17 = vld [vmem:[%s1146_s29 + $0x110] sm:$0xff]  ;;  %330 = vst [vmem:[%s1151_s30 + $0x78] sm:$0xff] %v329_v15 }
  0x1a   : > { %332 = vst [vmem:[%s1151_s30 + $0x80] sm:$0xff] %v331_v16  ;;  %334 = vst [vmem:[%s1151_s30 + $0x88] sm:$0xff] %v333_v17  ;;  %v335_v18 = vld [vmem:[%s1146_s29 + $0x120] sm:$0xff]  ;;  %v337_v19 = vld [vmem:[%s1146_s29 + $0x130] sm:$0xff] }
  0x1b   : > { %v339_v20 = vld [vmem:[%s1146_s29 + $0x140] sm:$0xff]  ;;  %336 = vst [vmem:[%s1151_s30 + $0x90] sm:$0xff] %v335_v18  ;;  %338 = vst [vmem:[%s1151_s30 + $0x98] sm:$0xff] %v337_v19  ;;  %v341_v21 = vld [vmem:[%s1146_s29 + $0x150] sm:$0xff] }
  0x1c   : > { %340 = vst [vmem:[%s1151_s30 + $0xa0] sm:$0xff] %v339_v20  ;;  %v343_v22 = vld [vmem:[%s1146_s29 + $0x160] sm:$0xff]  ;;  %v345_v23 = vld [vmem:[%s1146_s29 + $0x170] sm:$0xff]  ;;  %342 = vst [vmem:[%s1151_s30 + $0xa8] sm:$0xff] %v341_v21 }
  0x1d   : > { %344 = vst [vmem:[%s1151_s30 + $0xb0] sm:$0xff] %v343_v22  ;;  %346 = vst [vmem:[%s1151_s30 + $0xb8] sm:$0xff] %v345_v23  ;;  %v347_v24 = vld [vmem:[%s1146_s29 + $0x180] sm:$0xff]  ;;  %v349_v25 = vld [vmem:[%s1146_s29 + $0x190] sm:$0xff] }
  0x1e   : > { %v351_v26 = vld [vmem:[%s1146_s29 + $0x1a0] sm:$0xff]  ;;  %348 = vst [vmem:[%s1151_s30 + $0xc0] sm:$0xff] %v347_v24  ;;  %350 = vst [vmem:[%s1151_s30 + $0xc8] sm:$0xff] %v349_v25  ;;  %v353_v27 = vld [vmem:[%s1146_s29 + $0x1b0] sm:$0xff] }
  0x1f   : > { %352 = vst [vmem:[%s1151_s30 + $0xd0] sm:$0xff] %v351_v26  ;;  %v355_v28 = vld [vmem:[%s1146_s29 + $0x1c0] sm:$0xff]  ;;  %v357_v29 = vld [vmem:[%s1146_s29 + $0x1d0] sm:$0xff]  ;;  %354 = vst [vmem:[%s1151_s30 + $0xd8] sm:$0xff] %v353_v27 }
  0x20   : > { %356 = vst [vmem:[%s1151_s30 + $0xe0] sm:$0xff] %v355_v28  ;;  %358 = vst [vmem:[%s1151_s30 + $0xe8] sm:$0xff] %v357_v29  ;;  %v359_v30 = vld [vmem:[%s1146_s29 + $0x1e0] sm:$0xff]  ;;  %v361_v31 = vld [vmem:[%s1146_s29 + $0x1f0] sm:$0xff] }
  0x21   : > { %360 = vst [vmem:[%s1151_s30 + $0xf0] sm:$0xff] %v359_v30  ;;  %362 = vst [vmem:[%s1151_s30 + $0xf8] sm:$0xff] %v361_v31 }
  0x22 PF: > { %p903_p6 = scmp.ge.s32.totalorder %s1076_s19, 1  ;;  %p383_p7 = scmp.lt.s32.totalorder %s1076_s19, 3 }
  0x24   : > { %p384_p8 = pnand %p903_p6, %p383_p7 }
  0x25   : > { %s390_s5 = sand.u32 (!%p384_p8), 1, %s1060_s15   ;;  %v1220_v32 = vld [vmem:[%s1285_s0] sm:$0xff] (!%p384_p8)  ;;  %s905_s10 = sshll.u32 (!%p384_p8), %s1068_s17, 1  ;;  %v728_v3 = vlaneseq (!%p384_p8) }
  0x26   : > { %387 = sbr.rel (%p384_p8) target bundleno = 325 (0x145), region = 70  ;;  %s904_s8 = sshll.u32 (!%p384_p8), %s390_s5, 8  ;;  %v910_v33 = vcombine.high (!%p384_p8), %v1220_v32, %v1220_v32  ;;  %v909_v2 = vcombine.low (!%p384_p8), %v1220_v32, %v1220_v32 }
  0x27   : > { %s1224_s9 = scalar_lea.vmem (!%p384_p8), [#allocation3], %s904_s8  ;;  %p449_p9 = scmp.lt.s32.totalorder (!%p384_p8), %s905_s10, 3  ;;  %v729_v4 = vshrl.u32 (!%p384_p8), %v728_v3, 7 }
  0x28   : > { %v988_v34 = vld [vmem:[%s1224_s9 + $0x4] ss:$8 sps:$4 sm:$0xff] (!%p384_p8)   ;;  %708 = vmatprep.mubr.bf16.mxu0 (!%p384_p8), %v910_v33  ;;  %v990_v35 = vld [vmem:[%s1224_s9] ss:$8 sps:$4 sm:$0xff] (!%p384_p8)   ;;  %v991_v36 = vld [vmem:[%s1224_s9 + $0x14] ss:$8 sps:$4 sm:$0xff] (!%p384_p8)  }
  0x29   : > { %676 = vmatprep.subr.bf16.mxu0 (!%p384_p8), %v988_v34  ;;  %v993_v37 = vld [vmem:[%s1224_s9 + $0x10] ss:$8 sps:$4 sm:$0xff] (!%p384_p8)   ;;  %v994_v38 = vld [vmem:[%s1224_s9 + $0x24] ss:$8 sps:$4 sm:$0xff] (!%p384_p8)   ;;  %v996_v39 = vld [vmem:[%s1224_s9 + $0x20] ss:$8 sps:$4 sm:$0xff] (!%p384_p8)  }
  0x2a   : > { %677 = vmatpush1.bf16.msra.mxu0 (!%p384_p8), %v990_v35  ;;  %v997_v40 = vld [vmem:[%s1224_s9 + $0x34] ss:$8 sps:$4 sm:$0xff] (!%p384_p8)   ;;  %v999_v41 = vld [vmem:[%s1224_s9 + $0x30] ss:$8 sps:$4 sm:$0xff] (!%p384_p8)   ;;  %v1000_v42 = vld [vmem:[%s1224_s9 + $0x44] ss:$8 sps:$4 sm:$0xff] (!%p384_p8)  }
  0x2b   : > { %678 = vmatprep.subr.bf16.mxu0 (!%p384_p8), %v991_v36  ;;  %v1002_v43 = vld [vmem:[%s1224_s9 + $0x40] ss:$8 sps:$4 sm:$0xff] (!%p384_p8)   ;;  %v1003_v44 = vld [vmem:[%s1224_s9 + $0x54] ss:$8 sps:$4 sm:$0xff] (!%p384_p8)   ;;  %v1005_v45 = vld [vmem:[%s1224_s9 + $0x50] ss:$8 sps:$4 sm:$0xff] (!%p384_p8)  }
  0x2c   : > { %v1006_v46 = vld [vmem:[%s1224_s9 + $0x64] ss:$8 sps:$4 sm:$0xff] (!%p384_p8)   ;;  %v1008_v47 = vld [vmem:[%s1224_s9 + $0x60] ss:$8 sps:$4 sm:$0xff] (!%p384_p8)   ;;  %v1009_v48 = vld [vmem:[%s1224_s9 + $0x74] ss:$8 sps:$4 sm:$0xff] (!%p384_p8)  }
  0x2d   : > { %v1011_v49 = vld [vmem:[%s1224_s9 + $0x70] ss:$8 sps:$4 sm:$0xff]   ;;  %v1012_v50 = vld [vmem:[%s1224_s9 + $0x84] ss:$8 sps:$4 sm:$0xff]   ;;  %v1014_v51 = vld [vmem:[%s1224_s9 + $0x80] ss:$8 sps:$4 sm:$0xff]  }
  0x2e   : > { %679 = vmatpush1.bf16.msra.mxu0 %v993_v37  ;;  %v1015_v52 = vld [vmem:[%s1224_s9 + $0x94] ss:$8 sps:$4 sm:$0xff]   ;;  %v1017_v53 = vld [vmem:[%s1224_s9 + $0x90] ss:$8 sps:$4 sm:$0xff]   ;;  %v1018_v54 = vld [vmem:[%s1224_s9 + $0xa4] ss:$8 sps:$4 sm:$0xff]  }
  0x2f   : > { %680 = vmatprep.subr.bf16.mxu0 %v994_v38  ;;  %v1020_v55 = vld [vmem:[%s1224_s9 + $0xa0] ss:$8 sps:$4 sm:$0xff]   ;;  %v1021_v56 = vld [vmem:[%s1224_s9 + $0xb4] ss:$8 sps:$4 sm:$0xff]   ;;  %v1023_v57 = vld [vmem:[%s1224_s9 + $0xb0] ss:$8 sps:$4 sm:$0xff]  }
  0x30   : > { %v1024_v58 = vld [vmem:[%s1224_s9 + $0xc4] ss:$8 sps:$4 sm:$0xff]   ;;  %v1026_v59 = vld [vmem:[%s1224_s9 + $0xc0] ss:$8 sps:$4 sm:$0xff]   ;;  %v1027_v60 = vld [vmem:[%s1224_s9 + $0xd4] ss:$8 sps:$4 sm:$0xff]  }
  0x31   : > { %v1029_v61 = vld [vmem:[%s1224_s9 + $0xd0] ss:$8 sps:$4 sm:$0xff]   ;;  %v1030_v62 = vld [vmem:[%s1224_s9 + $0xe4] ss:$8 sps:$4 sm:$0xff]   ;;  %v1032_v63 = vld [vmem:[%s1224_s9 + $0xe0] ss:$8 sps:$4 sm:$0xff]  }
  0x32   : > { %681 = vmatpush1.bf16.msra.mxu0 %v996_v39  ;;  %v1033_v0 = vld [vmem:[%s1224_s9 + $0xf4] ss:$8 sps:$4 sm:$0xff]   ;;  %v1035_v1 = vld [vmem:[%s1224_s9 + $0xf0] ss:$8 sps:$4 sm:$0xff]   ;;  %s1297_s10 = smov (!%p449_p9, %s905_s10), 3  ;;  %v730_v5 = vsub.s32 0, %v729_v4 }
  0x33   : > { %682 = vmatprep.subr.bf16.mxu0 %v997_v40  ;;  %s451_s13 = scalar_lea.vmem %s1287_s2, %s1297_s10  ;;  %s456_s21 = scalar_lea.vmem %s1288_s3, %s1297_s10  ;;  %v734_v7 = vsub.s32 1, %v729_v4 }
  0x34   : > { %v726_v6 = vld [vmem:[%s451_s13] sm:$0x3]  ;;  %s908_s17 = sshll.u32 %s1297_s10, 2 }
  0x35   : > { %v740_v8 = vld [vmem:[%s456_s21] sm:$0x3]  ;;  %v731_v9 = vrot.slane %v726_v6, %v730_v5  ;;  %v735_v10 = vrot.slane %v726_v6, %v734_v7  ;;  %s466_s25 = scalar_lea.vmem %s1289_s4, %s908_s17 }
  0x36   : > { %683 = vmatpush1.bf16.msra.mxu0 %v999_v41  ;;  %v745_v11 = vrot.slane %v740_v8, %v730_v5  ;;  %v749_v13 = vrot.slane %v740_v8, %v734_v7 }
  0x37   : > { %684 = vmatprep.subr.bf16.mxu0 %v1000_v42 }
  0x3a   : > { %685 = vmatpush1.bf16.msra.mxu0 %v1002_v43 }
  0x3b   : > { %686 = vmatprep.subr.bf16.mxu0 %v1003_v44 }
  0x3e   : > { %687 = vmatpush1.bf16.msra.mxu0 %v1005_v45 }
  0x3f   : > { %688 = vmatprep.subr.bf16.mxu0 %v1006_v46 }
  0x42   : > { %689 = vmatpush1.bf16.msra.mxu0 %v1008_v47 }
  0x43   : > { %690 = vmatprep.subr.bf16.mxu0 %v1009_v48 }
  0x46   : > { %691 = vmatpush1.bf16.msra.mxu0 %v1011_v49 }
  0x47   : > { %692 = vmatprep.subr.bf16.mxu0 %v1012_v50 }
  0x4a   : > { %693 = vmatpush1.bf16.msra.mxu0 %v1014_v51 }
  0x4b   : > { %694 = vmatprep.subr.bf16.mxu0 %v1015_v52 }
  0x4e   : > { %695 = vmatpush1.bf16.msra.mxu0 %v1017_v53 }
  0x4f   : > { %696 = vmatprep.subr.bf16.mxu0 %v1018_v54 }
  0x52   : > { %697 = vmatpush1.bf16.msra.mxu0 %v1020_v55 }
  0x53   : > { %698 = vmatprep.subr.bf16.mxu0 %v1021_v56 }
  0x56   : > { %699 = vmatpush1.bf16.msra.mxu0 %v1023_v57 }
  0x57   : > { %700 = vmatprep.subr.bf16.mxu0 %v1024_v58 }
  0x5a   : > { %701 = vmatpush1.bf16.msra.mxu0 %v1026_v59 }
  0x5b   : > { %702 = vmatprep.subr.bf16.mxu0 %v1027_v60 }
  0x5e   : > { %703 = vmatpush1.bf16.msra.mxu0 %v1029_v61 }
  0x5f   : > { %704 = vmatprep.subr.bf16.mxu0 %v1030_v62 }
  0x62   : > { %705 = vmatpush1.bf16.msra.mxu0 %v1032_v63 }
  0x63   : > { %706 = vmatprep.subr.bf16.mxu0 %v1033_v0 }
  0x66   : > { %707 = vmatpush1.bf16.msra.mxu0 %v1035_v1 }
  0x69   : > { %709 = vmatmul.mubr.bf16.vlgmr.msra.gmra.mrb[0].mxu0 %v909_v2 }
 0x13c   : > { %v710_v12 = vpop.f32.mrb[0].mxu0 }
 0x13d   : > { %v738_v14 = vmul.f32 %v731_v9, %v710_v12  ;;  %v712_v15 = vpop.f32.mrb[1].mxu0 }
 0x13e   : > { %v739_v16 = vmul.f32 %v735_v10, %v712_v15  ;;  %v714_v17 = vpop.f32.mrb[2].mxu0 }
 0x13f   : > { %v752_v18 = vadd.f32 %v745_v11, %v738_v14  ;;  %v715_v19 = vpop.f32.mrb[3].mxu0 }
 0x140   : > { %v753_v20 = vadd.f32 %v749_v13, %v739_v16 }
 0x142   : > { %v947_v21 = vpack.c.bf16 %v753_v20, %v752_v18 }
 0x144   : > { %762 = vst [vmem:[%s466_s25] sm:$0xff] %v947_v21 }
 0x145 PF: > { %s14_s19 = sadd.s32 1, %s1076_s19   ;;  %s1290_s15 = smov %s1064_s16 }
 0x146   : > { %p11_p10 = scmp.ge.s32.totalorder %s14_s19, 4   ;;  %s1291_s16 = smov %s1138_s23 }
 0x147   : > { %s1292_s17 = smov %s1072_s18  ;;  %s1293_s18 = smov %s1295_s20 }
 0x148   :  { %13 = sbr.rel (!%p11_p10) target bundleno = 3 (0x3), region = 126 }

// kernel: resnet_model_mod_forward.72
= control target key start
LH: loop header
LB: loop body
LE: loop exit
PB: predicated region body
PF: predicated region fallthrough
CT: control target
= control target key end

     0   :  { %s1598_s15 = smov 0   ;;  %s1600_s16 = smov 0   ;;  %s1918_s0 = inlined_call_operand.vmem [shape: bf16[8,4608], index: 0, kind: input, shape index: {}]   ;;  %s1919_s1 = inlined_call_operand.vmem [shape: bf16[4608,512], index: 1, kind: input, shape index: {}]   ;;  %s1920_s2 = inlined_call_operand.vmem [shape: f32[1,512], index: 2, kind: input, shape index: {}]   ;;  %s1921_s3 = inlined_call_operand.vmem [shape: f32[1,512], index: 3, kind: input, shape index: {}]   ;;  %s1922_s4 = inlined_call_operand.vmem [shape: bf16[8,512], index: 4, kind: output, shape index: {}]  }
   0x1   :  { %s1602_s17 = smov 0   ;;  %s1604_s18 = smov 0  }
   0x2   :  { %s1606_s19 = smov 0   ;;  %s1608_s20 = smov 0  }
   0x3   :  { %s1610_s21 = smov 0  }
   0x4 LB: > { %s26_s22 = sadd.s32 1, %s1562_s19  ;;  %s29_s23 = sadd.s32 1, %s1566_s20  ;;  %s1570_s21 = sphi %s1610_s21, %s14_s21   ;;  %s1566_s20 = sphi %s1608_s20, %s1928_s20   ;;  %s1562_s19 = sphi %s1606_s19, %s1927_s19   ;;  %s1558_s18 = sphi %s1604_s18, %s1926_s18   ;;  %s1554_s17 = sphi %s1602_s17, %s1925_s17   ;;  %s1550_s16 = sphi %s1600_s16, %s1924_s16   ;;  %s1546_s15 = sphi %s1598_s15, %s1923_s15  }
   0x5   : > { %p27_p0 = scmp.ge.s32.totalorder %s26_s22, 9  ;;  %p77_p1 = scmp.ne.s32.totalorder %s1550_s16, %s1546_s15 }
   0x6   : > { %p78_p2 = scmp.eq.s32.totalorder %s1570_s21, 0  ;;  %s70_s27 = sadd.s32 1, %s1550_s16 }
   0x7   : > { %s1930_s22 = smov (%p27_p0, %s26_s22), 0  ;;  %s1932_s23 = smov (!%p27_p0, %s29_s23), %s1566_s20 }
   0x8   : > { %p79_p3 = por %p78_p2, %p77_p1  ;;  %p31_p4 = scmp.ge.s32.totalorder %s1932_s23, 2 }
   0x9   : > { %s65_s24 = ssub.s32 %s1562_s19, %s1930_s22  ;;  %p1270_p6 = scmp.ge.s32.totalorder %s1570_s21, 18 }
   0xa   : > { %s1934_s23 = smov (%p31_p4, %s1932_s23), 0 }
   0xb   : > { %s66_s25 = ssub.s32 %s1566_s20, %s1934_s23  ;;  %183 = sbr.rel (%p1270_p6) target bundleno = 57 (0x39), region = 16 }
   0xc   : > { %s67_s26 = sor.u32 %s66_s25, %s65_s24 }
   0xd   : > { %p68_p5 = scmp.eq.s32.totalorder %s67_s26, 0 }
   0xf   : > { %s1649_s28 = scalar_select %p68_p5, %s1550_s16, %s70_s27  }
  0x12   : > { %199 = sbr.rel (!%p79_p3) target bundleno = 57 (0x39), region = 24  ;;  %s201_s29 = sand.u32 (%p79_p3), 1, %s1550_s16  }
  0x13   : > { %s1273_s30 = sshll.u32 (%p79_p3), %s1566_s20, 1  ;;  %s1271_s5 = sshll.u32 (%p79_p3), %s201_s29, 9 }
  0x14   : > { %s1357_s6 = sshll.u32 (%p79_p3), %s1562_s19, 8  ;;  %s1663_s12 = scalar_lea.vmem (%p79_p3), [#allocation3], %s1271_s5 }
  0x15   : > { %s207_s7 = sadd.s32 (%p79_p3), %s1357_s6, %s1273_s30 }
  0x16   : > { %s1275_s8 = sshll.u32 (%p79_p3), %s207_s7, 2 }
  0x17   : > { %s1658_s11 = scalar_lea.vmem (%p79_p3), %s1919_s1, %s1275_s8 }
  0x18   : > { %v363_v0 = vld [vmem:[%s1658_s11] sm:$0xff] (%p79_p3)  ;;  %v365_v1 = vld [vmem:[%s1658_s11 + $0x10] sm:$0xff] (%p79_p3) }
  0x19   : > { %v367_v2 = vld [vmem:[%s1658_s11 + $0x20] sm:$0xff]  ;;  %364 = vst [vmem:[%s1663_s12] sm:$0xff] %v363_v0  ;;  %366 = vst [vmem:[%s1663_s12 + $0x8] sm:$0xff] %v365_v1  ;;  %v369_v3 = vld [vmem:[%s1658_s11 + $0x30] sm:$0xff] }
  0x1a   : > { %368 = vst [vmem:[%s1663_s12 + $0x10] sm:$0xff] %v367_v2  ;;  %v371_v4 = vld [vmem:[%s1658_s11 + $0x40] sm:$0xff]  ;;  %v373_v5 = vld [vmem:[%s1658_s11 + $0x50] sm:$0xff]  ;;  %370 = vst [vmem:[%s1663_s12 + $0x18] sm:$0xff] %v369_v3 }
  0x1b   : > { %372 = vst [vmem:[%s1663_s12 + $0x20] sm:$0xff] %v371_v4  ;;  %374 = vst [vmem:[%s1663_s12 + $0x28] sm:$0xff] %v373_v5  ;;  %v375_v6 = vld [vmem:[%s1658_s11 + $0x60] sm:$0xff]  ;;  %v377_v7 = vld [vmem:[%s1658_s11 + $0x70] sm:$0xff] }
  0x1c   : > { %v379_v8 = vld [vmem:[%s1658_s11 + $0x80] sm:$0xff]  ;;  %376 = vst [vmem:[%s1663_s12 + $0x30] sm:$0xff] %v375_v6  ;;  %378 = vst [vmem:[%s1663_s12 + $0x38] sm:$0xff] %v377_v7  ;;  %v381_v9 = vld [vmem:[%s1658_s11 + $0x90] sm:$0xff] }
  0x1d   : > { %380 = vst [vmem:[%s1663_s12 + $0x40] sm:$0xff] %v379_v8  ;;  %v383_v10 = vld [vmem:[%s1658_s11 + $0xa0] sm:$0xff]  ;;  %v385_v11 = vld [vmem:[%s1658_s11 + $0xb0] sm:$0xff]  ;;  %382 = vst [vmem:[%s1663_s12 + $0x48] sm:$0xff] %v381_v9 }
  0x1e   : > { %384 = vst [vmem:[%s1663_s12 + $0x50] sm:$0xff] %v383_v10  ;;  %386 = vst [vmem:[%s1663_s12 + $0x58] sm:$0xff] %v385_v11  ;;  %v387_v12 = vld [vmem:[%s1658_s11 + $0xc0] sm:$0xff]  ;;  %v389_v13 = vld [vmem:[%s1658_s11 + $0xd0] sm:$0xff] }
  0x1f   : > { %v391_v14 = vld [vmem:[%s1658_s11 + $0xe0] sm:$0xff]  ;;  %388 = vst [vmem:[%s1663_s12 + $0x60] sm:$0xff] %v387_v12  ;;  %390 = vst [vmem:[%s1663_s12 + $0x68] sm:$0xff] %v389_v13  ;;  %v393_v15 = vld [vmem:[%s1658_s11 + $0xf0] sm:$0xff] }
  0x20   : > { %392 = vst [vmem:[%s1663_s12 + $0x70] sm:$0xff] %v391_v14  ;;  %v395_v16 = vld [vmem:[%s1658_s11 + $0x100] sm:$0xff]  ;;  %v397_v17 = vld [vmem:[%s1658_s11 + $0x110] sm:$0xff]  ;;  %394 = vst [vmem:[%s1663_s12 + $0x78] sm:$0xff] %v393_v15 }
  0x21   : > { %396 = vst [vmem:[%s1663_s12 + $0x80] sm:$0xff] %v395_v16  ;;  %398 = vst [vmem:[%s1663_s12 + $0x88] sm:$0xff] %v397_v17  ;;  %v399_v18 = vld [vmem:[%s1658_s11 + $0x120] sm:$0xff]  ;;  %v401_v19 = vld [vmem:[%s1658_s11 + $0x130] sm:$0xff] }
  0x22   : > { %v403_v20 = vld [vmem:[%s1658_s11 + $0x140] sm:$0xff]  ;;  %400 = vst [vmem:[%s1663_s12 + $0x90] sm:$0xff] %v399_v18  ;;  %402 = vst [vmem:[%s1663_s12 + $0x98] sm:$0xff] %v401_v19  ;;  %v405_v21 = vld [vmem:[%s1658_s11 + $0x150] sm:$0xff] }
  0x23   : > { %404 = vst [vmem:[%s1663_s12 + $0xa0] sm:$0xff] %v403_v20  ;;  %v407_v22 = vld [vmem:[%s1658_s11 + $0x160] sm:$0xff]  ;;  %v409_v23 = vld [vmem:[%s1658_s11 + $0x170] sm:$0xff]  ;;  %406 = vst [vmem:[%s1663_s12 + $0xa8] sm:$0xff] %v405_v21 }
  0x24   : > { %408 = vst [vmem:[%s1663_s12 + $0xb0] sm:$0xff] %v407_v22  ;;  %410 = vst [vmem:[%s1663_s12 + $0xb8] sm:$0xff] %v409_v23  ;;  %v411_v24 = vld [vmem:[%s1658_s11 + $0x180] sm:$0xff]  ;;  %v413_v25 = vld [vmem:[%s1658_s11 + $0x190] sm:$0xff] }
  0x25   : > { %v415_v26 = vld [vmem:[%s1658_s11 + $0x1a0] sm:$0xff]  ;;  %412 = vst [vmem:[%s1663_s12 + $0xc0] sm:$0xff] %v411_v24  ;;  %414 = vst [vmem:[%s1663_s12 + $0xc8] sm:$0xff] %v413_v25  ;;  %v417_v27 = vld [vmem:[%s1658_s11 + $0x1b0] sm:$0xff] }
  0x26   : > { %416 = vst [vmem:[%s1663_s12 + $0xd0] sm:$0xff] %v415_v26  ;;  %v419_v28 = vld [vmem:[%s1658_s11 + $0x1c0] sm:$0xff]  ;;  %v421_v29 = vld [vmem:[%s1658_s11 + $0x1d0] sm:$0xff]  ;;  %418 = vst [vmem:[%s1663_s12 + $0xd8] sm:$0xff] %v417_v27 }
  0x27   : > { %420 = vst [vmem:[%s1663_s12 + $0xe0] sm:$0xff] %v419_v28  ;;  %422 = vst [vmem:[%s1663_s12 + $0xe8] sm:$0xff] %v421_v29  ;;  %v423_v30 = vld [vmem:[%s1658_s11 + $0x1e0] sm:$0xff]  ;;  %v425_v31 = vld [vmem:[%s1658_s11 + $0x1f0] sm:$0xff] }
  0x28   : > { %v427_v32 = vld [vmem:[%s1658_s11 + $0x200] sm:$0xff]  ;;  %424 = vst [vmem:[%s1663_s12 + $0xf0] sm:$0xff] %v423_v30  ;;  %426 = vst [vmem:[%s1663_s12 + $0xf8] sm:$0xff] %v425_v31  ;;  %v429_v33 = vld [vmem:[%s1658_s11 + $0x210] sm:$0xff] }
  0x29   : > { %428 = vst [vmem:[%s1663_s12 + $0x100] sm:$0xff] %v427_v32  ;;  %v431_v34 = vld [vmem:[%s1658_s11 + $0x220] sm:$0xff]  ;;  %v433_v35 = vld [vmem:[%s1658_s11 + $0x230] sm:$0xff]  ;;  %430 = vst [vmem:[%s1663_s12 + $0x108] sm:$0xff] %v429_v33 }
  0x2a   : > { %432 = vst [vmem:[%s1663_s12 + $0x110] sm:$0xff] %v431_v34  ;;  %434 = vst [vmem:[%s1663_s12 + $0x118] sm:$0xff] %v433_v35  ;;  %v435_v36 = vld [vmem:[%s1658_s11 + $0x240] sm:$0xff]  ;;  %v437_v37 = vld [vmem:[%s1658_s11 + $0x250] sm:$0xff] }
  0x2b   : > { %v439_v38 = vld [vmem:[%s1658_s11 + $0x260] sm:$0xff]  ;;  %436 = vst [vmem:[%s1663_s12 + $0x120] sm:$0xff] %v435_v36  ;;  %438 = vst [vmem:[%s1663_s12 + $0x128] sm:$0xff] %v437_v37  ;;  %v441_v39 = vld [vmem:[%s1658_s11 + $0x270] sm:$0xff] }
  0x2c   : > { %440 = vst [vmem:[%s1663_s12 + $0x130] sm:$0xff] %v439_v38  ;;  %v443_v40 = vld [vmem:[%s1658_s11 + $0x280] sm:$0xff]  ;;  %v445_v41 = vld [vmem:[%s1658_s11 + $0x290] sm:$0xff]  ;;  %442 = vst [vmem:[%s1663_s12 + $0x138] sm:$0xff] %v441_v39 }
  0x2d   : > { %444 = vst [vmem:[%s1663_s12 + $0x140] sm:$0xff] %v443_v40  ;;  %446 = vst [vmem:[%s1663_s12 + $0x148] sm:$0xff] %v445_v41  ;;  %v447_v42 = vld [vmem:[%s1658_s11 + $0x2a0] sm:$0xff]  ;;  %v449_v43 = vld [vmem:[%s1658_s11 + $0x2b0] sm:$0xff] }
  0x2e   : > { %v451_v44 = vld [vmem:[%s1658_s11 + $0x2c0] sm:$0xff]  ;;  %448 = vst [vmem:[%s1663_s12 + $0x150] sm:$0xff] %v447_v42  ;;  %450 = vst [vmem:[%s1663_s12 + $0x158] sm:$0xff] %v449_v43  ;;  %v453_v45 = vld [vmem:[%s1658_s11 + $0x2d0] sm:$0xff] }
  0x2f   : > { %452 = vst [vmem:[%s1663_s12 + $0x160] sm:$0xff] %v451_v44  ;;  %v455_v46 = vld [vmem:[%s1658_s11 + $0x2e0] sm:$0xff]  ;;  %v457_v47 = vld [vmem:[%s1658_s11 + $0x2f0] sm:$0xff]  ;;  %454 = vst [vmem:[%s1663_s12 + $0x168] sm:$0xff] %v453_v45 }
  0x30   : > { %456 = vst [vmem:[%s1663_s12 + $0x170] sm:$0xff] %v455_v46  ;;  %458 = vst [vmem:[%s1663_s12 + $0x178] sm:$0xff] %v457_v47  ;;  %v459_v48 = vld [vmem:[%s1658_s11 + $0x300] sm:$0xff]  ;;  %v461_v49 = vld [vmem:[%s1658_s11 + $0x310] sm:$0xff] }
  0x31   : > { %v463_v50 = vld [vmem:[%s1658_s11 + $0x320] sm:$0xff]  ;;  %460 = vst [vmem:[%s1663_s12 + $0x180] sm:$0xff] %v459_v48  ;;  %462 = vst [vmem:[%s1663_s12 + $0x188] sm:$0xff] %v461_v49  ;;  %v465_v51 = vld [vmem:[%s1658_s11 + $0x330] sm:$0xff] }
  0x32   : > { %464 = vst [vmem:[%s1663_s12 + $0x190] sm:$0xff] %v463_v50  ;;  %v467_v52 = vld [vmem:[%s1658_s11 + $0x340] sm:$0xff]  ;;  %v469_v53 = vld [vmem:[%s1658_s11 + $0x350] sm:$0xff]  ;;  %466 = vst [vmem:[%s1663_s12 + $0x198] sm:$0xff] %v465_v51 }
  0x33   : > { %468 = vst [vmem:[%s1663_s12 + $0x1a0] sm:$0xff] %v467_v52  ;;  %470 = vst [vmem:[%s1663_s12 + $0x1a8] sm:$0xff] %v469_v53  ;;  %v471_v54 = vld [vmem:[%s1658_s11 + $0x360] sm:$0xff]  ;;  %v473_v55 = vld [vmem:[%s1658_s11 + $0x370] sm:$0xff] }
  0x34   : > { %v475_v56 = vld [vmem:[%s1658_s11 + $0x380] sm:$0xff]  ;;  %472 = vst [vmem:[%s1663_s12 + $0x1b0] sm:$0xff] %v471_v54  ;;  %474 = vst [vmem:[%s1663_s12 + $0x1b8] sm:$0xff] %v473_v55  ;;  %v477_v57 = vld [vmem:[%s1658_s11 + $0x390] sm:$0xff] }
  0x35   : > { %476 = vst [vmem:[%s1663_s12 + $0x1c0] sm:$0xff] %v475_v56  ;;  %v479_v58 = vld [vmem:[%s1658_s11 + $0x3a0] sm:$0xff]  ;;  %v481_v59 = vld [vmem:[%s1658_s11 + $0x3b0] sm:$0xff]  ;;  %478 = vst [vmem:[%s1663_s12 + $0x1c8] sm:$0xff] %v477_v57 }
  0x36   : > { %480 = vst [vmem:[%s1663_s12 + $0x1d0] sm:$0xff] %v479_v58  ;;  %482 = vst [vmem:[%s1663_s12 + $0x1d8] sm:$0xff] %v481_v59  ;;  %v483_v60 = vld [vmem:[%s1658_s11 + $0x3c0] sm:$0xff]  ;;  %v485_v61 = vld [vmem:[%s1658_s11 + $0x3d0] sm:$0xff] }
  0x37   : > { %v487_v62 = vld [vmem:[%s1658_s11 + $0x3e0] sm:$0xff]  ;;  %484 = vst [vmem:[%s1663_s12 + $0x1e0] sm:$0xff] %v483_v60  ;;  %486 = vst [vmem:[%s1663_s12 + $0x1e8] sm:$0xff] %v485_v61  ;;  %v489_v63 = vld [vmem:[%s1658_s11 + $0x3f0] sm:$0xff] }
  0x38   : > { %488 = vst [vmem:[%s1663_s12 + $0x1f0] sm:$0xff] %v487_v62  ;;  %490 = vst [vmem:[%s1663_s12 + $0x1f8] sm:$0xff] %v489_v63 }
  0x39 PF: > { %p1276_p7 = scmp.ge.s32.totalorder %s1570_s21, 1  ;;  %p511_p8 = scmp.lt.s32.totalorder %s1570_s21, 19 }
  0x3b   : > { %p512_p9 = pnand %p1276_p7, %p511_p8 }
  0x3c   : > { %s518_s13 = sand.u32 (!%p512_p9), 1, %s1546_s15   ;;  %s1278_s14 = sshll.u32 (!%p512_p9), %s1554_s17, 2 }
  0x3d   : > { %515 = sbr.rel (%p512_p9) target bundleno = 378 (0x17a), region = 70  ;;  %s1277_s24 = sshll.u32 (!%p512_p9), %s518_s13, 9 }
  0x3e   : > { %p567_p10 = scmp.lt.s32.totalorder (!%p512_p9), %s1278_s14, 35  ;;  %s1280_s25 = sshll.u32 (!%p512_p9), %s1558_s18, 1 }
  0x3f   : > { %p577_p11 = scmp.lt.s32.totalorder (!%p512_p9), %s1280_s25, 3  ;;  %s1816_s13 = scalar_lea.vmem (!%p512_p9), [#allocation3], %s1277_s24 }
  0x40   : > { %p1284_p12 = scmp.ne.s32.totalorder (!%p512_p9), %s1554_s17, 0 }
  0x44   : > { %s1936_s14 = smov (!%p567_p10, %s1278_s14), 35  ;;  %s1938_s25 = smov (!%p577_p11, %s1280_s25), 3 }
  0x45   : > { %s1279_s26 = sshll.u32 %s1936_s14, 2  ;;  %s579_s15 = scalar_lea.vmem %s1920_s2, %s1938_s25  ;;  %v1572_v0 = vmov (!%p1284_p12), 0.0  }
  0x46   : > { %s1798_s30 = scalar_lea.vmem %s1918_s0, %s1279_s26  ;;  %s584_s18 = scalar_lea.vmem %s1921_s3, %s1938_s25  ;;  %600 = vst [vmem:[#allocation2] sm:$0xff] (!%p1284_p12), %v1572_v0  ;;  %601 = vst [vmem:[#allocation2 + $0x8] sm:$0xff] (!%p1284_p12), %v1572_v0 }
  0x47   : > { %s1283_s9 = sshll.u32 %s1938_s25, 2  ;;  %599 = sbr.rel (%p1284_p12) target bundleno = 78 (0x4e), region = 78 }
  0x48   : > { %s1814_s12 = scalar_lea.vmem %s1922_s4, %s1283_s9 }
  0x4e PF: > { %v1416_v1 = vld [vmem:[%s1816_s13 + $0x4] ss:$8 sps:$4 sm:$0xff]   ;;  %v1420_v3 = vld [vmem:[%s1816_s13] ss:$8 sps:$4 sm:$0xff]   ;;  %v1422_v5 = vld [vmem:[%s1816_s13 + $0x14] ss:$8 sps:$4 sm:$0xff]  }
  0x4f   : > { %v1418_v2 = vld [vmem:[%s1816_s13 + $0x104] ss:$8 sps:$4 sm:$0xff]   ;;  %1004 = vmatprep.subr.bf16.mxu0 %v1416_v1  ;;  %v1421_v4 = vld [vmem:[%s1816_s13 + $0x100] ss:$8 sps:$4 sm:$0xff]   ;;  %v1424_v6 = vld [vmem:[%s1816_s13 + $0x114] ss:$8 sps:$4 sm:$0xff]  }
  0x50   : > { %1045 = vmatprep.subr.bf16.mxu1 %v1418_v2  ;;  %1005 = vmatpush1.bf16.msra.mxu0 %v1420_v3  ;;  %v1426_v7 = vld [vmem:[%s1816_s13 + $0x10] ss:$8 sps:$4 sm:$0xff]   ;;  %v1428_v9 = vld [vmem:[%s1816_s13 + $0x24] ss:$8 sps:$4 sm:$0xff]   ;;  %v1432_v11 = vld [vmem:[%s1816_s13 + $0x20] ss:$8 sps:$4 sm:$0xff]  }
  0x51   : > { %1046 = vmatpush1.bf16.msra.mxu1 %v1421_v4  ;;  %1006 = vmatprep.subr.bf16.mxu0 %v1422_v5  ;;  %v1427_v8 = vld [vmem:[%s1816_s13 + $0x110] ss:$8 sps:$4 sm:$0xff]   ;;  %v1430_v10 = vld [vmem:[%s1816_s13 + $0x124] ss:$8 sps:$4 sm:$0xff]   ;;  %v1433_v12 = vld [vmem:[%s1816_s13 + $0x120] ss:$8 sps:$4 sm:$0xff]  }
  0x52   : > { %1047 = vmatprep.subr.bf16.mxu1 %v1424_v6  ;;  %v1434_v13 = vld [vmem:[%s1816_s13 + $0x34] ss:$8 sps:$4 sm:$0xff]   ;;  %v1438_v15 = vld [vmem:[%s1816_s13 + $0x30] ss:$8 sps:$4 sm:$0xff]   ;;  %v1440_v17 = vld [vmem:[%s1816_s13 + $0x44] ss:$8 sps:$4 sm:$0xff]  }
  0x53   : > { %v1436_v14 = vld [vmem:[%s1816_s13 + $0x134] ss:$8 sps:$4 sm:$0xff]   ;;  %v1439_v16 = vld [vmem:[%s1816_s13 + $0x130] ss:$8 sps:$4 sm:$0xff]   ;;  %v1442_v18 = vld [vmem:[%s1816_s13 + $0x144] ss:$8 sps:$4 sm:$0xff]  }
  0x54   : > { %1007 = vmatpush1.bf16.msra.mxu0 %v1426_v7  ;;  %v1444_v19 = vld [vmem:[%s1816_s13 + $0x40] ss:$8 sps:$4 sm:$0xff]   ;;  %v1446_v21 = vld [vmem:[%s1816_s13 + $0x54] ss:$8 sps:$4 sm:$0xff]   ;;  %v1450_v23 = vld [vmem:[%s1816_s13 + $0x50] ss:$8 sps:$4 sm:$0xff]  }
  0x55   : > { %1048 = vmatpush1.bf16.msra.mxu1 %v1427_v8  ;;  %1008 = vmatprep.subr.bf16.mxu0 %v1428_v9  ;;  %v1445_v20 = vld [vmem:[%s1816_s13 + $0x140] ss:$8 sps:$4 sm:$0xff]   ;;  %v1448_v22 = vld [vmem:[%s1816_s13 + $0x154] ss:$8 sps:$4 sm:$0xff]   ;;  %v1451_v24 = vld [vmem:[%s1816_s13 + $0x150] ss:$8 sps:$4 sm:$0xff]  }
  0x56   : > { %1049 = vmatprep.subr.bf16.mxu1 %v1430_v10  ;;  %v1452_v25 = vld [vmem:[%s1816_s13 + $0x64] ss:$8 sps:$4 sm:$0xff]   ;;  %v1456_v27 = vld [vmem:[%s1816_s13 + $0x60] ss:$8 sps:$4 sm:$0xff]   ;;  %v1458_v29 = vld [vmem:[%s1816_s13 + $0x74] ss:$8 sps:$4 sm:$0xff]  }
  0x57   : > { %v1454_v26 = vld [vmem:[%s1816_s13 + $0x164] ss:$8 sps:$4 sm:$0xff]   ;;  %v1457_v28 = vld [vmem:[%s1816_s13 + $0x160] ss:$8 sps:$4 sm:$0xff]   ;;  %v1460_v30 = vld [vmem:[%s1816_s13 + $0x174] ss:$8 sps:$4 sm:$0xff]  }
  0x58   : > { %1009 = vmatpush1.bf16.msra.mxu0 %v1432_v11  ;;  %v1462_v31 = vld [vmem:[%s1816_s13 + $0x70] ss:$8 sps:$4 sm:$0xff]   ;;  %v1464_v33 = vld [vmem:[%s1816_s13 + $0x84] ss:$8 sps:$4 sm:$0xff]   ;;  %v1468_v35 = vld [vmem:[%s1816_s13 + $0x80] ss:$8 sps:$4 sm:$0xff]  }
  0x59   : > { %1050 = vmatpush1.bf16.msra.mxu1 %v1433_v12  ;;  %1010 = vmatprep.subr.bf16.mxu0 %v1434_v13  ;;  %v1463_v32 = vld [vmem:[%s1816_s13 + $0x170] ss:$8 sps:$4 sm:$0xff]   ;;  %v1466_v34 = vld [vmem:[%s1816_s13 + $0x184] ss:$8 sps:$4 sm:$0xff]   ;;  %v1469_v36 = vld [vmem:[%s1816_s13 + $0x180] ss:$8 sps:$4 sm:$0xff]  }
  0x5a   : > { %1051 = vmatprep.subr.bf16.mxu1 %v1436_v14  ;;  %v1470_v37 = vld [vmem:[%s1816_s13 + $0x94] ss:$8 sps:$4 sm:$0xff]   ;;  %v1474_v39 = vld [vmem:[%s1816_s13 + $0x90] ss:$8 sps:$4 sm:$0xff]   ;;  %v1476_v41 = vld [vmem:[%s1816_s13 + $0xa4] ss:$8 sps:$4 sm:$0xff]  }
  0x5b   : > { %v1472_v38 = vld [vmem:[%s1816_s13 + $0x194] ss:$8 sps:$4 sm:$0xff]   ;;  %v1475_v40 = vld [vmem:[%s1816_s13 + $0x190] ss:$8 sps:$4 sm:$0xff]   ;;  %v1478_v42 = vld [vmem:[%s1816_s13 + $0x1a4] ss:$8 sps:$4 sm:$0xff]  }
  0x5c   : > { %1011 = vmatpush1.bf16.msra.mxu0 %v1438_v15  ;;  %v1480_v43 = vld [vmem:[%s1816_s13 + $0xa0] ss:$8 sps:$4 sm:$0xff]   ;;  %v1482_v45 = vld [vmem:[%s1816_s13 + $0xb4] ss:$8 sps:$4 sm:$0xff]   ;;  %v1486_v50 = vld [vmem:[%s1816_s13 + $0xb0] ss:$8 sps:$4 sm:$0xff]  }
  0x5d   : > { %1052 = vmatpush1.bf16.msra.mxu1 %v1439_v16  ;;  %1012 = vmatprep.subr.bf16.mxu0 %v1440_v17  ;;  %v1481_v44 = vld [vmem:[%s1816_s13 + $0x1a0] ss:$8 sps:$4 sm:$0xff]   ;;  %v1484_v46 = vld [vmem:[%s1816_s13 + $0x1b4] ss:$8 sps:$4 sm:$0xff]   ;;  %v1487_v51 = vld [vmem:[%s1816_s13 + $0x1b0] ss:$8 sps:$4 sm:$0xff]  }
  0x5e   : > { %1053 = vmatprep.subr.bf16.mxu1 %v1442_v18  ;;  %v604_v47 = vld [vmem:[%s1798_s30] sm:$0xff]  ;;  %v605_v49 = vld [vmem:[%s1798_s30 + $0x8] sm:$0xff]  ;;  %v1488_v53 = vld [vmem:[%s1816_s13 + $0xc4] ss:$8 sps:$4 sm:$0xff]   ;;  %p1353_p13 = scmp.ne.s32.totalorder %s1554_s17, 8 }
  0x5f   : > { %v1286_v48 = vcombine.high %v604_v47, %v604_v47  ;;  %v1288_v52 = vcombine.high %v605_v49, %v605_v49  ;;  %v1490_v54 = vld [vmem:[%s1816_s13 + $0x1c4] ss:$8 sps:$4 sm:$0xff]   ;;  %v1492_v55 = vld [vmem:[%s1816_s13 + $0xc0] ss:$8 sps:$4 sm:$0xff]   ;;  %v1494_v57 = vld [vmem:[%s1816_s13 + $0xd4] ss:$8 sps:$4 sm:$0xff]   ;;  %v1285_v5 = vcombine.low %v604_v47, %v604_v47  ;;  %v1287_v6 = vcombine.low %v605_v49, %v605_v49 }
  0x60   : > { %1013 = vmatpush1.bf16.msra.mxu0 %v1444_v19  ;;  %v1493_v56 = vld [vmem:[%s1816_s13 + $0x1c0] ss:$8 sps:$4 sm:$0xff]   ;;  %v1496_v58 = vld [vmem:[%s1816_s13 + $0x1d4] ss:$8 sps:$4 sm:$0xff]   ;;  %v1498_v59 = vld [vmem:[%s1816_s13 + $0xd0] ss:$8 sps:$4 sm:$0xff]  }
  0x61   : > { %1054 = vmatpush1.bf16.msra.mxu1 %v1445_v20  ;;  %1014 = vmatprep.subr.bf16.mxu0 %v1446_v21  ;;  %v1499_v60 = vld [vmem:[%s1816_s13 + $0x1d0] ss:$8 sps:$4 sm:$0xff]   ;;  %v1500_v61 = vld [vmem:[%s1816_s13 + $0xe4] ss:$8 sps:$4 sm:$0xff]   ;;  %v1504_v63 = vld [vmem:[%s1816_s13 + $0xe0] ss:$8 sps:$4 sm:$0xff]   ;;  %v1098_v21 = vlaneseq (!%p1353_p13) }
  0x62   : > { %1055 = vmatprep.subr.bf16.mxu1 %v1448_v22  ;;  %1036 = vmatprep.mubr.bf16.mxu0 %v1286_v48  ;;  %v1502_v62 = vld [vmem:[%s1816_s13 + $0x1e4] ss:$8 sps:$4 sm:$0xff]   ;;  %v1505_v0 = vld [vmem:[%s1816_s13 + $0x1e0] ss:$8 sps:$4 sm:$0xff]   ;;  %v1506_v1 = vld [vmem:[%s1816_s13 + $0xf4] ss:$8 sps:$4 sm:$0xff]  }
  0x63   : > { %1077 = vmatprep.mubr.bf16.mxu1 %v1288_v52  ;;  %v1508_v2 = vld [vmem:[%s1816_s13 + $0x1f4] ss:$8 sps:$4 sm:$0xff]   ;;  %v1510_v3 = vld [vmem:[%s1816_s13 + $0xf0] ss:$8 sps:$4 sm:$0xff]   ;;  %v1099_v22 = vshrl.u32 (!%p1353_p13), %v1098_v21, 7 }
  0x64   : > { %1015 = vmatpush1.bf16.msra.mxu0 %v1450_v23  ;;  %v1511_v4 = vld [vmem:[%s1816_s13 + $0x1f0] ss:$8 sps:$4 sm:$0xff]  }
  0x65   : > { %1056 = vmatpush1.bf16.msra.mxu1 %v1451_v24  ;;  %1016 = vmatprep.subr.bf16.mxu0 %v1452_v25  ;;  %v602_v8 = vld [vmem:[#allocation2] sm:$0xff]  ;;  %v603_v12 = vld [vmem:[#allocation2 + $0x8] sm:$0xff]  ;;  %v1100_v25 = vsub.s32 (!%p1353_p13), 0, %v1099_v22 }
  0x66   : > { %1057 = vmatprep.subr.bf16.mxu1 %v1454_v26  ;;  %v1096_v23 = vld [vmem:[%s579_s15] sm:$0x3] (!%p1353_p13)  ;;  %v1104_v26 = vsub.s32 (!%p1353_p13), 1, %v1099_v22 }
  0x67   : > { %v1110_v24 = vld [vmem:[%s584_s18] sm:$0x3] (!%p1353_p13) }
  0x68   : > { %1017 = vmatpush1.bf16.msra.mxu0 %v1456_v27 }
  0x69   : > { %1058 = vmatpush1.bf16.msra.mxu1 %v1457_v28  ;;  %1018 = vmatprep.subr.bf16.mxu0 %v1458_v29  ;;  %v1101_v29 = vrot.slane (!%p1353_p13), %v1096_v23, %v1100_v25 }
  0x6a   : > { %1059 = vmatprep.subr.bf16.mxu1 %v1460_v30  ;;  %v1105_v30 = vrot.slane (!%p1353_p13), %v1096_v23, %v1104_v26 }
  0x6c   : > { %1019 = vmatpush1.bf16.msra.mxu0 %v1462_v31  ;;  %v1115_v31 = vrot.slane (!%p1353_p13), %v1110_v24, %v1100_v25 }
  0x6d   : > { %1060 = vmatpush1.bf16.msra.mxu1 %v1463_v32  ;;  %1020 = vmatprep.subr.bf16.mxu0 %v1464_v33  ;;  %v1119_v32 = vrot.slane (!%p1353_p13), %v1110_v24, %v1104_v26 }
  0x6e   : > { %1061 = vmatprep.subr.bf16.mxu1 %v1466_v34 }
  0x70   : > { %1021 = vmatpush1.bf16.msra.mxu0 %v1468_v35 }
  0x71   : > { %1062 = vmatpush1.bf16.msra.mxu1 %v1469_v36  ;;  %1022 = vmatprep.subr.bf16.mxu0 %v1470_v37 }
  0x72   : > { %1063 = vmatprep.subr.bf16.mxu1 %v1472_v38 }
  0x74   : > { %1023 = vmatpush1.bf16.msra.mxu0 %v1474_v39 }
  0x75   : > { %1064 = vmatpush1.bf16.msra.mxu1 %v1475_v40  ;;  %1024 = vmatprep.subr.bf16.mxu0 %v1476_v41 }
  0x76   : > { %1065 = vmatprep.subr.bf16.mxu1 %v1478_v42 }
  0x78   : > { %1025 = vmatpush1.bf16.msra.mxu0 %v1480_v43 }
  0x79   : > { %1066 = vmatpush1.bf16.msra.mxu1 %v1481_v44  ;;  %1026 = vmatprep.subr.bf16.mxu0 %v1482_v45 }
  0x7a   : > { %1067 = vmatprep.subr.bf16.mxu1 %v1484_v46 }
  0x7c   : > { %1027 = vmatpush1.bf16.msra.mxu0 %v1486_v50 }
  0x7d   : > { %1068 = vmatpush1.bf16.msra.mxu1 %v1487_v51  ;;  %1028 = vmatprep.subr.bf16.mxu0 %v1488_v53 }
  0x7e   : > { %1069 = vmatprep.subr.bf16.mxu1 %v1490_v54 }
  0x80   : > { %1029 = vmatpush1.bf16.msra.mxu0 %v1492_v55 }
  0x81   : > { %1070 = vmatpush1.bf16.msra.mxu1 %v1493_v56  ;;  %1030 = vmatprep.subr.bf16.mxu0 %v1494_v57 }
  0x82   : > { %1071 = vmatprep.subr.bf16.mxu1 %v1496_v58 }
  0x84   : > { %1031 = vmatpush1.bf16.msra.mxu0 %v1498_v59 }
  0x85   : > { %1072 = vmatpush1.bf16.msra.mxu1 %v1499_v60  ;;  %1032 = vmatprep.subr.bf16.mxu0 %v1500_v61 }
  0x86   : > { %1073 = vmatprep.subr.bf16.mxu1 %v1502_v62 }
  0x88   : > { %1033 = vmatpush1.bf16.msra.mxu0 %v1504_v63 }
  0x89   : > { %1074 = vmatpush1.bf16.msra.mxu1 %v1505_v0  ;;  %1034 = vmatprep.subr.bf16.mxu0 %v1506_v1 }
  0x8a   : > { %1075 = vmatprep.subr.bf16.mxu1 %v1508_v2 }
  0x8c   : > { %1035 = vmatpush1.bf16.msra.mxu0 %v1510_v3 }
  0x8d   : > { %1076 = vmatpush1.bf16.msra.mxu1 %v1511_v4 }
  0x8f   : > { %1037 = vmatmul.mubr.bf16.vlgmr.msra.gmra.mrb[0].mxu0 %v1285_v5 }
  0x90   : > { %1078 = vmatmul.mubr.bf16.vlgmr.msra.gmra.mrb[0].mxu1 %v1287_v6 }
 0x162   : > { %v1038_v7 = vpop.f32.mrb[0].mxu0 }
 0x163   : > { %v1079_v9 = vpop.f32.mrb[0].mxu1  ;;  %v1040_v11 = vpop.f32.mrb[1].mxu0  ;;  %1093 = sbr.rel (%p1353_p13) target bundleno = 378 (0x17a), region = 82 }
 0x164   : > { %v1080_v10 = vadd.f32 %v1079_v9, %v1038_v7  ;;  %v1081_v13 = vpop.f32.mrb[1].mxu1  ;;  %v1042_v15 = vpop.f32.mrb[2].mxu0 }
 0x165   : > { %v1082_v14 = vadd.f32 %v1081_v13, %v1040_v11  ;;  %v1083_v16 = vpop.f32.mrb[2].mxu1  ;;  %v1043_v18 = vpop.f32.mrb[3].mxu0 }
 0x166   : > { %v1086_v17 = vadd.f32 %v1080_v10, %v602_v8  ;;  %v1084_v19 = vpop.f32.mrb[3].mxu1 }
 0x167   : > { %v1087_v20 = vadd.f32 %v1082_v14, %v603_v12 }
 0x168   : > { %1088 = vst [vmem:[#allocation2] sm:$0xff] %v1086_v17 }
 0x169   : > { %1089 = vst [vmem:[#allocation2 + $0x8] sm:$0xff] %v1087_v20 }
 0x16f   : > { %v1094_v27 = vld [vmem:[#allocation2] sm:$0xff] }
 0x170   : > { %v1095_v28 = vld [vmem:[#allocation2 + $0x8] sm:$0xff]  ;;  %v1108_v33 = vmul.f32 %v1101_v29, %v1094_v27 }
 0x171   : > { %v1109_v34 = vmul.f32 %v1105_v30, %v1095_v28 }
 0x172   : > { %v1122_v35 = vadd.f32 %v1115_v31, %v1108_v33 }
 0x173   : > { %v1123_v36 = vadd.f32 %v1119_v32, %v1109_v34 }
 0x174   : > { %v1124_v37 = vmax.f32 %v1122_v35, 0.0 }
 0x175   : > { %v1125_v38 = vmax.f32 %v1123_v36, 0.0 }
 0x177   : > { %v1358_v39 = vpack.c.bf16 %v1125_v38, %v1124_v37 }
 0x179   : > { %1134 = vst [vmem:[%s1814_s12] sm:$0xff] %v1358_v39 }
 0x17a PF: > { %s14_s21 = sadd.s32 1, %s1570_s21   ;;  %s1923_s15 = smov %s1550_s16 }
 0x17b   : > { %p11_p0 = scmp.ge.s32.totalorder %s14_s21, 20   ;;  %s1924_s16 = smov %s1649_s28 }
 0x17c   : > { %s1925_s17 = smov %s1562_s19  ;;  %s1926_s18 = smov %s1566_s20 }
 0x17d   : > { %s1927_s19 = smov %s1930_s22  ;;  %s1928_s20 = smov %s1934_s23 }
 0x17e   :  { %13 = sbr.rel (!%p11_p0) target bundleno = 4 (0x4), region = 126 }

// kernel: resnet_model_mod_forward.71
= control target key start
LH: loop header
LB: loop body
LE: loop exit
PB: predicated region body
PF: predicated region fallthrough
CT: control target
= control target key end

     0   :  { %s1691_s18 = smov 0   ;;  %s1693_s19 = smov 0   ;;  %s2017_s0 = inlined_call_operand.vmem [shape: bf16[8,4608], index: 0, kind: input, shape index: {}]   ;;  %s2018_s1 = inlined_call_operand.vmem [shape: bf16[4608,512], index: 1, kind: input, shape index: {}]   ;;  %s2019_s2 = inlined_call_operand.vmem [shape: f32[1,512], index: 2, kind: input, shape index: {}]   ;;  %s2020_s3 = inlined_call_operand.vmem [shape: f32[1,512], index: 3, kind: input, shape index: {}]   ;;  %s2021_s4 = inlined_call_operand.vmem [shape: bf16[8,512], index: 4, kind: input, shape index: {}]   ;;  %s2022_s5 = inlined_call_operand.vmem [shape: bf16[8,512], index: 5, kind: output, shape index: {}]  }
   0x1   :  { %s1695_s20 = smov 0   ;;  %s1697_s21 = smov 0  }
   0x2   :  { %s1699_s22 = smov 0   ;;  %s1701_s23 = smov 0  }
   0x3   :  { %s1703_s24 = smov 0  }
   0x4 LB: > { %s27_s25 = sadd.s32 1, %s1650_s22  ;;  %s30_s26 = sadd.s32 1, %s1654_s23  ;;  %s1658_s24 = sphi %s1703_s24, %s15_s24   ;;  %s1654_s23 = sphi %s1701_s23, %s2028_s23   ;;  %s1650_s22 = sphi %s1699_s22, %s2027_s22   ;;  %s1646_s21 = sphi %s1697_s21, %s2026_s21   ;;  %s1642_s20 = sphi %s1695_s20, %s2025_s20   ;;  %s1638_s19 = sphi %s1693_s19, %s2024_s19   ;;  %s1634_s18 = sphi %s1691_s18, %s2023_s18  }
   0x5   : > { %p28_p0 = scmp.ge.s32.totalorder %s27_s25, 9  ;;  %p78_p1 = scmp.ne.s32.totalorder %s1638_s19, %s1634_s18 }
   0x6   : > { %p79_p2 = scmp.eq.s32.totalorder %s1658_s24, 0  ;;  %s71_s30 = sadd.s32 1, %s1638_s19 }
   0x7   : > { %s2030_s25 = smov (%p28_p0, %s27_s25), 0  ;;  %s2032_s26 = smov (!%p28_p0, %s30_s26), %s1654_s23 }
   0x8   : > { %p80_p3 = por %p79_p2, %p78_p1  ;;  %p32_p4 = scmp.ge.s32.totalorder %s2032_s26, 2 }
   0x9   : > { %s66_s27 = ssub.s32 %s1650_s22, %s2030_s25  ;;  %p1356_p6 = scmp.ge.s32.totalorder %s1658_s24, 18 }
   0xa   : > { %s2034_s26 = smov (%p32_p4, %s2032_s26), 0 }
   0xb   : > { %s67_s28 = ssub.s32 %s1654_s23, %s2034_s26  ;;  %212 = sbr.rel (%p1356_p6) target bundleno = 57 (0x39), region = 16 }
   0xc   : > { %s68_s29 = sor.u32 %s67_s28, %s66_s27 }
   0xd   : > { %p69_p5 = scmp.eq.s32.totalorder %s68_s29, 0 }
   0xf   : > { %s1742_s6 = scalar_select %p69_p5, %s1638_s19, %s71_s30  }
  0x12   : > { %228 = sbr.rel (!%p80_p3) target bundleno = 57 (0x39), region = 24  ;;  %s230_s7 = sand.u32 (%p80_p3), 1, %s1638_s19  }
  0x13   : > { %s1359_s8 = sshll.u32 (%p80_p3), %s1654_s23, 1  ;;  %s1357_s9 = sshll.u32 (%p80_p3), %s230_s7, 9 }
  0x14   : > { %s1445_s10 = sshll.u32 (%p80_p3), %s1650_s22, 8  ;;  %s1756_s16 = scalar_lea.vmem (%p80_p3), [#allocation3], %s1357_s9 }
  0x15   : > { %s236_s11 = sadd.s32 (%p80_p3), %s1445_s10, %s1359_s8 }
  0x16   : > { %s1361_s12 = sshll.u32 (%p80_p3), %s236_s11, 2 }
  0x17   : > { %s1751_s15 = scalar_lea.vmem (%p80_p3), %s2018_s1, %s1361_s12 }
  0x18   : > { %v392_v0 = vld [vmem:[%s1751_s15] sm:$0xff] (%p80_p3)  ;;  %v394_v1 = vld [vmem:[%s1751_s15 + $0x10] sm:$0xff] (%p80_p3) }
  0x19   : > { %v396_v2 = vld [vmem:[%s1751_s15 + $0x20] sm:$0xff]  ;;  %393 = vst [vmem:[%s1756_s16] sm:$0xff] %v392_v0  ;;  %395 = vst [vmem:[%s1756_s16 + $0x8] sm:$0xff] %v394_v1  ;;  %v398_v3 = vld [vmem:[%s1751_s15 + $0x30] sm:$0xff] }
  0x1a   : > { %397 = vst [vmem:[%s1756_s16 + $0x10] sm:$0xff] %v396_v2  ;;  %v400_v4 = vld [vmem:[%s1751_s15 + $0x40] sm:$0xff]  ;;  %v402_v5 = vld [vmem:[%s1751_s15 + $0x50] sm:$0xff]  ;;  %399 = vst [vmem:[%s1756_s16 + $0x18] sm:$0xff] %v398_v3 }
  0x1b   : > { %401 = vst [vmem:[%s1756_s16 + $0x20] sm:$0xff] %v400_v4  ;;  %403 = vst [vmem:[%s1756_s16 + $0x28] sm:$0xff] %v402_v5  ;;  %v404_v6 = vld [vmem:[%s1751_s15 + $0x60] sm:$0xff]  ;;  %v406_v7 = vld [vmem:[%s1751_s15 + $0x70] sm:$0xff] }
  0x1c   : > { %v408_v8 = vld [vmem:[%s1751_s15 + $0x80] sm:$0xff]  ;;  %405 = vst [vmem:[%s1756_s16 + $0x30] sm:$0xff] %v404_v6  ;;  %407 = vst [vmem:[%s1756_s16 + $0x38] sm:$0xff] %v406_v7  ;;  %v410_v9 = vld [vmem:[%s1751_s15 + $0x90] sm:$0xff] }
  0x1d   : > { %409 = vst [vmem:[%s1756_s16 + $0x40] sm:$0xff] %v408_v8  ;;  %v412_v10 = vld [vmem:[%s1751_s15 + $0xa0] sm:$0xff]  ;;  %v414_v11 = vld [vmem:[%s1751_s15 + $0xb0] sm:$0xff]  ;;  %411 = vst [vmem:[%s1756_s16 + $0x48] sm:$0xff] %v410_v9 }
  0x1e   : > { %413 = vst [vmem:[%s1756_s16 + $0x50] sm:$0xff] %v412_v10  ;;  %415 = vst [vmem:[%s1756_s16 + $0x58] sm:$0xff] %v414_v11  ;;  %v416_v12 = vld [vmem:[%s1751_s15 + $0xc0] sm:$0xff]  ;;  %v418_v13 = vld [vmem:[%s1751_s15 + $0xd0] sm:$0xff] }
  0x1f   : > { %v420_v14 = vld [vmem:[%s1751_s15 + $0xe0] sm:$0xff]  ;;  %417 = vst [vmem:[%s1756_s16 + $0x60] sm:$0xff] %v416_v12  ;;  %419 = vst [vmem:[%s1756_s16 + $0x68] sm:$0xff] %v418_v13  ;;  %v422_v15 = vld [vmem:[%s1751_s15 + $0xf0] sm:$0xff] }
  0x20   : > { %421 = vst [vmem:[%s1756_s16 + $0x70] sm:$0xff] %v420_v14  ;;  %v424_v16 = vld [vmem:[%s1751_s15 + $0x100] sm:$0xff]  ;;  %v426_v17 = vld [vmem:[%s1751_s15 + $0x110] sm:$0xff]  ;;  %423 = vst [vmem:[%s1756_s16 + $0x78] sm:$0xff] %v422_v15 }
  0x21   : > { %425 = vst [vmem:[%s1756_s16 + $0x80] sm:$0xff] %v424_v16  ;;  %427 = vst [vmem:[%s1756_s16 + $0x88] sm:$0xff] %v426_v17  ;;  %v428_v18 = vld [vmem:[%s1751_s15 + $0x120] sm:$0xff]  ;;  %v430_v19 = vld [vmem:[%s1751_s15 + $0x130] sm:$0xff] }
  0x22   : > { %v432_v20 = vld [vmem:[%s1751_s15 + $0x140] sm:$0xff]  ;;  %429 = vst [vmem:[%s1756_s16 + $0x90] sm:$0xff] %v428_v18  ;;  %431 = vst [vmem:[%s1756_s16 + $0x98] sm:$0xff] %v430_v19  ;;  %v434_v21 = vld [vmem:[%s1751_s15 + $0x150] sm:$0xff] }
  0x23   : > { %433 = vst [vmem:[%s1756_s16 + $0xa0] sm:$0xff] %v432_v20  ;;  %v436_v22 = vld [vmem:[%s1751_s15 + $0x160] sm:$0xff]  ;;  %v438_v23 = vld [vmem:[%s1751_s15 + $0x170] sm:$0xff]  ;;  %435 = vst [vmem:[%s1756_s16 + $0xa8] sm:$0xff] %v434_v21 }
  0x24   : > { %437 = vst [vmem:[%s1756_s16 + $0xb0] sm:$0xff] %v436_v22  ;;  %439 = vst [vmem:[%s1756_s16 + $0xb8] sm:$0xff] %v438_v23  ;;  %v440_v24 = vld [vmem:[%s1751_s15 + $0x180] sm:$0xff]  ;;  %v442_v25 = vld [vmem:[%s1751_s15 + $0x190] sm:$0xff] }
  0x25   : > { %v444_v26 = vld [vmem:[%s1751_s15 + $0x1a0] sm:$0xff]  ;;  %441 = vst [vmem:[%s1756_s16 + $0xc0] sm:$0xff] %v440_v24  ;;  %443 = vst [vmem:[%s1756_s16 + $0xc8] sm:$0xff] %v442_v25  ;;  %v446_v27 = vld [vmem:[%s1751_s15 + $0x1b0] sm:$0xff] }
  0x26   : > { %445 = vst [vmem:[%s1756_s16 + $0xd0] sm:$0xff] %v444_v26  ;;  %v448_v28 = vld [vmem:[%s1751_s15 + $0x1c0] sm:$0xff]  ;;  %v450_v29 = vld [vmem:[%s1751_s15 + $0x1d0] sm:$0xff]  ;;  %447 = vst [vmem:[%s1756_s16 + $0xd8] sm:$0xff] %v446_v27 }
  0x27   : > { %449 = vst [vmem:[%s1756_s16 + $0xe0] sm:$0xff] %v448_v28  ;;  %451 = vst [vmem:[%s1756_s16 + $0xe8] sm:$0xff] %v450_v29  ;;  %v452_v30 = vld [vmem:[%s1751_s15 + $0x1e0] sm:$0xff]  ;;  %v454_v31 = vld [vmem:[%s1751_s15 + $0x1f0] sm:$0xff] }
  0x28   : > { %v456_v32 = vld [vmem:[%s1751_s15 + $0x200] sm:$0xff]  ;;  %453 = vst [vmem:[%s1756_s16 + $0xf0] sm:$0xff] %v452_v30  ;;  %455 = vst [vmem:[%s1756_s16 + $0xf8] sm:$0xff] %v454_v31  ;;  %v458_v33 = vld [vmem:[%s1751_s15 + $0x210] sm:$0xff] }
  0x29   : > { %457 = vst [vmem:[%s1756_s16 + $0x100] sm:$0xff] %v456_v32  ;;  %v460_v34 = vld [vmem:[%s1751_s15 + $0x220] sm:$0xff]  ;;  %v462_v35 = vld [vmem:[%s1751_s15 + $0x230] sm:$0xff]  ;;  %459 = vst [vmem:[%s1756_s16 + $0x108] sm:$0xff] %v458_v33 }
  0x2a   : > { %461 = vst [vmem:[%s1756_s16 + $0x110] sm:$0xff] %v460_v34  ;;  %463 = vst [vmem:[%s1756_s16 + $0x118] sm:$0xff] %v462_v35  ;;  %v464_v36 = vld [vmem:[%s1751_s15 + $0x240] sm:$0xff]  ;;  %v466_v37 = vld [vmem:[%s1751_s15 + $0x250] sm:$0xff] }
  0x2b   : > { %v468_v38 = vld [vmem:[%s1751_s15 + $0x260] sm:$0xff]  ;;  %465 = vst [vmem:[%s1756_s16 + $0x120] sm:$0xff] %v464_v36  ;;  %467 = vst [vmem:[%s1756_s16 + $0x128] sm:$0xff] %v466_v37  ;;  %v470_v39 = vld [vmem:[%s1751_s15 + $0x270] sm:$0xff] }
  0x2c   : > { %469 = vst [vmem:[%s1756_s16 + $0x130] sm:$0xff] %v468_v38  ;;  %v472_v40 = vld [vmem:[%s1751_s15 + $0x280] sm:$0xff]  ;;  %v474_v41 = vld [vmem:[%s1751_s15 + $0x290] sm:$0xff]  ;;  %471 = vst [vmem:[%s1756_s16 + $0x138] sm:$0xff] %v470_v39 }
  0x2d   : > { %473 = vst [vmem:[%s1756_s16 + $0x140] sm:$0xff] %v472_v40  ;;  %475 = vst [vmem:[%s1756_s16 + $0x148] sm:$0xff] %v474_v41  ;;  %v476_v42 = vld [vmem:[%s1751_s15 + $0x2a0] sm:$0xff]  ;;  %v478_v43 = vld [vmem:[%s1751_s15 + $0x2b0] sm:$0xff] }
  0x2e   : > { %v480_v44 = vld [vmem:[%s1751_s15 + $0x2c0] sm:$0xff]  ;;  %477 = vst [vmem:[%s1756_s16 + $0x150] sm:$0xff] %v476_v42  ;;  %479 = vst [vmem:[%s1756_s16 + $0x158] sm:$0xff] %v478_v43  ;;  %v482_v45 = vld [vmem:[%s1751_s15 + $0x2d0] sm:$0xff] }
  0x2f   : > { %481 = vst [vmem:[%s1756_s16 + $0x160] sm:$0xff] %v480_v44  ;;  %v484_v46 = vld [vmem:[%s1751_s15 + $0x2e0] sm:$0xff]  ;;  %v486_v47 = vld [vmem:[%s1751_s15 + $0x2f0] sm:$0xff]  ;;  %483 = vst [vmem:[%s1756_s16 + $0x168] sm:$0xff] %v482_v45 }
  0x30   : > { %485 = vst [vmem:[%s1756_s16 + $0x170] sm:$0xff] %v484_v46  ;;  %487 = vst [vmem:[%s1756_s16 + $0x178] sm:$0xff] %v486_v47  ;;  %v488_v48 = vld [vmem:[%s1751_s15 + $0x300] sm:$0xff]  ;;  %v490_v49 = vld [vmem:[%s1751_s15 + $0x310] sm:$0xff] }
  0x31   : > { %v492_v50 = vld [vmem:[%s1751_s15 + $0x320] sm:$0xff]  ;;  %489 = vst [vmem:[%s1756_s16 + $0x180] sm:$0xff] %v488_v48  ;;  %491 = vst [vmem:[%s1756_s16 + $0x188] sm:$0xff] %v490_v49  ;;  %v494_v51 = vld [vmem:[%s1751_s15 + $0x330] sm:$0xff] }
  0x32   : > { %493 = vst [vmem:[%s1756_s16 + $0x190] sm:$0xff] %v492_v50  ;;  %v496_v52 = vld [vmem:[%s1751_s15 + $0x340] sm:$0xff]  ;;  %v498_v53 = vld [vmem:[%s1751_s15 + $0x350] sm:$0xff]  ;;  %495 = vst [vmem:[%s1756_s16 + $0x198] sm:$0xff] %v494_v51 }
  0x33   : > { %497 = vst [vmem:[%s1756_s16 + $0x1a0] sm:$0xff] %v496_v52  ;;  %499 = vst [vmem:[%s1756_s16 + $0x1a8] sm:$0xff] %v498_v53  ;;  %v500_v54 = vld [vmem:[%s1751_s15 + $0x360] sm:$0xff]  ;;  %v502_v55 = vld [vmem:[%s1751_s15 + $0x370] sm:$0xff] }
  0x34   : > { %v504_v56 = vld [vmem:[%s1751_s15 + $0x380] sm:$0xff]  ;;  %501 = vst [vmem:[%s1756_s16 + $0x1b0] sm:$0xff] %v500_v54  ;;  %503 = vst [vmem:[%s1756_s16 + $0x1b8] sm:$0xff] %v502_v55  ;;  %v506_v57 = vld [vmem:[%s1751_s15 + $0x390] sm:$0xff] }
  0x35   : > { %505 = vst [vmem:[%s1756_s16 + $0x1c0] sm:$0xff] %v504_v56  ;;  %v508_v58 = vld [vmem:[%s1751_s15 + $0x3a0] sm:$0xff]  ;;  %v510_v59 = vld [vmem:[%s1751_s15 + $0x3b0] sm:$0xff]  ;;  %507 = vst [vmem:[%s1756_s16 + $0x1c8] sm:$0xff] %v506_v57 }
  0x36   : > { %509 = vst [vmem:[%s1756_s16 + $0x1d0] sm:$0xff] %v508_v58  ;;  %511 = vst [vmem:[%s1756_s16 + $0x1d8] sm:$0xff] %v510_v59  ;;  %v512_v60 = vld [vmem:[%s1751_s15 + $0x3c0] sm:$0xff]  ;;  %v514_v61 = vld [vmem:[%s1751_s15 + $0x3d0] sm:$0xff] }
  0x37   : > { %v516_v62 = vld [vmem:[%s1751_s15 + $0x3e0] sm:$0xff]  ;;  %513 = vst [vmem:[%s1756_s16 + $0x1e0] sm:$0xff] %v512_v60  ;;  %515 = vst [vmem:[%s1756_s16 + $0x1e8] sm:$0xff] %v514_v61  ;;  %v518_v63 = vld [vmem:[%s1751_s15 + $0x3f0] sm:$0xff] }
  0x38   : > { %517 = vst [vmem:[%s1756_s16 + $0x1f0] sm:$0xff] %v516_v62  ;;  %519 = vst [vmem:[%s1756_s16 + $0x1f8] sm:$0xff] %v518_v63 }
  0x39 PF: > { %p1362_p7 = scmp.ge.s32.totalorder %s1658_s24, 1  ;;  %p553_p8 = scmp.lt.s32.totalorder %s1658_s24, 19 }
  0x3b   : > { %p554_p9 = pnand %p1362_p7, %p553_p8 }
  0x3c   : > { %s560_s17 = sand.u32 (!%p554_p9), 1, %s1634_s18   ;;  %s1364_s27 = sshll.u32 (!%p554_p9), %s1642_s20, 2 }
  0x3d   : > { %557 = sbr.rel (%p554_p9) target bundleno = 380 (0x17c), region = 74  ;;  %s1363_s28 = sshll.u32 (!%p554_p9), %s560_s17, 9 }
  0x3e   : > { %p620_p10 = scmp.lt.s32.totalorder (!%p554_p9), %s1364_s27, 35  ;;  %s1366_s29 = sshll.u32 (!%p554_p9), %s1646_s21, 1 }
  0x3f   : > { %p630_p11 = scmp.lt.s32.totalorder (!%p554_p9), %s1366_s29, 3  ;;  %s1914_s8 = scalar_lea.vmem (!%p554_p9), [#allocation3], %s1363_s28 }
  0x40   : > { %p1372_p12 = scmp.ne.s32.totalorder (!%p554_p9), %s1642_s20, 0 }
  0x44   : > { %s2036_s27 = smov (!%p620_p10, %s1364_s27), 35  ;;  %s2038_s29 = smov (!%p630_p11, %s1366_s29), 3 }
  0x45   : > { %s1365_s30 = sshll.u32 %s2036_s27, 2  ;;  %s632_s18 = scalar_lea.vmem %s2019_s2, %s2038_s29  ;;  %v1660_v0 = vmov (!%p1372_p12), 0.0  }
  0x46   : > { %s1891_s9 = scalar_lea.vmem %s2017_s0, %s1365_s30  ;;  %s637_s21 = scalar_lea.vmem %s2020_s3, %s2038_s29  ;;  %663 = vst [vmem:[#allocation2] sm:$0xff] (!%p1372_p12), %v1660_v0  ;;  %664 = vst [vmem:[#allocation2 + $0x8] sm:$0xff] (!%p1372_p12), %v1660_v0 }
  0x47   : > { %s1369_s14 = sshll.u32 %s2038_s29, 2  ;;  %662 = sbr.rel (%p1372_p12) target bundleno = 78 (0x4e), region = 82 }
  0x48   : > { %s1907_s17 = scalar_lea.vmem %s2021_s4, %s1369_s14  ;;  %s1912_s7 = scalar_lea.vmem %s2022_s5, %s1369_s14 }
  0x4e PF: > { %v1504_v1 = vld [vmem:[%s1914_s8 + $0x4] ss:$8 sps:$4 sm:$0xff]   ;;  %v1508_v3 = vld [vmem:[%s1914_s8] ss:$8 sps:$4 sm:$0xff]   ;;  %v1510_v5 = vld [vmem:[%s1914_s8 + $0x14] ss:$8 sps:$4 sm:$0xff]  }
  0x4f   : > { %v1506_v2 = vld [vmem:[%s1914_s8 + $0x104] ss:$8 sps:$4 sm:$0xff]   ;;  %1067 = vmatprep.subr.bf16.mxu0 %v1504_v1  ;;  %v1509_v4 = vld [vmem:[%s1914_s8 + $0x100] ss:$8 sps:$4 sm:$0xff]   ;;  %v1512_v6 = vld [vmem:[%s1914_s8 + $0x114] ss:$8 sps:$4 sm:$0xff]  }
  0x50   : > { %1108 = vmatprep.subr.bf16.mxu1 %v1506_v2  ;;  %1068 = vmatpush1.bf16.msra.mxu0 %v1508_v3  ;;  %v1514_v7 = vld [vmem:[%s1914_s8 + $0x10] ss:$8 sps:$4 sm:$0xff]   ;;  %v1516_v9 = vld [vmem:[%s1914_s8 + $0x24] ss:$8 sps:$4 sm:$0xff]   ;;  %v1520_v11 = vld [vmem:[%s1914_s8 + $0x20] ss:$8 sps:$4 sm:$0xff]  }
  0x51   : > { %1109 = vmatpush1.bf16.msra.mxu1 %v1509_v4  ;;  %1069 = vmatprep.subr.bf16.mxu0 %v1510_v5  ;;  %v1515_v8 = vld [vmem:[%s1914_s8 + $0x110] ss:$8 sps:$4 sm:$0xff]   ;;  %v1518_v10 = vld [vmem:[%s1914_s8 + $0x124] ss:$8 sps:$4 sm:$0xff]   ;;  %v1521_v12 = vld [vmem:[%s1914_s8 + $0x120] ss:$8 sps:$4 sm:$0xff]  }
  0x52   : > { %1110 = vmatprep.subr.bf16.mxu1 %v1512_v6  ;;  %v1522_v13 = vld [vmem:[%s1914_s8 + $0x34] ss:$8 sps:$4 sm:$0xff]   ;;  %v1526_v15 = vld [vmem:[%s1914_s8 + $0x30] ss:$8 sps:$4 sm:$0xff]   ;;  %v1528_v17 = vld [vmem:[%s1914_s8 + $0x44] ss:$8 sps:$4 sm:$0xff]  }
  0x53   : > { %v1524_v14 = vld [vmem:[%s1914_s8 + $0x134] ss:$8 sps:$4 sm:$0xff]   ;;  %v1527_v16 = vld [vmem:[%s1914_s8 + $0x130] ss:$8 sps:$4 sm:$0xff]   ;;  %v1530_v18 = vld [vmem:[%s1914_s8 + $0x144] ss:$8 sps:$4 sm:$0xff]  }
  0x54   : > { %1070 = vmatpush1.bf16.msra.mxu0 %v1514_v7  ;;  %v1532_v19 = vld [vmem:[%s1914_s8 + $0x40] ss:$8 sps:$4 sm:$0xff]   ;;  %v1534_v21 = vld [vmem:[%s1914_s8 + $0x54] ss:$8 sps:$4 sm:$0xff]   ;;  %v1538_v23 = vld [vmem:[%s1914_s8 + $0x50] ss:$8 sps:$4 sm:$0xff]  }
  0x55   : > { %1111 = vmatpush1.bf16.msra.mxu1 %v1515_v8  ;;  %1071 = vmatprep.subr.bf16.mxu0 %v1516_v9  ;;  %v1533_v20 = vld [vmem:[%s1914_s8 + $0x140] ss:$8 sps:$4 sm:$0xff]   ;;  %v1536_v22 = vld [vmem:[%s1914_s8 + $0x154] ss:$8 sps:$4 sm:$0xff]   ;;  %v1539_v24 = vld [vmem:[%s1914_s8 + $0x150] ss:$8 sps:$4 sm:$0xff]  }
  0x56   : > { %1112 = vmatprep.subr.bf16.mxu1 %v1518_v10  ;;  %v1540_v25 = vld [vmem:[%s1914_s8 + $0x64] ss:$8 sps:$4 sm:$0xff]   ;;  %v1544_v27 = vld [vmem:[%s1914_s8 + $0x60] ss:$8 sps:$4 sm:$0xff]   ;;  %v1546_v29 = vld [vmem:[%s1914_s8 + $0x74] ss:$8 sps:$4 sm:$0xff]  }
  0x57   : > { %v1542_v26 = vld [vmem:[%s1914_s8 + $0x164] ss:$8 sps:$4 sm:$0xff]   ;;  %v1545_v28 = vld [vmem:[%s1914_s8 + $0x160] ss:$8 sps:$4 sm:$0xff]   ;;  %v1548_v30 = vld [vmem:[%s1914_s8 + $0x174] ss:$8 sps:$4 sm:$0xff]  }
  0x58   : > { %1072 = vmatpush1.bf16.msra.mxu0 %v1520_v11  ;;  %v1550_v31 = vld [vmem:[%s1914_s8 + $0x70] ss:$8 sps:$4 sm:$0xff]   ;;  %v1552_v33 = vld [vmem:[%s1914_s8 + $0x84] ss:$8 sps:$4 sm:$0xff]   ;;  %v1556_v35 = vld [vmem:[%s1914_s8 + $0x80] ss:$8 sps:$4 sm:$0xff]  }
  0x59   : > { %1113 = vmatpush1.bf16.msra.mxu1 %v1521_v12  ;;  %1073 = vmatprep.subr.bf16.mxu0 %v1522_v13  ;;  %v1551_v32 = vld [vmem:[%s1914_s8 + $0x170] ss:$8 sps:$4 sm:$0xff]   ;;  %v1554_v34 = vld [vmem:[%s1914_s8 + $0x184] ss:$8 sps:$4 sm:$0xff]   ;;  %v1557_v36 = vld [vmem:[%s1914_s8 + $0x180] ss:$8 sps:$4 sm:$0xff]  }
  0x5a   : > { %1114 = vmatprep.subr.bf16.mxu1 %v1524_v14  ;;  %v1558_v37 = vld [vmem:[%s1914_s8 + $0x94] ss:$8 sps:$4 sm:$0xff]   ;;  %v1562_v39 = vld [vmem:[%s1914_s8 + $0x90] ss:$8 sps:$4 sm:$0xff]   ;;  %v1564_v41 = vld [vmem:[%s1914_s8 + $0xa4] ss:$8 sps:$4 sm:$0xff]  }
  0x5b   : > { %v1560_v38 = vld [vmem:[%s1914_s8 + $0x194] ss:$8 sps:$4 sm:$0xff]   ;;  %v1563_v40 = vld [vmem:[%s1914_s8 + $0x190] ss:$8 sps:$4 sm:$0xff]   ;;  %v1566_v42 = vld [vmem:[%s1914_s8 + $0x1a4] ss:$8 sps:$4 sm:$0xff]  }
  0x5c   : > { %1074 = vmatpush1.bf16.msra.mxu0 %v1526_v15  ;;  %v1568_v43 = vld [vmem:[%s1914_s8 + $0xa0] ss:$8 sps:$4 sm:$0xff]   ;;  %v1570_v45 = vld [vmem:[%s1914_s8 + $0xb4] ss:$8 sps:$4 sm:$0xff]   ;;  %v1574_v50 = vld [vmem:[%s1914_s8 + $0xb0] ss:$8 sps:$4 sm:$0xff]  }
  0x5d   : > { %1115 = vmatpush1.bf16.msra.mxu1 %v1527_v16  ;;  %1075 = vmatprep.subr.bf16.mxu0 %v1528_v17  ;;  %v1569_v44 = vld [vmem:[%s1914_s8 + $0x1a0] ss:$8 sps:$4 sm:$0xff]   ;;  %v1572_v46 = vld [vmem:[%s1914_s8 + $0x1b4] ss:$8 sps:$4 sm:$0xff]   ;;  %v1575_v51 = vld [vmem:[%s1914_s8 + $0x1b0] ss:$8 sps:$4 sm:$0xff]  }
  0x5e   : > { %1116 = vmatprep.subr.bf16.mxu1 %v1530_v18  ;;  %v667_v47 = vld [vmem:[%s1891_s9] sm:$0xff]  ;;  %v668_v49 = vld [vmem:[%s1891_s9 + $0x8] sm:$0xff]  ;;  %v1576_v53 = vld [vmem:[%s1914_s8 + $0xc4] ss:$8 sps:$4 sm:$0xff]   ;;  %p1441_p13 = scmp.ne.s32.totalorder %s1642_s20, 8 }
  0x5f   : > { %v1374_v48 = vcombine.high %v667_v47, %v667_v47  ;;  %v1376_v52 = vcombine.high %v668_v49, %v668_v49  ;;  %v1578_v54 = vld [vmem:[%s1914_s8 + $0x1c4] ss:$8 sps:$4 sm:$0xff]   ;;  %v1580_v55 = vld [vmem:[%s1914_s8 + $0xc0] ss:$8 sps:$4 sm:$0xff]   ;;  %v1582_v57 = vld [vmem:[%s1914_s8 + $0xd4] ss:$8 sps:$4 sm:$0xff]   ;;  %v1373_v5 = vcombine.low %v667_v47, %v667_v47  ;;  %v1375_v6 = vcombine.low %v668_v49, %v668_v49 }
  0x60   : > { %1076 = vmatpush1.bf16.msra.mxu0 %v1532_v19  ;;  %v1581_v56 = vld [vmem:[%s1914_s8 + $0x1c0] ss:$8 sps:$4 sm:$0xff]   ;;  %v1584_v58 = vld [vmem:[%s1914_s8 + $0x1d4] ss:$8 sps:$4 sm:$0xff]   ;;  %v1586_v59 = vld [vmem:[%s1914_s8 + $0xd0] ss:$8 sps:$4 sm:$0xff]  }
  0x61   : > { %1117 = vmatpush1.bf16.msra.mxu1 %v1533_v20  ;;  %1077 = vmatprep.subr.bf16.mxu0 %v1534_v21  ;;  %v1587_v60 = vld [vmem:[%s1914_s8 + $0x1d0] ss:$8 sps:$4 sm:$0xff]   ;;  %v1588_v61 = vld [vmem:[%s1914_s8 + $0xe4] ss:$8 sps:$4 sm:$0xff]   ;;  %v1592_v63 = vld [vmem:[%s1914_s8 + $0xe0] ss:$8 sps:$4 sm:$0xff]   ;;  %v1161_v21 = vlaneseq (!%p1441_p13) }
  0x62   : > { %1118 = vmatprep.subr.bf16.mxu1 %v1536_v22  ;;  %1099 = vmatprep.mubr.bf16.mxu0 %v1374_v48  ;;  %v1590_v62 = vld [vmem:[%s1914_s8 + $0x1e4] ss:$8 sps:$4 sm:$0xff]   ;;  %v1593_v0 = vld [vmem:[%s1914_s8 + $0x1e0] ss:$8 sps:$4 sm:$0xff]   ;;  %v1594_v1 = vld [vmem:[%s1914_s8 + $0xf4] ss:$8 sps:$4 sm:$0xff]  }
  0x63   : > { %1140 = vmatprep.mubr.bf16.mxu1 %v1376_v52  ;;  %v1596_v2 = vld [vmem:[%s1914_s8 + $0x1f4] ss:$8 sps:$4 sm:$0xff]   ;;  %v1598_v3 = vld [vmem:[%s1914_s8 + $0xf0] ss:$8 sps:$4 sm:$0xff]   ;;  %v1162_v22 = vshrl.u32 (!%p1441_p13), %v1161_v21, 7 }
  0x64   : > { %1078 = vmatpush1.bf16.msra.mxu0 %v1538_v23  ;;  %v1599_v4 = vld [vmem:[%s1914_s8 + $0x1f0] ss:$8 sps:$4 sm:$0xff]  }
  0x65   : > { %1119 = vmatpush1.bf16.msra.mxu1 %v1539_v24  ;;  %1079 = vmatprep.subr.bf16.mxu0 %v1540_v25  ;;  %v665_v8 = vld [vmem:[#allocation2] sm:$0xff]  ;;  %v666_v12 = vld [vmem:[#allocation2 + $0x8] sm:$0xff]  ;;  %v1163_v25 = vsub.s32 (!%p1441_p13), 0, %v1162_v22 }
  0x66   : > { %1120 = vmatprep.subr.bf16.mxu1 %v1542_v26  ;;  %v1159_v23 = vld [vmem:[%s632_s18] sm:$0x3] (!%p1441_p13)  ;;  %v1167_v26 = vsub.s32 (!%p1441_p13), 1, %v1162_v22 }
  0x67   : > { %v1173_v24 = vld [vmem:[%s637_s21] sm:$0x3] (!%p1441_p13) }
  0x68   : > { %1080 = vmatpush1.bf16.msra.mxu0 %v1544_v27 }
  0x69   : > { %1121 = vmatpush1.bf16.msra.mxu1 %v1545_v28  ;;  %1081 = vmatprep.subr.bf16.mxu0 %v1546_v29  ;;  %v1187_v29 = vld [vmem:[%s1907_s17] sm:$0xff] (!%p1441_p13) }
  0x6a   : > { %1122 = vmatprep.subr.bf16.mxu1 %v1548_v30  ;;  %v1164_v30 = vrot.slane (!%p1441_p13), %v1159_v23, %v1163_v25 }
  0x6c   : > { %1082 = vmatpush1.bf16.msra.mxu0 %v1550_v31  ;;  %v1168_v31 = vrot.slane (!%p1441_p13), %v1159_v23, %v1167_v26 }
  0x6d   : > { %1123 = vmatpush1.bf16.msra.mxu1 %v1551_v32  ;;  %1083 = vmatprep.subr.bf16.mxu0 %v1552_v33  ;;  %v1178_v32 = vrot.slane (!%p1441_p13), %v1173_v24, %v1163_v25  ;;  %v1182_v33 = vrot.slane (!%p1441_p13), %v1173_v24, %v1167_v26 }
  0x6e   : > { %1124 = vmatprep.subr.bf16.mxu1 %v1554_v34 }
  0x70   : > { %1084 = vmatpush1.bf16.msra.mxu0 %v1556_v35 }
  0x71   : > { %1125 = vmatpush1.bf16.msra.mxu1 %v1557_v36  ;;  %1085 = vmatprep.subr.bf16.mxu0 %v1558_v37  ;;  %v1188_v36 = vunpack.c.l.bf16 (!%p1441_p13), %v1187_v29  ;;  %v1189_v37 = vunpack.c.h.bf16 (!%p1441_p13), %v1187_v29 }
  0x72   : > { %1126 = vmatprep.subr.bf16.mxu1 %v1560_v38 }
  0x74   : > { %1086 = vmatpush1.bf16.msra.mxu0 %v1562_v39 }
  0x75   : > { %1127 = vmatpush1.bf16.msra.mxu1 %v1563_v40  ;;  %1087 = vmatprep.subr.bf16.mxu0 %v1564_v41 }
  0x76   : > { %1128 = vmatprep.subr.bf16.mxu1 %v1566_v42 }
  0x78   : > { %1088 = vmatpush1.bf16.msra.mxu0 %v1568_v43 }
  0x79   : > { %1129 = vmatpush1.bf16.msra.mxu1 %v1569_v44  ;;  %1089 = vmatprep.subr.bf16.mxu0 %v1570_v45 }
  0x7a   : > { %1130 = vmatprep.subr.bf16.mxu1 %v1572_v46 }
  0x7c   : > { %1090 = vmatpush1.bf16.msra.mxu0 %v1574_v50 }
  0x7d   : > { %1131 = vmatpush1.bf16.msra.mxu1 %v1575_v51  ;;  %1091 = vmatprep.subr.bf16.mxu0 %v1576_v53 }
  0x7e   : > { %1132 = vmatprep.subr.bf16.mxu1 %v1578_v54 }
  0x80   : > { %1092 = vmatpush1.bf16.msra.mxu0 %v1580_v55 }
  0x81   : > { %1133 = vmatpush1.bf16.msra.mxu1 %v1581_v56  ;;  %1093 = vmatprep.subr.bf16.mxu0 %v1582_v57 }
  0x82   : > { %1134 = vmatprep.subr.bf16.mxu1 %v1584_v58 }
  0x84   : > { %1094 = vmatpush1.bf16.msra.mxu0 %v1586_v59 }
  0x85   : > { %1135 = vmatpush1.bf16.msra.mxu1 %v1587_v60  ;;  %1095 = vmatprep.subr.bf16.mxu0 %v1588_v61 }
  0x86   : > { %1136 = vmatprep.subr.bf16.mxu1 %v1590_v62 }
  0x88   : > { %1096 = vmatpush1.bf16.msra.mxu0 %v1592_v63 }
  0x89   : > { %1137 = vmatpush1.bf16.msra.mxu1 %v1593_v0  ;;  %1097 = vmatprep.subr.bf16.mxu0 %v1594_v1 }
  0x8a   : > { %1138 = vmatprep.subr.bf16.mxu1 %v1596_v2 }
  0x8c   : > { %1098 = vmatpush1.bf16.msra.mxu0 %v1598_v3 }
  0x8d   : > { %1139 = vmatpush1.bf16.msra.mxu1 %v1599_v4 }
  0x8f   : > { %1100 = vmatmul.mubr.bf16.vlgmr.msra.gmra.mrb[0].mxu0 %v1373_v5 }
  0x90   : > { %1141 = vmatmul.mubr.bf16.vlgmr.msra.gmra.mrb[0].mxu1 %v1375_v6 }
 0x162   : > { %v1101_v7 = vpop.f32.mrb[0].mxu0 }
 0x163   : > { %v1142_v9 = vpop.f32.mrb[0].mxu1  ;;  %v1103_v11 = vpop.f32.mrb[1].mxu0  ;;  %1156 = sbr.rel (%p1441_p13) target bundleno = 380 (0x17c), region = 86 }
 0x164   : > { %v1143_v10 = vadd.f32 %v1142_v9, %v1101_v7  ;;  %v1144_v13 = vpop.f32.mrb[1].mxu1  ;;  %v1105_v15 = vpop.f32.mrb[2].mxu0 }
 0x165   : > { %v1145_v14 = vadd.f32 %v1144_v13, %v1103_v11  ;;  %v1146_v16 = vpop.f32.mrb[2].mxu1  ;;  %v1106_v18 = vpop.f32.mrb[3].mxu0 }
 0x166   : > { %v1149_v17 = vadd.f32 %v1143_v10, %v665_v8  ;;  %v1147_v19 = vpop.f32.mrb[3].mxu1 }
 0x167   : > { %v1150_v20 = vadd.f32 %v1145_v14, %v666_v12 }
 0x168   : > { %1151 = vst [vmem:[#allocation2] sm:$0xff] %v1149_v17 }
 0x169   : > { %1152 = vst [vmem:[#allocation2 + $0x8] sm:$0xff] %v1150_v20 }
 0x16f   : > { %v1157_v27 = vld [vmem:[#allocation2] sm:$0xff] }
 0x170   : > { %v1158_v28 = vld [vmem:[#allocation2 + $0x8] sm:$0xff]  ;;  %v1171_v34 = vmul.f32 %v1164_v30, %v1157_v27 }
 0x171   : > { %v1172_v35 = vmul.f32 %v1168_v31, %v1158_v28 }
 0x172   : > { %v1185_v38 = vadd.f32 %v1178_v32, %v1171_v34 }
 0x173   : > { %v1186_v39 = vadd.f32 %v1182_v33, %v1172_v35 }
 0x174   : > { %v1190_v40 = vadd.f32 %v1188_v36, %v1185_v38 }
 0x175   : > { %v1191_v41 = vadd.f32 %v1189_v37, %v1186_v39 }
 0x176   : > { %v1192_v42 = vmax.f32 %v1190_v40, 0.0 }
 0x177   : > { %v1193_v43 = vmax.f32 %v1191_v41, 0.0 }
 0x179   : > { %v1446_v44 = vpack.c.bf16 %v1193_v43, %v1192_v42 }
 0x17b   : > { %1202 = vst [vmem:[%s1912_s7] sm:$0xff] %v1446_v44 }
 0x17c PF: > { %s15_s24 = sadd.s32 1, %s1658_s24   ;;  %s2023_s18 = smov %s1638_s19 }
 0x17d   : > { %p12_p0 = scmp.ge.s32.totalorder %s15_s24, 20   ;;  %s2024_s19 = smov %s1742_s6 }
 0x17e   : > { %s2025_s20 = smov %s1650_s22  ;;  %s2026_s21 = smov %s1654_s23 }
 0x17f   : > { %s2027_s22 = smov %s2030_s25  ;;  %s2028_s23 = smov %s2034_s26 }
 0x180   :  { %14 = sbr.rel (!%p12_p0) target bundleno = 4 (0x4), region = 133 }

// kernel: resnet_model_mod_forward.76
= control target key start
LH: loop header
LB: loop body
LE: loop exit
PB: predicated region body
PF: predicated region fallthrough
CT: control target
= control target key end

     0   :  { %s204_s6 = smov 0   ;;  %s225_s0 = inlined_call_operand.vmem [shape: bf16[2,1,512], index: 0, kind: input, shape index: {}]   ;;  %s226_s1 = inlined_call_operand.vmem [shape: f32[2,1,512], index: 1, kind: output, shape index: {}]  }
   0x1 LB: > { %s182_s7 = sadd.s32 4294967295, %s206_s6   ;;  %p186_p0 = scmp.ge.s32.totalorder %s206_s6, 1  ;;  %s206_s6 = sphi %s204_s6, %s11_s6  }
   0x2   : > { %p86_p1 = scmp.lt.s32.totalorder %s206_s6, 3 }
   0x4   : > { %p87_p2 = pnand %p186_p0, %p86_p1 }
   0x5   : > { %p104_p3 = scmp.lt.s32.totalorder (!%p87_p2), %s182_s7, 1  ;;  %v119_v0 = vlaneseq (!%p87_p2)  ;;  %v208_v1 = vmov (!%p87_p2), 1966171168  }
   0x6   : > { %90 = sbr.rel (%p87_p2) target bundleno = 22 (0x16), region = 24  ;;  %v117_v2 = vunpack.c.l.s4 (!%p87_p2), %v208_v1 }
   0x7   : > { %v120_v3 = vshrl.u32 (!%p87_p2), %v119_v0, 7  ;;  %vm126_vm0 = vcmp.lt.s32.totalorder (!%p87_p2), %v119_v0, 512 }
   0x8   : > { %v118_v4 = vunpack.c.0.s8 (!%p87_p2), %v117_v2 }
   0xa   : > { %v121_v5 = vsub.s32 (!%p87_p2), %v118_v4, %v120_v3 }
   0xd   : > { %s228_s7 = smov (!%p104_p3, %s182_s7), 1 }
   0xe   : > { %s187_s8 = sshll.u32 %s228_s7, 2 }
   0xf   : > { %s107_s11 = scalar_lea.vmem %s225_s0, %s187_s8  ;;  %s111_s14 = scalar_lea.vmem %s226_s1, %s187_s8 }
  0x10   : > { %v112_v6 = vld [vmem:[%s107_s11] sm:$0xf] }
  0x11   : > { %v113_v7 = vunpack.c.l.bf16 %v112_v6 }
  0x13   : > { %v122_v8 = vrot.slane %v113_v7, %v121_v5 }
  0x15   : > { %128 = vst.msk [vmem:[%s111_s14] sm:$0xf] %vm126_vm0, %v122_v8 }
  0x16 PF: > { %s11_s6 = sadd.s32 1, %s206_s6  }
  0x17   : > { %p8_p4 = scmp.ge.s32.totalorder %s11_s6, 4  }
  0x19   :  { %10 = sbr.rel (!%p8_p4) target bundleno = 1 (0x1), region = 54 }

// kernel: resnet_model_mod_forward.77
= control target key start
LH: loop header
LB: loop body
LE: loop exit
PB: predicated region body
PF: predicated region fallthrough
CT: control target
= control target key end

     0   :  { %s657_s1 = inlined_call_operand.vmem [shape: bf16[512,128], index: 1, kind: input, shape index: {}]   ;;  %s658_s0 = inlined_call_operand.vmem [shape: bf16[8,512], index: 0, kind: input, shape index: {}]   ;;  %s659_s2 = inlined_call_operand.vmem [shape: f32[1,128], index: 2, kind: input, shape index: {}]   ;;  %s660_s3 = inlined_call_operand.vmem [shape: f32[1,128], index: 3, kind: input, shape index: {}]   ;;  %s661_s4 = inlined_call_operand.vmem [shape: f32[8,128], index: 4, kind: output, shape index: {}]  }
   0x1   :  { %v485_v0 = vld [vmem:[%s657_s1 + $0x40] sm:$0xff]   ;;  %v489_v4 = vld [vmem:[%s657_s1 + $0x48] sm:$0xff]   ;;  %v493_v8 = vld [vmem:[%s657_s1 + $0x50] sm:$0xff]  }
   0x2   :  { %v486_v1 = vld [vmem:[%s657_s1 + $0xc0] sm:$0xff]   ;;  %441 = vmatprep.subr.bf16.mxu0 %v485_v0  ;;  %v490_v5 = vld [vmem:[%s657_s1 + $0xc8] sm:$0xff]   ;;  %v494_v9 = vld [vmem:[%s657_s1 + $0xd0] sm:$0xff]  }
   0x3   :  { %v487_v2 = vld [vmem:[%s657_s1] sm:$0xff]   ;;  %463 = vmatprep.subr.bf16.mxu1 %v486_v1  ;;  %v491_v6 = vld [vmem:[%s657_s1 + $0x8] sm:$0xff]   ;;  %v495_v10 = vld [vmem:[%s657_s1 + $0x10] sm:$0xff]  }
   0x4   :  { %v488_v3 = vld [vmem:[%s657_s1 + $0x80] sm:$0xff]   ;;  %442 = vmatpush3.bf16.msra.mxu0 %v487_v2  ;;  %v492_v7 = vld [vmem:[%s657_s1 + $0x88] sm:$0xff]   ;;  %v496_v11 = vld [vmem:[%s657_s1 + $0x90] sm:$0xff]  }
   0x5   :  { %464 = vmatpush3.bf16.msra.mxu1 %v488_v3  ;;  %443 = vmatprep.subr.bf16.mxu0 %v489_v4  ;;  %v497_v12 = vld [vmem:[%s657_s1 + $0x58] sm:$0xff]   ;;  %v501_v16 = vld [vmem:[%s657_s1 + $0x60] sm:$0xff]   ;;  %v505_v20 = vld [vmem:[%s657_s1 + $0x68] sm:$0xff]  }
   0x6   :  { %465 = vmatprep.subr.bf16.mxu1 %v490_v5  ;;  %v498_v13 = vld [vmem:[%s657_s1 + $0xd8] sm:$0xff]   ;;  %v502_v17 = vld [vmem:[%s657_s1 + $0xe0] sm:$0xff]   ;;  %v506_v21 = vld [vmem:[%s657_s1 + $0xe8] sm:$0xff]  }
   0x7   :  { %v499_v14 = vld [vmem:[%s657_s1 + $0x18] sm:$0xff]   ;;  %v503_v18 = vld [vmem:[%s657_s1 + $0x20] sm:$0xff]   ;;  %v507_v22 = vld [vmem:[%s657_s1 + $0x28] sm:$0xff]  }
   0x8   :  { %444 = vmatpush3.bf16.msra.mxu0 %v491_v6  ;;  %v500_v15 = vld [vmem:[%s657_s1 + $0x98] sm:$0xff]   ;;  %v504_v19 = vld [vmem:[%s657_s1 + $0xa0] sm:$0xff]   ;;  %v508_v23 = vld [vmem:[%s657_s1 + $0xa8] sm:$0xff]  }
   0x9   :  { %466 = vmatpush3.bf16.msra.mxu1 %v492_v7  ;;  %445 = vmatprep.subr.bf16.mxu0 %v493_v8  ;;  %v509_v24 = vld [vmem:[%s657_s1 + $0x70] sm:$0xff]   ;;  %v513_v28 = vld [vmem:[%s657_s1 + $0x78] sm:$0xff]   ;;  %v24_v32 = vld [vmem:[%s658_s0] sm:$0xff] }
   0xa   :  { %467 = vmatprep.subr.bf16.mxu1 %v494_v9  ;;  %v510_v25 = vld [vmem:[%s657_s1 + $0xf0] sm:$0xff]   ;;  %v514_v29 = vld [vmem:[%s657_s1 + $0xf8] sm:$0xff]   ;;  %v25_v33 = vld [vmem:[%s658_s0 + $0x8] sm:$0xff]  ;;  %v403_v34 = vcombine.low %v24_v32, %v24_v32  ;;  %v404_v35 = vcombine.high %v24_v32, %v24_v32 }
   0xb   :  { %v511_v26 = vld [vmem:[%s657_s1 + $0x30] sm:$0xff]   ;;  %v515_v30 = vld [vmem:[%s657_s1 + $0x38] sm:$0xff]   ;;  %v405_v36 = vcombine.low %v25_v33, %v25_v33  ;;  %v406_v37 = vcombine.high %v25_v33, %v25_v33  ;;  %v439_v46 = vld [vmem:[%s659_s2] ss:$0 sm:$0xff] }
   0xc   :  { %446 = vmatpush3.bf16.msra.mxu0 %v495_v10  ;;  %v512_v27 = vld [vmem:[%s657_s1 + $0xb0] sm:$0xff]   ;;  %v516_v31 = vld [vmem:[%s657_s1 + $0xb8] sm:$0xff]   ;;  %328 = vmatprep.mubr.bf16.mxu0 %v404_v35  ;;  %v440_v50 = vld [vmem:[%s660_s3] ss:$0 sm:$0xff] }
   0xd   :  { %468 = vmatpush3.bf16.msra.mxu1 %v496_v11  ;;  %447 = vmatprep.subr.bf16.mxu0 %v497_v12 }
   0xe   :  { %469 = vmatprep.subr.bf16.mxu1 %v498_v13  ;;  %368 = vmatprep.mubr.bf16.mxu1 %v406_v37 }
  0x10   :  { %448 = vmatpush3.bf16.msra.mxu0 %v499_v14 }
  0x11   :  { %470 = vmatpush3.bf16.msra.mxu1 %v500_v15  ;;  %449 = vmatprep.subr.bf16.mxu0 %v501_v16 }
  0x12   :  { %471 = vmatprep.subr.bf16.mxu1 %v502_v17 }
  0x14   :  { %450 = vmatpush3.bf16.msra.mxu0 %v503_v18 }
  0x15   :  { %472 = vmatpush3.bf16.msra.mxu1 %v504_v19  ;;  %451 = vmatprep.subr.bf16.mxu0 %v505_v20 }
  0x16   :  { %473 = vmatprep.subr.bf16.mxu1 %v506_v21 }
  0x18   :  { %452 = vmatpush3.bf16.msra.mxu0 %v507_v22 }
  0x19   :  { %474 = vmatpush3.bf16.msra.mxu1 %v508_v23  ;;  %453 = vmatprep.subr.bf16.mxu0 %v509_v24 }
  0x1a   :  { %475 = vmatprep.subr.bf16.mxu1 %v510_v25 }
  0x1c   :  { %454 = vmatpush3.bf16.msra.mxu0 %v511_v26 }
  0x1d   :  { %476 = vmatpush3.bf16.msra.mxu1 %v512_v27  ;;  %455 = vmatprep.subr.bf16.mxu0 %v513_v28 }
  0x1e   :  { %477 = vmatprep.subr.bf16.mxu1 %v514_v29 }
  0x20   :  { %456 = vmatpush3.bf16.msra.mxu0 %v515_v30 }
  0x21   :  { %478 = vmatpush3.bf16.msra.mxu1 %v516_v31 }
  0x23   :  { %329 = vmatmul.mubr.bf16.vlgmr.msra.gmra.mrb[0].mxu0 %v403_v34 }
  0x24   :  { %369 = vmatmul.mubr.bf16.vlgmr.msra.gmra.mrb[0].mxu1 %v405_v36 }
  0xf6   :  { %v457_v38 = vpop.f32.mrb[0].mxu0 }
  0xf7   :  { %v479_v39 = vpop.f32.mrb[0].mxu1  ;;  %v458_v40 = vpop.f32.mrb[1].mxu0 }
  0xf8   :  { %v480_v41 = vpop.f32.mrb[1].mxu1  ;;  %v459_v42 = vadd.f32 %v458_v40, %v457_v38  ;;  %v460_v44 = vpop.f32.mrb[2].mxu0 }
  0xf9   :  { %v481_v43 = vadd.f32 %v480_v41, %v479_v39  ;;  %v482_v45 = vpop.f32.mrb[2].mxu1  ;;  %v461_v47 = vpop.f32.mrb[3].mxu0 }
  0xfa   :  { %v483_v48 = vpop.f32.mrb[3].mxu1 }
  0xfb   :  { %v371_v49 = vadd.f32 %v481_v43, %v459_v42 }
  0xfd   :  { %v389_v51 = vmul.f32 %v439_v46, %v371_v49 }
  0xff   :  { %v397_v52 = vadd.f32 %v440_v50, %v389_v51 }
 0x101   :  { %398 = vst [vmem:[%s661_s4] sm:$0xff] %v397_v52 }

</bundles_post_ra>
